<compile_context>
chip_gen: v5e
topology: v5e:2x2
jax: 0.10.0
libtpu: 0.0.40
codegen_flags: <defaults>
</compile_context>

<pallas_src>
import jax
import jax.numpy as jnp
import numpy as np
from jax import lax
from jax.experimental import pallas as pl
from jax.experimental.pallas import tpu as pltpu


# ----------------------------------------------------------------------------
# Host-side weight preprocessing: expand the strided 2-D (de)convs into dense
# per-time-tap matrices acting on the flattened (C*F) axis.
# ----------------------------------------------------------------------------
def _expand_conv_taps(w, f_in, f_out):
    """Causal-in-time Conv2d, stride (1,2).  w: (C_out, C_in, kt, kf).
    Returns [A_0, ..., A_{kt-1}], A_s of shape (C_out*f_out, C_in*f_in);
    tap s multiplies the input shifted by s frames (y[t] uses x[t-s])."""
    w = np.asarray(w, np.float32)
    c_out, c_in, kt, kf = w.shape
    blocks = []
    for s in range(kt):
        dt = kt - 1 - s
        a = np.zeros((c_out, f_out, c_in, f_in), np.float32)
        for df in range(kf):
            for fo in range(f_out):
                a[:, fo, :, 2 * fo + df] = w[:, :, dt, df]
        blocks.append(a.reshape(c_out * f_out, c_in * f_in))
    return blocks


def _expand_deconv_taps(w, f_in, f_out):
    """ConvTranspose2d, stride (1,2), followed by Chomp_T(kt-1).
    w: (C_in, C_out, kt, kf) (PyTorch layout).  Same contract as above
    (tap s multiplies the input shifted by s frames)."""
    w = np.asarray(w, np.float32)
    c_in, c_out, kt, kf = w.shape
    blocks = []
    for s in range(kt):
        a = np.zeros((c_out, f_out, c_in, f_in), np.float32)
        for df in range(kf):
            for fi in range(f_in):
                a[:, 2 * fi + df, :, fi] = w[:, :, s, df].T
        blocks.append(a.reshape(c_out * f_out, c_in * f_in))
    return blocks


def _pack(f_out, cols):
    """Pack per-channel vectors into one (C*f_out, len(cols)) f32 array, each
    channel value repeated across its f_out frequency rows."""
    mat = np.stack(
        [np.repeat(np.asarray(c, np.float32), f_out) for c in cols], axis=1)
    return jnp.asarray(mat)


def _pick_nb(B, T, lane_target=512):
    """Number of batch elements folded into the lane axis per grid step.
    Keep >=2 grid steps when B>=2 so v7x's two TensorCores both get work."""
    divs = [d for d in range(1, B + 1) if B % d == 0]
    ok = [d for d in divs if d * T <= lane_target and B // d >= min(2, B)]
    return max(ok) if ok else 1


# ----------------------------------------------------------------------------
# Kernel
# ----------------------------------------------------------------------------
def _make_kernel(k1t, k2t, cout, enc_F, scale, intra_connect, eps):
    def kernel(*refs):
        x_ref, tri_ref, meta_ref = refs[0], refs[1], refs[2]
        out_ref = refs[-1]
        prm = refs[3:-1]

        meta = meta_ref[...]                     # (1+max_shift, NT) f32
        cnt_base = meta[0:1, :]                  # per-lane (t_local + 1)

        def tap_list(x, kt):
            """[x, shift1(x), ...] in bf16, causal-masked per batch segment."""
            taps = [x.astype(jnp.bfloat16)]
            for s in range(1, kt):
                shifted = pltpu.roll(x, shift=s, axis=1) * meta[s:s + 1, :]
                taps.append(shifted.astype(jnp.bfloat16))
            return taps

        def matmul_sum(a_refs, tap_lists):
            """y = sum over sources/taps of A_block @ tap  (bf16 MXU, f32 acc)."""
            y = None
            bi = 0
            for taps in tap_lists:
                for t in taps:
                    d = jnp.dot(a_refs[bi][...], t,
                                preferred_element_type=jnp.float32)
                    y = d if y is None else y + d
                    bi += 1
            return y

        def cln(z, gain, bias):                  # cumulative layer norm
            nrows = z.shape[0]
            s0 = jnp.sum(z, axis=0, keepdims=True)          # (1, NT)
            s1 = jnp.sum(z * z, axis=0, keepdims=True)      # (1, NT)
            pad = jnp.zeros((6, s0.shape[1]), jnp.float32)  # sublane-align M=8
            stats = jnp.concatenate([s0, s1, pad], axis=0)  # (8, NT)
            # block-diag upper-tri matrix => per-segment inclusive cumsum (MXU)
            cum = jnp.dot(stats, tri_ref[...],
                          preferred_element_type=jnp.float32)
            cnt = cnt_base * float(nrows)
            cum_s = cum[0:1, :]
            cum_p = cum[1:2, :]
            mean = cum_s / cnt
            var = (cum_p - 2.0 * mean * cum_s) / cnt + mean * mean
            inv_std = lax.rsqrt(var + eps)
            return (z - mean) * inv_std * gain + bias

        def prelu(z, alpha):
            return jnp.where(z >= 0.0, z, alpha * z)

        x_in = x_ref[...].astype(jnp.float32)    # (cin*F0, NT)

        idx = 0
        # ---- gated in_conv (GateConv2d + cLN + PReLU) ----
        a_out = prm[idx: idx + k1t]; idx += k1t
        a_gate = prm[idx: idx + k1t]; idx += k1t
        pk = prm[idx][...]; idx += 1
        taps_in = tap_list(x_in, k1t)            # shared by both halves
        y_o = matmul_sum(a_out, [taps_in]) + pk[:, 0:1]
        y_g = matmul_sum(a_gate, [taps_in]) + pk[:, 1:2]
        z = y_o * jax.nn.sigmoid(y_g)
        x_resi = prelu(cln(z, pk[:, 2:3], pk[:, 3:4]), pk[:, 4:5])

        # ---- encoder ladder ----
        x = x_resi
        skips = []
        for _ in range(scale):
            a_blk = prm[idx: idx + k2t]; idx += k2t
            pk = prm[idx][...]; idx += 1
            y = matmul_sum(a_blk, [tap_list(x, k2t)]) + pk[:, 0:1]
            x = prelu(cln(y, pk[:, 1:2], pk[:, 2:3]), pk[:, 3:4])
            skips.append(x)

        # ---- decoder ladder (skip connections, no in-kernel concat) ----
        for i in range(scale):
            if i == 0:
                srcs = [x]
            else:
                aux = skips[scale - 1 - i]
                srcs = [x, aux] if intra_connect == "cat" else [x + aux]
            nblk = len(srcs) * k2t
            a_blk = prm[idx: idx + nblk]; idx += nblk
            pk = prm[idx][...]; idx += 1
            y = matmul_sum(a_blk, [tap_list(s, k2t) for s in srcs]) + pk[:, 0:1]
            x = prelu(cln(y, pk[:, 1:2], pk[:, 2:3]), pk[:, 3:4])

        out_ref[...] = (x_resi + x).astype(out_ref.dtype)

    return kernel


# ----------------------------------------------------------------------------
# Wrapper
# ----------------------------------------------------------------------------
def en_unet_module_pallas(inp, params, k1, k2, intra_connect, scale,
                          eps=1e-5, lane_target=512):
    B, cin, T, F0 = inp.shape
    k1t, k1f = k1
    k2t, k2f = k2
    cout = params["in_b"].shape[0] // 2

    enc_F = [(F0 - k1f) // 2 + 1]
    for _ in range(scale):
        enc_F.append((enc_F[-1] - k2f) // 2 + 1)
    for i in range(scale):                      # deconvs must invert the ladder
        assert (enc_F[scale - i] - 1) * 2 + k2f == enc_F[scale - 1 - i], \
            "frequency sizes do not round-trip through the U-Net"
    F1 = enc_F[0]

    nb = _pick_nb(B, T, lane_target)
    Bg = B // nb
    NT = nb * T

    # ---- host-side constants: block-diag cumsum matrix + lane metadata ----
    tri = jnp.asarray(np.kron(np.eye(nb, dtype=np.float32),
                              np.triu(np.ones((T, T), np.float32))))
    max_shift = max(k1t, k2t) - 1
    t_local = np.tile(np.arange(T, dtype=np.int64), nb)
    meta_np = np.zeros((1 + max_shift, NT), np.float32)
    meta_np[0] = t_local + 1.0                           # cLN entry-count base
    for s in range(1, max_shift + 1):
        meta_np[s] = (t_local >= s).astype(np.float32)   # causal-shift mask
    meta = jnp.asarray(meta_np)

    def _bf16(a):
        return jnp.asarray(a, dtype=jnp.bfloat16)

    # ---- host-side expanded bf16 weights & packed f32 per-channel params ----
    args = []
    w_in = np.asarray(params["in_w"], np.float32)
    args += [_bf16(b) for b in _expand_conv_taps(w_in[:cout], F0, F1)]
    args += [_bf16(b) for b in _expand_conv_taps(w_in[cout:], F0, F1)]
    args.append(_pack(F1, [params["in_b"][:cout], params["in_b"][cout:],
                           params["in_ln_g"], params["in_ln_b"],
                           params["in_alpha"]]))
    for i in range(scale):
        args += [_bf16(b) for b in _expand_conv_taps(
            params[f"enc{i}_w"], enc_F[i], enc_F[i + 1])]
        args.append(_pack(enc_F[i + 1],
                          [params[f"enc{i}_b"], params[f"enc{i}_ln_g"],
                           params[f"enc{i}_ln_b"], params[f"enc{i}_alpha"]]))
    for i in range(scale):
        f_in_d, f_out_d = enc_F[scale - i], enc_F[scale - 1 - i]
        w = np.asarray(params[f"dec{i}_w"], np.float32)
        if i == 0 or intra_connect != "cat":
            src_w = [w]                           # single source
        else:
            src_w = [w[:cout], w[cout:]]          # (x, aux) column split
        for sw in src_w:
            args += [_bf16(b) for b in _expand_deconv_taps(sw, f_in_d, f_out_d)]
        args.append(_pack(f_out_d,
                          [params[f"dec{i}_b"], params[f"dec{i}_ln_g"],
                           params[f"dec{i}_ln_b"], params[f"dec{i}_alpha"]]))

    # (B,C,T,F) -> (B,C*F,T) -> fold nb batch elements onto the lane axis
    x_flat = jnp.transpose(inp, (0, 1, 3, 2)).reshape(B, cin * F0, T)
    x_fold = (x_flat.reshape(Bg, nb, cin * F0, T)
              .transpose(0, 2, 1, 3).reshape(Bg, cin * F0, NT))

    kernel = _make_kernel(k1t, k2t, cout, enc_F, scale, intra_connect, eps)

    def _full(a):
        return pl.BlockSpec(a.shape, lambda b, _n=a.ndim: (0,) * _n)

    in_specs = ([pl.BlockSpec((None, cin * F0, NT), lambda b: (b, 0, 0)),
                 _full(tri), _full(meta)]
                + [_full(a) for a in args])
    out_spec = pl.BlockSpec((None, cout * F1, NT), lambda b: (b, 0, 0))

    out_fold = pl.pallas_call(
        kernel,
        out_shape=jax.ShapeDtypeStruct((Bg, cout * F1, NT), inp.dtype),
        grid=(Bg,),
        in_specs=in_specs,
        out_specs=out_spec,
        compiler_params=pltpu.CompilerParams(
            dimension_semantics=("parallel",),
            vmem_limit_bytes=32 * 1024 * 1024),
    )(x_fold, tri, meta, *args)

    # Unfold and restore the module layout.  NOTE: if the downstream consumer
    # accepts the flat (B, C*F, T) layout, this reshape/transpose (one extra
    # HBM round-trip) can be skipped or fused into the next kernel.
    out_flat = (out_fold.reshape(Bg, cout * F1, nb, T)
                .transpose(0, 2, 1, 3).reshape(B, cout * F1, T))
    return out_flat.reshape(B, cout, F1, T).transpose(0, 1, 3, 2)


# ----------------------------------------------------------------------------
# Pure-JAX reference mirroring the PyTorch forward
# ----------------------------------------------------------------------------
def _conv2d_ref(x, w, b, k):
    kt, kf = k
    if kt > 1:
        x = jnp.pad(x, ((0, 0), (0, 0), (kt - 1, 0), (0, 0)))
    y = lax.conv_general_dilated(
        x, w, window_strides=(1, 2), padding="VALID",
        dimension_numbers=("NCHW", "OIHW", "NCHW"),
        precision=lax.Precision.HIGHEST)
    return y + b[None, :, None, None]


def _deconv2d_ref(x, w, b, k):
    kt, kf = k
    B, Ci, T, F = x.shape
    Co = w.shape[1]
    To, Fo = T + kt - 1, (F - 1) * 2 + kf
    y = jnp.zeros((B, Co, To, Fo), x.dtype)
    for dt in range(kt):
        for df in range(kf):
            contrib = jnp.einsum("io,bitf->botf", w[:, :, dt, df], x,
                                 precision=lax.Precision.HIGHEST)
            y = y.at[:, :, dt:dt + T, df:df + 2 * F:2].add(contrib)
    y = y + b[None, :, None, None]
    if kt > 1:
        y = y[:, :, :-(kt - 1), :]             # Chomp_T
    return y


def _cln_ref(x, g, b, eps=1e-5):
    _, C, T, F = x.shape
    ssum = jnp.sum(x, axis=(1, 3), keepdims=True)
    spow = jnp.sum(x * x, axis=(1, 3), keepdims=True)
    csum = jnp.cumsum(ssum, axis=2)
    cpow = jnp.cumsum(spow, axis=2)
    cnt = (C * F) * jnp.arange(1, T + 1, dtype=x.dtype).reshape(1, 1, T, 1)
    mean = csum / cnt
    var = (cpow - 2.0 * mean * csum) / cnt + mean ** 2
    std = jnp.sqrt(var + eps)
    return (x - mean) / std * g[None, :, None, None] + b[None, :, None, None]


def _prelu_ref(x, a):
    return jnp.where(x >= 0, x, a[None, :, None, None] * x)


def en_unet_reference(inp, params, k1, k2, intra_connect, scale, eps=1e-5):
    cout = params["in_b"].shape[0] // 2

    y = _conv2d_ref(inp, params["in_w"], params["in_b"], k1)
    outp, gate = y[:, :cout], y[:, cout:]
    x_resi = outp * jax.nn.sigmoid(gate)
    x_resi = _prelu_ref(_cln_ref(x_resi, params["in_ln_g"], params["in_ln_b"],
                                 eps), params["in_alpha"])
    x = x_resi
    xs = []
    for i in range(scale):
        x = _conv2d_ref(x, params[f"enc{i}_w"], params[f"enc{i}_b"], k2)
        x = _prelu_ref(_cln_ref(x, params[f"enc{i}_ln_g"],
                                params[f"enc{i}_ln_b"], eps),
                       params[f"enc{i}_alpha"])
        xs.append(x)
    for i in range(scale):
        if i > 0:
            aux = xs[-(i + 1)]
            x = (jnp.concatenate([x, aux], axis=1)
                 if intra_connect == "cat" else x + aux)
        x = _deconv2d_ref(x, params[f"dec{i}_w"], params[f"dec{i}_b"], k2)
        x = _prelu_ref(_cln_ref(x, params[f"dec{i}_ln_g"],
                                params[f"dec{i}_ln_b"], eps),
                       params[f"dec{i}_alpha"])
    return x_resi + x


# ----------------------------------------------------------------------------
if __name__ == "__main__":
    B, cin, cout = 4, 2, 8
    k1, k2 = (2, 5), (2, 3)
    scale = 2
    intra_connect = "cat"
    T, F = 128, 25                       # T lane-dense (multiple of 128)

    key = jax.random.PRNGKey(0)
    keys = iter(jax.random.split(key, 64))
    nxt = lambda: next(keys)

    def conv_w(shape, fan_in):
        return jax.random.normal(nxt(), shape, jnp.float32) / np.sqrt(fan_in)

    params = {}
    params["in_w"] = conv_w((2 * cout, cin, k1[0], k1[1]), cin * k1[0] * k1[1])
    params["in_b"] = 0.05 * jax.random.normal(nxt(), (2 * cout,), jnp.float32)
    params["in_ln_g"] = 1.0 + 0.1 * jax.random.normal(nxt(), (cout,), jnp.float32)
    params["in_ln_b"] = 0.05 * jax.random.normal(nxt(), (cout,), jnp.float32)
    params["in_alpha"] = 0.25 * jnp.ones((cout,), jnp.float32)
    for i in range(scale):
        params[f"enc{i}_w"] = conv_w((cout, cout, k2[0], k2[1]),
                                     cout * k2[0] * k2[1])
        params[f"enc{i}_b"] = 0.05 * jax.random.normal(nxt(), (cout,), jnp.float32)
        params[f"enc{i}_ln_g"] = 1.0 + 0.1 * jax.random.normal(nxt(), (cout,), jnp.float32)
        params[f"enc{i}_ln_b"] = 0.05 * jax.random.normal(nxt(), (cout,), jnp.float32)
        params[f"enc{i}_alpha"] = 0.25 * jnp.ones((cout,), jnp.float32)
    for i in range(scale):
        cin_d = cout if (i == 0 or intra_connect == "add") else 2 * cout
        params[f"dec{i}_w"] = conv_w((cin_d, cout, k2[0], k2[1]),
                                     cin_d * k2[0] * k2[1])
        params[f"dec{i}_b"] = 0.05 * jax.random.normal(nxt(), (cout,), jnp.float32)
        params[f"dec{i}_ln_g"] = 1.0 + 0.1 * jax.random.normal(nxt(), (cout,), jnp.float32)
        params[f"dec{i}_ln_b"] = 0.05 * jax.random.normal(nxt(), (cout,), jnp.float32)
        params[f"dec{i}_alpha"] = 0.25 * jnp.ones((cout,), jnp.float32)

    inp = jax.random.normal(nxt(), (B, cin, T, F), jnp.float32)

    out = jax.block_until_ready(
        en_unet_module_pallas(inp, params, k1, k2, intra_connect, scale))
    ref = jax.block_until_ready(
        en_unet_reference(inp, params, k1, k2, intra_connect, scale))

    # Tolerance accounts for bf16 MXU operands (standard TPU matmul precision)
    # accumulated over the 2*scale+1 chained conv units; accumulation is f32.
    np.testing.assert_allclose(np.asarray(out), np.asarray(ref),
                               rtol=3e-2, atol=3e-2)
    print("KERNEL_OK")
</pallas_src>

<mosaic_0001>
module attributes {stable_mosaic.version = 11 : i64} {
  func.func @kernel(%arg0: i32, %arg1: memref<1x50x256xf32, #tpu.memory_space<vmem>>, %arg2: memref<256x256xf32, #tpu.memory_space<vmem>>, %arg3: memref<2x256xf32, #tpu.memory_space<vmem>>, %arg4: memref<88x50xbf16, #tpu.memory_space<vmem>>, %arg5: memref<88x50xbf16, #tpu.memory_space<vmem>>, %arg6: memref<88x50xbf16, #tpu.memory_space<vmem>>, %arg7: memref<88x50xbf16, #tpu.memory_space<vmem>>, %arg8: memref<88x5xf32, #tpu.memory_space<vmem>>, %arg9: memref<40x88xbf16, #tpu.memory_space<vmem>>, %arg10: memref<40x88xbf16, #tpu.memory_space<vmem>>, %arg11: memref<40x4xf32, #tpu.memory_space<vmem>>, %arg12: memref<16x40xbf16, #tpu.memory_space<vmem>>, %arg13: memref<16x40xbf16, #tpu.memory_space<vmem>>, %arg14: memref<16x4xf32, #tpu.memory_space<vmem>>, %arg15: memref<40x16xbf16, #tpu.memory_space<vmem>>, %arg16: memref<40x16xbf16, #tpu.memory_space<vmem>>, %arg17: memref<40x4xf32, #tpu.memory_space<vmem>>, %arg18: memref<88x40xbf16, #tpu.memory_space<vmem>>, %arg19: memref<88x40xbf16, #tpu.memory_space<vmem>>, %arg20: memref<88x40xbf16, #tpu.memory_space<vmem>>, %arg21: memref<88x40xbf16, #tpu.memory_space<vmem>>, %arg22: memref<88x4xf32, #tpu.memory_space<vmem>>, %arg23: memref<1x88x256xf32, #tpu.memory_space<vmem>>) attributes {dimension_semantics = [#tpu.dimension_semantics<parallel>], iteration_bounds = array<i64: 2>, scalar_prefetch = 0 : i64, scratch_operands = 0 : i64, tpu.core_type = #tpu.core_type<tc>, window_params = [{transform_indices = @transform_0, window_bounds = array<i64: 1, 50, 256>}, {pipeline_mode = #tpu.pipeline_mode<synchronous>, transform_indices = @transform_1, window_bounds = array<i64: 256, 256>}, {pipeline_mode = #tpu.pipeline_mode<synchronous>, transform_indices = @transform_2, window_bounds = array<i64: 2, 256>}, {pipeline_mode = #tpu.pipeline_mode<synchronous>, transform_indices = @transform_3, window_bounds = array<i64: 88, 50>}, {pipeline_mode = #tpu.pipeline_mode<synchronous>, transform_indices = @transform_4, window_bounds = array<i64: 88, 50>}, {pipeline_mode = #tpu.pipeline_mode<synchronous>, transform_indices = @transform_5, window_bounds = array<i64: 88, 50>}, {pipeline_mode = #tpu.pipeline_mode<synchronous>, transform_indices = @transform_6, window_bounds = array<i64: 88, 50>}, {pipeline_mode = #tpu.pipeline_mode<synchronous>, transform_indices = @transform_7, window_bounds = array<i64: 88, 5>}, {pipeline_mode = #tpu.pipeline_mode<synchronous>, transform_indices = @transform_8, window_bounds = array<i64: 40, 88>}, {pipeline_mode = #tpu.pipeline_mode<synchronous>, transform_indices = @transform_9, window_bounds = array<i64: 40, 88>}, {pipeline_mode = #tpu.pipeline_mode<synchronous>, transform_indices = @transform_10, window_bounds = array<i64: 40, 4>}, {pipeline_mode = #tpu.pipeline_mode<synchronous>, transform_indices = @transform_11, window_bounds = array<i64: 16, 40>}, {pipeline_mode = #tpu.pipeline_mode<synchronous>, transform_indices = @transform_12, window_bounds = array<i64: 16, 40>}, {pipeline_mode = #tpu.pipeline_mode<synchronous>, transform_indices = @transform_13, window_bounds = array<i64: 16, 4>}, {pipeline_mode = #tpu.pipeline_mode<synchronous>, transform_indices = @transform_14, window_bounds = array<i64: 40, 16>}, {pipeline_mode = #tpu.pipeline_mode<synchronous>, transform_indices = @transform_15, window_bounds = array<i64: 40, 16>}, {pipeline_mode = #tpu.pipeline_mode<synchronous>, transform_indices = @transform_16, window_bounds = array<i64: 40, 4>}, {pipeline_mode = #tpu.pipeline_mode<synchronous>, transform_indices = @transform_17, window_bounds = array<i64: 88, 40>}, {pipeline_mode = #tpu.pipeline_mode<synchronous>, transform_indices = @transform_18, window_bounds = array<i64: 88, 40>}, {pipeline_mode = #tpu.pipeline_mode<synchronous>, transform_indices = @transform_19, window_bounds = array<i64: 88, 40>}, {pipeline_mode = #tpu.pipeline_mode<synchronous>, transform_indices = @transform_20, window_bounds = array<i64: 88, 40>}, {pipeline_mode = #tpu.pipeline_mode<synchronous>, transform_indices = @transform_21, window_bounds = array<i64: 88, 4>}, {transform_indices = @transform_22, window_bounds = array<i64: 1, 88, 256>}]} {
    %c0 = arith.constant 0 : index
    %c0_0 = arith.constant 0 : index
    %0 = vector.load %arg3[%c0, %c0_0] : memref<2x256xf32, #tpu.memory_space<vmem>>, vector<2x256xf32>
    %1 = vector.extract_strided_slice %0 {offsets = [0, 0], sizes = [1, 256], strides = [1, 1]} : vector<2x256xf32> to vector<1x256xf32>
    %c0_1 = arith.constant 0 : index
    %c0_2 = arith.constant 0 : index
    %c0_3 = arith.constant 0 : index
    %2 = vector.load %arg1[%c0_1, %c0_2, %c0_3] : memref<1x50x256xf32, #tpu.memory_space<vmem>>, vector<1x50x256xf32>
    %3 = vector.shape_cast %2 : vector<1x50x256xf32> to vector<50x256xf32>
    %c0_4 = arith.constant 0 : index
    %c0_5 = arith.constant 0 : index
    %4 = vector.load %arg8[%c0_4, %c0_5] : memref<88x5xf32, #tpu.memory_space<vmem>>, vector<88x5xf32>
    %5 = arith.truncf %3 : vector<50x256xf32> to vector<50x256xbf16>
    %c1_i32 = arith.constant 1 : i32
    %6 = tpu.dynamic_rotate %3 by %c1_i32 dim 1 : vector<50x256xf32>, i32 -> vector<50x256xf32>
    %7 = vector.extract_strided_slice %0 {offsets = [1, 0], sizes = [1, 256], strides = [1, 1]} : vector<2x256xf32> to vector<1x256xf32>
    %8 = vector.broadcast %7 : vector<1x256xf32> to vector<50x256xf32>
    %9 = arith.mulf %6, %8 : vector<50x256xf32>
    %10 = arith.truncf %9 : vector<50x256xf32> to vector<50x256xbf16>
    %c0_6 = arith.constant 0 : index
    %c0_7 = arith.constant 0 : index
    %11 = vector.load %arg4[%c0_6, %c0_7] : memref<88x50xbf16, #tpu.memory_space<vmem>>, vector<88x50xbf16>
    %cst = arith.constant dense<0.000000e+00> : vector<88x256xf32>
    %12 = tpu.matmul %11, %5, %cst {dimension_numbers = #tpu.dot_dimension_numbers<[1], [0], [0], [1], [0, 0, 1, 1], [], []>} : vector<88x50xbf16>, vector<50x256xbf16>, vector<88x256xf32> -> vector<88x256xf32>
    %c0_8 = arith.constant 0 : index
    %c0_9 = arith.constant 0 : index
    %13 = vector.load %arg5[%c0_8, %c0_9] : memref<88x50xbf16, #tpu.memory_space<vmem>>, vector<88x50xbf16>
    %cst_10 = arith.constant dense<0.000000e+00> : vector<88x256xf32>
    %14 = tpu.matmul %13, %10, %cst_10 {dimension_numbers = #tpu.dot_dimension_numbers<[1], [0], [0], [1], [0, 0, 1, 1], [], []>} : vector<88x50xbf16>, vector<50x256xbf16>, vector<88x256xf32> -> vector<88x256xf32>
    %15 = arith.addf %12, %14 : vector<88x256xf32>
    %16 = vector.extract_strided_slice %4 {offsets = [0, 0], sizes = [88, 1], strides = [1, 1]} : vector<88x5xf32> to vector<88x1xf32>
    %17 = vector.broadcast %16 : vector<88x1xf32> to vector<88x256xf32>
    %18 = arith.addf %15, %17 : vector<88x256xf32>
    %c0_11 = arith.constant 0 : index
    %c0_12 = arith.constant 0 : index
    %19 = vector.load %arg6[%c0_11, %c0_12] : memref<88x50xbf16, #tpu.memory_space<vmem>>, vector<88x50xbf16>
    %cst_13 = arith.constant dense<0.000000e+00> : vector<88x256xf32>
    %20 = tpu.matmul %19, %5, %cst_13 {dimension_numbers = #tpu.dot_dimension_numbers<[1], [0], [0], [1], [0, 0, 1, 1], [], []>} : vector<88x50xbf16>, vector<50x256xbf16>, vector<88x256xf32> -> vector<88x256xf32>
    %c0_14 = arith.constant 0 : index
    %c0_15 = arith.constant 0 : index
    %21 = vector.load %arg7[%c0_14, %c0_15] : memref<88x50xbf16, #tpu.memory_space<vmem>>, vector<88x50xbf16>
    %cst_16 = arith.constant dense<0.000000e+00> : vector<88x256xf32>
    %22 = tpu.matmul %21, %10, %cst_16 {dimension_numbers = #tpu.dot_dimension_numbers<[1], [0], [0], [1], [0, 0, 1, 1], [], []>} : vector<88x50xbf16>, vector<50x256xbf16>, vector<88x256xf32> -> vector<88x256xf32>
    %23 = arith.addf %20, %22 : vector<88x256xf32>
    %24 = vector.extract_strided_slice %4 {offsets = [0, 1], sizes = [88, 1], strides = [1, 1]} : vector<88x5xf32> to vector<88x1xf32>
    %25 = vector.broadcast %24 : vector<88x1xf32> to vector<88x256xf32>
    %26 = arith.addf %23, %25 : vector<88x256xf32>
    %27 = arith.negf %26 : vector<88x256xf32>
    %28 = math.exp %27 : vector<88x256xf32>
    %cst_17 = arith.constant 1.000000e+00 : f32
    %29 = vector.broadcast %cst_17 : f32 to vector<88x256xf32>
    %30 = arith.addf %29, %28 : vector<88x256xf32>
    %31 = arith.divf %29, %30 : vector<88x256xf32>
    %32 = arith.mulf %18, %31 : vector<88x256xf32>
    %33 = vector.extract_strided_slice %4 {offsets = [0, 2], sizes = [88, 1], strides = [1, 1]} : vector<88x5xf32> to vector<88x1xf32>
    %34 = vector.extract_strided_slice %4 {offsets = [0, 3], sizes = [88, 1], strides = [1, 1]} : vector<88x5xf32> to vector<88x1xf32>
    %cst_18 = arith.constant dense<0.000000e+00> : vector<256xf32>
    %35 = vector.multi_reduction <add>, %32, %cst_18 [0] : vector<88x256xf32> to vector<256xf32>
    %36 = vector.shape_cast %35 : vector<256xf32> to vector<1x256xf32>
    %37 = arith.mulf %32, %32 : vector<88x256xf32>
    %cst_19 = arith.constant dense<0.000000e+00> : vector<256xf32>
    %38 = vector.multi_reduction <add>, %37, %cst_19 [0] : vector<88x256xf32> to vector<256xf32>
    %39 = vector.shape_cast %38 : vector<256xf32> to vector<1x256xf32>
    %cst_20 = arith.constant 0.000000e+00 : f32
    %40 = vector.broadcast %cst_20 : f32 to vector<6x256xf32>
    %41 = tpu.concatenate %36, %39, %40 in 0 : vector<1x256xf32>, vector<1x256xf32>, vector<6x256xf32> -> vector<8x256xf32>
    %c0_21 = arith.constant 0 : index
    %c0_22 = arith.constant 0 : index
    %42 = vector.load %arg2[%c0_21, %c0_22] : memref<256x256xf32, #tpu.memory_space<vmem>>, vector<256x256xf32>
    %cst_23 = arith.constant dense<0.000000e+00> : vector<8x256xf32>
    %43 = tpu.matmul %41, %42, %cst_23 {dimension_numbers = #tpu.dot_dimension_numbers<[1], [0], [0], [1], [0, 0, 1, 1], [], []>} : vector<8x256xf32>, vector<256x256xf32>, vector<8x256xf32> -> vector<8x256xf32>
    %cst_24 = arith.constant 8.800000e+01 : f32
    %44 = vector.broadcast %cst_24 : f32 to vector<1x256xf32>
    %45 = arith.mulf %1, %44 : vector<1x256xf32>
    %46 = vector.extract_strided_slice %43 {offsets = [0, 0], sizes = [1, 256], strides = [1, 1]} : vector<8x256xf32> to vector<1x256xf32>
    %47 = vector.extract_strided_slice %43 {offsets = [1, 0], sizes = [1, 256], strides = [1, 1]} : vector<8x256xf32> to vector<1x256xf32>
    %48 = arith.divf %46, %45 : vector<1x256xf32>
    %cst_25 = arith.constant 2.000000e+00 : f32
    %49 = vector.broadcast %cst_25 : f32 to vector<1x256xf32>
    %50 = arith.mulf %49, %48 : vector<1x256xf32>
    %51 = arith.mulf %50, %46 : vector<1x256xf32>
    %52 = arith.subf %47, %51 : vector<1x256xf32>
    %53 = arith.divf %52, %45 : vector<1x256xf32>
    %54 = arith.mulf %48, %48 : vector<1x256xf32>
    %55 = arith.addf %53, %54 : vector<1x256xf32>
    %cst_26 = arith.constant 9.99999974E-6 : f32
    %56 = vector.broadcast %cst_26 : f32 to vector<1x256xf32>
    %57 = arith.addf %55, %56 : vector<1x256xf32>
    %58 = math.rsqrt %57 : vector<1x256xf32>
    %59 = vector.broadcast %48 : vector<1x256xf32> to vector<88x256xf32>
    %60 = arith.subf %32, %59 : vector<88x256xf32>
    %61 = vector.broadcast %58 : vector<1x256xf32> to vector<88x256xf32>
    %62 = arith.mulf %60, %61 : vector<88x256xf32>
    %63 = vector.broadcast %33 : vector<88x1xf32> to vector<88x256xf32>
    %64 = arith.mulf %62, %63 : vector<88x256xf32>
    %65 = vector.broadcast %34 : vector<88x1xf32> to vector<88x256xf32>
    %66 = arith.addf %64, %65 : vector<88x256xf32>
    %67 = vector.extract_strided_slice %4 {offsets = [0, 4], sizes = [88, 1], strides = [1, 1]} : vector<88x5xf32> to vector<88x1xf32>
    %cst_27 = arith.constant 0.000000e+00 : f32
    %68 = vector.broadcast %cst_27 : f32 to vector<88x256xf32>
    %69 = arith.cmpf oge, %66, %68 : vector<88x256xf32>
    %70 = vector.broadcast %67 : vector<88x1xf32> to vector<88x256xf32>
    %71 = arith.mulf %70, %66 : vector<88x256xf32>
    %72 = arith.select %69, %66, %71 : vector<88x256xi1>, vector<88x256xf32>
    %c0_28 = arith.constant 0 : index
    %c0_29 = arith.constant 0 : index
    %73 = vector.load %arg11[%c0_28, %c0_29] : memref<40x4xf32, #tpu.memory_space<vmem>>, vector<40x4xf32>
    %74 = arith.truncf %72 : vector<88x256xf32> to vector<88x256xbf16>
    %c1_i32_30 = arith.constant 1 : i32
    %75 = tpu.dynamic_rotate %72 by %c1_i32_30 dim 1 : vector<88x256xf32>, i32 -> vector<88x256xf32>
    %76 = vector.extract_strided_slice %0 {offsets = [1, 0], sizes = [1, 256], strides = [1, 1]} : vector<2x256xf32> to vector<1x256xf32>
    %77 = vector.broadcast %76 : vector<1x256xf32> to vector<88x256xf32>
    %78 = arith.mulf %75, %77 : vector<88x256xf32>
    %79 = arith.truncf %78 : vector<88x256xf32> to vector<88x256xbf16>
    %c0_31 = arith.constant 0 : index
    %c0_32 = arith.constant 0 : index
    %80 = vector.load %arg9[%c0_31, %c0_32] : memref<40x88xbf16, #tpu.memory_space<vmem>>, vector<40x88xbf16>
    %cst_33 = arith.constant dense<0.000000e+00> : vector<40x256xf32>
    %81 = tpu.matmul %80, %74, %cst_33 {dimension_numbers = #tpu.dot_dimension_numbers<[1], [0], [0], [1], [0, 0, 1, 1], [], []>} : vector<40x88xbf16>, vector<88x256xbf16>, vector<40x256xf32> -> vector<40x256xf32>
    %c0_34 = arith.constant 0 : index
    %c0_35 = arith.constant 0 : index
    %82 = vector.load %arg10[%c0_34, %c0_35] : memref<40x88xbf16, #tpu.memory_space<vmem>>, vector<40x88xbf16>
    %cst_36 = arith.constant dense<0.000000e+00> : vector<40x256xf32>
    %83 = tpu.matmul %82, %79, %cst_36 {dimension_numbers = #tpu.dot_dimension_numbers<[1], [0], [0], [1], [0, 0, 1, 1], [], []>} : vector<40x88xbf16>, vector<88x256xbf16>, vector<40x256xf32> -> vector<40x256xf32>
    %84 = arith.addf %81, %83 : vector<40x256xf32>
    %85 = vector.extract_strided_slice %73 {offsets = [0, 0], sizes = [40, 1], strides = [1, 1]} : vector<40x4xf32> to vector<40x1xf32>
    %86 = vector.broadcast %85 : vector<40x1xf32> to vector<40x256xf32>
    %87 = arith.addf %84, %86 : vector<40x256xf32>
    %88 = vector.extract_strided_slice %73 {offsets = [0, 1], sizes = [40, 1], strides = [1, 1]} : vector<40x4xf32> to vector<40x1xf32>
    %89 = vector.extract_strided_slice %73 {offsets = [0, 2], sizes = [40, 1], strides = [1, 1]} : vector<40x4xf32> to vector<40x1xf32>
    %cst_37 = arith.constant dense<0.000000e+00> : vector<256xf32>
    %90 = vector.multi_reduction <add>, %87, %cst_37 [0] : vector<40x256xf32> to vector<256xf32>
    %91 = vector.shape_cast %90 : vector<256xf32> to vector<1x256xf32>
    %92 = arith.mulf %87, %87 : vector<40x256xf32>
    %cst_38 = arith.constant dense<0.000000e+00> : vector<256xf32>
    %93 = vector.multi_reduction <add>, %92, %cst_38 [0] : vector<40x256xf32> to vector<256xf32>
    %94 = vector.shape_cast %93 : vector<256xf32> to vector<1x256xf32>
    %cst_39 = arith.constant 0.000000e+00 : f32
    %95 = vector.broadcast %cst_39 : f32 to vector<6x256xf32>
    %96 = tpu.concatenate %91, %94, %95 in 0 : vector<1x256xf32>, vector<1x256xf32>, vector<6x256xf32> -> vector<8x256xf32>
    %c0_40 = arith.constant 0 : index
    %c0_41 = arith.constant 0 : index
    %97 = vector.load %arg2[%c0_40, %c0_41] : memref<256x256xf32, #tpu.memory_space<vmem>>, vector<256x256xf32>
    %cst_42 = arith.constant dense<0.000000e+00> : vector<8x256xf32>
    %98 = tpu.matmul %96, %97, %cst_42 {dimension_numbers = #tpu.dot_dimension_numbers<[1], [0], [0], [1], [0, 0, 1, 1], [], []>} : vector<8x256xf32>, vector<256x256xf32>, vector<8x256xf32> -> vector<8x256xf32>
    %cst_43 = arith.constant 4.000000e+01 : f32
    %99 = vector.broadcast %cst_43 : f32 to vector<1x256xf32>
    %100 = arith.mulf %1, %99 : vector<1x256xf32>
    %101 = vector.extract_strided_slice %98 {offsets = [0, 0], sizes = [1, 256], strides = [1, 1]} : vector<8x256xf32> to vector<1x256xf32>
    %102 = vector.extract_strided_slice %98 {offsets = [1, 0], sizes = [1, 256], strides = [1, 1]} : vector<8x256xf32> to vector<1x256xf32>
    %103 = arith.divf %101, %100 : vector<1x256xf32>
    %cst_44 = arith.constant 2.000000e+00 : f32
    %104 = vector.broadcast %cst_44 : f32 to vector<1x256xf32>
    %105 = arith.mulf %104, %103 : vector<1x256xf32>
    %106 = arith.mulf %105, %101 : vector<1x256xf32>
    %107 = arith.subf %102, %106 : vector<1x256xf32>
    %108 = arith.divf %107, %100 : vector<1x256xf32>
    %109 = arith.mulf %103, %103 : vector<1x256xf32>
    %110 = arith.addf %108, %109 : vector<1x256xf32>
    %cst_45 = arith.constant 9.99999974E-6 : f32
    %111 = vector.broadcast %cst_45 : f32 to vector<1x256xf32>
    %112 = arith.addf %110, %111 : vector<1x256xf32>
    %113 = math.rsqrt %112 : vector<1x256xf32>
    %114 = vector.broadcast %103 : vector<1x256xf32> to vector<40x256xf32>
    %115 = arith.subf %87, %114 : vector<40x256xf32>
    %116 = vector.broadcast %113 : vector<1x256xf32> to vector<40x256xf32>
    %117 = arith.mulf %115, %116 : vector<40x256xf32>
    %118 = vector.broadcast %88 : vector<40x1xf32> to vector<40x256xf32>
    %119 = arith.mulf %117, %118 : vector<40x256xf32>
    %120 = vector.broadcast %89 : vector<40x1xf32> to vector<40x256xf32>
    %121 = arith.addf %119, %120 : vector<40x256xf32>
    %122 = vector.extract_strided_slice %73 {offsets = [0, 3], sizes = [40, 1], strides = [1, 1]} : vector<40x4xf32> to vector<40x1xf32>
    %cst_46 = arith.constant 0.000000e+00 : f32
    %123 = vector.broadcast %cst_46 : f32 to vector<40x256xf32>
    %124 = arith.cmpf oge, %121, %123 : vector<40x256xf32>
    %125 = vector.broadcast %122 : vector<40x1xf32> to vector<40x256xf32>
    %126 = arith.mulf %125, %121 : vector<40x256xf32>
    %127 = arith.select %124, %121, %126 : vector<40x256xi1>, vector<40x256xf32>
    %c0_47 = arith.constant 0 : index
    %c0_48 = arith.constant 0 : index
    %128 = vector.load %arg14[%c0_47, %c0_48] : memref<16x4xf32, #tpu.memory_space<vmem>>, vector<16x4xf32>
    %129 = arith.truncf %127 : vector<40x256xf32> to vector<40x256xbf16>
    %c1_i32_49 = arith.constant 1 : i32
    %130 = tpu.dynamic_rotate %127 by %c1_i32_49 dim 1 : vector<40x256xf32>, i32 -> vector<40x256xf32>
    %131 = vector.extract_strided_slice %0 {offsets = [1, 0], sizes = [1, 256], strides = [1, 1]} : vector<2x256xf32> to vector<1x256xf32>
    %132 = vector.broadcast %131 : vector<1x256xf32> to vector<40x256xf32>
    %133 = arith.mulf %130, %132 : vector<40x256xf32>
    %134 = arith.truncf %133 : vector<40x256xf32> to vector<40x256xbf16>
    %c0_50 = arith.constant 0 : index
    %c0_51 = arith.constant 0 : index
    %135 = vector.load %arg12[%c0_50, %c0_51] : memref<16x40xbf16, #tpu.memory_space<vmem>>, vector<16x40xbf16>
    %cst_52 = arith.constant dense<0.000000e+00> : vector<16x256xf32>
    %136 = tpu.matmul %135, %129, %cst_52 {dimension_numbers = #tpu.dot_dimension_numbers<[1], [0], [0], [1], [0, 0, 1, 1], [], []>} : vector<16x40xbf16>, vector<40x256xbf16>, vector<16x256xf32> -> vector<16x256xf32>
    %c0_53 = arith.constant 0 : index
    %c0_54 = arith.constant 0 : index
    %137 = vector.load %arg13[%c0_53, %c0_54] : memref<16x40xbf16, #tpu.memory_space<vmem>>, vector<16x40xbf16>
    %cst_55 = arith.constant dense<0.000000e+00> : vector<16x256xf32>
    %138 = tpu.matmul %137, %134, %cst_55 {dimension_numbers = #tpu.dot_dimension_numbers<[1], [0], [0], [1], [0, 0, 1, 1], [], []>} : vector<16x40xbf16>, vector<40x256xbf16>, vector<16x256xf32> -> vector<16x256xf32>
    %139 = arith.addf %136, %138 : vector<16x256xf32>
    %140 = vector.extract_strided_slice %128 {offsets = [0, 0], sizes = [16, 1], strides = [1, 1]} : vector<16x4xf32> to vector<16x1xf32>
    %141 = vector.broadcast %140 : vector<16x1xf32> to vector<16x256xf32>
    %142 = arith.addf %139, %141 : vector<16x256xf32>
    %143 = vector.extract_strided_slice %128 {offsets = [0, 1], sizes = [16, 1], strides = [1, 1]} : vector<16x4xf32> to vector<16x1xf32>
    %144 = vector.extract_strided_slice %128 {offsets = [0, 2], sizes = [16, 1], strides = [1, 1]} : vector<16x4xf32> to vector<16x1xf32>
    %cst_56 = arith.constant dense<0.000000e+00> : vector<256xf32>
    %145 = vector.multi_reduction <add>, %142, %cst_56 [0] : vector<16x256xf32> to vector<256xf32>
    %146 = vector.shape_cast %145 : vector<256xf32> to vector<1x256xf32>
    %147 = arith.mulf %142, %142 : vector<16x256xf32>
    %cst_57 = arith.constant dense<0.000000e+00> : vector<256xf32>
    %148 = vector.multi_reduction <add>, %147, %cst_57 [0] : vector<16x256xf32> to vector<256xf32>
    %149 = vector.shape_cast %148 : vector<256xf32> to vector<1x256xf32>
    %cst_58 = arith.constant 0.000000e+00 : f32
    %150 = vector.broadcast %cst_58 : f32 to vector<6x256xf32>
    %151 = tpu.concatenate %146, %149, %150 in 0 : vector<1x256xf32>, vector<1x256xf32>, vector<6x256xf32> -> vector<8x256xf32>
    %c0_59 = arith.constant 0 : index
    %c0_60 = arith.constant 0 : index
    %152 = vector.load %arg2[%c0_59, %c0_60] : memref<256x256xf32, #tpu.memory_space<vmem>>, vector<256x256xf32>
    %cst_61 = arith.constant dense<0.000000e+00> : vector<8x256xf32>
    %153 = tpu.matmul %151, %152, %cst_61 {dimension_numbers = #tpu.dot_dimension_numbers<[1], [0], [0], [1], [0, 0, 1, 1], [], []>} : vector<8x256xf32>, vector<256x256xf32>, vector<8x256xf32> -> vector<8x256xf32>
    %cst_62 = arith.constant 1.600000e+01 : f32
    %154 = vector.broadcast %cst_62 : f32 to vector<1x256xf32>
    %155 = arith.mulf %1, %154 : vector<1x256xf32>
    %156 = vector.extract_strided_slice %153 {offsets = [0, 0], sizes = [1, 256], strides = [1, 1]} : vector<8x256xf32> to vector<1x256xf32>
    %157 = vector.extract_strided_slice %153 {offsets = [1, 0], sizes = [1, 256], strides = [1, 1]} : vector<8x256xf32> to vector<1x256xf32>
    %158 = arith.divf %156, %155 : vector<1x256xf32>
    %cst_63 = arith.constant 2.000000e+00 : f32
    %159 = vector.broadcast %cst_63 : f32 to vector<1x256xf32>
    %160 = arith.mulf %159, %158 : vector<1x256xf32>
    %161 = arith.mulf %160, %156 : vector<1x256xf32>
    %162 = arith.subf %157, %161 : vector<1x256xf32>
    %163 = arith.divf %162, %155 : vector<1x256xf32>
    %164 = arith.mulf %158, %158 : vector<1x256xf32>
    %165 = arith.addf %163, %164 : vector<1x256xf32>
    %cst_64 = arith.constant 9.99999974E-6 : f32
    %166 = vector.broadcast %cst_64 : f32 to vector<1x256xf32>
    %167 = arith.addf %165, %166 : vector<1x256xf32>
    %168 = math.rsqrt %167 : vector<1x256xf32>
    %169 = vector.broadcast %158 : vector<1x256xf32> to vector<16x256xf32>
    %170 = arith.subf %142, %169 : vector<16x256xf32>
    %171 = vector.broadcast %168 : vector<1x256xf32> to vector<16x256xf32>
    %172 = arith.mulf %170, %171 : vector<16x256xf32>
    %173 = vector.broadcast %143 : vector<16x1xf32> to vector<16x256xf32>
    %174 = arith.mulf %172, %173 : vector<16x256xf32>
    %175 = vector.broadcast %144 : vector<16x1xf32> to vector<16x256xf32>
    %176 = arith.addf %174, %175 : vector<16x256xf32>
    %177 = vector.extract_strided_slice %128 {offsets = [0, 3], sizes = [16, 1], strides = [1, 1]} : vector<16x4xf32> to vector<16x1xf32>
    %cst_65 = arith.constant 0.000000e+00 : f32
    %178 = vector.broadcast %cst_65 : f32 to vector<16x256xf32>
    %179 = arith.cmpf oge, %176, %178 : vector<16x256xf32>
    %180 = vector.broadcast %177 : vector<16x1xf32> to vector<16x256xf32>
    %181 = arith.mulf %180, %176 : vector<16x256xf32>
    %182 = arith.select %179, %176, %181 : vector<16x256xi1>, vector<16x256xf32>
    %c0_66 = arith.constant 0 : index
    %c0_67 = arith.constant 0 : index
    %183 = vector.load %arg17[%c0_66, %c0_67] : memref<40x4xf32, #tpu.memory_space<vmem>>, vector<40x4xf32>
    %184 = arith.truncf %182 : vector<16x256xf32> to vector<16x256xbf16>
    %c1_i32_68 = arith.constant 1 : i32
    %185 = tpu.dynamic_rotate %182 by %c1_i32_68 dim 1 : vector<16x256xf32>, i32 -> vector<16x256xf32>
    %186 = vector.extract_strided_slice %0 {offsets = [1, 0], sizes = [1, 256], strides = [1, 1]} : vector<2x256xf32> to vector<1x256xf32>
    %187 = vector.broadcast %186 : vector<1x256xf32> to vector<16x256xf32>
    %188 = arith.mulf %185, %187 : vector<16x256xf32>
    %189 = arith.truncf %188 : vector<16x256xf32> to vector<16x256xbf16>
    %c0_69 = arith.constant 0 : index
    %c0_70 = arith.constant 0 : index
    %190 = vector.load %arg15[%c0_69, %c0_70] : memref<40x16xbf16, #tpu.memory_space<vmem>>, vector<40x16xbf16>
    %cst_71 = arith.constant dense<0.000000e+00> : vector<40x256xf32>
    %191 = tpu.matmul %190, %184, %cst_71 {dimension_numbers = #tpu.dot_dimension_numbers<[1], [0], [0], [1], [0, 0, 1, 1], [], []>} : vector<40x16xbf16>, vector<16x256xbf16>, vector<40x256xf32> -> vector<40x256xf32>
    %c0_72 = arith.constant 0 : index
    %c0_73 = arith.constant 0 : index
    %192 = vector.load %arg16[%c0_72, %c0_73] : memref<40x16xbf16, #tpu.memory_space<vmem>>, vector<40x16xbf16>
    %cst_74 = arith.constant dense<0.000000e+00> : vector<40x256xf32>
    %193 = tpu.matmul %192, %189, %cst_74 {dimension_numbers = #tpu.dot_dimension_numbers<[1], [0], [0], [1], [0, 0, 1, 1], [], []>} : vector<40x16xbf16>, vector<16x256xbf16>, vector<40x256xf32> -> vector<40x256xf32>
    %194 = arith.addf %191, %193 : vector<40x256xf32>
    %195 = vector.extract_strided_slice %183 {offsets = [0, 0], sizes = [40, 1], strides = [1, 1]} : vector<40x4xf32> to vector<40x1xf32>
    %196 = vector.broadcast %195 : vector<40x1xf32> to vector<40x256xf32>
    %197 = arith.addf %194, %196 : vector<40x256xf32>
    %198 = vector.extract_strided_slice %183 {offsets = [0, 1], sizes = [40, 1], strides = [1, 1]} : vector<40x4xf32> to vector<40x1xf32>
    %199 = vector.extract_strided_slice %183 {offsets = [0, 2], sizes = [40, 1], strides = [1, 1]} : vector<40x4xf32> to vector<40x1xf32>
    %cst_75 = arith.constant dense<0.000000e+00> : vector<256xf32>
    %200 = vector.multi_reduction <add>, %197, %cst_75 [0] : vector<40x256xf32> to vector<256xf32>
    %201 = vector.shape_cast %200 : vector<256xf32> to vector<1x256xf32>
    %202 = arith.mulf %197, %197 : vector<40x256xf32>
    %cst_76 = arith.constant dense<0.000000e+00> : vector<256xf32>
    %203 = vector.multi_reduction <add>, %202, %cst_76 [0] : vector<40x256xf32> to vector<256xf32>
    %204 = vector.shape_cast %203 : vector<256xf32> to vector<1x256xf32>
    %cst_77 = arith.constant 0.000000e+00 : f32
    %205 = vector.broadcast %cst_77 : f32 to vector<6x256xf32>
    %206 = tpu.concatenate %201, %204, %205 in 0 : vector<1x256xf32>, vector<1x256xf32>, vector<6x256xf32> -> vector<8x256xf32>
    %c0_78 = arith.constant 0 : index
    %c0_79 = arith.constant 0 : index
    %207 = vector.load %arg2[%c0_78, %c0_79] : memref<256x256xf32, #tpu.memory_space<vmem>>, vector<256x256xf32>
    %cst_80 = arith.constant dense<0.000000e+00> : vector<8x256xf32>
    %208 = tpu.matmul %206, %207, %cst_80 {dimension_numbers = #tpu.dot_dimension_numbers<[1], [0], [0], [1], [0, 0, 1, 1], [], []>} : vector<8x256xf32>, vector<256x256xf32>, vector<8x256xf32> -> vector<8x256xf32>
    %cst_81 = arith.constant 4.000000e+01 : f32
    %209 = vector.broadcast %cst_81 : f32 to vector<1x256xf32>
    %210 = arith.mulf %1, %209 : vector<1x256xf32>
    %211 = vector.extract_strided_slice %208 {offsets = [0, 0], sizes = [1, 256], strides = [1, 1]} : vector<8x256xf32> to vector<1x256xf32>
    %212 = vector.extract_strided_slice %208 {offsets = [1, 0], sizes = [1, 256], strides = [1, 1]} : vector<8x256xf32> to vector<1x256xf32>
    %213 = arith.divf %211, %210 : vector<1x256xf32>
    %cst_82 = arith.constant 2.000000e+00 : f32
    %214 = vector.broadcast %cst_82 : f32 to vector<1x256xf32>
    %215 = arith.mulf %214, %213 : vector<1x256xf32>
    %216 = arith.mulf %215, %211 : vector<1x256xf32>
    %217 = arith.subf %212, %216 : vector<1x256xf32>
    %218 = arith.divf %217, %210 : vector<1x256xf32>
    %219 = arith.mulf %213, %213 : vector<1x256xf32>
    %220 = arith.addf %218, %219 : vector<1x256xf32>
    %cst_83 = arith.constant 9.99999974E-6 : f32
    %221 = vector.broadcast %cst_83 : f32 to vector<1x256xf32>
    %222 = arith.addf %220, %221 : vector<1x256xf32>
    %223 = math.rsqrt %222 : vector<1x256xf32>
    %224 = vector.broadcast %213 : vector<1x256xf32> to vector<40x256xf32>
    %225 = arith.subf %197, %224 : vector<40x256xf32>
    %226 = vector.broadcast %223 : vector<1x256xf32> to vector<40x256xf32>
    %227 = arith.mulf %225, %226 : vector<40x256xf32>
    %228 = vector.broadcast %198 : vector<40x1xf32> to vector<40x256xf32>
    %229 = arith.mulf %227, %228 : vector<40x256xf32>
    %230 = vector.broadcast %199 : vector<40x1xf32> to vector<40x256xf32>
    %231 = arith.addf %229, %230 : vector<40x256xf32>
    %232 = vector.extract_strided_slice %183 {offsets = [0, 3], sizes = [40, 1], strides = [1, 1]} : vector<40x4xf32> to vector<40x1xf32>
    %cst_84 = arith.constant 0.000000e+00 : f32
    %233 = vector.broadcast %cst_84 : f32 to vector<40x256xf32>
    %234 = arith.cmpf oge, %231, %233 : vector<40x256xf32>
    %235 = vector.broadcast %232 : vector<40x1xf32> to vector<40x256xf32>
    %236 = arith.mulf %235, %231 : vector<40x256xf32>
    %237 = arith.select %234, %231, %236 : vector<40x256xi1>, vector<40x256xf32>
    %c0_85 = arith.constant 0 : index
    %c0_86 = arith.constant 0 : index
    %238 = vector.load %arg22[%c0_85, %c0_86] : memref<88x4xf32, #tpu.memory_space<vmem>>, vector<88x4xf32>
    %239 = arith.truncf %237 : vector<40x256xf32> to vector<40x256xbf16>
    %c1_i32_87 = arith.constant 1 : i32
    %240 = tpu.dynamic_rotate %237 by %c1_i32_87 dim 1 : vector<40x256xf32>, i32 -> vector<40x256xf32>
    %241 = vector.extract_strided_slice %0 {offsets = [1, 0], sizes = [1, 256], strides = [1, 1]} : vector<2x256xf32> to vector<1x256xf32>
    %242 = vector.broadcast %241 : vector<1x256xf32> to vector<40x256xf32>
    %243 = arith.mulf %240, %242 : vector<40x256xf32>
    %244 = arith.truncf %243 : vector<40x256xf32> to vector<40x256xbf16>
    %245 = arith.truncf %127 : vector<40x256xf32> to vector<40x256xbf16>
    %c1_i32_88 = arith.constant 1 : i32
    %246 = tpu.dynamic_rotate %127 by %c1_i32_88 dim 1 : vector<40x256xf32>, i32 -> vector<40x256xf32>
    %247 = vector.extract_strided_slice %0 {offsets = [1, 0], sizes = [1, 256], strides = [1, 1]} : vector<2x256xf32> to vector<1x256xf32>
    %248 = vector.broadcast %247 : vector<1x256xf32> to vector<40x256xf32>
    %249 = arith.mulf %246, %248 : vector<40x256xf32>
    %250 = arith.truncf %249 : vector<40x256xf32> to vector<40x256xbf16>
    %c0_89 = arith.constant 0 : index
    %c0_90 = arith.constant 0 : index
    %251 = vector.load %arg18[%c0_89, %c0_90] : memref<88x40xbf16, #tpu.memory_space<vmem>>, vector<88x40xbf16>
    %cst_91 = arith.constant dense<0.000000e+00> : vector<88x256xf32>
    %252 = tpu.matmul %251, %239, %cst_91 {dimension_numbers = #tpu.dot_dimension_numbers<[1], [0], [0], [1], [0, 0, 1, 1], [], []>} : vector<88x40xbf16>, vector<40x256xbf16>, vector<88x256xf32> -> vector<88x256xf32>
    %c0_92 = arith.constant 0 : index
    %c0_93 = arith.constant 0 : index
    %253 = vector.load %arg19[%c0_92, %c0_93] : memref<88x40xbf16, #tpu.memory_space<vmem>>, vector<88x40xbf16>
    %cst_94 = arith.constant dense<0.000000e+00> : vector<88x256xf32>
    %254 = tpu.matmul %253, %244, %cst_94 {dimension_numbers = #tpu.dot_dimension_numbers<[1], [0], [0], [1], [0, 0, 1, 1], [], []>} : vector<88x40xbf16>, vector<40x256xbf16>, vector<88x256xf32> -> vector<88x256xf32>
    %255 = arith.addf %252, %254 : vector<88x256xf32>
    %c0_95 = arith.constant 0 : index
    %c0_96 = arith.constant 0 : index
    %256 = vector.load %arg20[%c0_95, %c0_96] : memref<88x40xbf16, #tpu.memory_space<vmem>>, vector<88x40xbf16>
    %cst_97 = arith.constant dense<0.000000e+00> : vector<88x256xf32>
    %257 = tpu.matmul %256, %245, %cst_97 {dimension_numbers = #tpu.dot_dimension_numbers<[1], [0], [0], [1], [0, 0, 1, 1], [], []>} : vector<88x40xbf16>, vector<40x256xbf16>, vector<88x256xf32> -> vector<88x256xf32>
    %258 = arith.addf %255, %257 : vector<88x256xf32>
    %c0_98 = arith.constant 0 : index
    %c0_99 = arith.constant 0 : index
    %259 = vector.load %arg21[%c0_98, %c0_99] : memref<88x40xbf16, #tpu.memory_space<vmem>>, vector<88x40xbf16>
    %cst_100 = arith.constant dense<0.000000e+00> : vector<88x256xf32>
    %260 = tpu.matmul %259, %250, %cst_100 {dimension_numbers = #tpu.dot_dimension_numbers<[1], [0], [0], [1], [0, 0, 1, 1], [], []>} : vector<88x40xbf16>, vector<40x256xbf16>, vector<88x256xf32> -> vector<88x256xf32>
    %261 = arith.addf %258, %260 : vector<88x256xf32>
    %262 = vector.extract_strided_slice %238 {offsets = [0, 0], sizes = [88, 1], strides = [1, 1]} : vector<88x4xf32> to vector<88x1xf32>
    %263 = vector.broadcast %262 : vector<88x1xf32> to vector<88x256xf32>
    %264 = arith.addf %261, %263 : vector<88x256xf32>
    %265 = vector.extract_strided_slice %238 {offsets = [0, 1], sizes = [88, 1], strides = [1, 1]} : vector<88x4xf32> to vector<88x1xf32>
    %266 = vector.extract_strided_slice %238 {offsets = [0, 2], sizes = [88, 1], strides = [1, 1]} : vector<88x4xf32> to vector<88x1xf32>
    %cst_101 = arith.constant dense<0.000000e+00> : vector<256xf32>
    %267 = vector.multi_reduction <add>, %264, %cst_101 [0] : vector<88x256xf32> to vector<256xf32>
    %268 = vector.shape_cast %267 : vector<256xf32> to vector<1x256xf32>
    %269 = arith.mulf %264, %264 : vector<88x256xf32>
    %cst_102 = arith.constant dense<0.000000e+00> : vector<256xf32>
    %270 = vector.multi_reduction <add>, %269, %cst_102 [0] : vector<88x256xf32> to vector<256xf32>
    %271 = vector.shape_cast %270 : vector<256xf32> to vector<1x256xf32>
    %cst_103 = arith.constant 0.000000e+00 : f32
    %272 = vector.broadcast %cst_103 : f32 to vector<6x256xf32>
    %273 = tpu.concatenate %268, %271, %272 in 0 : vector<1x256xf32>, vector<1x256xf32>, vector<6x256xf32> -> vector<8x256xf32>
    %c0_104 = arith.constant 0 : index
    %c0_105 = arith.constant 0 : index
    %274 = vector.load %arg2[%c0_104, %c0_105] : memref<256x256xf32, #tpu.memory_space<vmem>>, vector<256x256xf32>
    %cst_106 = arith.constant dense<0.000000e+00> : vector<8x256xf32>
    %275 = tpu.matmul %273, %274, %cst_106 {dimension_numbers = #tpu.dot_dimension_numbers<[1], [0], [0], [1], [0, 0, 1, 1], [], []>} : vector<8x256xf32>, vector<256x256xf32>, vector<8x256xf32> -> vector<8x256xf32>
    %cst_107 = arith.constant 8.800000e+01 : f32
    %276 = vector.broadcast %cst_107 : f32 to vector<1x256xf32>
    %277 = arith.mulf %1, %276 : vector<1x256xf32>
    %278 = vector.extract_strided_slice %275 {offsets = [0, 0], sizes = [1, 256], strides = [1, 1]} : vector<8x256xf32> to vector<1x256xf32>
    %279 = vector.extract_strided_slice %275 {offsets = [1, 0], sizes = [1, 256], strides = [1, 1]} : vector<8x256xf32> to vector<1x256xf32>
    %280 = arith.divf %278, %277 : vector<1x256xf32>
    %cst_108 = arith.constant 2.000000e+00 : f32
    %281 = vector.broadcast %cst_108 : f32 to vector<1x256xf32>
    %282 = arith.mulf %281, %280 : vector<1x256xf32>
    %283 = arith.mulf %282, %278 : vector<1x256xf32>
    %284 = arith.subf %279, %283 : vector<1x256xf32>
    %285 = arith.divf %284, %277 : vector<1x256xf32>
    %286 = arith.mulf %280, %280 : vector<1x256xf32>
    %287 = arith.addf %285, %286 : vector<1x256xf32>
    %cst_109 = arith.constant 9.99999974E-6 : f32
    %288 = vector.broadcast %cst_109 : f32 to vector<1x256xf32>
    %289 = arith.addf %287, %288 : vector<1x256xf32>
    %290 = math.rsqrt %289 : vector<1x256xf32>
    %291 = vector.broadcast %280 : vector<1x256xf32> to vector<88x256xf32>
    %292 = arith.subf %264, %291 : vector<88x256xf32>
    %293 = vector.broadcast %290 : vector<1x256xf32> to vector<88x256xf32>
    %294 = arith.mulf %292, %293 : vector<88x256xf32>
    %295 = vector.broadcast %265 : vector<88x1xf32> to vector<88x256xf32>
    %296 = arith.mulf %294, %295 : vector<88x256xf32>
    %297 = vector.broadcast %266 : vector<88x1xf32> to vector<88x256xf32>
    %298 = arith.addf %296, %297 : vector<88x256xf32>
    %299 = vector.extract_strided_slice %238 {offsets = [0, 3], sizes = [88, 1], strides = [1, 1]} : vector<88x4xf32> to vector<88x1xf32>
    %cst_110 = arith.constant 0.000000e+00 : f32
    %300 = vector.broadcast %cst_110 : f32 to vector<88x256xf32>
    %301 = arith.cmpf oge, %298, %300 : vector<88x256xf32>
    %302 = vector.broadcast %299 : vector<88x1xf32> to vector<88x256xf32>
    %303 = arith.mulf %302, %298 : vector<88x256xf32>
    %304 = arith.select %301, %298, %303 : vector<88x256xi1>, vector<88x256xf32>
    %305 = arith.addf %72, %304 : vector<88x256xf32>
    %c0_111 = arith.constant 0 : index
    %c0_112 = arith.constant 0 : index
    %c0_113 = arith.constant 0 : index
    %306 = vector.load %arg23[%c0_111, %c0_112, %c0_113] : memref<1x88x256xf32, #tpu.memory_space<vmem>>, vector<1x88x256xf32>
    %307 = vector.shape_cast %306 : vector<1x88x256xf32> to vector<88x256xf32>
    %308 = vector.shape_cast %305 : vector<88x256xf32> to vector<1x88x256xf32>
    tpu.vector_store %arg23[%c0_111, %c0_112, %c0_113], %308 {strides = array<i32>} : memref<1x88x256xf32, #tpu.memory_space<vmem>>, vector<1x88x256xf32>,
    return
  }
  func.func @transform_0(%arg0: i32) -> (i32, i32, i32) {
    %c0_i32 = arith.constant 0 : i32
    %c0_i32_0 = arith.constant 0 : i32
    %c0_i32_1 = arith.constant 0 : i32
    return %arg0, %c0_i32, %c0_i32_0 : i32, i32, i32
  }
  func.func @transform_1(%arg0: i32) -> (i32, i32) {
    %c0_i32 = arith.constant 0 : i32
    %c0_i32_0 = arith.constant 0 : i32
    %c0_i32_1 = arith.constant 0 : i32
    return %c0_i32, %c0_i32_0 : i32, i32
  }
  func.func @transform_2(%arg0: i32) -> (i32, i32) {
    %c0_i32 = arith.constant 0 : i32
    %c0_i32_0 = arith.constant 0 : i32
    %c0_i32_1 = arith.constant 0 : i32
    return %c0_i32, %c0_i32_0 : i32, i32
  }
  func.func @transform_3(%arg0: i32) -> (i32, i32) {
    %c0_i32 = arith.constant 0 : i32
    %c0_i32_0 = arith.constant 0 : i32
    %c0_i32_1 = arith.constant 0 : i32
    return %c0_i32, %c0_i32_0 : i32, i32
  }
  func.func @transform_4(%arg0: i32) -> (i32, i32) {
    %c0_i32 = arith.constant 0 : i32
    %c0_i32_0 = arith.constant 0 : i32
    %c0_i32_1 = arith.constant 0 : i32
    return %c0_i32, %c0_i32_0 : i32, i32
  }
  func.func @transform_5(%arg0: i32) -> (i32, i32) {
    %c0_i32 = arith.constant 0 : i32
    %c0_i32_0 = arith.constant 0 : i32
    %c0_i32_1 = arith.constant 0 : i32
    return %c0_i32, %c0_i32_0 : i32, i32
  }
  func.func @transform_6(%arg0: i32) -> (i32, i32) {
    %c0_i32 = arith.constant 0 : i32
    %c0_i32_0 = arith.constant 0 : i32
    %c0_i32_1 = arith.constant 0 : i32
    return %c0_i32, %c0_i32_0 : i32, i32
  }
  func.func @transform_7(%arg0: i32) -> (i32, i32) {
    %c0_i32 = arith.constant 0 : i32
    %c0_i32_0 = arith.constant 0 : i32
    %c0_i32_1 = arith.constant 0 : i32
    return %c0_i32, %c0_i32_0 : i32, i32
  }
  func.func @transform_8(%arg0: i32) -> (i32, i32) {
    %c0_i32 = arith.constant 0 : i32
    %c0_i32_0 = arith.constant 0 : i32
    %c0_i32_1 = arith.constant 0 : i32
    return %c0_i32, %c0_i32_0 : i32, i32
  }
  func.func @transform_9(%arg0: i32) -> (i32, i32) {
    %c0_i32 = arith.constant 0 : i32
    %c0_i32_0 = arith.constant 0 : i32
    %c0_i32_1 = arith.constant 0 : i32
    return %c0_i32, %c0_i32_0 : i32, i32
  }
  func.func @transform_10(%arg0: i32) -> (i32, i32) {
    %c0_i32 = arith.constant 0 : i32
    %c0_i32_0 = arith.constant 0 : i32
    %c0_i32_1 = arith.constant 0 : i32
    return %c0_i32, %c0_i32_0 : i32, i32
  }
  func.func @transform_11(%arg0: i32) -> (i32, i32) {
    %c0_i32 = arith.constant 0 : i32
    %c0_i32_0 = arith.constant 0 : i32
    %c0_i32_1 = arith.constant 0 : i32
    return %c0_i32, %c0_i32_0 : i32, i32
  }
  func.func @transform_12(%arg0: i32) -> (i32, i32) {
    %c0_i32 = arith.constant 0 : i32
    %c0_i32_0 = arith.constant 0 : i32
    %c0_i32_1 = arith.constant 0 : i32
    return %c0_i32, %c0_i32_0 : i32, i32
  }
  func.func @transform_13(%arg0: i32) -> (i32, i32) {
    %c0_i32 = arith.constant 0 : i32
    %c0_i32_0 = arith.constant 0 : i32
    %c0_i32_1 = arith.constant 0 : i32
    return %c0_i32, %c0_i32_0 : i32, i32
  }
  func.func @transform_14(%arg0: i32) -> (i32, i32) {
    %c0_i32 = arith.constant 0 : i32
    %c0_i32_0 = arith.constant 0 : i32
    %c0_i32_1 = arith.constant 0 : i32
    return %c0_i32, %c0_i32_0 : i32, i32
  }
  func.func @transform_15(%arg0: i32) -> (i32, i32) {
    %c0_i32 = arith.constant 0 : i32
    %c0_i32_0 = arith.constant 0 : i32
    %c0_i32_1 = arith.constant 0 : i32
    return %c0_i32, %c0_i32_0 : i32, i32
  }
  func.func @transform_16(%arg0: i32) -> (i32, i32) {
    %c0_i32 = arith.constant 0 : i32
    %c0_i32_0 = arith.constant 0 : i32
    %c0_i32_1 = arith.constant 0 : i32
    return %c0_i32, %c0_i32_0 : i32, i32
  }
  func.func @transform_17(%arg0: i32) -> (i32, i32) {
    %c0_i32 = arith.constant 0 : i32
    %c0_i32_0 = arith.constant 0 : i32
    %c0_i32_1 = arith.constant 0 : i32
    return %c0_i32, %c0_i32_0 : i32, i32
  }
  func.func @transform_18(%arg0: i32) -> (i32, i32) {
    %c0_i32 = arith.constant 0 : i32
    %c0_i32_0 = arith.constant 0 : i32
    %c0_i32_1 = arith.constant 0 : i32
    return %c0_i32, %c0_i32_0 : i32, i32
  }
  func.func @transform_19(%arg0: i32) -> (i32, i32) {
    %c0_i32 = arith.constant 0 : i32
    %c0_i32_0 = arith.constant 0 : i32
    %c0_i32_1 = arith.constant 0 : i32
    return %c0_i32, %c0_i32_0 : i32, i32
  }
  func.func @transform_20(%arg0: i32) -> (i32, i32) {
    %c0_i32 = arith.constant 0 : i32
    %c0_i32_0 = arith.constant 0 : i32
    %c0_i32_1 = arith.constant 0 : i32
    return %c0_i32, %c0_i32_0 : i32, i32
  }
  func.func @transform_21(%arg0: i32) -> (i32, i32) {
    %c0_i32 = arith.constant 0 : i32
    %c0_i32_0 = arith.constant 0 : i32
    %c0_i32_1 = arith.constant 0 : i32
    return %c0_i32, %c0_i32_0 : i32, i32
  }
  func.func @transform_22(%arg0: i32) -> (i32, i32, i32) {
    %c0_i32 = arith.constant 0 : i32
    %c0_i32_0 = arith.constant 0 : i32
    %c0_i32_1 = arith.constant 0 : i32
    return %arg0, %c0_i32, %c0_i32_0 : i32, i32, i32
  }
}

</mosaic_0001>

<bundles_post_ra>
// kernel: tpu_custom_call.1
= control target key start
LH: loop header
LB: loop body
LE: loop exit
PB: predicated region body
PF: predicated region fallthrough
CT: control target
= control target key end

     0   :  { %s10830_s0 = inlined_call_operand.vmem [shape: f32[2,50,256], index: 0, kind: input, shape index: {}]   ;;  %s10831_s1 = inlined_call_operand.vmem [shape: f32[256,256], index: 1, kind: input, shape index: {}]   ;;  %s10832_s2 = inlined_call_operand.vmem [shape: f32[2,256], index: 2, kind: input, shape index: {}]   ;;  %s10833_s3 = inlined_call_operand.vmem [shape: bf16[88,50], index: 3, kind: input, shape index: {}]   ;;  %s10834_s4 = inlined_call_operand.vmem [shape: bf16[88,50], index: 4, kind: input, shape index: {}]   ;;  %s10835_s5 = inlined_call_operand.vmem [shape: bf16[88,50], index: 5, kind: input, shape index: {}]   ;;  %s10836_s6 = inlined_call_operand.vmem [shape: bf16[88,50], index: 6, kind: input, shape index: {}]   ;;  %s10837_s7 = inlined_call_operand.vmem [shape: f32[88,5], index: 7, kind: input, shape index: {}]   ;;  %s10838_s8 = inlined_call_operand.vmem [shape: bf16[40,88], index: 8, kind: input, shape index: {}]   ;;  %s10839_s9 = inlined_call_operand.vmem [shape: bf16[40,88], index: 9, kind: input, shape index: {}]   ;;  %s10840_s10 = inlined_call_operand.vmem [shape: f32[40,4], index: 10, kind: input, shape index: {}]   ;;  %s10841_s11 = inlined_call_operand.vmem [shape: bf16[16,40], index: 11, kind: input, shape index: {}]   ;;  %s10842_s12 = inlined_call_operand.vmem [shape: bf16[16,40], index: 12, kind: input, shape index: {}]   ;;  %s10843_s13 = inlined_call_operand.vmem [shape: f32[16,4], index: 13, kind: input, shape index: {}]   ;;  %s10844_s14 = inlined_call_operand.vmem [shape: bf16[40,16], index: 14, kind: input, shape index: {}]   ;;  %s10845_s15 = inlined_call_operand.vmem [shape: bf16[40,16], index: 15, kind: input, shape index: {}]   ;;  %s10846_s16 = inlined_call_operand.vmem [shape: f32[40,4], index: 16, kind: input, shape index: {}]   ;;  %s10847_s17 = inlined_call_operand.vmem [shape: bf16[88,40], index: 17, kind: input, shape index: {}]   ;;  %s10848_s18 = inlined_call_operand.vmem [shape: bf16[88,40], index: 18, kind: input, shape index: {}]   ;;  %s10849_s19 = inlined_call_operand.vmem [shape: bf16[88,40], index: 19, kind: input, shape index: {}]   ;;  %s10850_s20 = inlined_call_operand.vmem [shape: bf16[88,40], index: 20, kind: input, shape index: {}]   ;;  %s10851_s21 = inlined_call_operand.vmem [shape: f32[88,4], index: 21, kind: input, shape index: {}]   ;;  %s10852_s22 = inlined_call_operand.hbm [shape: f32[2,88,256], index: 22, kind: output, shape index: {}]  }
   0x1   :  { %10991 = sst [smem:[#allocation70_spill]] %s10830_s0 }
   0x2   :  { %10992 = sst [smem:[#allocation71_spill]] %s10831_s1 }
   0x3   :  { %10993 = sst [smem:[#allocation72_spill]] %s10832_s2 }
   0x4   :  { %10994 = sst [smem:[#allocation73_spill]] %s10833_s3 }
   0x5   :  { %10995 = sst [smem:[#allocation74_spill]] %s10834_s4 }
   0x6   :  { %10996 = sst [smem:[#allocation75_spill]] %s10835_s5 }
   0x7   :  { %10997 = sst [smem:[#allocation76_spill]] %s10836_s6 }
   0x8   :  { %10998 = sst [smem:[#allocation77_spill]] %s10837_s7 }
   0x9   :  { %10999 = sst [smem:[#allocation78_spill]] %s10838_s8 }
   0xa   :  { %27 = vsyncpa [#allocation3], 0 }
   0xb   :  { %29 = vsyncpa [#allocation3 + $0x1], 0  ;;  %s6507_s3 = smov 0   ;;  %s6509_s28 = smov 0  }
   0xc   :  { %s6511_s29 = smov 0   ;;  %s6513_s30 = smov 0  }
   0xd LB: > { %11000 = sst [smem:[#allocation5_spill]] %s6370_s3  ;;  %s6528_s4 = sadd.s32 4294967295, %s6382_s30   ;;  %s6382_s30 = sphi %s6513_s30, %s11311_s30   ;;  %s6378_s29 = sphi %s6511_s29, %s11313_s29   ;;  %s6374_s28 = sphi %s6509_s28, %s11315_s28   ;;  %s6370_s3 = sphi %s6507_s3, %s11314_s3  }
   0xe   : > { %11001 = sst [smem:[#allocation6_spill]] %s6378_s29  ;;  %s5481_s0 = sadd.s32 4294967294, %s6382_s30  }
   0xf   : > { %11002 = sst [smem:[#allocation7_spill]] %s6382_s30  ;;  %s6532_s23 = sadd.s32 1, %s6382_s30  }
  0x10   : > { %11003 = sst [smem:[#allocation8_spill]] %s6532_s23  ;;  %s509_s1 = sadd.s32 1, %s6378_s29 }
  0x11   : > { %s506_s5 = ssub.s32 %s6382_s30, %s6532_s23  ;;  %p519_p0 = scmp.ne.s32.totalorder %s6378_s29, %s6374_s28 }
  0x12   : > { %p507_p1 = scmp.eq.s32.totalorder %s506_s5, 0  ;;  %p520_p2 = scmp.eq.s32.totalorder %s6528_s4, 1 }
  0x13   : > { %p525_p3 = scmp.ne.s32.totalorder %s6374_s28, %s6370_s3  ;;  %p526_p4 = scmp.eq.s32.totalorder %s5481_s0, 1 }
  0x14   : > { %s6543_s24 = scalar_select %p507_p1, %s6378_s29, %s509_s1  }
  0x15   : > { %p6545_p5 = por %p520_p2, %p519_p0  ;;  %p6549_p6 = por %p526_p4, %p525_p3 }
  0x16   : > { %11004 = sst [smem:[#allocation9_spill]] %s6543_s24  ;;  %p5484_p7 = scmp.ge.s32.totalorder %s6382_s30, 1 }
  0x17   : > { %s11006_s25 = scalar_select %p6549_p6, 1, 0 }
  0x18   : > { %p615_p8 = scmp.lt.s32.totalorder %s6382_s30, 3 }
  0x19   : > { %11007 = sst [smem:[#allocation10_spill]] %s11006_s25 }
  0x1a   : > { %p616_p9 = pnand %p5484_p7, %p615_p8 }
  0x1c   : > { %619 = sbr.rel (%p616_p9) target bundleno = 2932 (0xb74), region = 108 }
  0x21   : > { %p677_p10 = scmp.lt.s32.totalorder %s6528_s4, 1  ;;  %s11008_s1 = sld [smem:[#allocation70_spill]]  ;;  %vm860_vm0 = vcmask 1040384   ;;  %vm841_vm1 = vcmask 408576   ;;  %v745_v27 = vlaneseq  ;;  %v10866_v32 = vmov 1  }
  0x22   : > { %s10859_s24 = smov 1   ;;  %s11009_s27 = sld [smem:[#allocation73_spill]]  ;;  %5957 = vset.pattern.permute.xlu1 %v10866_v32  ;;  %5956 = vset.pattern.permute.xlu0 %v10866_v32 }
  0x23   : > { %s678_s26 = scalar_select %p677_p10, %s6528_s4, 1  ;;  %v6598_v33 = vand.u32 127, %v745_v27  ;;  %5955 = vset.pattern.permute.xlu2 %v10866_v32 }
  0x24   : > { %s11011_s7 = sld [smem:[#allocation77_spill]]  ;;  %s11128_s0 = smov 1  }
  0x25   : > { %s5906_s2 = smul.u32 112, %s678_s26  ;;  %11012 = vst [vmem:[#allocation11_spill] sm:$0xff] %v6598_v33  ;;  %vm747_vm2 = vcmp.lt.s32.totalorder %v6598_v33, 1  ;;  %s11015_s29 = sld [smem:[#allocation74_spill]] }
  0x26   : > { %s11017_s26 = sld [smem:[#allocation75_spill]] }
  0x27   : > { %s681_s5 = scalar_lea.vmem %s11008_s1, %s5906_s2  ;;  %s11018_s23 = sld [smem:[#allocation76_spill]] }
  0x28   : > { %v696_v0 = vld [vmem:[%s681_s5 + $0x60] sm:$0x3]  ;;  %v693_v2 = vld [vmem:[%s681_s5 + $0x48] sm:$0xff]  ;;  %v694_v4 = vld [vmem:[%s681_s5 + $0x50] sm:$0xff]  ;;  %s11048_s1 = sld [smem:[#allocation71_spill]] }
  0x29   : > { %v692_v1 = vld [vmem:[%s681_s5 + $0x40] sm:$0xff]  ;;  %729 = vrot.lane.b32.xlu0 %v696_v0, %s10859_s24  ;;  %739 = vrot.lane.b32.xlu2 %v693_v2, %s10859_s24  ;;  %v697_v3 = vld [vmem:[%s681_s5 + $0x68] sm:$0x3]  ;;  %v715_v14 = vpack.c.bf16 %v696_v0, %v696_v0  ;;  %s11166_s8 = sld [smem:[#allocation78_spill]] }
  0x2a   : > { %725 = vrot.lane.b32.xlu1 %v692_v1, %s10859_s24  ;;  %v695_v5 = vld [vmem:[%s681_s5 + $0x58] sm:$0xff]  ;;  %v690_v6 = vld [vmem:[%s681_s5 + $0x30] sm:$0xff]  ;;  %v688_v7 = vld [vmem:[%s681_s5 + $0x20] sm:$0xff]  ;;  %v716_v15 = vpack.c.bf16 %v697_v3, %v697_v3  ;;  %v713_v18 = vpack.c.bf16 %v694_v4, %v692_v1 }
  0x2b   : > { %v689_v8 = vld [vmem:[%s681_s5 + $0x28] sm:$0xff]  ;;  %v691_v9 = vld [vmem:[%s681_s5 + $0x38] sm:$0xff]  ;;  %v684_v10 = vld [vmem:[%s681_s5] sm:$0xff]  ;;  %v990_v16 = vsel %vm860_vm0, %v715_v14, 0  ;;  %v714_v19 = vpack.c.bf16 %v695_v5, %v693_v2  ;;  %v711_v20 = vpack.c.bf16 %v690_v6, %v688_v7 }
  0x2c   : > { %v686_v11 = vld [vmem:[%s681_s5 + $0x10] sm:$0xff]  ;;  %v685_v12 = vld [vmem:[%s681_s5 + $0x8] sm:$0xff]  ;;  %v687_v13 = vld [vmem:[%s681_s5 + $0x18] sm:$0xff]  ;;  %999 = vmatpush.bf16.msra.mxu2 %v990_v16  ;;  %v993_v17 = vsel %vm860_vm0, %v716_v15, 0  ;;  %v712_v21 = vpack.c.bf16 %v691_v9, %v689_v8  ;;  %s11010_s5 = sld [smem:[#allocation72_spill]] }
  0x2d   : > { %1037 = vmatpush.bf16.msra.mxu3 %v993_v17  ;;  %v710_v22 = vpack.c.bf16 %v687_v13, %v685_v12  ;;  %v709_v23 = vpack.c.bf16 %v686_v11, %v684_v10  ;;  %v5855_v24 = vld [vmem:[%s11009_s27] sm:$0xff]  ;;  %v6587_v30 = vld [vmem:[%s11011_s7 + $0x8] sm:$0xff]  ;;  %v6592_v31 = vld [vmem:[%s11011_s7 + $0x10] sm:$0xff] }
  0x2e   : > { %v5856_v43 = vld [vmem:[%s11009_s27 + $0x8] sm:$0xff]  ;;  %v6624_v48 = vld [vmem:[%s11011_s7] sm:$0xff]  ;;  %v6629_v49 = vld [vmem:[%s11011_s7 + $0x30] sm:$0xff] }
  0x2f   : > { %v6634_v50 = vld [vmem:[%s11011_s7 + $0x20] sm:$0xff]  ;;  %v6652_v2 = vld [vmem:[%s11011_s7 + $0x18] sm:$0xff] }
  0x30   : > { %1000 = vmatpush.bf16.msra.mxu2 %v713_v18 }
  0x31   : > { %743 = vrot.lane.b32.xlu0 %v697_v3, %s10859_s24  ;;  %741 = vrot.lane.b32.xlu2 %v695_v5, %s10859_s24  ;;  %v6657_v3 = vld [vmem:[%s11011_s7 + $0x48] sm:$0xff] }
  0x32   : > { %727 = vrot.lane.b32.xlu1 %v694_v4, %s10859_s24  ;;  %1038 = vmatpush.bf16.msra.mxu3 %v714_v19  ;;  %v683_v29 = vld [vmem:[%s11010_s5] sm:$0xf]  ;;  %v6662_v4 = vld [vmem:[%s11011_s7 + $0x38] sm:$0xff] }
  0x33   : > { %v763_v34 = vperm.slane %v683_v29, 1  ;;  %v764_v35 = vperm.slane %v683_v29, 3 }
  0x34   : > { %1001 = vmatpush.bf16.msra.mxu2 %v711_v20 }
  0x35   : > { %v6602_v39 = vperm.slane %v763_v34, 1  ;;  %v6604_v40 = vperm.slane %v764_v35, 1 }
  0x36   : > { %1039 = vmatpush.bf16.msra.mxu3 %v712_v21 }
  0x37   : > { %11013 = vst [vmem:[#allocation12_spill] sm:$0xff] %v6602_v39 }
  0x38   : > { %1002 = vmatpush.bf16.msra.mxu2 %v709_v23  ;;  %11014 = vst [vmem:[#allocation13_spill] sm:$0xff] %v6604_v40 }
  0x39   : > { %721 = vrot.lane.b32.xlu0 %v688_v7, %s10859_s24  ;;  %735 = vrot.lane.b32.xlu2 %v689_v8, %s10859_s24 }
  0x3a   : > { %723 = vrot.lane.b32.xlu1 %v690_v6, %s10859_s24  ;;  %1040 = vmatpush.bf16.msra.mxu3 %v710_v22 }
  0x3b   : > { %5538 = vmatmul.msk.bf16.vlgmr.msra.gmra.mxu2 %vm841_vm1, %v5855_v24 }
  0x3c   : > { %1342 = vmatpush.bf16.msrb.mxu2 %v990_v16 }
  0x3d   : > { %5544 = vmatmul.msk.bf16.vlgmr.msra.gmra.mxu3 %vm841_vm1, %v5855_v24 }
  0x3e   : > { %1380 = vmatpush.bf16.msrb.mxu3 %v993_v17  ;;  %v708_v17 = vld [vmem:[%s11011_s7 + $0x50] sm:$0xff] }
  0x40   : > { %1343 = vmatpush.bf16.msrb.mxu2 %v713_v18 }
  0x41   : > { %737 = vrot.lane.b32.xlu0 %v691_v9, %s10859_s24  ;;  %719 = vrot.lane.b32.xlu2 %v686_v11, %s10859_s24 }
  0x42   : > { %717 = vrot.lane.b32.xlu1 %v684_v10, %s10859_s24  ;;  %1381 = vmatpush.bf16.msrb.mxu3 %v714_v19 }
  0x44   : > { %1344 = vmatpush.bf16.msrb.mxu2 %v711_v20  ;;  %v10868_v20 = vmov 0  }
  0x46   : > { %1382 = vmatpush.bf16.msrb.mxu3 %v712_v21 }
  0x48   : > { %1345 = vmatpush.bf16.msrb.mxu2 %v709_v23 }
  0x49   : > { %731 = vrot.lane.b32.xlu0 %v685_v12, %s10859_s24  ;;  %1415 = vperm.xlu2 %5955, %v6624_v48   ;;  %v5857_v12 = vld [vmem:[%s11009_s27 + $0x10] sm:$0xff] }
  0x4a   : > { %733 = vrot.lane.b32.xlu1 %v687_v13, %s10859_s24  ;;  %1383 = vmatpush.bf16.msrb.mxu3 %v710_v22  ;;  %v703_v13 = vld [vmem:[%s11011_s7 + $0x28] sm:$0xff]  ;;  %s11016_s24 = smov %s11015_s29 }
  0x4b   : > { %5539 = vmatmul.msk.bf16.gmra.mxu2 %vm841_vm1, %v5856_v43 }
  0x4d   : > { %5545 = vmatmul.msk.bf16.gmra.mxu3 %vm841_vm1, %v5856_v43  ;;  %v5862_v43 = vld [vmem:[%s11016_s24 + $0x10] sm:$0xff] }
  0x51   : > { %1419 = vperm.xlu0 %5956, %v6587_v30   ;;  %1427 = vperm.xlu2 %5955, %v6652_v2  }
  0x52   : > { %1423 = vperm.xlu1 %5957, %v6592_v31  }
  0x59   : > { %1439 = vperm.xlu0 %5956, %v6629_v49   ;;  %1435 = vperm.xlu2 %5955, %v703_v13  }
  0x5a   : > { %1431 = vperm.xlu1 %5957, %v6634_v50  }
  0x5b   : > { %5540 = vmatmul.msk.bf16.gmra.mxu2 %vm841_vm1, %v5857_v12 }
  0x5d   : > { %5546 = vmatmul.msk.bf16.gmra.mxu3 %vm841_vm1, %v5857_v12 }
  0x61   : > { %1451 = vperm.xlu0 %5956, %v6657_v3  }
  0x62   : > { %1443 = vperm.xlu1 %5957, %v6662_v4  }
  0x69   : > { %5959 = vset.pattern.permute.xlu0 %v10868_v20 }
  0x6a   : > { %1455 = vperm.xlu1 %5957, %v708_v17   ;;  %1078 = vperm.xlu0 %5959, %v6587_v30  }
  0x72   : > { %5960 = vset.pattern.permute.xlu1 %v10868_v20  ;;  %1103 = vperm.xlu0 %5959, %v6629_v49   ;;  %v5864_v49 = vld [vmem:[%s11016_s24 + $0x20] sm:$0xff] }
  0x73   : > { %1083 = vperm.xlu1 %5960, %v6592_v31   ;;  %v5861_v31 = vld [vmem:[%s11016_s24 + $0x8] sm:$0xff] }
  0x7a   : > { %1118 = vperm.xlu0 %5959, %v6657_v3  }
  0x7b   : > { %1093 = vperm.xlu1 %5960, %v6634_v50   ;;  %v5866_v50 = vld [vmem:[%s11017_s26 + $0x8] sm:$0xff] }
  0x83   : > { %v740_v25 = vpop.permute.xlu2 %739  ;;  %1108 = vperm.xlu1 %5960, %v6662_v4  }
  0x8b   : > { %v742_v36 = vpop.permute.xlu2 %741  ;;  %1123 = vperm.xlu1 %5960, %v708_v17  }
  0x93   : > { %v736_v1 = vpop.permute.xlu2 %735 }
  0x9b   : > { %v730_v26 = vpop.permute.xlu0 %729  ;;  %v720_v21 = vpop.permute.xlu2 %719 }
  0x9c   : > { %v726_v28 = vpop.permute.xlu1 %725 }
  0x9d   : > { %v752_v51 = vsel %vm747_vm2, %v726_v28, %v740_v25  ;;  %v759_v52 = vsel %vm747_vm2, %v740_v25, %v726_v28  ;;  %v706_v28 = vld [vmem:[%s11011_s7 + $0x40] sm:$0xff] }
  0x9e   : > { %v777_v59 = vmul.f32 %v6602_v39, %v759_v52  ;;  %v778_v60 = vmul.f32 %v6604_v40, %v752_v51  ;;  %1447 = vperm.xlu2 %5955, %v706_v28   ;;  %v812_v51 = vld [vmem:[%s11016_s24 + $0x28] sm:$0xf] }
  0x9f   : > { %v834_v52 = vunpack.c.l.b16 %v812_v51 }
  0xa3   : > { %v744_v37 = vpop.permute.xlu0 %743 }
  0xa4   : > { %v728_v38 = vpop.permute.xlu1 %727  ;;  %v754_v41 = vsel %vm747_vm2, %v730_v26, %v744_v37  ;;  %v761_v42 = vsel %vm747_vm2, %v744_v37, %v730_v26 }
  0xa5   : > { %v753_v44 = vsel %vm747_vm2, %v728_v38, %v742_v36  ;;  %v760_v45 = vsel %vm747_vm2, %v742_v36, %v728_v38  ;;  %v781_v46 = vmul.f32 %v6602_v39, %v761_v42  ;;  %v782_v47 = vmul.f32 %v6604_v40, %v754_v41  ;;  %v5860_v38 = vld [vmem:[%s11015_s29] sm:$0xff]  ;;  %v5858_v41 = vld [vmem:[%s11009_s27 + $0x18] sm:$0xff] }
  0xa6   : > { %v779_v55 = vmul.f32 %v6602_v39, %v760_v45  ;;  %v780_v56 = vmul.f32 %v6604_v40, %v753_v44  ;;  %5541 = vmatmul.msk.bf16.gmra.mxu2 %vm841_vm1, %v5858_v41  ;;  %5547 = vmatmul.msk.bf16.gmra.mxu3 %vm841_vm1, %v5858_v41  ;;  %v5859_v42 = vld [vmem:[%s11009_s27 + $0x20] sm:$0xff]  ;;  %v801_v44 = vld [vmem:[%s11009_s27 + $0x28] sm:$0xf] }
  0xa7   : > { %v789_v53 = vpack.c.bf16 %v781_v46, %v781_v46  ;;  %v790_v54 = vpack.c.bf16 %v782_v47, %v782_v47  ;;  %5958 = vset.pattern.permute.xlu2 %v10868_v20  ;;  %v964_v45 = vunpack.c.l.b16 %v801_v44  ;;  %v5863_v47 = vld [vmem:[%s11016_s24 + $0x18] sm:$0xff]  ;;  %s5907_s24 = smul.u32 176, %s6528_s4  ;;  %s6340_s4 = scalar_lea.hbm %s10852_s22, 352 }
  0xa8   : > { %v787_v63 = vpack.c.bf16 %v779_v55, %v777_v59  ;;  %v788_v0 = vpack.c.bf16 %v780_v56, %v778_v60  ;;  %1073 = vperm.xlu2 %5958, %v6624_v48   ;;  %v5865_v48 = vld [vmem:[%s11017_s26] sm:$0xff]  ;;  %v5868_v60 = vld [vmem:[%s11017_s26 + $0x18] sm:$0xff] }
  0xa9   : > { %v862_v57 = vsel %vm860_vm0, %v789_v53, 0  ;;  %v865_v58 = vsel %vm860_vm0, %v790_v54, 0  ;;  %v970_v46 = vpack.c.b16 %v964_v45, %v964_v45  ;;  %v840_v53 = vpack.c.b16 %v834_v52, %v834_v52  ;;  %v5867_v54 = vld [vmem:[%s11017_s26 + $0x10] sm:$0xff]  ;;  %s5415_s27 = scalar_lea.hbm %s10852_s22, %s5907_s24 }
  0xaa   : > { %871 = vmatpush.bf16.msra.mxu0 %v862_v57  ;;  %909 = vmatpush.bf16.msra.mxu1 %v865_v58 }
  0xab   : > { %v722_v62 = vpop.permute.xlu0 %721 }
  0xac   : > { %v724_v61 = vpop.permute.xlu1 %723  ;;  %v757_v5 = vsel %vm747_vm2, %v736_v1, %v722_v62  ;;  %v750_v6 = vsel %vm747_vm2, %v722_v62, %v736_v1 }
  0xad   : > { %v773_v11 = vmul.f32 %v6602_v39, %v757_v5  ;;  %v774_v15 = vmul.f32 %v6604_v40, %v750_v6  ;;  %v5872_v5 = vld [vmem:[%s11018_s23 + $0x10] sm:$0xff] }
  0xae   : > { %872 = vmatpush.bf16.msra.mxu0 %v787_v63  ;;  %910 = vmatpush.bf16.msra.mxu1 %v788_v0 }
  0xb0   : > { %1088 = vperm.xlu2 %5958, %v6652_v2   ;;  %v5869_v2 = vld [vmem:[%s11017_s26 + $0x20] sm:$0xff] }
  0xb3   : > { %v738_v7 = vpop.permute.xlu0 %737 }
  0xb4   : > { %v718_v8 = vpop.permute.xlu1 %717  ;;  %v751_v9 = vsel %vm747_vm2, %v724_v61, %v738_v7  ;;  %v758_v10 = vsel %vm747_vm2, %v738_v7, %v724_v61 }
  0xb5   : > { %v775_v14 = vmul.f32 %v6602_v39, %v758_v10  ;;  %v776_v16 = vmul.f32 %v6604_v40, %v751_v9 }
  0xb6   : > { %5542 = vmatmul.msk.bf16.gmra.mxu2 %vm841_vm1, %v5859_v42  ;;  %5548 = vmatmul.msk.bf16.gmra.mxu3 %vm841_vm1, %v5859_v42  ;;  %v1169_v42 = vld [vmem:[%s11018_s23 + $0x28] sm:$0xf] }
  0xb7   : > { %v785_v18 = vpack.c.bf16 %v775_v14, %v773_v11  ;;  %v786_v19 = vpack.c.bf16 %v776_v16, %v774_v15 }
  0xb8   : > { %1098 = vperm.xlu2 %5958, %v703_v13  }
  0xb9   : > { %873 = vmatpush.bf16.msra.mxu0 %v785_v18  ;;  %911 = vmatpush.bf16.msra.mxu1 %v786_v19 }
  0xbb   : > { %v732_v22 = vpop.permute.xlu0 %731 }
  0xbc   : > { %v734_v23 = vpop.permute.xlu1 %733  ;;  %v748_v24 = vsel %vm747_vm2, %v718_v8, %v732_v22  ;;  %v755_v25 = vsel %vm747_vm2, %v732_v22, %v718_v8  ;;  %v1158_v8 = vld [vmem:[%s11017_s26 + $0x28] sm:$0xf]  ;;  %s5418_s26 = sshll.u32 %s5415_s27, 4  ;;  %s5419_s26 = int_to_ptr.hbm [resolvable:$true] %s5418_s26 }
  0xbd   : > { %v749_v26 = vsel %vm747_vm2, %v720_v21, %v734_v23  ;;  %v756_v27 = vsel %vm747_vm2, %v734_v23, %v720_v21  ;;  %v769_v29 = vmul.f32 %v6602_v39, %v755_v25  ;;  %v770_v34 = vmul.f32 %v6604_v40, %v748_v24 }
  0xbe   : > { %v771_v30 = vmul.f32 %v6602_v39, %v756_v27  ;;  %v772_v35 = vmul.f32 %v6604_v40, %v749_v26  ;;  %v6776_v55 = vpop.f32.mrf.mxu2  ;;  %v1313_v11 = vunpack.c.l.b16 %v1158_v8 }
  0xc0   : > { %v783_v36 = vpack.c.bf16 %v771_v30, %v769_v29  ;;  %v784_v37 = vpack.c.bf16 %v772_v35, %v770_v34  ;;  %1113 = vperm.xlu2 %5958, %v706_v28   ;;  %v6778_v56 = vpop.f32.mrf.mxu3  ;;  %v1319_v12 = vpack.c.b16 %v1313_v11, %v1313_v11  ;;  %v5874_v34 = vld [vmem:[%s11018_s23 + $0x20] sm:$0xff] }
  0xc2   : > { %874 = vmatpush.bf16.msra.mxu0 %v783_v36  ;;  %912 = vmatpush.bf16.msra.mxu1 %v784_v37 }
  0xc5   : > { %5506 = vmatmul.msk.bf16.vlgmr.msra.gmra.mxu0 %vm841_vm1, %v5860_v38  ;;  %5512 = vmatmul.msk.bf16.vlgmr.msra.gmra.mxu1 %vm841_vm1, %v5860_v38 }
  0xc6   : > { %1220 = vmatpush.bf16.msrb.mxu0 %v862_v57  ;;  %1258 = vmatpush.bf16.msrb.mxu1 %v865_v58  ;;  %v5870_v57 = vld [vmem:[%s11018_s23] sm:$0xff]  ;;  %v1006_v58 = vpop.f32.mrf.mxu2 }
  0xc7   : > { %5543 = vmatmul.msk.bf16.gmra.mxu2 %vm841_vm1, %v970_v46  ;;  %5549 = vmatmul.msk.bf16.gmra.mxu3 %vm841_vm1, %v970_v46 }
  0xc8   : > { %v1044_v59 = vpop.f32.mrf.mxu3 }
  0xca   : > { %1221 = vmatpush.bf16.msrb.mxu0 %v787_v63  ;;  %1259 = vmatpush.bf16.msrb.mxu1 %v788_v0  ;;  %v5871_v63 = vld [vmem:[%s11018_s23 + $0x8] sm:$0xff] }
  0xce   : > { %1222 = vmatpush.bf16.msrb.mxu0 %v785_v18  ;;  %1260 = vmatpush.bf16.msrb.mxu1 %v786_v19  ;;  %v6790_v61 = vpop.f32.mrf.mxu2  ;;  %v5873_v19 = vld [vmem:[%s11018_s23 + $0x18] sm:$0xff]  ;;  %s674_s23 = sand.u32 1, %s6374_s28  }
  0xcf   : > { %s5905_s3 = smul.u32 176, %s674_s23  ;;  %s5404_s2 = scalar_lea.sflag [#allocation3], %s674_s23 }
  0xd0   : > { %v6792_v62 = vpop.f32.mrf.mxu3 }
  0xd1   : > { %s10662_s30 = scalar_lea.vmem [#allocation2], %s5905_s3 }
  0xd2   : > { %1223 = vmatpush.bf16.msrb.mxu0 %v783_v36  ;;  %1261 = vmatpush.bf16.msrb.mxu1 %v784_v37  ;;  %s5416_s25 = sshll.u32 %s10662_s30, 4  ;;  %s5417_s25 = int_to_ptr.vmem [resolvable:$true] %s5416_s25 }
  0xd5   : > { %5507 = vmatmul.msk.bf16.gmra.mxu0 %vm841_vm1, %v5861_v31  ;;  %5513 = vmatmul.msk.bf16.gmra.mxu1 %vm841_vm1, %v5861_v31 }
  0xd6   : > { %v1011_v0 = vpop.f32.mrf.mxu2 }
  0xd7   : > { %5602 = vmatmul.msk.bf16.vlgmr.msrb.gmra.mxu2 %vm841_vm1, %v5865_v48  ;;  %5608 = vmatmul.msk.bf16.vlgmr.msrb.gmra.mxu3 %vm841_vm1, %v5865_v48 }
  0xd8   : > { %v1049_v1 = vpop.f32.mrf.mxu3 }
  0xde   : > { %v6804_v3 = vpop.f32.mrf.mxu2 }
  0xe0   : > { %v6806_v4 = vpop.f32.mrf.mxu3 }
  0xe5   : > { %5508 = vmatmul.msk.bf16.gmra.mxu0 %vm841_vm1, %v5862_v43  ;;  %5514 = vmatmul.msk.bf16.gmra.mxu1 %vm841_vm1, %v5862_v43 }
  0xe6   : > { %v1016_v9 = vpop.f32.mrf.mxu2 }
  0xe7   : > { %5603 = vmatmul.msk.bf16.gmra.mxu2 %vm841_vm1, %v5866_v50  ;;  %5609 = vmatmul.msk.bf16.gmra.mxu3 %vm841_vm1, %v5866_v50 }
  0xe8   : > { %v1054_v10 = vpop.f32.mrf.mxu3 }
  0xf5   : > { %5509 = vmatmul.msk.bf16.gmra.mxu0 %vm841_vm1, %v5863_v47  ;;  %5515 = vmatmul.msk.bf16.gmra.mxu1 %vm841_vm1, %v5863_v47  ;;  %v1191_v47 = vunpack.c.l.b16 %v1169_v42 }
  0xf7   : > { %5604 = vmatmul.msk.bf16.gmra.mxu2 %vm841_vm1, %v5867_v54  ;;  %5610 = vmatmul.msk.bf16.gmra.mxu3 %vm841_vm1, %v5867_v54  ;;  %v1197_v48 = vpack.c.b16 %v1191_v47, %v1191_v47 }
 0x105   : > { %5510 = vmatmul.msk.bf16.gmra.mxu0 %vm841_vm1, %v5864_v49  ;;  %5516 = vmatmul.msk.bf16.gmra.mxu1 %vm841_vm1, %v5864_v49 }
 0x107   : > { %5605 = vmatmul.msk.bf16.gmra.mxu2 %vm841_vm1, %v5868_v60  ;;  %5611 = vmatmul.msk.bf16.gmra.mxu3 %vm841_vm1, %v5868_v60  ;;  %v6881_v60 = vpop.permute.xlu1 %1423 }
 0x115   : > { %5511 = vmatmul.msk.bf16.gmra.mxu0 %vm841_vm1, %v840_v53  ;;  %5517 = vmatmul.msk.bf16.gmra.mxu1 %vm841_vm1, %v840_v53 }
 0x117   : > { %5606 = vmatmul.msk.bf16.gmra.mxu2 %vm841_vm1, %v5869_v2  ;;  %5612 = vmatmul.msk.bf16.gmra.mxu3 %vm841_vm1, %v5869_v2 }
 0x125   : > { %5570 = vmatmul.msk.bf16.vlgmr.msrb.gmra.mxu0 %vm841_vm1, %v5870_v57  ;;  %5576 = vmatmul.msk.bf16.vlgmr.msrb.gmra.mxu1 %vm841_vm1, %v5870_v57  ;;  %v1416_v57 = vpop.permute.xlu2 %1415 }
 0x127   : > { %5607 = vmatmul.msk.bf16.gmra.mxu2 %vm841_vm1, %v1319_v12  ;;  %5613 = vmatmul.msk.bf16.gmra.mxu3 %vm841_vm1, %v1319_v12 }
 0x129   : > { %v6826_v17 = vpop.f32.mrf.mxu2  ;;  %v6828_v18 = vpop.f32.mrf.mxu3 }
 0x131   : > { %v6837_v23 = vpop.f32.mrf.mxu2  ;;  %v6839_v24 = vpop.f32.mrf.mxu3 }
 0x135   : > { %5571 = vmatmul.msk.bf16.gmra.mxu0 %vm841_vm1, %v5871_v63  ;;  %5577 = vmatmul.msk.bf16.gmra.mxu1 %vm841_vm1, %v5871_v63 }
 0x139   : > { %v1024_v29 = vpop.f32.mrf.mxu2  ;;  %v1062_v30 = vpop.f32.mrf.mxu3 }
 0x141   : > { %v6854_v37 = vpop.f32.mrf.mxu2  ;;  %v6856_v38 = vpop.f32.mrf.mxu3 }
 0x142   : > { %v6811_v6 = vpop.f32.mrf.mxu0  ;;  %v6813_v7 = vpop.f32.mrf.mxu1 }
 0x145   : > { %5572 = vmatmul.msk.bf16.gmra.mxu0 %vm841_vm1, %v5872_v5  ;;  %5578 = vmatmul.msk.bf16.gmra.mxu1 %vm841_vm1, %v5872_v5  ;;  %v6887_v5 = vpop.permute.xlu2 %1427 }
 0x14a   : > { %v878_v13 = vpop.f32.mrf.mxu0  ;;  %v916_v14 = vpop.f32.mrf.mxu1 }
 0x14b   : > { %v6822_v15 = vadd.f32 %v1006_v58, %v878_v13  ;;  %v6824_v16 = vadd.f32 %v1044_v59, %v916_v14  ;;  %v6867_v45 = vpop.f32.mrf.mxu2  ;;  %v6869_v46 = vpop.f32.mrf.mxu3 }
 0x14c   : > { %v1420_v14 = vpop.permute.xlu0 %1419 }
 0x14d   : > { %v6895_v13 = vpop.permute.xlu2 %1435 }
 0x14e   : > { %11020 = vst [vmem:[#allocation15_spill] sm:$0xff] %v6895_v13 }
 0x152   : > { %v6833_v21 = vpop.f32.mrf.mxu0  ;;  %v6835_v22 = vpop.f32.mrf.mxu1 }
 0x153   : > { %v1031_v51 = vpop.f32.mrf.mxu2  ;;  %v1069_v52 = vpop.f32.mrf.mxu3 }
 0x154   : > { %v6905_v42 = vpop.permute.xlu0 %1439 }
 0x155   : > { %5573 = vmatmul.msk.bf16.gmra.mxu0 %vm841_vm1, %v5873_v19  ;;  %5579 = vmatmul.msk.bf16.gmra.mxu1 %vm841_vm1, %v5873_v19  ;;  %11023 = vst [vmem:[#allocation18_spill] sm:$0xff] %v6905_v42 }
 0x15a   : > { %v883_v25 = vpop.f32.mrf.mxu0  ;;  %v921_v26 = vpop.f32.mrf.mxu1 }
 0x15b   : > { %v6843_v27 = vadd.f32 %v1011_v0, %v883_v25  ;;  %v6845_v28 = vadd.f32 %v1049_v1, %v921_v26  ;;  %v1347_v1 = vpop.f32.mrf.mxu2  ;;  %v1385_v2 = vpop.f32.mrf.mxu3 }
 0x15c   : > { %v6913_v33 = vpop.permute.xlu0 %1451 }
 0x15d   : > { %11025 = vst [vmem:[#allocation20_spill] sm:$0xff] %v6913_v33 }
 0x162   : > { %v6850_v35 = vpop.f32.mrf.mxu0  ;;  %v6852_v36 = vpop.f32.mrf.mxu1 }
 0x163   : > { %v1349_v11 = vpop.f32.mrf.mxu2  ;;  %v1387_v12 = vpop.f32.mrf.mxu3 }
 0x164   : > { %v1079_v33 = vpop.permute.xlu0 %1078 }
 0x165   : > { %5574 = vmatmul.msk.bf16.gmra.mxu0 %vm841_vm1, %v5874_v34  ;;  %5580 = vmatmul.msk.bf16.gmra.mxu1 %vm841_vm1, %v5874_v34 }
 0x16a   : > { %v888_v41 = vpop.f32.mrf.mxu0  ;;  %v926_v31 = vpop.f32.mrf.mxu1 }
 0x16b   : > { %v6863_v43 = vadd.f32 %v1016_v9, %v888_v41  ;;  %v6865_v44 = vadd.f32 %v1054_v10, %v926_v31  ;;  %v6893_v10 = vpop.permute.xlu1 %1431  ;;  %v6903_v31 = vpop.permute.xlu2 %1447 }
 0x16c   : > { %11022 = vst [vmem:[#allocation17_spill] sm:$0xff] %v6903_v31 }
 0x172   : > { %v6871_v49 = vpop.f32.mrf.mxu0  ;;  %v6873_v50 = vpop.f32.mrf.mxu1 }
 0x173   : > { %v6901_v26 = vpop.permute.xlu1 %1443  ;;  %v1074_v39 = vpop.permute.xlu2 %1073 }
 0x174   : > { %11021 = vst [vmem:[#allocation16_spill] sm:$0xff] %v6901_v26 }
 0x175   : > { %5575 = vmatmul.msk.bf16.gmra.mxu0 %vm841_vm1, %v1197_v48  ;;  %5581 = vmatmul.msk.bf16.gmra.mxu1 %vm841_vm1, %v1197_v48 }
 0x17a   : > { %v6877_v53 = vpop.f32.mrf.mxu0  ;;  %v6879_v54 = vpop.f32.mrf.mxu1 }
 0x17b   : > { %v6907_v47 = vpop.permute.xlu1 %1455 }
 0x17c   : > { %11024 = vst [vmem:[#allocation19_spill] sm:$0xff] %v6907_v47 }
 0x182   : > { %v896_v58 = vpop.f32.mrf.mxu0  ;;  %v934_v59 = vpop.f32.mrf.mxu1 }
 0x183   : > { %v6883_v63 = vadd.f32 %v1024_v29, %v896_v58  ;;  %v6885_v0 = vadd.f32 %v1062_v30, %v934_v59  ;;  %v1352_v29 = vpop.f32.mrf.mxu2  ;;  %v1390_v30 = vpop.f32.mrf.mxu3 }
 0x184   : > { %v1084_v47 = vpop.permute.xlu1 %1083 }
 0x185   : > { %11019 = vst [vmem:[#allocation14_spill] sm:$0xff] %v6885_v0 }
 0x18a   : > { %v6889_v8 = vpop.f32.mrf.mxu0  ;;  %v6891_v9 = vpop.f32.mrf.mxu1 }
 0x18b   : > { %v6909_v59 = vpop.f32.mrf.mxu2  ;;  %v6911_v32 = vpop.f32.mrf.mxu3 }
 0x192   : > { %v6897_v19 = vpop.f32.mrf.mxu0  ;;  %v6899_v25 = vpop.f32.mrf.mxu1 }
 0x19a   : > { %v903_v34 = vpop.f32.mrf.mxu0  ;;  %v941_v41 = vpop.f32.mrf.mxu1 }
 0x1a2   : > { %v1225_v48 = vpop.f32.mrf.mxu0  ;;  %v1263_v51 = vpop.f32.mrf.mxu1 }
 0x1a3   : > { %v1348_v52 = vadd.f32 %v1347_v1, %v1225_v48  ;;  %v1386_v58 = vadd.f32 %v1385_v2, %v1263_v51  ;;  %v6915_v48 = vpop.f32.mrf.mxu2  ;;  %v6917_v51 = vpop.f32.mrf.mxu3 }
 0x1a5   : > { %v1458_v20 = vadd.f32 %v1416_v57, %v1348_v52  ;;  %v1459_v40 = vadd.f32 %v1416_v57, %v1386_v58  ;;  %v1089_v52 = vpop.permute.xlu2 %1088 }
 0x1a7   : > { %v5614_v34 = vmul.f32 -1.442695, %v1458_v20  ;;  %v5615_v41 = vmul.f32 -1.442695, %v1459_v40 }
 0x1a9   : > { %6036 = vpow2.f32 %v5614_v34  ;;  %v1005_v34 = vadd.f32 %v6776_v55, %v6811_v6  ;;  %v1015_v55 = vadd.f32 %v6804_v3, %v6850_v35 }
 0x1aa   : > { %6038 = vpow2.f32 %v5615_v41  ;;  %v1227_v31 = vpop.f32.mrf.mxu0  ;;  %v1265_v26 = vpop.f32.mrf.mxu1 }
 0x1ab   : > { %v1350_v42 = vadd.f32 %v1349_v11, %v1227_v31  ;;  %v1388_v13 = vadd.f32 %v1387_v12, %v1265_v26  ;;  %v1043_v11 = vadd.f32 %v6778_v56, %v6813_v7  ;;  %v1048_v31 = vadd.f32 %v6792_v62, %v6835_v22 }
 0x1ac   : > { %v6935_v6 = vadd.f32 %v1074_v39, %v1005_v34  ;;  %v6945_v62 = vadd.f32 %v1079_v33, %v6824_v16 }
 0x1ad   : > { %v1460_v1 = vadd.f32 %v1420_v14, %v1350_v42  ;;  %v1461_v2 = vadd.f32 %v1420_v14, %v1388_v13  ;;  %v1010_v13 = vadd.f32 %v6790_v61, %v6833_v21  ;;  %v1094_v42 = vpop.permute.xlu1 %1093  ;;  %v6937_v7 = vadd.f32 %v1074_v39, %v1043_v11  ;;  %v1099_v41 = vpop.permute.xlu2 %1098 }
 0x1ae   : > { %v1053_v61 = vadd.f32 %v6806_v4, %v6852_v36  ;;  %v6953_v39 = vadd.f32 %v1089_v52, %v6843_v27  ;;  %v1020_v4 = vadd.f32 %v6826_v17, %v6871_v49  ;;  %v6958_v36 = vpop.f32.mrf.mxu2  ;;  %v6976_v49 = vadd.f32 %v1099_v41, %v6863_v43 }
 0x1af   : > { %v6037_v57 = vpop.eup %6036  ;;  %v5616_v58 = vmul.f32 -1.442695, %v1460_v1  ;;  %v5617_v40 = vmul.f32 -1.442695, %v1461_v2  ;;  %v6947_v22 = vadd.f32 %v1084_v47, %v1010_v13  ;;  %v6967_v1 = vadd.f32 %v1094_v42, %v1015_v55 }
 0x1b0   : > { %v6039_v0 = vpop.eup %6038  ;;  %v6919_v20 = vadd.f32 1.0, %v6037_v57  ;;  %v6973_v17 = vadd.f32 %v1094_v42, %v1053_v61 }
 0x1b1   : > { %v6925_v12 = vadd.f32 1.0, %v6039_v0  ;;  %6040 = vpow2.f32 %v5616_v58  ;;  %v6942_v0 = vadd.f32 %v1079_v33, %v6822_v15  ;;  %v6960_v33 = vpop.f32.mrf.mxu3  ;;  %v1058_v58 = vadd.f32 %v6828_v18, %v6873_v50 }
 0x1b2   : > { %6042 = vrcp.f32 %v6919_v20  ;;  %v1230_v14 = vpop.f32.mrf.mxu0  ;;  %v1268_v26 = vpop.f32.mrf.mxu1  ;;  %v1060_v18 = vadd.f32 %v6839_v24, %v6879_v54  ;;  %v1579_v42 = vand.u32 2147483648, %v6919_v20  ;;  %vm1573_vm3 = vweird.f32 %v6919_v20 }
 0x1b3   : > { %6044 = vrcp.f32 %v6925_v12  ;;  %v1353_v56 = vadd.f32 %v1352_v29, %v1230_v14  ;;  %v1391_v21 = vadd.f32 %v1390_v30, %v1268_v26  ;;  %v6950_v29 = vadd.f32 %v1084_v47, %v1048_v31  ;;  %v1104_v47 = vpop.permute.xlu0 %1103 }
 0x1b4   : > { %6046 = vpow2.f32 %v5617_v40  ;;  %v6965_v30 = vadd.f32 %v1089_v52, %v6845_v28  ;;  %v1022_v40 = vadd.f32 %v6837_v23, %v6877_v53  ;;  %v6990_v13 = vadd.f32 %v1104_v47, %v1020_v4 }
 0x1b5   : > { %v1462_v3 = vadd.f32 %v6881_v60, %v1353_v56  ;;  %v1463_v15 = vadd.f32 %v6881_v60, %v1391_v21  ;;  %v6979_v60 = vadd.f32 %v1099_v41, %v6865_v44  ;;  %v1109_v44 = vpop.permute.xlu1 %1108  ;;  %v1577_v53 = vand.u32 2147483647, %v6919_v20 }
 0x1b6   : > { %v7001_v56 = vadd.f32 %v1104_v47, %v1058_v58  ;;  %v7003_v61 = vadd.f32 %v1109_v44, %v1022_v40  ;;  %v1594_v24 = vand.u32 2147483648, %v6925_v12  ;;  %v1592_v54 = vand.u32 2147483647, %v6925_v12 }
 0x1b7   : > { %v6041_v35 = vpop.eup %6040  ;;  %v5618_v27 = vmul.f32 -1.442695, %v1462_v3  ;;  %v5619_v31 = vmul.f32 -1.442695, %v1463_v15  ;;  %v7010_v3 = vadd.f32 %v1109_v44, %v1060_v18  ;;  %vm1588_vm4 = vweird.f32 %v6925_v12 }
 0x1b8   : > { %v6962_v16 = vpop.eup %6042  ;;  %v6969_v2 = vadd.f32 1.0, %v6041_v35  ;;  %v7014_v35 = vadd.f32 %v6854_v37, %v6889_v8  ;;  %vm7018_vm5 = vcmp.eq.f32.partialorder %v1577_v53, 8.507059e+37  ;;  %v1580_v15 = vor.u32 1.1754944e-38, %v1579_v42 }
 0x1b9   : > { %v6971_v57 = vpop.eup %6044  ;;  %v1569_v28 = vmul.f32 %v6962_v16, %v6919_v20  ;;  %vm1574_vm6 = vweird.f32 %v6962_v16  ;;  %v1595_v58 = vor.u32 1.1754944e-38, %v1594_v24  ;;  %vm7032_vm8 = vcmp.eq.f32.partialorder %v1592_v54, 8.507059e+37  ;;  %v1114_v54 = vpop.permute.xlu2 %1113 }
 0x1ba   : > { %v6047_v52 = vpop.eup %6046  ;;  %v1584_v34 = vmul.f32 %v6971_v57, %v6925_v12  ;;  %6048 = vrcp.f32 %v6969_v2  ;;  %v1232_v43 = vpop.f32.mrf.mxu0  ;;  %v1607_v40 = vand.u32 2147483647, %v6969_v2  ;;  %vm1589_vm7 = vweird.f32 %v6971_v57  ;;  %vm7045_vm10 = vmor %vm1573_vm3, %vm1574_vm6 }
 0x1bb   : > { %v1270_v11 = vpop.f32.mrf.mxu1  ;;  %v1570_v14 = vsub.f32 1.0, %v1569_v28  ;;  %v6992_v26 = vadd.f32 1.0, %v6047_v52  ;;  %6050 = vpow2.f32 %v5618_v27  ;;  %v1355_v23 = vadd.f32 %v6909_v59, %v1232_v43  ;;  %v7024_v28 = vpop.f32.mrf.mxu2  ;;  %vm7063_vm13 = vmor %vm1588_vm4, %vm1589_vm7 }
 0x1bc   : > { %v1393_v50 = vadd.f32 %v6911_v32, %v1270_v11  ;;  %v1585_v55 = vsub.f32 1.0, %v1584_v34  ;;  %v7026_v52 = vpop.f32.mrf.mxu3  ;;  %vm1603_vm9 = vweird.f32 %v6969_v2  ;;  %vm7054_vm12 = vcmp.eq.f32.partialorder %v1607_v40, 8.507059e+37 }
 0x1bd   : > { %6052 = vrcp.f32 %v6992_v26  ;;  %v1571_v21 = vmul.f32 %v6962_v16, %v1570_v14  ;;  %v1464_v32 = vadd.f32 %v6887_v5, %v1355_v23  ;;  %v1609_v23 = vand.u32 2147483648, %v6969_v2 }
 0x1be   : > { %6054 = vpow2.f32 %v5619_v31  ;;  %v1465_v59 = vadd.f32 %v6887_v5, %v1393_v50  ;;  %v1586_v47 = vmul.f32 %v6971_v57, %v1585_v55  ;;  %v1624_v20 = vand.u32 2147483648, %v6992_v26 }
 0x1bf   : > { %v5620_v27 = vmul.f32 -1.442695, %v1464_v32  ;;  %v1572_v8 = vadd.f32 %v6962_v16, %v1571_v21  ;;  %vm1618_vm1 = vweird.f32 %v6992_v26 }
 0x1c0   : > { %v6049_v41 = vpop.eup %6048  ;;  %v5621_v18 = vmul.f32 -1.442695, %v1465_v59  ;;  %v1587_v55 = vadd.f32 %v6971_v57, %v1586_v47 }
 0x1c1   : > { %v1599_v5 = vmul.f32 %v6049_v41, %v6969_v2  ;;  %v6051_v37 = vpop.eup %6050  ;;  %6056 = vpow2.f32 %v5620_v27  ;;  %vm1604_vm11 = vweird.f32 %v6049_v41  ;;  %v1576_v24 = vsel %vm7045_vm10, %v6962_v16, %v1572_v8 }
 0x1c2   : > { %v1235_v34 = vpop.f32.mrf.mxu0  ;;  %v7036_v31 = vadd.f32 1.0, %v6051_v37  ;;  %vm1605_vm14 = vmor %vm1603_vm9, %vm1604_vm11  ;;  %v1610_v27 = vor.u32 1.1754944e-38, %v1609_v23  ;;  %v1622_v8 = vand.u32 2147483647, %v6992_v26  ;;  %v1591_v12 = vsel %vm7063_vm13, %v6971_v57, %v1587_v55 }
 0x1c3   : > { %v1273_v43 = vpop.f32.mrf.mxu1  ;;  %v6053_v11 = vpop.eup %6052  ;;  %v1600_v14 = vsub.f32 1.0, %v1599_v5  ;;  %v1358_v16 = vadd.f32 %v6915_v48, %v1235_v34  ;;  %v1581_v48 = vsel %vm7018_vm5, %v1580_v15, %v1576_v24  ;;  %v1596_v55 = vsel %vm7032_vm8, %v1595_v58, %v1591_v12 }
 0x1c4   : > { %v1614_v50 = vmul.f32 %v6053_v11, %v6992_v26  ;;  %v6055_v53 = vpop.eup %6054  ;;  %6058 = vrcp.f32 %v7036_v31  ;;  %vm1619_vm15 = vweird.f32 %v6053_v11  ;;  %v1396_v4 = vadd.f32 %v6917_v51, %v1273_v43  ;;  %v7096_v15 = vpop.f32.mrf.mxu2 }
 0x1c5   : > { %v1601_v21 = vmul.f32 %v6049_v41, %v1600_v14  ;;  %v7067_v5 = vadd.f32 1.0, %v6055_v53  ;;  %6060 = vpow2.f32 %v5621_v18  ;;  %v1625_v18 = vor.u32 1.1754944e-38, %v1624_v20  ;;  %vm1620_vm3 = vmor %vm1618_vm1, %vm1619_vm15  ;;  %v7098_v42 = vpop.f32.mrf.mxu3  ;;  %v1119_v20 = vpop.permute.xlu0 %1118 }
 0x1c6   : > { %v1615_v32 = vsub.f32 1.0, %v1614_v50  ;;  %vm1623_vm4 = vcmp.eq.f32.partialorder %v1622_v8, 8.507059e+37  ;;  %v1030_v51 = vadd.f32 %v6867_v45, %v6897_v19  ;;  %v1068_v58 = vadd.f32 %v6869_v46, %v6899_v25 }
 0x1c7   : > { %v1602_v47 = vadd.f32 %v6049_v41, %v1601_v21  ;;  %6062 = vrcp.f32 %v7067_v5  ;;  %v6057_v14 = vpop.eup %6056  ;;  %v7126_v46 = vadd.f32 %v1114_v54, %v6883_v63  ;;  %v1637_v25 = vand.u32 2147483647, %v7036_v31 }
 0x1c8   : > { %v1616_v37 = vmul.f32 %v6053_v11, %v1615_v32  ;;  %v7092_v26 = vadd.f32 1.0, %v6057_v14  ;;  %v1065_v32 = vadd.f32 %v6856_v38, %v6891_v9  ;;  %v1124_v38 = vpop.permute.xlu1 %1123  ;;  %v7120_v9 = vmul.f32 %v1596_v55, %v6937_v7 }
 0x1c9   : > { %v1606_v40 = vsel %vm1605_vm14, %v6049_v41, %v1602_v47  ;;  %v1466_v41 = vadd.f32 %v6893_v10, %v1358_v16  ;;  %v1467_v16 = vadd.f32 %v6893_v10, %v1396_v4  ;;  %v7136_v7 = vadd.f32 %v1119_v20, %v7014_v35 }
 0x1ca   : > { %v1611_v2 = vsel %vm7054_vm12, %v1610_v27, %v1606_v40  ;;  %v1617_v34 = vadd.f32 %v6053_v11, %v1616_v37  ;;  %v7082_v23 = vpop.f32.mrf.mxu0  ;;  %v7086_v53 = vpop.eup %6058  ;;  %6064 = vrcp.f32 %v7092_v26  ;;  %11037 = vst [vmem:[#allocation22_spill] sm:$0xff] %v7120_v9  ;;  %v11038_v27 = vld [vmem:[#allocation14_spill] sm:$0xff]  ;;  %v7140_v10 = vadd.f32 %v1119_v20, %v1065_v32 }
 0x1cb   : > { %v7084_v50 = vpop.f32.mrf.mxu1  ;;  %v7089_v57 = vmul.f32 %v1611_v2, %v6942_v0  ;;  %v1629_v0 = vmul.f32 %v7086_v53, %v7036_v31  ;;  %v6061_v24 = vpop.eup %6060  ;;  %v5622_v19 = vmul.f32 -1.442695, %v1466_v41  ;;  %v7133_v37 = vadd.f32 %v1114_v54, %v11038_v27 }
 0x1cc   : > { %v1621_v21 = vsel %vm1620_vm3, %v6053_v11, %v1617_v34  ;;  %v7112_v11 = vmul.f32 %v1581_v48, %v6935_v6  ;;  %v7122_v45 = vadd.f32 1.0, %v6061_v24  ;;  %v1639_v6 = vand.u32 2147483648, %v7036_v31  ;;  %v7165_v24 = vpop.f32.mrf.mxu2 }
 0x1cd   : > { %v1626_v43 = vsel %vm1623_vm4, %v1625_v18, %v1621_v21  ;;  %v1630_v59 = vsub.f32 1.0, %v1629_v0  ;;  %v7117_v47 = vpop.eup %6062  ;;  %v7142_v63 = vadd.f32 %v1124_v38, %v1030_v51  ;;  %v7144_v12 = vadd.f32 %v1124_v38, %v1068_v58  ;;  %v7167_v54 = vpop.f32.mrf.mxu3 }
 0x1ce   : > { %v7115_v44 = vmul.f32 %v1626_v43, %v6945_v62  ;;  %v1644_v62 = vmul.f32 %v7117_v47, %v7067_v5  ;;  %6066 = vrcp.f32 %v7122_v45  ;;  %v7148_v40 = vmul.f32 %v7112_v11, %v7112_v11 }
 0x1cf   : > { %v1631_v8 = vmul.f32 %v7086_v53, %v1630_v59  ;;  %v7154_v35 = vmul.f32 %v7120_v9, %v7120_v9  ;;  %vm1633_vm5 = vweird.f32 %v7036_v31  ;;  %6068 = vpow2.f32 %v5622_v19 }
 0x1d0   : > { %11036 = vst [vmem:[#allocation21_spill] sm:$0xff] %v7115_v44  ;;  %v6065_v2 = vpop.eup %6064  ;;  %v5623_v34 = vmul.f32 -1.442695, %v1467_v16  ;;  %vm7157_vm6 = vcmp.eq.f32.partialorder %v1637_v25, 8.507059e+37  ;;  %v1640_v41 = vor.u32 1.1754944e-38, %v1639_v6  ;;  %v1645_v4 = vsub.f32 1.0, %v1644_v62 }
 0x1d1   : > { %v1659_v55 = vmul.f32 %v6065_v2, %v7092_v26  ;;  %v1632_v21 = vadd.f32 %v7086_v53, %v1631_v8  ;;  %vm1634_vm7 = vweird.f32 %v7086_v53  ;;  %v1667_v0 = vand.u32 2147483647, %v7092_v26 }
 0x1d2   : > { %v1240_v14 = vpop.f32.mrf.mxu0  ;;  %6070 = vpow2.f32 %v5623_v34  ;;  %vm1648_vm8 = vweird.f32 %v7067_v5  ;;  %v1652_v32 = vand.u32 2147483647, %v7067_v5  ;;  %v1669_v43 = vand.u32 2147483648, %v7092_v26  ;;  %vm7188_vm10 = vmor %vm1633_vm5, %vm1634_vm7 }
 0x1d3   : > { %v7150_v48 = vpop.f32.mrf.mxu1  ;;  %v1660_v51 = vsub.f32 1.0, %v1659_v55  ;;  %v1360_v20 = vadd.f32 %v6958_v36, %v7082_v23  ;;  %v7178_v59 = vmul.f32 %v7089_v57, %v7089_v57  ;;  %v1654_v38 = vand.u32 2147483648, %v7067_v5 }
 0x1d4   : > { %v7174_v58 = vpop.eup %6066  ;;  %vm1663_vm9 = vweird.f32 %v7092_v26  ;;  %v1398_v19 = vadd.f32 %v6960_v33, %v7084_v50  ;;  %v1646_v36 = vmul.f32 %v7117_v47, %v1645_v4  ;;  %vm1649_vm11 = vweird.f32 %v7117_v47  ;;  %v11045_v50 = vld [vmem:[#allocation15_spill] sm:$0xff] }
 0x1d5   : > { %v1661_v23 = vmul.f32 %v6065_v2, %v1660_v51  ;;  %vm1664_vm12 = vweird.f32 %v6065_v2  ;;  %v6069_v25 = vpop.eup %6068  ;;  %v1636_v6 = vsel %vm7188_vm10, %v7086_v53, %v1632_v21  ;;  %vm7197_vm13 = vcmp.eq.f32.partialorder %v1667_v0, 8.507059e+37  ;;  %vm7249_vm4 = vmor %vm1648_vm8, %vm1649_vm11 }
 0x1d6   : > { %v1674_v31 = vmul.f32 %v7174_v58, %v7122_v45  ;;  %v1468_v62 = vadd.f32 %v11045_v50, %v1360_v20  ;;  %vm7204_vm14 = vcmp.eq.f32.partialorder %v1652_v32, 8.507059e+37  ;;  %v1670_v34 = vor.u32 1.1754944e-38, %v1669_v43  ;;  %vm1665_vm15 = vmor %vm1663_vm9, %vm1664_vm12 }
 0x1d7   : > { %v1662_v8 = vadd.f32 %v6065_v2, %v1661_v23  ;;  %v7208_v4 = vadd.f32 1.0, %v6069_v25  ;;  %v1363_v55 = vadd.f32 %v7024_v28, %v1240_v14  ;;  %v1684_v20 = vand.u32 2147483648, %v7122_v45 }
 0x1d8   : > { %v6071_v0 = vpop.eup %6070  ;;  %v1675_v51 = vsub.f32 1.0, %v1674_v31  ;;  %v5624_v32 = vmul.f32 -1.442695, %v1468_v62  ;;  %v1469_v16 = vadd.f32 %v11045_v50, %v1398_v19  ;;  %v1641_v43 = vsel %vm7157_vm6, %v1640_v41, %v1636_v6  ;;  %v2073_v41 = vld [vmem:[%s11048_s1 + $0x1f0] sm:$0xff]  ;;  %v2039_v19 = vld [vmem:[%s11048_s1 + $0xe0] sm:$0xff] }
 0x1d9   : > { %v1647_v23 = vadd.f32 %v7117_v47, %v1646_v36  ;;  %v1666_v25 = vsel %vm1665_vm15, %v6065_v2, %v1662_v8  ;;  %6072 = vrcp.f32 %v7208_v4  ;;  %vm1679_vm1 = vweird.f32 %v7174_v58  ;;  %v2041_v2 = vld [vmem:[%s11048_s1 + $0xf0] sm:$0xff]  ;;  %v11049_v36 = vld [vmem:[#allocation18_spill] sm:$0xff]  ;;  %2095 = vmatpush.msra.mxu1 %v2073_v41  ;;  %v2071_v8 = vld [vmem:[%s11048_s1 + $0x1e0] sm:$0xff] }
 0x1da   : > { %v1242_v53 = vpop.f32.mrf.mxu0  ;;  %v1671_v28 = vsel %vm7197_vm13, %v1670_v34, %v1666_v25  ;;  %v1676_v26 = vmul.f32 %v7174_v58, %v1675_v51  ;;  %v1682_v14 = vand.u32 2147483647, %v7122_v45  ;;  %vm1678_vm3 = vweird.f32 %v7122_v45  ;;  %2075 = vmatpush.msra.mxu0 %v2041_v2  ;;  %v7259_v34 = vpop.f32.mrf.mxu3 }
 0x1db   : > { %v7211_v21 = vpop.f32.mrf.mxu1  ;;  %v7227_v31 = vmul.f32 %v1671_v28, %v6953_v39  ;;  %v7230_v18 = vadd.f32 1.0, %v6071_v0  ;;  %v1470_v6 = vadd.f32 %v11049_v36, %v1363_v55  ;;  %v7243_v39 = vmul.f32 %v1641_v43, %v6947_v22  ;;  %v7257_v22 = vpop.f32.mrf.mxu2  ;;  %vm1680_vm5 = vmor %vm1678_vm3, %vm1679_vm1  ;;  %2096 = vmatpush.msra.mxu1 %v2071_v8 }
 0x1dc   : > { %v1677_v50 = vadd.f32 %v7174_v58, %v1676_v26  ;;  %6074 = vpow2.f32 %v5624_v32  ;;  %v5625_v62 = vmul.f32 -1.442695, %v1469_v16  ;;  %v1651_v5 = vsel %vm7249_vm4, %v7117_v47, %v1647_v23  ;;  %2076 = vmatpush.msra.mxu0 %v2039_v19 }
 0x1dd   : > { %v1685_v55 = vor.u32 1.1754944e-38, %v1684_v20  ;;  %6076 = vrcp.f32 %v7230_v18  ;;  %v1401_v0 = vadd.f32 %v7026_v52, %v7150_v48  ;;  %v1955_v51 = vmul.f32 %v7115_v44, %v7115_v44 }
 0x1de   : > { %v1655_v32 = vor.u32 1.1754944e-38, %v1654_v38  ;;  %v1681_v16 = vsel %vm1680_vm5, %v7174_v58, %v1677_v50  ;;  %vm1683_vm6 = vcmp.eq.f32.partialorder %v1682_v14, 8.507059e+37  ;;  %v1920_v45 = vadd.f32 %v7089_v57, %v7112_v11 }
 0x1df   : > { %v7274_v47 = vpop.eup %6072  ;;  %v1686_v20 = vsel %vm1683_vm6, %v1685_v55, %v1681_v16  ;;  %6078 = vpow2.f32 %v5625_v62  ;;  %v5626_v43 = vmul.f32 -1.442695, %v1470_v6  ;;  %v1956_v48 = vmul.f32 %v7243_v39, %v7243_v39 }
 0x1e0   : > { %v1656_v58 = vsel %vm7204_vm14, %v1655_v32, %v1651_v5  ;;  %v7287_v38 = vmul.f32 %v1686_v20, %v6965_v30  ;;  %v1689_v25 = vmul.f32 %v7274_v47, %v7208_v4  ;;  %v1974_v28 = vadd.f32 %v7178_v59, %v7148_v40 }
 0x1e1   : > { %6080 = vpow2.f32 %v5626_v43  ;;  %v1471_v26 = vadd.f32 %v11049_v36, %v1401_v0  ;;  %v1365_v14 = vadd.f32 %v7096_v15, %v1242_v53  ;;  %v1936_v41 = vadd.f32 %v7115_v44, %v7120_v9  ;;  %v2037_v15 = vld [vmem:[%s11048_s1 + $0xd0] sm:$0xff] }
 0x1e2   : > { %v7278_v23 = vpop.f32.mrf.mxu0  ;;  %11052 = vst [vmem:[#allocation14_spill] sm:$0xff] %v7287_v38  ;;  %v6075_v2 = vpop.eup %6074  ;;  %v1990_v27 = vadd.f32 %v1955_v51, %v7154_v35  ;;  %v1921_v30 = vadd.f32 %v1920_v45, %v7243_v39  ;;  %v1690_v19 = vsub.f32 1.0, %v1689_v25  ;;  %v7302_v33 = vmul.f32 %v1656_v58, %v6950_v29  ;;  %v2069_v53 = vld [vmem:[%s11048_s1 + $0x1d0] sm:$0xff]  ;;  %v11054_v35 = vld [vmem:[#allocation16_spill] sm:$0xff]  ;;  %2077 = vmatpush.msra.mxu0 %v2037_v15 }
 0x1e3   : > { %v7280_v52 = vpop.f32.mrf.mxu1  ;;  %v7299_v6 = vpop.eup %6076  ;;  %v7304_v40 = vadd.f32 1.0, %v6075_v2  ;;  %v5627_v59 = vmul.f32 -1.442695, %v1471_v26  ;;  %v1472_v36 = vadd.f32 %v11054_v35, %v1365_v14  ;;  %v1975_v50 = vadd.f32 %v1974_v28, %v1956_v48  ;;  %2097 = vmatpush.msra.mxu1 %v2069_v53 }
 0x1e4   : > { %11053 = vst [vmem:[#allocation15_spill] sm:$0xff] %v7302_v33  ;;  %v1691_v62 = vmul.f32 %v7274_v47, %v1690_v19  ;;  %vm1694_vm7 = vweird.f32 %v7274_v47  ;;  %v1704_v29 = vmul.f32 %v7299_v6, %v7230_v18  ;;  %v7317_v8 = vpop.f32.mrf.mxu2  ;;  %v7319_v5 = vpop.f32.mrf.mxu3  ;;  %vm1693_vm8 = vweird.f32 %v7208_v4 }
 0x1e5   : > { %v6079_v55 = vpop.eup %6078  ;;  %v1697_v0 = vand.u32 2147483647, %v7208_v4  ;;  %v1699_v51 = vand.u32 2147483648, %v7208_v4  ;;  %6082 = vrcp.f32 %v7304_v40  ;;  %v1937_v43 = vadd.f32 %v1936_v41, %v7302_v33  ;;  %vm7335_vm9 = vmor %vm1693_vm8, %vm1694_vm7 }
 0x1e6   : > { %v1692_v32 = vadd.f32 %v7274_v47, %v1691_v62  ;;  %v1705_v16 = vsub.f32 1.0, %v1704_v29  ;;  %v7326_v45 = vadd.f32 1.0, %v6079_v55  ;;  %6084 = vpow2.f32 %v5627_v59 }
 0x1e7   : > { %v6081_v20 = vpop.eup %6080  ;;  %v1957_v48 = vmul.f32 %v7302_v33, %v7302_v33  ;;  %v1958_v58 = vmul.f32 %v7227_v31, %v7227_v31  ;;  %v5628_v25 = vmul.f32 -1.442695, %v1472_v36  ;;  %v1403_v41 = vadd.f32 %v7098_v42, %v7211_v21 }
 0x1e8   : > { %v1696_v14 = vsel %vm7335_vm9, %v7274_v47, %v1692_v32  ;;  %v1706_v2 = vmul.f32 %v7299_v6, %v1705_v16  ;;  %6086 = vrcp.f32 %v7326_v45  ;;  %v1700_v19 = vor.u32 1.1754944e-38, %v1699_v51 }
 0x1e9   : > { %vm1709_vm10 = vweird.f32 %v7299_v6  ;;  %v1712_v59 = vand.u32 2147483647, %v7230_v18  ;;  %v7352_v15 = vadd.f32 1.0, %v6081_v20  ;;  %vm1698_vm11 = vcmp.eq.f32.partialorder %v1697_v0, 8.507059e+37 }
 0x1ea   : > { %v7339_v28 = vpop.f32.mrf.mxu0  ;;  %v1707_v53 = vadd.f32 %v7299_v6, %v1706_v2  ;;  %v1714_v36 = vand.u32 2147483648, %v7230_v18  ;;  %6088 = vpow2.f32 %v5628_v25  ;;  %v1991_v62 = vadd.f32 %v1990_v27, %v1957_v48 }
 0x1eb   : > { %v7341_v26 = vpop.f32.mrf.mxu1  ;;  %v7356_v47 = vpop.eup %6082  ;;  %v1701_v29 = vsel %vm1698_vm11, %v1700_v19, %v1696_v14  ;;  %vm1708_vm12 = vweird.f32 %v7230_v18  ;;  %6090 = vrcp.f32 %v7352_v15  ;;  %v1922_v21 = vadd.f32 %v1921_v30, %v7227_v31 }
 0x1ec   : > { %v6085_v42 = vpop.eup %6084  ;;  %v1959_v55 = vmul.f32 %v7287_v38, %v7287_v38  ;;  %vm7365_vm13 = vmor %vm1708_vm12, %vm1709_vm10  ;;  %v1719_v27 = vmul.f32 %v7356_v47, %v7304_v40  ;;  %v1473_v51 = vadd.f32 %v11054_v35, %v1403_v41  ;;  %v1374_v18 = vpop.f32.mrf.mxu2  ;;  %v1976_v16 = vadd.f32 %v1975_v50, %v1958_v58  ;;  %v2035_v41 = vld [vmem:[%s11048_s1 + $0xc0] sm:$0xff] }
 0x1ed   : > { %v1412_v32 = vpop.f32.mrf.mxu3  ;;  %v1711_v30 = vsel %vm7365_vm13, %v7299_v6, %v1707_v53  ;;  %vm7375_vm14 = vcmp.eq.f32.partialorder %v1712_v59, 8.507059e+37  ;;  %v1729_v48 = vand.u32 2147483648, %v7304_v40  ;;  %v7383_v25 = vmul.f32 %v1701_v29, %v6967_v1  ;;  %v2067_v1 = vld [vmem:[%s11048_s1 + $0x1c0] sm:$0xff]  ;;  %2078 = vmatpush.msra.mxu0 %v2035_v41 }
 0x1ee   : > { %v7380_v4 = vpop.eup %6086  ;;  %v1715_v14 = vor.u32 1.1754944e-38, %v1714_v36  ;;  %v1720_v35 = vsub.f32 1.0, %v1719_v27  ;;  %v7385_v2 = vadd.f32 1.0, %v6085_v42  ;;  %v1938_v50 = vadd.f32 %v1937_v43, %v7287_v38  ;;  %2098 = vmatpush.msra.mxu1 %v2067_v1 }
 0x1ef   : > { %v1727_v58 = vand.u32 2147483647, %v7304_v40  ;;  %v1734_v6 = vmul.f32 %v7380_v4, %v7326_v45  ;;  %v1368_v19 = vadd.f32 %v7165_v24, %v7278_v23  ;;  %v1992_v36 = vadd.f32 %v1991_v62, %v1959_v55 }
 0x1f0   : > { %v6089_v43 = vpop.eup %6088  ;;  %v1716_v29 = vsel %vm7375_vm14, %v1715_v14, %v1711_v30  ;;  %6092 = vrcp.f32 %v7385_v2  ;;  %v5629_v42 = vmul.f32 -1.442695, %v1473_v51  ;;  %v1721_v27 = vmul.f32 %v7356_v47, %v1720_v35  ;;  %v11063_v35 = vld [vmem:[#allocation17_spill] sm:$0xff] }
 0x1f1   : > { %v7406_v0 = vpop.eup %6090  ;;  %vm1723_vm15 = vweird.f32 %v7304_v40  ;;  %v1730_v24 = vor.u32 1.1754944e-38, %v1729_v48  ;;  %v1735_v23 = vsub.f32 1.0, %v1734_v6  ;;  %v1960_v18 = vmul.f32 %v7383_v25, %v7383_v25 }
 0x1f2   : > { %v7399_v59 = vpop.f32.mrf.mxu0  ;;  %v1742_v62 = vand.u32 2147483647, %v7326_v45  ;;  %v1744_v55 = vand.u32 2147483648, %v7326_v45  ;;  %v1749_v51 = vmul.f32 %v7406_v0, %v7352_v15  ;;  %v7417_v32 = vmul.f32 %v1716_v29, %v6973_v17 }
 0x1f3   : > { %v7401_v53 = vpop.f32.mrf.mxu1  ;;  %vm1724_vm1 = vweird.f32 %v7356_v47  ;;  %vm7420_vm3 = vcmp.eq.f32.partialorder %v1727_v58, 8.507059e+37  ;;  %v1736_v20 = vmul.f32 %v7380_v4, %v1735_v23  ;;  %v7425_v48 = vadd.f32 1.0, %v6089_v43 }
 0x1f4   : > { %vm1739_vm4 = vweird.f32 %v7380_v4  ;;  %v1759_v14 = vand.u32 2147483648, %v7352_v15  ;;  %6094 = vpow2.f32 %v5629_v42  ;;  %v1474_v6 = vadd.f32 %v11063_v35, %v1368_v19  ;;  %vm7449_vm7 = vmor %vm1723_vm15, %vm1724_vm1 }
 0x1f5   : > { %v1722_v17 = vadd.f32 %v7356_v47, %v1721_v27  ;;  %v1737_v41 = vadd.f32 %v7380_v4, %v1736_v20  ;;  %v1750_v1 = vsub.f32 1.0, %v1749_v51  ;;  %6096 = vrcp.f32 %v7425_v48  ;;  %v11074_v27 = vld [vmem:[#allocation20_spill] sm:$0xff] }
 0x1f6   : > { %v7433_v58 = vpop.eup %6092  ;;  %v7436_v29 = vadd.f32 %v1922_v21, %v7383_v25  ;;  %vm1738_vm5 = vweird.f32 %v7326_v45  ;;  %vm7439_vm6 = vcmp.eq.f32.partialorder %v1742_v62, 8.507059e+37  ;;  %v1745_v42 = vor.u32 1.1754944e-38, %v1744_v55 }
 0x1f7   : > { %v1961_v19 = vmul.f32 %v7417_v32, %v7417_v32  ;;  %vm1753_vm8 = vweird.f32 %v7352_v15  ;;  %v1757_v45 = vand.u32 2147483647, %v7352_v15  ;;  %v1764_v21 = vmul.f32 %v7433_v58, %v7385_v2  ;;  %vm7464_vm9 = vmor %vm1738_vm5, %vm1739_vm4 }
 0x1f8   : > { %v5630_v23 = vmul.f32 -1.442695, %v1474_v6  ;;  %v7457_v51 = vadd.f32 %v1976_v16, %v1960_v18  ;;  %v7460_v20 = vadd.f32 %v1938_v50, %v7417_v32  ;;  %v7468_v9 = vor.u32 1.1754944e-38, %v1759_v14 }
 0x1f9   : > { %v1772_v44 = vand.u32 2147483647, %v7385_v2  ;;  %v1726_v6 = vsel %vm7449_vm7, %v7356_v47, %v1722_v17  ;;  %v1741_v16 = vsel %vm7464_vm9, %v7380_v4, %v1737_v41  ;;  %v1751_v50 = vmul.f32 %v7406_v0, %v1750_v1  ;;  %v2065_v41 = vld [vmem:[%s11048_s1 + $0x1b0] sm:$0xff] }
 0x1fa   : > { %v1252_v62 = vpop.f32.mrf.mxu0  ;;  %v1765_v18 = vsub.f32 1.0, %v1764_v21  ;;  %6098 = vpow2.f32 %v5630_v23  ;;  %v1406_v14 = vadd.f32 %v7167_v54, %v7280_v52  ;;  %v1370_v33 = vadd.f32 %v7257_v22, %v7339_v28  ;;  %2099 = vmatpush.msra.mxu1 %v2065_v41 }
 0x1fb   : > { %v1290_v55 = vpop.f32.mrf.mxu1  ;;  %v6095_v62 = vpop.eup %6094  ;;  %v7485_v47 = vadd.f32 %v1992_v36, %v1961_v19  ;;  %vm1754_vm10 = vweird.f32 %v7406_v0  ;;  %vm7488_vm11 = vcmp.eq.f32.partialorder %v1757_v45, 8.507059e+37  ;;  %vm1768_vm12 = vweird.f32 %v7385_v2  ;;  %v2033_v36 = vld [vmem:[%s11048_s1 + $0xb0] sm:$0xff]  ;;  %v2031_v19 = vld [vmem:[%s11048_s1 + $0xa0] sm:$0xff] }
 0x1fc   : > { %v1774_v55 = vand.u32 2147483648, %v7385_v2  ;;  %v7483_v38 = vpop.eup %6096  ;;  %v1766_v17 = vmul.f32 %v7433_v58, %v1765_v18  ;;  %v1731_v54 = vsel %vm7420_vm3, %v1730_v24, %v1726_v6  ;;  %v1746_v22 = vsel %vm7439_vm6, %v1745_v42, %v1741_v16  ;;  %v2042_v24 = vld [vmem:[%s11048_s1 + $0xf8] sm:$0xff]  ;;  %2079 = vmatpush.msra.mxu0 %v2033_v36  ;;  %vm7542_vm1 = vmor %vm1753_vm8, %vm1754_vm10  ;;  %v2072_v36 = vld [vmem:[%s11048_s1 + $0x1e8] sm:$0xff] }
 0x1fd   : > { %v1779_v52 = vmul.f32 %v7483_v38, %v7425_v48  ;;  %v7500_v28 = vadd.f32 1.0, %v6095_v62  ;;  %v1752_v30 = vadd.f32 %v7406_v0, %v1751_v50  ;;  %vm7512_vm13 = vcmp.eq.f32.partialorder %v1772_v44, 8.507059e+37  ;;  %v2074_v42 = vld [vmem:[%s11048_s1 + $0x1f8] sm:$0xff]  ;;  %2115 = vmatpush.msra.mxu2 %v2042_v24  ;;  %v2063_v44 = vld [vmem:[%s11048_s1 + $0x1a0] sm:$0xff] }
 0x1fe   : > { %v1475_v43 = vadd.f32 %v11063_v35, %v1406_v14  ;;  %v1476_v45 = vadd.f32 %v11074_v27, %v1370_v33  ;;  %v1775_v21 = vor.u32 1.1754944e-38, %v1774_v55  ;;  %vm1783_vm14 = vweird.f32 %v7425_v48  ;;  %2135 = vmatpush.msra.mxu3 %v2074_v42  ;;  %2080 = vmatpush.msra.mxu0 %v2031_v19 }
 0x1ff   : > { %v1780_v23 = vsub.f32 1.0, %v1779_v52  ;;  %6100 = vrcp.f32 %v7500_v28  ;;  %v7530_v35 = vmul.f32 %v1731_v54, %v6976_v49  ;;  %v1767_v40 = vadd.f32 %v7433_v58, %v1766_v17  ;;  %2100 = vmatpush.msra.mxu1 %v2063_v44  ;;  %v7558_v17 = vld [vmem:[%s11011_s7 + $0x50] sm:$0xff]  ;;  %v2040_v52 = vld [vmem:[%s11048_s1 + $0xe8] sm:$0xff] }
 0x200   : > { %vm1769_vm15 = vweird.f32 %v7433_v58  ;;  %v1787_v33 = vand.u32 2147483647, %v7425_v48  ;;  %v6099_v6 = vpop.eup %6098  ;;  %v7536_v16 = vmul.f32 %v1746_v22, %v6979_v60  ;;  %v5631_v18 = vmul.f32 -1.442695, %v1475_v43  ;;  %2116 = vmatpush.msra.mxu2 %v2040_v52  ;;  %2136 = vmatpush.msra.mxu3 %v2072_v36  ;;  %v2057_v43 = vld [vmem:[%s11048_s1 + $0x170] sm:$0xff] }
 0x201   : > { %v1781_v49 = vmul.f32 %v7483_v38, %v1780_v23  ;;  %v5632_v62 = vmul.f32 -1.442695, %v1476_v45  ;;  %v6387_v55 = vmov 4   ;;  %v1756_v60 = vsel %vm7542_vm1, %v7406_v0, %v1752_v30  ;;  %vm7565_vm4 = vmor %vm1768_vm12, %vm1769_vm15 }
 0x202   : > { %5962 = vset.pattern.permute.xlu1 %v6387_v55  ;;  %vm1784_vm3 = vweird.f32 %v7483_v38  ;;  %v1789_v14 = vand.u32 2147483648, %v7425_v48  ;;  %v7553_v15 = vadd.f32 1.0, %v6099_v6  ;;  %6102 = vpow2.f32 %v5631_v18 }
 0x203   : > { %2480 = vperm.xlu1 %5962, %v7558_v17   ;;  %v1782_v0 = vadd.f32 %v7483_v38, %v1781_v49  ;;  %v1408_v22 = vadd.f32 %v7259_v34, %v7341_v26  ;;  %v1373_v2 = vadd.f32 %v7317_v8, %v7399_v59  ;;  %v7582_v41 = vadd.f32 %v7436_v29, %v7530_v35  ;;  %v2029_v8 = vld [vmem:[%s11048_s1 + $0x90] sm:$0xff]  ;;  %v2038_v59 = vld [vmem:[%s11048_s1 + $0xd8] sm:$0xff]  ;;  %vm7614_vm5 = vmor %vm1783_vm14, %vm1784_vm3 }
 0x204   : > { %v7586_v24 = vmul.f32 %v7530_v35, %v7530_v35  ;;  %v1771_v34 = vsel %vm7565_vm4, %v7433_v58, %v1767_v40  ;;  %6104 = vrcp.f32 %v7553_v15  ;;  %v2061_v26 = vld [vmem:[%s11048_s1 + $0x190] sm:$0xff]  ;;  %v7605_v58 = vadd.f32 %v7460_v20, %v7536_v16  ;;  %2081 = vmatpush.msra.mxu0 %v2029_v8  ;;  %v2070_v20 = vld [vmem:[%s11048_s1 + $0x1d8] sm:$0xff]  ;;  %2117 = vmatpush.msra.mxu2 %v2038_v59  ;;  %v11083_v40 = vld [vmem:[#allocation19_spill] sm:$0xff] }
 0x205   : > { %v7601_v29 = vpop.eup %6100  ;;  %v1761_v30 = vsel %vm7488_vm11, %v7468_v9, %v1756_v60  ;;  %vm7618_vm6 = vcmp.eq.f32.partialorder %v1787_v33, 8.507059e+37  ;;  %6106 = vpow2.f32 %v5632_v62  ;;  %2101 = vmatpush.msra.mxu1 %v2061_v26  ;;  %v1786_v9 = vsel %vm7614_vm5, %v7483_v38, %v1782_v0  ;;  %2137 = vmatpush.msra.mxu3 %v2070_v20  ;;  %v2036_v38 = vld [vmem:[%s11048_s1 + $0xc8] sm:$0xff]  ;;  %v2027_v8 = vld [vmem:[%s11048_s1 + $0x80] sm:$0xff]  ;;  %v2025_v59 = vld [vmem:[%s11048_s1 + $0x70] sm:$0xff] }
 0x206   : > { %v1790_v48 = vor.u32 1.1754944e-38, %v1789_v14  ;;  %v1794_v4 = vmul.f32 %v7601_v29, %v7500_v28  ;;  %v1477_v19 = vadd.f32 %v11074_v27, %v1408_v22  ;;  %v7633_v45 = vmul.f32 %v7536_v16, %v7536_v16  ;;  %v2068_v27 = vld [vmem:[%s11048_s1 + $0x1c8] sm:$0xff]  ;;  %2118 = vmatpush.msra.mxu2 %v2036_v38  ;;  %v2034_v14 = vld [vmem:[%s11048_s1 + $0xb8] sm:$0xff]  ;;  %v2059_v26 = vld [vmem:[%s11048_s1 + $0x180] sm:$0xff]  ;;  %2082 = vmatpush.msra.mxu0 %v2027_v8 }
 0x207   : > { %v1776_v23 = vsel %vm7512_vm13, %v1775_v21, %v1771_v34  ;;  %v1802_v44 = vand.u32 2147483647, %v7500_v28  ;;  %v1478_v33 = vadd.f32 %v11083_v40, %v1373_v2  ;;  %v1411_v49 = vadd.f32 %v7319_v5, %v7401_v53  ;;  %2138 = vmatpush.msra.mxu3 %v2068_v27  ;;  %v2066_v5 = vld [vmem:[%s11048_s1 + $0x1b8] sm:$0xff]  ;;  %2102 = vmatpush.msra.mxu1 %v2059_v26  ;;  %v2032_v27 = vld [vmem:[%s11048_s1 + $0xa8] sm:$0xff]  ;;  %v2051_v8 = vld [vmem:[%s11048_s1 + $0x140] sm:$0xff] }
 0x208   : > { %v1795_v6 = vsub.f32 1.0, %v1794_v4  ;;  %v5633_v50 = vmul.f32 -1.442695, %v1477_v19  ;;  %v6103_v1 = vpop.eup %6102  ;;  %v7648_v21 = vmul.f32 %v1761_v30, %v6990_v13  ;;  %v1791_v18 = vsel %vm7618_vm6, %v1790_v48, %v1786_v9  ;;  %2119 = vmatpush.msra.mxu2 %v2034_v14  ;;  %v2023_v48 = vld [vmem:[%s11048_s1 + $0x60] sm:$0xff]  ;;  %v7707_v19 = vld [vmem:[%s11011_s7 + $0x48] sm:$0xff]  ;;  %2083 = vmatpush.msra.mxu0 %v2025_v59 }
 0x209   : > { %v1804_v62 = vand.u32 2147483648, %v7500_v28  ;;  %v5634_v60 = vmul.f32 -1.442695, %v1478_v33  ;;  %v10891_v53 = vmov 2   ;;  %v7664_v0 = vadd.f32 1.0, %v6103_v1  ;;  %2139 = vmatpush.msra.mxu3 %v2066_v5  ;;  %v2055_v4 = vld [vmem:[%s11048_s1 + $0x160] sm:$0xff]  ;;  %2103 = vmatpush.msra.mxu1 %v2057_v43 }
 0x20a   : > { %5961 = vset.pattern.permute.xlu2 %v10891_v53  ;;  %5970 = vset.pattern.permute.xlu0 %v10891_v53  ;;  %v7661_v13 = vpop.eup %6104  ;;  %v1796_v54 = vmul.f32 %v7601_v29, %v1795_v6  ;;  %6108 = vpow2.f32 %v5633_v50  ;;  %v1479_v22 = vadd.f32 %v11083_v40, %v1411_v49  ;;  %v7668_v36 = vmul.f32 %v1776_v23, %v7001_v56  ;;  %v7713_v23 = vld [vmem:[%s11011_s7 + $0x28] sm:$0xff]  ;;  %v2021_v6 = vld [vmem:[%s11048_s1 + $0x50] sm:$0xff] }
 0x20b   : > { %v6107_v52 = vpop.eup %6106  ;;  %v1809_v2 = vmul.f32 %v7661_v13, %v7553_v15  ;;  %v1817_v34 = vand.u32 2147483647, %v7553_v15  ;;  %6110 = vpow2.f32 %v5634_v60  ;;  %5963 = vset.pattern.permute.xlu1 %v10891_v53  ;;  %2326 = vperm.xlu2 %5961, %v7558_v17   ;;  %v7685_v56 = vmul.f32 %v1791_v18, %v7003_v61  ;;  %v2053_v1 = vld [vmem:[%s11048_s1 + $0x150] sm:$0xff]  ;;  %v2030_v18 = vld [vmem:[%s11048_s1 + $0x98] sm:$0xff]  ;;  %v2060_v26 = vld [vmem:[%s11048_s1 + $0x188] sm:$0xff] }
 0x20c   : > { %vm1799_vm7 = vweird.f32 %v7601_v29  ;;  %v1819_v30 = vand.u32 2147483648, %v7553_v15  ;;  %6112 = vrcp.f32 %v7664_v0  ;;  %v7694_v42 = vadd.f32 %v7601_v29, %v1796_v54  ;;  %2322 = vperm.xlu1 %5963, %v7707_v19   ;;  %2306 = vperm.xlu0 %5970, %v7713_v23  }
 0x20d   : > { %v1810_v20 = vsub.f32 1.0, %v1809_v2  ;;  %v7696_v9 = vadd.f32 1.0, %v6107_v52  ;;  %v5635_v61 = vmul.f32 -1.442695, %v1479_v22  ;;  %v1925_v40 = vadd.f32 %v7582_v41, %v7648_v21  ;;  %v2064_v41 = vld [vmem:[%s11048_s1 + $0x1a8] sm:$0xff]  ;;  %2120 = vmatpush.msra.mxu2 %v2032_v27  ;;  %2084 = vmatpush.msra.mxu0 %v2023_v48  ;;  %v2017_v48 = vld [vmem:[%s11048_s1 + $0x30] sm:$0xff] }
 0x20e   : > { %v7720_v33 = vmul.f32 %v7648_v21, %v7648_v21  ;;  %vm1798_vm8 = vweird.f32 %v7500_v28  ;;  %vm7723_vm9 = vcmp.eq.f32.partialorder %v1802_v44, 8.507059e+37  ;;  %v7738_v44 = vadd.f32 %v7605_v58, %v7668_v36  ;;  %2140 = vmatpush.msra.mxu3 %v2064_v41  ;;  %v2062_v58 = vld [vmem:[%s11048_s1 + $0x198] sm:$0xff]  ;;  %2104 = vmatpush.msra.mxu1 %v2055_v4  ;;  %v2028_v22 = vld [vmem:[%s11048_s1 + $0x88] sm:$0xff]  ;;  %v2049_v4 = vld [vmem:[%s11048_s1 + $0x130] sm:$0xff] }
 0x20f   : > { %v1805_v50 = vor.u32 1.1754944e-38, %v1804_v62  ;;  %v1811_v49 = vmul.f32 %v7661_v13, %v1810_v20  ;;  %6114 = vrcp.f32 %v7696_v9  ;;  %v7753_v62 = vmul.f32 %v7668_v36, %v7668_v36  ;;  %vm7759_vm10 = vmor %vm1798_vm8, %vm1799_vm7  ;;  %2121 = vmatpush.msra.mxu2 %v2030_v18  ;;  %2085 = vmatpush.msra.mxu0 %v2021_v6  ;;  %v2058_v41 = vld [vmem:[%s11048_s1 + $0x178] sm:$0xff]  ;;  %v2015_v18 = vld [vmem:[%s11048_s1 + $0x20] sm:$0xff] }
 0x210   : > { %v6109_v60 = vpop.eup %6108  ;;  %vm1813_vm11 = vweird.f32 %v7553_v15  ;;  %vm7764_vm12 = vcmp.eq.f32.partialorder %v1817_v34, 8.507059e+37  ;;  %v7768_v54 = vor.u32 1.1754944e-38, %v1819_v30  ;;  %v1801_v28 = vsel %vm7759_vm10, %v7601_v29, %v7694_v42  ;;  %2141 = vmatpush.msra.mxu3 %v2062_v58  ;;  %v2019_v34 = vld [vmem:[%s11048_s1 + $0x40] sm:$0xff]  ;;  %2105 = vmatpush.msra.mxu1 %v2053_v1  ;;  %v2026_v6 = vld [vmem:[%s11048_s1 + $0x78] sm:$0xff] }
 0x211   : > { %v6111_v52 = vpop.eup %6110  ;;  %v7777_v2 = vadd.f32 1.0, %v6109_v60  ;;  %6116 = vpow2.f32 %v5635_v61  ;;  %v7789_v59 = vadd.f32 %v1925_v40, %v7685_v56  ;;  %v1812_v30 = vadd.f32 %v7661_v13, %v1811_v49  ;;  %2122 = vmatpush.msra.mxu2 %v2028_v22  ;;  %2086 = vmatpush.msra.mxu0 %v2019_v34  ;;  %v7842_v15 = vld [vmem:[%s11011_s7 + $0x40] sm:$0xff] }
 0x212   : > { %v7791_v29 = vpop.eup %6112  ;;  %vm1814_vm13 = vweird.f32 %v7661_v13  ;;  %v1832_v43 = vand.u32 2147483647, %v7664_v0  ;;  %v7796_v42 = vadd.f32 1.0, %v6111_v52  ;;  %v1834_v61 = vand.u32 2147483648, %v7664_v0  ;;  %2142 = vmatpush.msra.mxu3 %v2060_v26  ;;  %2106 = vmatpush.msra.mxu1 %v2051_v8  ;;  %v2047_v58 = vld [vmem:[%s11048_s1 + $0x120] sm:$0xff] }
 0x213   : > { %v1824_v20 = vmul.f32 %v7791_v29, %v7664_v0  ;;  %6118 = vrcp.f32 %v7777_v2  ;;  %v1978_v40 = vadd.f32 %v7457_v51, %v7586_v24  ;;  %v1806_v27 = vsel %vm7723_vm9, %v1805_v50, %v1801_v28  ;;  %vm7827_vm15 = vmor %vm1813_vm11, %vm1814_vm13  ;;  %v7836_v50 = vld [vmem:[%s11011_s7 + $0x30] sm:$0xff]  ;;  %2318 = vperm.xlu2 %5961, %v7842_v15   ;;  %2087 = vmatpush.msra.mxu0 %v2017_v48  ;;  %v2024_v28 = vld [vmem:[%s11048_s1 + $0x68] sm:$0xff] }
 0x214   : > { %vm1828_vm14 = vweird.f32 %v7664_v0  ;;  %v1966_v49 = vmul.f32 %v7685_v56, %v7685_v56  ;;  %v1847_v38 = vand.u32 2147483647, %v7696_v9  ;;  %6120 = vrcp.f32 %v7796_v42  ;;  %2310 = vperm.xlu1 %5963, %v7836_v50   ;;  %2107 = vmatpush.msra.mxu1 %v2049_v4  ;;  %v2054_v48 = vld [vmem:[%s11048_s1 + $0x158] sm:$0xff]  ;;  %v2043_v51 = vld [vmem:[%s11048_s1 + $0x100] sm:$0xff] }
 0x215   : > { %v7821_v1 = vpop.eup %6114  ;;  %v1825_v24 = vsub.f32 1.0, %v1824_v20  ;;  %v1979_v60 = vadd.f32 %v1978_v40, %v7720_v33  ;;  %v1816_v14 = vsel %vm7827_vm15, %v7661_v13, %v1812_v30  ;;  %vm7855_vm1 = vcmp.eq.f32.partialorder %v1832_v43, 8.507059e+37  ;;  %v2056_v33 = vld [vmem:[%s11048_s1 + $0x168] sm:$0xff]  ;;  %2143 = vmatpush.msra.mxu3 %v2058_v41  ;;  %2123 = vmatpush.msra.mxu2 %v2026_v6  ;;  %v2013_v20 = vld [vmem:[%s11048_s1 + $0x10] sm:$0xff]  ;;  %v2011_v6 = vld [vmem:[%s11048_s1] sm:$0xff] }
 0x216   : > { %v1839_v52 = vmul.f32 %v7821_v1, %v7696_v9  ;;  %v7869_v13 = vadd.f32 %v7485_v47, %v7633_v45  ;;  %v7872_v8 = vmul.f32 %v1806_v27, %v7010_v3  ;;  %v1835_v30 = vor.u32 1.1754944e-38, %v1834_v61  ;;  %v2045_v47 = vld [vmem:[%s11048_s1 + $0x110] sm:$0xff]  ;;  %2088 = vmatpush.msra.mxu0 %v2015_v18  ;;  %2108 = vmatpush.msra.mxu1 %v2047_v58  ;;  %v2022_v61 = vld [vmem:[%s11048_s1 + $0x58] sm:$0xff]  ;;  %v7999_v41 = vld [vmem:[%s11048_s1 + $0x28] sm:$0xff] }
 0x217   : > { %v6117_v34 = vpop.eup %6116  ;;  %v1826_v26 = vmul.f32 %v7791_v29, %v1825_v24  ;;  %v1849_v43 = vand.u32 2147483648, %v7696_v9  ;;  %vm1829_vm3 = vweird.f32 %v7791_v29  ;;  %vm1843_vm4 = vweird.f32 %v7696_v9  ;;  %2124 = vmatpush.msra.mxu2 %v2024_v28  ;;  %2144 = vmatpush.msra.mxu3 %v2056_v33  ;;  %v7940_v33 = vld [vmem:[%s11048_s1 + $0x48] sm:$0xff]  ;;  %11105 = vst [vmem:[#allocation20_spill] sm:$0xff] %v7999_v41 }
 0x218   : > { %v1840_v45 = vsub.f32 1.0, %v1839_v52  ;;  %v7884_v3 = vadd.f32 1.0, %v6117_v34  ;;  %v1821_v40 = vsel %vm7764_vm12, %v7768_v54, %v1816_v14  ;;  %vm7898_vm5 = vcmp.eq.f32.partialorder %v1847_v38, 8.507059e+37  ;;  %2089 = vmatpush.msra.mxu0 %v2013_v20  ;;  %2109 = vmatpush.msra.mxu1 %v2045_v47  ;;  %vm7921_vm7 = vmor %vm1828_vm14, %vm1829_vm3  ;;  %11098 = vst [vmem:[#allocation18_spill] sm:$0xff] %v7940_v33 }
 0x219   : > { %v7892_v4 = vpop.eup %6118  ;;  %v1827_v27 = vadd.f32 %v7791_v29, %v1826_v26  ;;  %v7908_v24 = vadd.f32 %v1979_v60, %v1966_v49  ;;  %vm1844_vm6 = vweird.f32 %v7821_v1  ;;  %v1850_v18 = vor.u32 1.1754944e-38, %v1849_v43  ;;  %2125 = vmatpush.msra.mxu2 %v2022_v61  ;;  %2145 = vmatpush.msra.mxu3 %v2054_v48  ;;  %v7971_v61 = vld [vmem:[%s11048_s1 + $0x138] sm:$0xff] }
 0x21a   : > { %v1841_v5 = vmul.f32 %v7821_v1, %v1840_v45  ;;  %v1854_v54 = vmul.f32 %v7892_v4, %v7777_v2  ;;  %6122 = vrcp.f32 %v7884_v3  ;;  %v7915_v38 = vpop.eup %6120  ;;  %vm1858_vm8 = vweird.f32 %v7777_v2  ;;  %2090 = vmatpush.msra.mxu0 %v2011_v6  ;;  %2110 = vmatpush.msra.mxu1 %v2043_v51  ;;  %vm7952_vm9 = vmor %vm1843_vm4, %vm1844_vm6  ;;  %11101 = vst [vmem:[#allocation16_spill] sm:$0xff] %v7971_v61  ;;  %v7976_v48 = vld [vmem:[%s11048_s1 + $0x38] sm:$0xff] }
 0x21b   : > { %v1862_v58 = vand.u32 2147483647, %v7777_v2  ;;  %v7929_v60 = vadd.f32 %v7738_v44, %v7872_v8  ;;  %v1831_v14 = vsel %vm7921_vm7, %v7791_v29, %v1827_v27  ;;  %v1869_v28 = vmul.f32 %v7915_v38, %v7796_v42  ;;  %v2052_v44 = vld [vmem:[%s11048_s1 + $0x148] sm:$0xff]  ;;  %11102 = vst [vmem:[#allocation17_spill] sm:$0xff] %v7976_v48  ;;  %2126 = vmatpush.msra.mxu2 %v7940_v33 }
 0x21c   : > { %v1842_v0 = vadd.f32 %v7821_v1, %v1841_v5  ;;  %v1855_v52 = vsub.f32 1.0, %v1854_v54  ;;  %v7946_v34 = vmul.f32 %v1821_v40, %v7126_v46  ;;  %v1864_v26 = vand.u32 2147483648, %v7777_v2  ;;  %5966 = vset.pattern.permute.xlu1 %v6387_v55  ;;  %2146 = vmatpush.msra.mxu3 %v2052_v44  ;;  %v8004_v5 = vld [vmem:[%s11048_s1 + $0x128] sm:$0xff] }
 0x21d   : > { %v1877_v43 = vand.u32 2147483647, %v7796_v42  ;;  %v1879_v20 = vand.u32 2147483648, %v7796_v42  ;;  %v10889_v47 = vmov 3   ;;  %vm1859_vm10 = vweird.f32 %v7892_v4  ;;  %2476 = vperm.xlu1 %5966, %v7707_v19   ;;  %11106 = vst [vmem:[#allocation19_spill] sm:$0xff] %v8004_v5  ;;  %2127 = vmatpush.msra.mxu2 %v7976_v48 }
 0x21e   : > { %5964 = vset.pattern.permute.xlu2 %v10889_v47  ;;  %v1846_v46 = vsel %vm7952_vm9, %v7821_v1, %v1842_v0  ;;  %v1856_v9 = vmul.f32 %v7892_v4, %v1855_v52  ;;  %v1870_v45 = vsub.f32 1.0, %v1869_v28  ;;  %v1836_v1 = vsel %vm7855_vm1, %v1835_v30, %v1831_v14  ;;  %vm1860_vm14 = vmor %vm1858_vm8, %vm1859_vm10  ;;  %2147 = vmatpush.msra.mxu3 %v7971_v61  ;;  %v8033_v28 = vld [vmem:[%s11048_s1 + $0x18] sm:$0xff] }
 0x21f   : > { %2384 = vperm.xlu2 %5964, %v7842_v15   ;;  %v1851_v40 = vsel %vm7898_vm5, %v1850_v18, %v1846_v46  ;;  %vm7982_vm11 = vcmp.eq.f32.partialorder %v1862_v58, 8.507059e+37  ;;  %vm1873_vm12 = vweird.f32 %v7796_v42  ;;  %vm1874_vm13 = vweird.f32 %v7915_v38  ;;  %11109 = vst [vmem:[#allocation23_spill] sm:$0xff] %v8033_v28  ;;  %2128 = vmatpush.msra.mxu2 %v7999_v41 }
 0x220   : > { %v7988_v6 = vpop.eup %6122  ;;  %v7991_v51 = vmul.f32 %v1851_v40, %v7136_v7  ;;  %v1857_v22 = vadd.f32 %v7892_v4, %v1856_v9  ;;  %v1871_v30 = vmul.f32 %v7915_v38, %v1870_v45  ;;  %v8009_v7 = vld [vmem:[%s11011_s7 + $0x10] sm:$0xff]  ;;  %v1865_v54 = vor.u32 1.1754944e-38, %v1864_v26  ;;  %vm1875_vm1 = vmor %vm1873_vm12, %vm1874_vm13  ;;  %2148 = vmatpush.msra.mxu3 %v8004_v5 }
 0x221   : > { %2294 = vperm.xlu0 %5970, %v8009_v7   ;;  %v1884_v49 = vmul.f32 %v7988_v6, %v7884_v3  ;;  %v1927_v18 = vadd.f32 %v7789_v59, %v7946_v34  ;;  %v1968_v58 = vmul.f32 %v7946_v34, %v7946_v34  ;;  %vm8026_vm15 = vcmp.eq.f32.partialorder %v1877_v43, 8.507059e+37  ;;  %v8038_v59 = vld [vmem:[%s11048_s1 + $0x118] sm:$0xff]  ;;  %2129 = vmatpush.msra.mxu2 %v8033_v28 }
 0x222   : > { %v1861_v14 = vsel %vm1860_vm14, %v7892_v4, %v1857_v22  ;;  %v1872_v0 = vadd.f32 %v7915_v38, %v1871_v30  ;;  %v1880_v52 = vor.u32 1.1754944e-38, %v1879_v20  ;;  %11110 = vst [vmem:[#allocation24_spill] sm:$0xff] %v8038_v59  ;;  %v8041_v44 = vmul.f32 %v1836_v1, %v7133_v37  ;;  %2149 = vmatpush.msra.mxu3 %v8038_v59 }
 0x223   : > { %v1866_v4 = vsel %vm7982_vm11, %v1865_v54, %v1861_v14  ;;  %v1885_v29 = vsub.f32 1.0, %v1884_v49  ;;  %v1892_v26 = vand.u32 2147483647, %v7884_v3  ;;  %v1894_v37 = vand.u32 2147483648, %v7884_v3 }
 0x224   : > { %v1876_v43 = vsel %vm1875_vm1, %v7915_v38, %v1872_v0  ;;  %v1970_v20 = vmul.f32 %v7991_v51, %v7991_v51  ;;  %v1967_v46 = vmul.f32 %v7872_v8, %v7872_v8  ;;  %v8059_v42 = vmul.f32 %v1866_v4, %v7140_v10  ;;  %v8070_v38 = vld [vmem:[%s11048_s1 + $0x8] sm:$0xff] }
 0x225   : > { %v1881_v9 = vsel %vm8026_vm15, %v1880_v52, %v1876_v43  ;;  %v1886_v45 = vmul.f32 %v7988_v6, %v1885_v29  ;;  %vm1889_vm3 = vweird.f32 %v7988_v6  ;;  %11111 = vst [vmem:[#allocation25_spill] sm:$0xff] %v8070_v38  ;;  %v8075_v10 = vld [vmem:[%s11048_s1 + $0x108] sm:$0xff]  ;;  %vm1888_vm4 = vweird.f32 %v7884_v3  ;;  %5968 = vset.pattern.permute.xlu1 %v10889_v47  ;;  %2130 = vmatpush.msra.mxu2 %v8070_v38  ;;  %v11122_v38 = vld [vmem:[#allocation21_spill] sm:$0xff] }
 0x226   : > { %11112 = vst [vmem:[#allocation26_spill] sm:$0xff] %v8075_v10  ;;  %v8078_v1 = vmul.f32 %v1881_v9, %v7142_v63  ;;  %v1928_v40 = vadd.f32 %v1927_v18, %v7991_v51  ;;  %v1981_v27 = vadd.f32 %v7908_v24, %v1968_v58  ;;  %vm8086_vm5 = vcmp.eq.f32.partialorder %v1892_v26, 8.507059e+37  ;;  %v8093_v63 = vld [vmem:[%s11011_s7 + $0x38] sm:$0xff]  ;;  %vm1890_vm6 = vmor %vm1888_vm4, %vm1889_vm3  ;;  %2150 = vmatpush.msra.mxu3 %v8075_v10 }
 0x227   : > { %5965 = vset.pattern.permute.xlu2 %v10891_v53  ;;  %v1887_v22 = vadd.f32 %v7988_v6, %v1886_v45  ;;  %2380 = vperm.xlu1 %5968, %v8093_v63   ;;  %v1969_v3 = vmul.f32 %v8041_v44, %v8041_v44  ;;  %v1995_v24 = vadd.f32 %v7869_v13, %v7753_v62  ;;  %v1895_v54 = vor.u32 1.1754944e-38, %v1894_v37 }
 0x228   : > { %2314 = vperm.xlu2 %5965, %v8093_v63   ;;  %v1929_v49 = vadd.f32 %v1928_v40, %v8078_v1  ;;  %v1972_v18 = vmul.f32 %v8078_v1, %v8078_v1  ;;  %v1982_v58 = vadd.f32 %v1981_v27, %v1970_v20  ;;  %v1943_v0 = vadd.f32 %v7929_v60, %v8041_v44 }
 0x229   : > { %v1891_v14 = vsel %vm1890_vm6, %v7988_v6, %v1887_v22  ;;  %v1971_v62 = vmul.f32 %v8059_v42, %v8059_v42  ;;  %v1996_v13 = vadd.f32 %v1995_v24, %v1967_v46  ;;  %5975 = vset.pattern.permute.xlu0 %v6387_v55  ;;  %vm2008_vm7 = vcmask 1041408  }
 0x22a   : > { %v1896_v2 = vsel %vm8086_vm5, %v1895_v54, %v1891_v14  ;;  %v1930_v52 = vrot.slane %v1929_v49, 4  ;;  %v1983_v4 = vadd.f32 %v1982_v58, %v1972_v18  ;;  %2472 = vperm.xlu0 %5975, %v7842_v15   ;;  %v1944_v6 = vadd.f32 %v1943_v0, %v8059_v42 }
 0x22b   : > { %v8118_v29 = vmul.f32 %v1896_v2, %v7144_v12  ;;  %v1997_v26 = vadd.f32 %v1996_v13, %v1969_v3 }
 0x22c   : > { %v1931_v60 = vadd.f32 %v1930_v52, %v1929_v49  ;;  %v1984_v43 = vrot.slane %v1983_v4, 4 }
 0x22d   : > { %v1945_v37 = vadd.f32 %v1944_v6, %v8118_v29  ;;  %v1973_v20 = vmul.f32 %v8118_v29, %v8118_v29  ;;  %v1998_v46 = vadd.f32 %v1997_v26, %v1971_v62 }
 0x22e   : > { %v1932_v9 = vrot.slane %v1931_v60, 2  ;;  %v1985_v45 = vadd.f32 %v1984_v43, %v1983_v4  ;;  %v6163_v4 = vld [vmem:[%s11011_s7 + $0x20] sm:$0xff]  ;;  %v6164_v43 = vld [vmem:[%s11011_s7 + $0x18] sm:$0xff] }
 0x22f   : > { %v1946_v40 = vrot.slane %v1945_v37, 4  ;;  %v1999_v27 = vadd.f32 %v1998_v46, %v1973_v20  ;;  %5971 = vset.pattern.permute.xlu1 %v6387_v55  ;;  %v6167_v20 = vld [vmem:[%s11010_s5] sm:$0xf] }
 0x230   : > { %5967 = vset.pattern.permute.xlu2 %v10889_v47  ;;  %v1933_v12 = vadd.f32 %v1932_v9, %v1931_v60  ;;  %v1986_v15 = vrot.slane %v1985_v45, 2  ;;  %2464 = vperm.xlu1 %5971, %v7836_v50   ;;  %v2155_v46 = vmul.f32 88.0, %v6167_v20 }
 0x231   : > { %2376 = vperm.xlu2 %5967, %v7836_v50   ;;  %v1947_v22 = vadd.f32 %v1946_v40, %v1945_v37  ;;  %v2000_v30 = vrot.slane %v1999_v27, 4 }
 0x232   : > { %v1934_v3 = vrot.slane %v1933_v12, 1  ;;  %v1987_v24 = vadd.f32 %v1986_v15, %v1985_v45  ;;  %2460 = vperm.xlu0 %5975, %v7713_v23   ;;  %v2157_v9 = vperm.slane %v2155_v46, 0 }
 0x233   : > { %v1948_v54 = vrot.slane %v1947_v22, 2  ;;  %v2001_v49 = vadd.f32 %v2000_v30, %v1999_v27 }
 0x234   : > { %v1988_v18 = vrot.slane %v1987_v24, 1  ;;  %v1935_v0 = vadd.f32 %v1934_v3, %v1933_v12  ;;  %6124 = vrcp.f32 %v2157_v9  ;;  %vm2166_vm8 = vweird.f32 %v2157_v9 }
 0x235   : > { %v1949_v58 = vadd.f32 %v1948_v54, %v1947_v22  ;;  %v2002_v14 = vrot.slane %v2001_v49, 2 }
 0x236   : > { %v1989_v62 = vadd.f32 %v1988_v18, %v1987_v24  ;;  %v2172_v18 = vand.u32 2147483648, %v2157_v9 }
 0x237   : > { %v1950_v13 = vrot.slane %v1949_v58, 1  ;;  %v2003_v2 = vadd.f32 %v2002_v14, %v2001_v49 }
 0x238   : > { %v2006_v52 = vsel %vm860_vm0, %v1935_v0, %v1989_v62  ;;  %5973 = vset.pattern.permute.xlu1 %v10889_v47  ;;  %v2170_v0 = vand.u32 2147483647, %v2157_v9 }
 0x239   : > { %5969 = vset.pattern.permute.xlu2 %v10891_v53  ;;  %5636 = vmatmul.msk.f32.vlgmr.msra.gmra.mxu0 %vm2008_vm7, %v2006_v52  ;;  %v2004_v50 = vrot.slane %v2003_v2, 1  ;;  %v1951_v6 = vadd.f32 %v1950_v13, %v1949_v58 }
 0x23a   : > { %5638 = vmatmul.msk.f32.vlgmr.msra.gmra.mxu2 %vm2008_vm7, %v2006_v52  ;;  %2368 = vperm.xlu1 %5973, %v6163_v4   ;;  %v6125_v27 = vpop.eup %6124  ;;  %vm2171_vm11 = vcmp.eq.f32.partialorder %v2170_v0, 8.507059e+37 }
 0x23b   : > { %2302 = vperm.xlu2 %5969, %v6163_v4   ;;  %v2005_v26 = vadd.f32 %v2004_v50, %v2003_v2  ;;  %2448 = vperm.xlu0 %5975, %v8009_v7   ;;  %v2162_v15 = vmul.f32 %v6125_v27, %v2157_v9  ;;  %vm2167_vm9 = vweird.f32 %v6125_v27  ;;  %v2173_v2 = vor.u32 1.1754944e-38, %v2172_v18 }
 0x23c   : > { %vm2168_vm10 = vmor %vm2166_vm8, %vm2167_vm9  ;;  %vm2677_vm9 = vcmask 1043456  }
 0x23d   : > { %v2007_v60 = vsel %vm860_vm0, %v1951_v6, %v2005_v26  ;;  %v2163_v3 = vsub.f32 1.0, %v2162_v15 }
 0x23e   : > { %5637 = vmatmul.msk.f32.vlgmr.msra.gmra.mxu1 %vm2008_vm7, %v2007_v60  ;;  %5639 = vmatmul.msk.f32.vlgmr.msra.gmra.mxu3 %vm2008_vm7, %v2007_v60 }
 0x23f   : > { %v2164_v54 = vmul.f32 %v6125_v27, %v2163_v3 }
 0x241   : > { %v2165_v14 = vadd.f32 %v6125_v27, %v2164_v54 }
 0x242   : > { %5976 = vset.pattern.permute.xlu1 %v10891_v53 }
 0x243   : > { %5972 = vset.pattern.permute.xlu2 %v6387_v55  ;;  %2298 = vperm.xlu1 %5976, %v6164_v43   ;;  %v2169_v50 = vsel %vm2168_vm10, %v6125_v27, %v2165_v14 }
 0x244   : > { %2468 = vperm.xlu2 %5972, %v8093_v63   ;;  %5982 = vset.pattern.permute.xlu0 %v10889_v47  ;;  %v6165_v63 = vld [vmem:[%s11011_s7] sm:$0xff] }
 0x245   : > { %2392 = vperm.xlu0 %5982, %v7558_v17   ;;  %v6166_v17 = vld [vmem:[%s11011_s7 + $0x8] sm:$0xff]  ;;  %s6334_s7 = sshra.s32 %s5419_s26, 4  ;;  %s6335_s7 = int_to_ptr.hbm [resolvable:$true] %s6334_s7 }
 0x246   : > { %s6336_s29 = scalar_lea.hbm %s6335_s7, 176  ;;  %p6341_p0 = scmp.lt.s32.totalorder %s6335_s7, %s10852_s22 }
 0x247   : > { %p6337_p11 = scmp.ne.s32.totalorder %s6335_s7, %s6336_s29  ;;  %p6342_p1 = scmp.lt.s32.totalorder %s6340_s4, %s6336_s29 }
 0x249   : > { %p6338_p12 = pnand %p6337_p11, %p6545_p5  ;;  %p6343_p2 = por %p6342_p1, %p6341_p0 }
 0x24b   : > { %5978 = vset.pattern.permute.xlu1 %v10889_v47  ;;  %p6339_p13 = pneg %p6338_p12 }
 0x24c   : > { %5974 = vset.pattern.permute.xlu2 %v10889_v47  ;;  %2360 = vperm.xlu1 %5978, %v8009_v7  }
 0x24d   : > { %2372 = vperm.xlu2 %5974, %v7713_v23   ;;  %2388 = vperm.xlu0 %5982, %v7707_v19   ;;  %v11115_v19 = vmov 0   ;;  %p6344_p3 = pnand %p6343_p2, %p6339_p13 }
 0x254   : > { %5980 = vset.pattern.permute.xlu1 %v10891_v53 }
 0x255   : > { %5977 = vset.pattern.permute.xlu2 %v6387_v55  ;;  %2286 = vperm.xlu1 %5980, %v6165_v63  }
 0x256   : > { %2456 = vperm.xlu2 %5977, %v6163_v4   ;;  %2356 = vperm.xlu0 %5982, %v6166_v17  }
 0x25d   : > { %5983 = vset.pattern.permute.xlu1 %v6387_v55 }
 0x25e   : > { %5979 = vset.pattern.permute.xlu2 %v10889_v47  ;;  %2452 = vperm.xlu1 %5983, %v6164_v43  }
 0x25f   : > { %2364 = vperm.xlu2 %5979, %v6164_v43   ;;  %5987 = vset.pattern.permute.xlu0 %v11115_v19  ;;  %v8195_v43 = vsel %vm2171_vm11, %v2173_v2, %v2169_v50 }
 0x260   : > { %11116 = vst [vmem:[#allocation27_spill] sm:$0xff] %v8195_v43 }
 0x265   : > { %v8170_v23 = vpop.permute.xlu2 %2326 }
 0x266   : > { %2440 = vperm.xlu1 %5983, %v6165_v63  }
 0x267   : > { %5981 = vset.pattern.permute.xlu2 %v10891_v53 }
 0x268   : > { %2290 = vperm.xlu2 %5981, %v6166_v17  }
 0x26d   : > { %v8172_v7 = vpop.permute.xlu2 %2318 }
 0x26e   : > { %5988 = vset.pattern.permute.xlu1 %v11115_v19 }
 0x270   : > { %5984 = vset.pattern.permute.xlu2 %v10889_v47 }
 0x271   : > { %2352 = vperm.xlu2 %5984, %v6165_v63  }
 0x275   : > { %v8174_v37 = vpop.permute.xlu1 %2480 }
 0x279   : > { %5985 = vset.pattern.permute.xlu2 %v6387_v55  ;;  %v8179_v45 = vpop.permute.xlu2 %2384  ;;  %v2158_v55 = vperm.slane %v2155_v46, 2 }
 0x27a   : > { %2444 = vperm.xlu2 %5985, %v6166_v17  }
 0x27b   : > { %6126 = vrcp.f32 %v2158_v55  ;;  %vm2181_vm12 = vweird.f32 %v2158_v55  ;;  %v2187_v6 = vand.u32 2147483648, %v2158_v55  ;;  %v2185_v17 = vand.u32 2147483647, %v2158_v55 }
 0x27d   : > { %v2188_v9 = vor.u32 1.1754944e-38, %v2187_v6  ;;  %vm2186_vm15 = vcmp.eq.f32.partialorder %v2185_v17, 8.507059e+37 }
 0x27e   : > { %v8181_v40 = vpop.permute.xlu1 %2322  ;;  %v8191_v13 = vpop.permute.xlu0 %2306 }
 0x281   : > { %v6127_v30 = vpop.eup %6126 }
 0x282   : > { %5986 = vset.pattern.permute.xlu2 %v11115_v19  ;;  %v8183_v12 = vpop.permute.xlu2 %2314  ;;  %v2177_v24 = vmul.f32 %v6127_v30, %v2158_v55  ;;  %vm2182_vm13 = vweird.f32 %v6127_v30 }
 0x283   : > { %vm2183_vm14 = vmor %vm2181_vm12, %vm2182_vm13 }
 0x284   : > { %v2178_v58 = vsub.f32 1.0, %v2177_v24 }
 0x286   : > { %v8185_v22 = vpop.permute.xlu1 %2310  ;;  %v2179_v52 = vmul.f32 %v6127_v30, %v2178_v58 }
 0x288   : > { %v2180_v63 = vadd.f32 %v6127_v30, %v2179_v52 }
 0x28a   : > { %v2184_v3 = vsel %vm2183_vm14, %v6127_v30, %v2180_v63 }
 0x28b   : > { %v8187_v49 = vpop.permute.xlu2 %2376  ;;  %v8202_v14 = vsel %vm2186_vm15, %v2188_v9, %v2184_v3 }
 0x28c   : > { %11117 = vst [vmem:[#allocation28_spill] sm:$0xff] %v8202_v14 }
 0x28f   : > { %v8189_v62 = vpop.permute.xlu1 %2476 }
 0x293   : > { %v8200_v27 = vpop.permute.xlu0 %2294 }
 0x295   : > { %v8193_v26 = vpop.permute.xlu2 %2302 }
 0x299   : > { %v8198_v15 = vpop.permute.xlu1 %2380 }
 0x29c   : > { %v8210_v63 = vpop.permute.xlu0 %2472 }
 0x29e   : > { %v8204_v52 = vpop.permute.xlu2 %2468 }
 0x2a2   : > { %v8208_v30 = vpop.permute.xlu1 %2464 }
 0x2ac   : > { %v8215_v19 = vpop.permute.xlu1 %2368 }
 0x2b6   : > { %v2092_v4 = vpop.f32.mrf.mxu0 }
 0x2bb   : > { %v2112_v60 = vpop.f32.mrf.mxu1 }
 0x2bc   : > { %v2113_v20 = vadd.f32 %v2112_v60, %v2092_v4 }
 0x2bd   : > { %v2132_v54 = vpop.f32.mrf.mxu2 }
 0x2be   : > { %v2175_v46 = vmul.f32 %v8195_v43, %v2113_v20 }
 0x2c0   : > { %v2191_v24 = vmul.f32 2.0, %v2175_v46  ;;  %v2205_v55 = vmul.f32 %v2175_v46, %v2175_v46 }
 0x2c1   : > { %v2152_v18 = vpop.f32.mrf.mxu3 }
 0x2c2   : > { %v2193_v58 = vmul.f32 %v2191_v24, %v2113_v20  ;;  %v2153_v0 = vadd.f32 %v2152_v18, %v2132_v54  ;;  %v2209_v47 = vrot.slane %v2205_v55, 7 }
 0x2c4   : > { %v2197_v2 = vrot.slane %v2193_v58, 7  ;;  %v2190_v50 = vmul.f32 %v8202_v14, %v2153_v0  ;;  %v8212_v58 = vpop.permute.xlu2 %2372 }
 0x2c6   : > { %v2201_v4 = vsub.f32 %v2113_v20, %v2197_v2  ;;  %v2192_v6 = vmul.f32 2.0, %v2190_v50  ;;  %v2206_v3 = vmul.f32 %v2190_v50, %v2190_v50 }
 0x2c8   : > { %v2203_v60 = vmul.f32 %v2201_v4, %v8195_v43  ;;  %v2194_v17 = vmul.f32 %v2192_v6, %v2153_v0  ;;  %v2210_v20 = vrot.slane %v2206_v3, 7  ;;  %v8217_v4 = vpop.permute.xlu0 %2460  ;;  %v8221_v3 = vpop.permute.xlu1 %2298 }
 0x2ca   : > { %v2213_v24 = vadd.f32 %v2209_v47, %v2203_v60  ;;  %v2198_v9 = vrot.slane %v2194_v17, 7 }
 0x2cc   : > { %v2215_v54 = vadd.f32 1e-05, %v2213_v24  ;;  %v2202_v18 = vsub.f32 %v2153_v0, %v2198_v9  ;;  %v8219_v60 = vpop.permute.xlu2 %2456 }
 0x2cd   : > { %11118 = vst [vmem:[#allocation29_spill] sm:$0xff] %v8219_v60 }
 0x2ce   : > { %6128 = vrsqrt.f32 %v2215_v54  ;;  %v2204_v53 = vmul.f32 %v2202_v18, %v8202_v14  ;;  %vm2223_vm3 = vweird.f32 %v2215_v54 }
 0x2d0   : > { %v2214_v2 = vadd.f32 %v2210_v20, %v2204_v53  ;;  %v8223_v53 = vpop.permute.xlu0 %2448 }
 0x2d1   : > { %11119 = vst [vmem:[#allocation30_spill] sm:$0xff] %v8223_v53 }
 0x2d2   : > { %v2216_v55 = vadd.f32 1e-05, %v2214_v2  ;;  %v8225_v2 = vperm.slane %v2175_v46, 0 }
 0x2d4   : > { %v6129_v43 = vpop.eup %6128  ;;  %6130 = vrsqrt.f32 %v2216_v55  ;;  %v8235_v59 = vpop.permute.xlu2 %2364  ;;  %vm2233_vm6 = vweird.f32 %v2216_v55  ;;  %v2245_v46 = vsub.f32 %v7227_v31, %v8225_v2 }
 0x2d5   : > { %v2218_v10 = vmul.f32 %v6129_v43, %v2215_v54  ;;  %vm2224_vm1 = vweird.f32 %v6129_v43  ;;  %v2249_v54 = vsub.f32 %v7530_v35, %v8225_v2  ;;  %v2241_v35 = vsub.f32 %v7089_v57, %v8225_v2 }
 0x2d6   : > { %vm2225_vm4 = vmor %vm2223_vm3, %vm2224_vm1 }
 0x2d7   : > { %v2219_v47 = vmul.f32 %v6129_v43, %v2218_v10 }
 0x2d9   : > { %v2220_v6 = vmul.f32 0.5, %v2219_v47 }
 0x2da   : > { %v6131_v0 = vpop.eup %6130 }
 0x2db   : > { %v2221_v17 = vsub.f32 1.5, %v2220_v6  ;;  %v2228_v24 = vmul.f32 %v6131_v0, %v2216_v55  ;;  %vm2234_vm5 = vweird.f32 %v6131_v0  ;;  %v2255_v6 = vsub.f32 %v7946_v34, %v8225_v2 }
 0x2dc   : > { %vm2235_vm8 = vmor %vm2233_vm6, %vm2234_vm5  ;;  %v2259_v34 = vsub.f32 %v8078_v1, %v8225_v2 }
 0x2dd   : > { %v2222_v9 = vmul.f32 %v6129_v43, %v2221_v17  ;;  %v2229_v18 = vmul.f32 %v6131_v0, %v2228_v24  ;;  %v2247_v17 = vsub.f32 %v7383_v25, %v8225_v2  ;;  %v2239_v25 = vsub.f32 %v7112_v11, %v8225_v2  ;;  %v2393_v11 = vpop.permute.xlu0 %2392 }
 0x2df   : > { %v2226_v20 = vsel %vm2225_vm4, %v6129_v43, %v2222_v9  ;;  %v2230_v14 = vmul.f32 0.5, %v2229_v18  ;;  %v8237_v43 = vperm.slane %v2190_v50, 0  ;;  %v2257_v9 = vsub.f32 %v7991_v51, %v8225_v2 }
 0x2e0   : > { %v8227_v10 = vperm.slane %v2226_v20, 1  ;;  %v8259_v20 = vpop.permute.xlu1 %2360 }
 0x2e1   : > { %v2231_v47 = vsub.f32 1.5, %v2230_v14  ;;  %v2243_v14 = vsub.f32 %v7243_v39, %v8225_v2  ;;  %v2248_v51 = vsub.f32 %v7417_v32, %v8237_v43 }
 0x2e2   : > { %v2279_v55 = vmul.f32 %v8227_v10, %v2255_v6  ;;  %v2273_v39 = vmul.f32 %v8227_v10, %v2249_v54  ;;  %v2271_v18 = vmul.f32 %v8227_v10, %v2247_v17  ;;  %v2269_v57 = vmul.f32 %v8227_v10, %v2245_v46  ;;  %v11120_v54 = vld [vmem:[#allocation14_spill] sm:$0xff] }
 0x2e3   : > { %v2232_v24 = vmul.f32 %v6131_v0, %v2231_v47  ;;  %v2260_v47 = vsub.f32 %v8118_v29, %v8237_v43  ;;  %v2246_v17 = vsub.f32 %v11120_v54, %v8237_v43  ;;  %v2283_v31 = vmul.f32 %v8227_v10, %v2259_v34 }
 0x2e4   : > { %v2242_v29 = vsub.f32 %v11122_v38, %v8237_v43  ;;  %v2265_v5 = vmul.f32 %v8227_v10, %v2241_v35  ;;  %v2339_v6 = vmul.f32 %v8191_v13, %v2273_v39  ;;  %v2337_v54 = vmul.f32 %v8193_v26, %v2271_v18  ;;  %v2291_v18 = vpop.permute.xlu2 %2290 }
 0x2e5   : > { %v2236_v50 = vsel %vm2235_vm8, %v6131_v0, %v2232_v24  ;;  %v2250_v0 = vsub.f32 %v7536_v16, %v8237_v43  ;;  %v11121_v24 = vld [vmem:[#allocation15_spill] sm:$0xff]  ;;  %v2345_v16 = vmul.f32 %v8172_v7, %v2279_v55  ;;  %v2335_v28 = vmul.f32 %v8221_v3, %v2269_v57  ;;  %v2389_v38 = vpop.permute.xlu0 %2388 }
 0x2e6   : > { %v8256_v1 = vperm.slane %v2236_v50, 1  ;;  %v2244_v46 = vsub.f32 %v11121_v24, %v8237_v43  ;;  %v2267_v50 = vmul.f32 %v8227_v10, %v2243_v14  ;;  %v11123_v24 = vld [vmem:[#allocation22_spill] sm:$0xff]  ;;  %v2258_v55 = vsub.f32 %v8059_v42, %v8237_v43 }
 0x2e7   : > { %v2240_v14 = vsub.f32 %v11123_v24, %v8237_v43  ;;  %v2349_v39 = vmul.f32 %v8170_v23, %v2283_v31  ;;  %v2281_v57 = vmul.f32 %v8227_v10, %v2257_v9  ;;  %v8298_v42 = vmul.f32 %v2291_v18, %v2265_v5 }
 0x2e8   : > { %v2284_v32 = vmul.f32 %v8256_v1, %v2260_v47  ;;  %v2333_v35 = vmul.f32 %v8200_v27, %v2267_v50  ;;  %v2282_v47 = vmul.f32 %v8256_v1, %v2258_v55  ;;  %v8302_v41 = vadd.f32 %v8212_v58, %v2339_v6 }
 0x2e9   : > { %v8305_v50 = vadd.f32 %v8215_v19, %v2337_v54  ;;  %v2347_v9 = vmul.f32 %v8181_v40, %v2281_v57  ;;  %v2274_v31 = vmul.f32 %v8256_v1, %v2250_v0  ;;  %v2270_v5 = vmul.f32 %v8256_v1, %v2246_v17 }
 0x2ea   : > { %v2350_v34 = vmul.f32 %v8170_v23, %v2284_v32  ;;  %v2411_v32 = vadd.f32 %v8179_v45, %v2345_v16  ;;  %v8308_v23 = vadd.f32 %v8235_v59, %v2335_v28  ;;  %v2272_v16 = vmul.f32 %v8256_v1, %v2248_v51  ;;  %v2287_v28 = vpop.permute.xlu1 %2286 }
 0x2eb   : > { %v2268_v6 = vmul.f32 %v8256_v1, %v2244_v46  ;;  %v2415_v55 = vadd.f32 %v2393_v11, %v2349_v39  ;;  %v2266_v24 = vmul.f32 %v8256_v1, %v2242_v29  ;;  %v8319_v57 = vadd.f32 %v8259_v20, %v2333_v35 }
 0x2ec   : > { %v2416_v61 = vadd.f32 %v2393_v11, %v2350_v34  ;;  %v2263_v34 = vmul.f32 %v8227_v10, %v2239_v25  ;;  %v2348_v0 = vmul.f32 %v8181_v40, %v2282_v47  ;;  %v2413_v51 = vadd.f32 %v2389_v38, %v2347_v9 }
 0x2ed   : > { %v2499_v17 = vmul.f32 %v8210_v63, %v2411_v32  ;;  %v2493_v25 = vmul.f32 %v8217_v4, %v8302_v41  ;;  %v8327_v11 = vmul.f32 %v8219_v60, %v8305_v50  ;;  %v2264_v46 = vmul.f32 %v8256_v1, %v2240_v14 }
 0x2ee   : > { %v2504_v54 = vmul.f32 %v8174_v37, %v2416_v61  ;;  %vm2438_vm10 = vcmp.ge.f32.partialorder %v2416_v61, 0.0  ;;  %v2340_v29 = vmul.f32 %v8191_v13, %v2274_v31  ;;  %v2338_v35 = vmul.f32 %v8193_v26, %v2272_v16 }
 0x2ef   : > { %v2336_v39 = vmul.f32 %v8221_v3, %v2270_v5  ;;  %v2329_v48 = vmul.f32 %v2287_v28, %v2263_v34  ;;  %v2334_v40 = vmul.f32 %v8200_v27, %v2268_v6  ;;  %v8336_v9 = vmul.f32 %v2291_v18, %v2266_v24 }
 0x2f0   : > { %v8334_v47 = vsel %vm2438_vm10, %v2416_v61, %v2504_v54  ;;  %vm2437_vm11 = vcmp.ge.f32.partialorder %v2415_v55, 0.0  ;;  %v2414_v33 = vadd.f32 %v2389_v38, %v2348_v0  ;;  %v2501_v60 = vmul.f32 %v8189_v62, %v2413_v51 }
 0x2f1   : > { %11124 = vst [vmem:[#allocation14_spill] sm:$0xff] %v8334_v47  ;;  %v2503_v53 = vmul.f32 %v8174_v37, %v2415_v55  ;;  %vm2433_vm12 = vcmp.ge.f32.partialorder %v2411_v32, 0.0  ;;  %v8340_v14 = vmul.f32 %v2287_v28, %v2264_v46  ;;  %vm2435_vm13 = vcmp.ge.f32.partialorder %v2413_v51, 0.0 }
 0x2f2   : > { %v8342_v13 = vsel %vm2433_vm12, %v2411_v32, %v2499_v17  ;;  %v11126_v26 = vsub.f32 %v7685_v56, %v8225_v2  ;;  %v8349_v27 = vadd.f32 %v8212_v58, %v2340_v29  ;;  %v8352_v3 = vadd.f32 %v8215_v19, %v2338_v35  ;;  %v2453_v5 = vpop.permute.xlu1 %2452  ;;  %v2357_v17 = vpop.permute.xlu0 %2356 }
 0x2f3   : > { %11125 = vst [vmem:[#allocation15_spill] sm:$0xff] %v8342_v13  ;;  %v8355_v38 = vadd.f32 %v8235_v59, %v2336_v39  ;;  %v8357_v37 = vsel %vm2437_vm11, %v2415_v55, %v2503_v53  ;;  %2560 = vrot.lane.b32.xlu0 %v8342_v13, %s11128_s0  ;;  %v8362_v18 = vadd.f32 %v8259_v20, %v2334_v40  ;;  %v2353_v53 = vpop.permute.xlu2 %2352  ;;  %vm2427_vm14 = vcmp.ge.f32.partialorder %v8302_v41, 0.0 }
 0x2f4   : > { %v2277_v61 = vmul.f32 %v8227_v10, %v11126_v26  ;;  %11127 = vst [vmem:[#allocation21_spill] sm:$0xff] %v8357_v37  ;;  %2564 = vrot.lane.b32.xlu1 %v8357_v37, %s11128_s0  ;;  %v2542_v56 = vpack.c.bf16 %v8357_v37, %v8357_v37  ;;  %v2543_v59 = vpack.c.bf16 %v8334_v47, %v8334_v47  ;;  %vm2436_vm15 = vcmp.ge.f32.partialorder %v2414_v33, 0.0 }
 0x2f5   : > { %v2502_v58 = vmul.f32 %v8189_v62, %v2414_v33  ;;  %v8372_v24 = vsel %vm2435_vm13, %v2413_v51, %v2501_v60  ;;  %v11130_v20 = vsub.f32 %v7648_v21, %v8225_v2  ;;  %v11131_v31 = vsub.f32 %v8041_v44, %v8237_v43 }
 0x2f6   : > { %v2343_v19 = vmul.f32 %v8183_v12, %v2277_v61  ;;  %11129 = vst [vmem:[#allocation22_spill] sm:$0xff] %v8372_v24  ;;  %v2753_v6 = vsel %vm2677_vm9, %v2542_v56, 0  ;;  %v2756_v62 = vsel %vm2677_vm9, %v2543_v59, 0  ;;  %v8386_v60 = vadd.f32 %v2353_v53, %v2329_v48  ;;  %v11141_v61 = vld [vmem:[#allocation29_spill] sm:$0xff] }
 0x2f7   : > { %v2275_v32 = vmul.f32 %v8227_v10, %v11130_v20  ;;  %v2280_v16 = vmul.f32 %v8256_v1, %v11131_v31  ;;  %2760 = vmatpush.bf16.msrb.mxu2 %v2753_v6  ;;  %2783 = vmatpush.bf16.msrb.mxu3 %v2756_v62  ;;  %vm2423_vm1 = vcmp.ge.f32.partialorder %v8308_v23, 0.0  ;;  %v11132_v10 = vsub.f32 %v7668_v36, %v8237_v43 }
 0x2f8   : > { %v2409_v34 = vadd.f32 %v8198_v15, %v2343_v19  ;;  %v11133_v48 = vsub.f32 %v7872_v8, %v8237_v43  ;;  %v2540_v28 = vpack.c.bf16 %v8372_v24, %v8342_v13  ;;  %v8410_v36 = vsel %vm2436_vm15, %v2414_v33, %v2502_v58 }
 0x2f9   : > { %v2341_v21 = vmul.f32 %v8185_v22, %v2275_v32  ;;  %v2346_v44 = vmul.f32 %v8172_v7, %v2280_v16  ;;  %v2276_v55 = vmul.f32 %v8256_v1, %v11132_v10  ;;  %v8403_v7 = vsel %vm2427_vm14, %v8302_v41, %v2493_v25  ;;  %11136 = vst [vmem:[#allocation33_spill] sm:$0xff] %v8410_v36 }
 0x2fa   : > { %vm2431_vm3 = vcmp.ge.f32.partialorder %v2409_v34, 0.0  ;;  %v2497_v2 = vmul.f32 %v8204_v52, %v2409_v34  ;;  %v2278_v54 = vmul.f32 %v8256_v1, %v11133_v48  ;;  %11134 = vst [vmem:[#allocation31_spill] sm:$0xff] %v8403_v7  ;;  %v2494_v1 = vmul.f32 %v8217_v4, %v8349_v27  ;;  %v2441_v58 = vpop.permute.xlu1 %2440  ;;  %v6170_v48 = vld [vmem:[%s11048_s1 + $0x1f8] sm:$0xff] }
 0x2fb   : > { %v2407_v0 = vadd.f32 %v8187_v49, %v2341_v21  ;;  %v2412_v51 = vadd.f32 %v8179_v45, %v2346_v44  ;;  %v2342_v8 = vmul.f32 %v8185_v22, %v2276_v55  ;;  %2761 = vmatpush.bf16.msrb.mxu2 %v2540_v28  ;;  %2554 = vrot.lane.b32.xlu0 %v8403_v7, %s11128_s0  ;;  %vm2425_vm6 = vcmp.ge.f32.partialorder %v8305_v50, 0.0  ;;  %v2445_v39 = vpop.permute.xlu2 %2444  ;;  %v6169_v55 = vld [vmem:[%s11048_s1 + $0xe8] sm:$0xff] }
 0x2fc   : > { %v8407_v46 = vsel %vm2431_vm3, %v2409_v34, %v2497_v2  ;;  %v2344_v43 = vmul.f32 %v8183_v12, %v2278_v54  ;;  %2562 = vrot.lane.b32.xlu1 %v8372_v24, %s11128_s0  ;;  %v2489_v22 = vmul.f32 %v2453_v5, %v8308_v23  ;;  %v2397_v25 = vadd.f32 %v2357_v17, %v8298_v42  ;;  %v6168_v2 = vld [vmem:[%s11048_s1 + $0xf8] sm:$0xff]  ;;  %v6172_v28 = vld [vmem:[%s11048_s1 + $0x1e8] sm:$0xff] }
 0x2fd   : > { %11135 = vst [vmem:[#allocation32_spill] sm:$0xff] %v8407_v46  ;;  %2558 = vrot.lane.b32.xlu2 %v8407_v46, %s11128_s0  ;;  %vm2429_vm4 = vcmp.ge.f32.partialorder %v2407_v0, 0.0  ;;  %v2495_v41 = vmul.f32 %v8208_v30, %v2407_v0  ;;  %vm2434_vm5 = vcmp.ge.f32.partialorder %v2412_v51, 0.0  ;;  %v2500_v45 = vmul.f32 %v8210_v63, %v2412_v51  ;;  %v6171_v54 = vld [vmem:[%s11048_s1 + $0xd8] sm:$0xff] }
 0x2fe   : > { %v2408_v33 = vadd.f32 %v8187_v49, %v2342_v8  ;;  %v2410_v12 = vadd.f32 %v8198_v15, %v2344_v43  ;;  %v8439_v49 = vsel %vm2425_vm6, %v8305_v50, %v8327_v11  ;;  %v11140_v15 = vld [vmem:[#allocation30_spill] sm:$0xff]  ;;  %v2492_v56 = vmul.f32 %v11141_v61, %v8352_v3  ;;  %v6176_v8 = vld [vmem:[%s11048_s1 + $0x1c8] sm:$0xff] }
 0x2ff   : > { %v8429_v63 = vsel %vm2429_vm4, %v2407_v0, %v2495_v41  ;;  %v8431_v29 = vsel %vm2434_vm5, %v2412_v51, %v2500_v45  ;;  %11139 = vst [vmem:[#allocation36_spill] sm:$0xff] %v8439_v49  ;;  %v2487_v42 = vmul.f32 %v11140_v15, %v8319_v57  ;;  %v2488_v19 = vmul.f32 %v11140_v15, %v8362_v18  ;;  %v6173_v0 = vld [vmem:[%s11048_s1 + $0xc8] sm:$0xff]  ;;  %v6174_v51 = vld [vmem:[%s11048_s1 + $0x1d8] sm:$0xff] }
 0x300   : > { %11137 = vst [vmem:[#allocation34_spill] sm:$0xff] %v8429_v63  ;;  %v2538_v4 = vpack.c.bf16 %v8407_v46, %v8429_v63  ;;  %v2541_v35 = vpack.c.bf16 %v8410_v36, %v8431_v29  ;;  %vm2430_vm8 = vcmp.ge.f32.partialorder %v2408_v33, 0.0  ;;  %vm2432_vm10 = vcmp.ge.f32.partialorder %v2410_v12, 0.0  ;;  %v6177_v43 = vld [vmem:[%s11048_s1 + $0xa8] sm:$0xff]  ;;  %v6178_v41 = vld [vmem:[%s11048_s1 + $0x1b8] sm:$0xff] }
 0x301   : > { %11138 = vst [vmem:[#allocation35_spill] sm:$0xff] %v8431_v29  ;;  %v2496_v40 = vmul.f32 %v8208_v30, %v2408_v33  ;;  %v2498_v26 = vmul.f32 %v8204_v52, %v2410_v12  ;;  %v2396_v59 = vadd.f32 %v2353_v53, %v8340_v14  ;;  %vm2421_vm11 = vcmp.ge.f32.partialorder %v8319_v57, 0.0  ;;  %v6179_v45 = vld [vmem:[%s11048_s1 + $0x98] sm:$0xff]  ;;  %v6188_v15 = vld [vmem:[%s11048_s1 + $0x168] sm:$0xff] }
 0x302   : > { %2762 = vmatpush.bf16.msrb.mxu2 %v2538_v4  ;;  %2784 = vmatpush.bf16.msrb.mxu3 %v2541_v35  ;;  %vm2426_vm12 = vcmp.ge.f32.partialorder %v8352_v3, 0.0  ;;  %vm2428_vm13 = vcmp.ge.f32.partialorder %v8349_v27, 0.0  ;;  %vm2417_vm14 = vcmp.ge.f32.partialorder %v8386_v60, 0.0  ;;  %v2490_v52 = vmul.f32 %v2453_v5, %v8355_v38  ;;  %v6185_v4 = vld [vmem:[%s11048_s1 + $0x68] sm:$0xff]  ;;  %v6186_v35 = vld [vmem:[%s11048_s1 + $0x178] sm:$0xff] }
 0x303   : > { %v8451_v50 = vsel %vm2430_vm8, %v2408_v33, %v2496_v40  ;;  %v8453_v11 = vsel %vm2432_vm10, %v2410_v12, %v2498_v26  ;;  %v2485_v30 = vmul.f32 %v2445_v39, %v2397_v25  ;;  %v2536_v14 = vpack.c.bf16 %v8403_v7, %v8439_v49  ;;  %v6181_v33 = vld [vmem:[%s11048_s1 + $0x88] sm:$0xff]  ;;  %v6182_v12 = vld [vmem:[%s11048_s1 + $0x198] sm:$0xff]  ;;  %v11155_v26 = vld [vmem:[#allocation17_spill] sm:$0xff] }
 0x304   : > { %11142 = vst [vmem:[#allocation30_spill] sm:$0xff] %v8451_v50  ;;  %v2483_v53 = vmul.f32 %v2441_v58, %v8386_v60  ;;  %v8465_v20 = vsel %vm2421_vm11, %v8319_v57, %v2487_v42  ;;  %v2539_v32 = vpack.c.bf16 %v8453_v11, %v8451_v50  ;;  %v8472_v31 = vsel %vm2423_vm1, %v8308_v23, %v2489_v22  ;;  %v6183_v22 = vld [vmem:[%s11048_s1 + $0x78] sm:$0xff]  ;;  %v6190_v61 = vld [vmem:[%s11048_s1 + $0x148] sm:$0xff] }
 0x305   : > { %11143 = vst [vmem:[#allocation29_spill] sm:$0xff] %v8453_v11  ;;  %2552 = vrot.lane.b32.xlu2 %v8439_v49, %s11128_s0  ;;  %v2398_v16 = vadd.f32 %v2357_v17, %v8336_v9  ;;  %vm2419_vm15 = vcmp.ge.f32.partialorder %v2397_v25, 0.0  ;;  %2556 = vrot.lane.b32.xlu1 %v8429_v63, %s11128_s0  ;;  %v8478_v5 = vsel %vm2426_vm12, %v8352_v3, %v2492_v56  ;;  %vm2424_vm3 = vcmp.ge.f32.partialorder %v8355_v38, 0.0  ;;  %v6175_v17 = vld [vmem:[%s11048_s1 + $0xb8] sm:$0xff]  ;;  %v11156_v56 = vld [vmem:[#allocation20_spill] sm:$0xff] }
 0x306   : > { %11144 = vst [vmem:[#allocation37_spill] sm:$0xff] %v8465_v20  ;;  %2763 = vmatpush.bf16.msrb.mxu2 %v2536_v14  ;;  %v8481_v57 = vsel %vm2428_vm13, %v8349_v27, %v2494_v1  ;;  %vm2422_vm4 = vcmp.ge.f32.partialorder %v8362_v18, 0.0  ;;  %2548 = vrot.lane.b32.xlu0 %v8465_v20, %s11128_s0  ;;  %v2534_v23 = vpack.c.bf16 %v8472_v31, %v8465_v20  ;;  %vm2418_vm1 = vcmp.ge.f32.partialorder %v2396_v59, 0.0  ;;  %v6180_v1 = vld [vmem:[%s11048_s1 + $0x1a8] sm:$0xff]  ;;  %v11154_v42 = vld [vmem:[#allocation18_spill] sm:$0xff] }
 0x307   : > { %11145 = vst [vmem:[#allocation38_spill] sm:$0xff] %v8472_v31  ;;  %2785 = vmatpush.bf16.msrb.mxu3 %v2539_v32  ;;  %v2537_v9 = vpack.c.bf16 %v8481_v57, %v8478_v5  ;;  %v8494_v3 = vsel %vm2417_vm14, %v8386_v60, %v2483_v53  ;;  %v8496_v27 = vsel %vm2419_vm15, %v2397_v25, %v2485_v30  ;;  %vm2420_vm5 = vcmp.ge.f32.partialorder %v2398_v16, 0.0  ;;  %v6184_v25 = vld [vmem:[%s11048_s1 + $0x188] sm:$0xff]  ;;  %v6189_v40 = vld [vmem:[%s11048_s1 + $0x158] sm:$0xff] }
 0x308   : > { %11146 = vst [vmem:[#allocation39_spill] sm:$0xff] %v8478_v5  ;;  %v2486_v34 = vmul.f32 %v2445_v39, %v2398_v16  ;;  %v2484_v6 = vmul.f32 %v2441_v58, %v2396_v59  ;;  %v8499_v62 = vsel %vm2422_vm4, %v8362_v18, %v2488_v19  ;;  %v8502_v21 = vsel %vm2424_vm3, %v8355_v38, %v2490_v52  ;;  %v6187_v39 = vld [vmem:[%s11048_s1 + $0x58] sm:$0xff]  ;;  %v11157_v19 = vld [vmem:[#allocation16_spill] sm:$0xff]  ;;  %v11159_v58 = vld [vmem:[#allocation19_spill] sm:$0xff] }
 0x309   : > { %11147 = vst [vmem:[#allocation40_spill] sm:$0xff] %v8481_v57  ;;  %v2532_v44 = vpack.c.bf16 %v8496_v27, %v8494_v3  ;;  %v2535_v60 = vpack.c.bf16 %v8502_v21, %v8499_v62  ;;  %v11160_v52 = vld [vmem:[#allocation25_spill] sm:$0xff]  ;;  %v11161_v30 = vld [vmem:[#allocation24_spill] sm:$0xff]  ;;  %v11162_v14 = vld [vmem:[#allocation26_spill] sm:$0xff]  ;;  %vm2667_vm6 = vcmask 719872   ;;  %v11186_v37 = vmov 0  }
 0x30a   : > { %11148 = vst [vmem:[#allocation41_spill] sm:$0xff] %v8494_v3  ;;  %2764 = vmatpush.bf16.msrb.mxu2 %v2534_v23  ;;  %v8512_v18 = vsel %vm2418_vm1, %v2396_v59, %v2484_v6  ;;  %v8514_v38 = vsel %vm2420_vm5, %v2398_v16, %v2486_v34  ;;  %v11158_v59 = vld [vmem:[#allocation23_spill] sm:$0xff]  ;;  %v6316_v34 = vld [vmem:[%s11048_s1 + $0x118] sm:$0xff] }
 0x30b   : > { %11149 = vst [vmem:[#allocation42_spill] sm:$0xff] %v8496_v27  ;;  %2786 = vmatpush.bf16.msrb.mxu3 %v2537_v9  ;;  %v2533_v10 = vpack.c.bf16 %v8514_v38, %v8512_v18 }
 0x30c   : > { %11150 = vst [vmem:[#allocation43_spill] sm:$0xff] %v8499_v62 }
 0x30d   : > { %11151 = vst [vmem:[#allocation44_spill] sm:$0xff] %v8502_v21  ;;  %2586 = vrot.lane.b32.xlu2 %v8334_v47, %s11128_s0  ;;  %2550 = vrot.lane.b32.xlu1 %v8472_v31, %s11128_s0  ;;  %v8946_v47 = vld [vmem:[%s11048_s1 + $0x100] sm:$0xff] }
 0x30e   : > { %2765 = vmatpush.bf16.msrb.mxu2 %v2532_v44  ;;  %11152 = vst [vmem:[#allocation45_spill] sm:$0xff] %v8512_v18  ;;  %2584 = vrot.lane.b32.xlu0 %v8410_v36, %s11128_s0 }
 0x30f   : > { %11153 = vst [vmem:[#allocation46_spill] sm:$0xff] %v8514_v38  ;;  %2787 = vmatpush.bf16.msrb.mxu3 %v2535_v60  ;;  %v11164_v60 = vld [vmem:[#allocation12_spill] sm:$0xff] }
 0x310   : > { %11185 = vst [vmem:[#allocation50_spill] sm:$0xff] %v8946_v47 }
 0x312   : > { %2933 = vmatpush.msra.mxu2 %v6168_v2 }
 0x313   : > { %2788 = vmatpush.bf16.msrb.mxu3 %v2533_v10  ;;  %v11165_v10 = vld [vmem:[#allocation13_spill] sm:$0xff] }
 0x314   : > { %2934 = vmatpush.msra.mxu2 %v6169_v55 }
 0x315   : > { %2582 = vrot.lane.b32.xlu2 %v8431_v29, %s11128_s0  ;;  %2544 = vrot.lane.b32.xlu1 %v8494_v3, %s11128_s0 }
 0x316   : > { %2935 = vmatpush.msra.mxu2 %v6171_v54  ;;  %2578 = vrot.lane.b32.xlu0 %v8451_v50, %s11128_s0 }
 0x317   : > { %2953 = vmatpush.msra.mxu3 %v6170_v48 }
 0x318   : > { %2936 = vmatpush.msra.mxu2 %v6173_v0 }
 0x319   : > { %2954 = vmatpush.msra.mxu3 %v6172_v28 }
 0x31a   : > { %2937 = vmatpush.msra.mxu2 %v6175_v17 }
 0x31b   : > { %2955 = vmatpush.msra.mxu3 %v6174_v51 }
 0x31c   : > { %2938 = vmatpush.msra.mxu2 %v6177_v43 }
 0x31d   : > { %2956 = vmatpush.msra.mxu3 %v6176_v8  ;;  %2576 = vrot.lane.b32.xlu2 %v8481_v57, %s11128_s0 }
 0x31e   : > { %2939 = vmatpush.msra.mxu2 %v6179_v45  ;;  %2580 = vrot.lane.b32.xlu1 %v8453_v11, %s11128_s0 }
 0x31f   : > { %2957 = vmatpush.msra.mxu3 %v6178_v41  ;;  %2572 = vrot.lane.b32.xlu0 %v8502_v21, %s11128_s0  ;;  %v5875_v41 = vld [vmem:[%s11166_s8] sm:$0xff] }
 0x320   : > { %2940 = vmatpush.msra.mxu2 %v6181_v33  ;;  %5665 = vmatmul.msk.bf16.vlgmr.msrb.gmra.mxu3 %vm2667_vm6, %v5875_v41 }
 0x321   : > { %2958 = vmatpush.msra.mxu3 %v6180_v1  ;;  %5662 = vmatmul.msk.bf16.vlgmr.msrb.gmra.mxu2 %vm2667_vm6, %v5875_v41 }
 0x322   : > { %2941 = vmatpush.msra.mxu2 %v6183_v22 }
 0x323   : > { %2959 = vmatpush.msra.mxu3 %v6182_v12 }
 0x324   : > { %2942 = vmatpush.msra.mxu2 %v6185_v4 }
 0x325   : > { %2960 = vmatpush.msra.mxu3 %v6184_v25  ;;  %2570 = vrot.lane.b32.xlu2 %v8499_v62, %s11128_s0 }
 0x326   : > { %2943 = vmatpush.msra.mxu2 %v6187_v39  ;;  %2574 = vrot.lane.b32.xlu1 %v8478_v5, %s11128_s0 }
 0x327   : > { %2961 = vmatpush.msra.mxu3 %v6186_v35  ;;  %2566 = vrot.lane.b32.xlu0 %v8512_v18, %s11128_s0 }
 0x328   : > { %2944 = vmatpush.msra.mxu2 %v11154_v42 }
 0x329   : > { %2962 = vmatpush.msra.mxu3 %v6188_v15 }
 0x32a   : > { %2945 = vmatpush.msra.mxu2 %v11155_v26 }
 0x32b   : > { %2963 = vmatpush.msra.mxu3 %v6189_v40 }
 0x32c   : > { %2946 = vmatpush.msra.mxu2 %v11156_v56 }
 0x32d   : > { %2964 = vmatpush.msra.mxu3 %v6190_v61  ;;  %2546 = vrot.lane.b32.xlu2 %v8496_v27, %s11128_s0 }
 0x32e   : > { %2947 = vmatpush.msra.mxu2 %v11158_v59  ;;  %2568 = vrot.lane.b32.xlu1 %v8514_v38, %s11128_s0 }
 0x32f   : > { %2965 = vmatpush.msra.mxu3 %v11157_v19  ;;  %v5876_v19 = vld [vmem:[%s11166_s8 + $0x8] sm:$0xff] }
 0x330   : > { %2948 = vmatpush.msra.mxu2 %v11160_v52  ;;  %5666 = vmatmul.msk.bf16.gmra.mxu3 %vm2667_vm6, %v5876_v19 }
 0x331   : > { %2966 = vmatpush.msra.mxu3 %v11159_v58  ;;  %5663 = vmatmul.msk.bf16.gmra.mxu2 %vm2667_vm6, %v5876_v19 }
 0x333   : > { %2967 = vmatpush.msra.mxu3 %v11161_v30 }
 0x335   : > { %2968 = vmatpush.msra.mxu3 %v11162_v14 }
 0x357   : > { %v2559_v53 = vpop.permute.xlu2 %2558 }
 0x35f   : > { %v8620_v32 = vpop.permute.xlu2 %2552 }
 0x365   : > { %v2561_v16 = vpop.permute.xlu0 %2560 }
 0x366   : > { %v2565_v9 = vpop.permute.xlu1 %2564 }
 0x367   : > { %v2587_v23 = vpop.permute.xlu2 %2586 }
 0x368   : > { %v2598_v6 = vsel %vm747_vm2, %v2565_v9, %v2587_v23  ;;  %v2609_v44 = vsel %vm747_vm2, %v2587_v23, %v2565_v9 }
 0x369   : > { %v2630_v2 = vmul.f32 %v2609_v44, %v11164_v60  ;;  %v2631_v55 = vmul.f32 %v2598_v6, %v11165_v10 }
 0x36b   : > { %v2642_v48 = vpack.c.bf16 %v2630_v2, %v2630_v2  ;;  %v2643_v54 = vpack.c.bf16 %v2631_v55, %v2631_v55 }
 0x36d   : > { %v2679_v28 = vsel %vm2677_vm9, %v2642_v48, 0  ;;  %v2682_v0 = vsel %vm2677_vm9, %v2643_v54, 0  ;;  %v2555_v17 = vpop.permute.xlu0 %2554 }
 0x36e   : > { %2686 = vmatpush.bf16.msrb.mxu0 %v2679_v28  ;;  %2709 = vmatpush.bf16.msrb.mxu1 %v2682_v0  ;;  %v2563_v51 = vpop.permute.xlu1 %2562 }
 0x36f   : > { %v2583_v45 = vpop.permute.xlu2 %2582 }
 0x370   : > { %v2596_v1 = vsel %vm747_vm2, %v2561_v16, %v2583_v45  ;;  %v2607_v33 = vsel %vm747_vm2, %v2583_v45, %v2561_v16 }
 0x371   : > { %v2626_v35 = vmul.f32 %v2607_v33, %v11164_v60  ;;  %v2627_v39 = vmul.f32 %v2596_v1, %v11165_v10  ;;  %v2648_v1 = vld [vmem:[%s11166_s8 + $0x10] sm:$0xf] }
 0x372   : > { %v8689_v33 = vld [vmem:[%s10840_s10 + $0x10] sm:$0xff] }
 0x373   : > { %2816 = vperm.xlu1 %5988, %v8689_v33  }
 0x377   : > { %v2557_v8 = vpop.permute.xlu1 %2556  ;;  %v2577_v59 = vpop.permute.xlu2 %2576 }
 0x378   : > { %v2549_v43 = vpop.permute.xlu0 %2548  ;;  %v2593_v28 = vsel %vm747_vm2, %v2555_v17, %v2577_v59  ;;  %v2604_v0 = vsel %vm747_vm2, %v2577_v59, %v2555_v17  ;;  %v8684_v17 = vld [vmem:[%s10840_s10 + $0x8] sm:$0xff] }
 0x379   : > { %2811 = vperm.xlu0 %5987, %v8684_v17  }
 0x37f   : > { %v2551_v12 = vpop.permute.xlu1 %2550  ;;  %v2571_v54 = vpop.permute.xlu2 %2570 }
 0x380   : > { %v2585_v22 = vpop.permute.xlu0 %2584 }
 0x381   : > { %v2597_v25 = vsel %vm747_vm2, %v2563_v51, %v2585_v22  ;;  %v2608_v4 = vsel %vm747_vm2, %v2585_v22, %v2563_v51  ;;  %v2621_v22 = vmul.f32 %v2593_v28, %v11165_v10 }
 0x382   : > { %v2628_v15 = vmul.f32 %v2608_v4, %v11164_v60  ;;  %v2629_v42 = vmul.f32 %v2597_v25, %v11165_v10  ;;  %v2590_v4 = vsel %vm747_vm2, %v2549_v43, %v2571_v54 }
 0x384   : > { %v2640_v40 = vpack.c.bf16 %v2628_v15, %v2626_v35  ;;  %v2641_v26 = vpack.c.bf16 %v2629_v42, %v2627_v39  ;;  %v2601_v35 = vsel %vm747_vm2, %v2571_v54, %v2549_v43  ;;  %v2739_v15 = vunpack.c.l.b16 %v2648_v1  ;;  %v8755_v1 = vld [vmem:[%s11048_s1 + $0x1e0] sm:$0xff] }
 0x385   : > { %v2614_v59 = vmul.f32 %v2601_v35, %v11164_v60  ;;  %v8790_v35 = vld [vmem:[%s11048_s1 + $0xb0] sm:$0xff] }
 0x386   : > { %2687 = vmatpush.bf16.msrb.mxu0 %v2640_v40  ;;  %2710 = vmatpush.bf16.msrb.mxu1 %v2641_v26  ;;  %v2742_v19 = vpack.c.b16 %v2739_v15, %v2739_v15  ;;  %v11168_v15 = vmov 3  }
 0x387   : > { %v2545_v61 = vpop.permute.xlu1 %2544 }
 0x388   : > { %v2579_v56 = vpop.permute.xlu0 %2578  ;;  %5664 = vmatmul.msk.bf16.gmra.mxu2 %vm2667_vm6, %v2742_v19  ;;  %5667 = vmatmul.msk.bf16.gmra.mxu3 %vm2667_vm6, %v2742_v19  ;;  %v8826_v19 = vld [vmem:[%s11048_s1 + $0x190] sm:$0xff] }
 0x389   : > { %v2594_v58 = vsel %vm747_vm2, %v2557_v8, %v2579_v56  ;;  %v2605_v52 = vsel %vm747_vm2, %v2579_v56, %v2557_v8 }
 0x38a   : > { %v2622_v9 = vmul.f32 %v2605_v52, %v11164_v60  ;;  %v2623_v6 = vmul.f32 %v2594_v58, %v11165_v10  ;;  %v2615_v58 = vmul.f32 %v2590_v4, %v11165_v10  ;;  %v8784_v4 = vld [vmem:[%s11048_s1 + $0x1c0] sm:$0xff] }
 0x390   : > { %v2581_v30 = vpop.permute.xlu1 %2580 }
 0x391   : > { %v2573_v14 = vpop.permute.xlu0 %2572  ;;  %v2595_v16 = vsel %vm747_vm2, %v2559_v53, %v2581_v30  ;;  %v2606_v23 = vsel %vm747_vm2, %v2581_v30, %v2559_v53  ;;  %v2547_v30 = vpop.permute.xlu2 %2546 }
 0x392   : > { %v2624_v44 = vmul.f32 %v2606_v23, %v11164_v60  ;;  %v2625_v2 = vmul.f32 %v2595_v16, %v11165_v10  ;;  %v2591_v51 = vsel %vm747_vm2, %v2551_v12, %v2573_v14  ;;  %v2602_v8 = vsel %vm747_vm2, %v2573_v14, %v2551_v12 }
 0x393   : > { %v2620_v12 = vmul.f32 %v2604_v0, %v11164_v60  ;;  %v2616_v42 = vmul.f32 %v2602_v8, %v11164_v60  ;;  %v2617_v40 = vmul.f32 %v2591_v51, %v11165_v10  ;;  %v5877_v0 = vld [vmem:[%s10839_s9] sm:$0xff]  ;;  %v8732_v51 = vld [vmem:[%s11048_s1 + $0x1f0] sm:$0xff] }
 0x394   : > { %v2638_v55 = vpack.c.bf16 %v2624_v44, %v2622_v9  ;;  %v2639_v48 = vpack.c.bf16 %v2625_v2, %v2623_v6  ;;  %v8740_v8 = vld [vmem:[%s10840_s10] sm:$0xff] }
 0x395   : > { %v2634_v16 = vpack.c.bf16 %v2616_v42, %v2614_v59  ;;  %v2635_v23 = vpack.c.bf16 %v2617_v40, %v2615_v58  ;;  %2806 = vperm.xlu2 %5986, %v8740_v8   ;;  %v8804_v42 = vld [vmem:[%s11048_s1 + $0xa0] sm:$0xff] }
 0x396   : > { %2688 = vmatpush.bf16.msrb.mxu0 %v2638_v55  ;;  %2711 = vmatpush.bf16.msrb.mxu1 %v2639_v48  ;;  %v11167_v48 = vmov 2   ;;  %v8810_v40 = vld [vmem:[%s11048_s1 + $0x1a0] sm:$0xff] }
 0x397   : > { %5990 = vset.pattern.permute.xlu0 %v11167_v48  ;;  %v8832_v59 = vld [vmem:[%s11048_s1 + $0x80] sm:$0xff] }
 0x398   : > { %v2575_v53 = vpop.permute.xlu1 %2574  ;;  %v8838_v58 = vld [vmem:[%s11048_s1 + $0x180] sm:$0xff] }
 0x399   : > { %v2592_v41 = vsel %vm747_vm2, %v8620_v32, %v2575_v53  ;;  %v2603_v45 = vsel %vm747_vm2, %v2575_v53, %v8620_v32  ;;  %v2567_v39 = vpop.permute.xlu0 %2566  ;;  %v8726_v53 = vld [vmem:[%s11048_s1 + $0xf0] sm:$0xff] }
 0x39a   : > { %v2618_v32 = vmul.f32 %v2603_v45, %v11164_v60  ;;  %v2619_v25 = vmul.f32 %v2592_v41, %v11165_v10  ;;  %v2599_v52 = vsel %vm747_vm2, %v2567_v39, %v2545_v61  ;;  %v2588_v43 = vsel %vm747_vm2, %v2545_v61, %v2567_v39  ;;  %v2531_v41 = vld [vmem:[%s10840_s10 + $0x20] sm:$0xff]  ;;  %v8796_v39 = vld [vmem:[%s11048_s1 + $0x1b0] sm:$0xff] }
 0x39b   : > { %v2610_v9 = vmul.f32 %v2599_v52, %v11164_v60  ;;  %v2611_v2 = vmul.f32 %v2588_v43, %v11165_v10  ;;  %2826 = vperm.xlu1 %5988, %v2531_v41   ;;  %v8749_v45 = vld [vmem:[%s11048_s1 + $0xe0] sm:$0xff]  ;;  %3126 = vperm.xlu0 %5990, %v2531_v41   ;;  %v8846_v52 = vld [vmem:[%s11048_s1 + $0x70] sm:$0xff] }
 0x39c   : > { %v2636_v26 = vpack.c.bf16 %v2620_v12, %v2618_v32  ;;  %v2637_v56 = vpack.c.bf16 %v2621_v22, %v2619_v25  ;;  %v8761_v12 = vld [vmem:[%s11048_s1 + $0xd0] sm:$0xff]  ;;  %v8773_v32 = vld [vmem:[%s10840_s10 + $0x18] sm:$0xff]  ;;  %v8778_v25 = vld [vmem:[%s11048_s1 + $0xc0] sm:$0xff]  ;;  %11169 = vst [vmem:[#allocation18_spill] sm:$0xff] %v8846_v52 }
 0x39d   : > { %v8767_v22 = vld [vmem:[%s11048_s1 + $0x1d0] sm:$0xff]  ;;  %2821 = vperm.xlu2 %5986, %v8773_v32  }
 0x39e   : > { %2689 = vmatpush.bf16.msrb.mxu0 %v2636_v26  ;;  %2712 = vmatpush.bf16.msrb.mxu1 %v2637_v56  ;;  %v5878_v26 = vld [vmem:[%s10839_s9 + $0x8] sm:$0xff]  ;;  %v8820_v56 = vld [vmem:[%s11048_s1 + $0x90] sm:$0xff] }
 0x39f   : > { %v8852_v43 = vld [vmem:[%s11048_s1 + $0x170] sm:$0xff] }
 0x3a0   : > { %v2569_v14 = vpop.permute.xlu1 %2568  ;;  %11170 = vst [vmem:[#allocation17_spill] sm:$0xff] %v8852_v43 }
 0x3a1   : > { %v2589_v6 = vsel %vm747_vm2, %v2547_v30, %v2569_v14  ;;  %v2600_v44 = vsel %vm747_vm2, %v2569_v14, %v2547_v30  ;;  %v11171_v30 = vmov 1   ;;  %v8859_v14 = vld [vmem:[%s11048_s1 + $0x60] sm:$0xff] }
 0x3a2   : > { %v2612_v61 = vmul.f32 %v2600_v44, %v11164_v60  ;;  %v2613_v55 = vmul.f32 %v2589_v6, %v11165_v10  ;;  %2690 = vmatpush.bf16.msrb.mxu0 %v2634_v16  ;;  %2713 = vmatpush.bf16.msrb.mxu1 %v2635_v23  ;;  %11172 = vst [vmem:[#allocation20_spill] sm:$0xff] %v8859_v14  ;;  %v8865_v16 = vld [vmem:[%s11048_s1 + $0x160] sm:$0xff]  ;;  %v2653_v23 = vld [vmem:[%s10839_s9 + $0x10] sm:$0xf] }
 0x3a3   : > { %5991 = vset.pattern.permute.xlu1 %v11168_v15  ;;  %3122 = vperm.xlu0 %5990, %v8773_v32   ;;  %11173 = vst [vmem:[#allocation16_spill] sm:$0xff] %v8865_v16  ;;  %v8881_v6 = vld [vmem:[%s11048_s1 + $0x150] sm:$0xff]  ;;  %v8889_v44 = vld [vmem:[%s11048_s1 + $0x40] sm:$0xff] }
 0x3a4   : > { %v2632_v54 = vpack.c.bf16 %v2612_v61, %v2610_v9  ;;  %v2633_v28 = vpack.c.bf16 %v2613_v55, %v2611_v2  ;;  %3166 = vperm.xlu1 %5991, %v2531_v41   ;;  %v8875_v9 = vld [vmem:[%s11048_s1 + $0x50] sm:$0xff]  ;;  %11175 = vst [vmem:[#allocation19_spill] sm:$0xff] %v8881_v6  ;;  %v8895_v2 = vld [vmem:[%s11048_s1 + $0x140] sm:$0xff]  ;;  %v2663_v61 = vunpack.c.l.b16 %v2653_v23 }
 0x3a5   : > { %5989 = vset.pattern.permute.xlu2 %v11171_v30  ;;  %11174 = vst [vmem:[#allocation23_spill] sm:$0xff] %v8875_v9  ;;  %v8902_v55 = vld [vmem:[%s11048_s1 + $0x30] sm:$0xff] }
 0x3a6   : > { %2691 = vmatpush.bf16.msrb.mxu0 %v2632_v54  ;;  %2714 = vmatpush.bf16.msrb.mxu1 %v2633_v28  ;;  %11176 = vst [vmem:[#allocation25_spill] sm:$0xff] %v8889_v44  ;;  %v8908_v54 = vld [vmem:[%s11048_s1 + $0x130] sm:$0xff]  ;;  %v8914_v28 = vld [vmem:[%s11048_s1 + $0x20] sm:$0xff] }
 0x3a7   : > { %3096 = vperm.xlu2 %5989, %v2531_v41   ;;  %11177 = vst [vmem:[#allocation24_spill] sm:$0xff] %v8895_v2  ;;  %v2666_v41 = vpack.c.b16 %v2663_v61, %v2663_v61  ;;  %v8933_v23 = vld [vmem:[%s11048_s1 + $0x110] sm:$0xff]  ;;  %v8940_v61 = vld [vmem:[%s11048_s1] sm:$0xff] }
 0x3a8   : > { %11178 = vst [vmem:[#allocation26_spill] sm:$0xff] %v8902_v55 }
 0x3a9   : > { %5648 = vmatmul.msk.bf16.vlgmr.msrb.gmra.mxu0 %vm2667_vm6, %v5877_v0  ;;  %5651 = vmatmul.msk.bf16.vlgmr.msrb.gmra.mxu1 %vm2667_vm6, %v5877_v0  ;;  %11179 = vst [vmem:[#allocation11_spill] sm:$0xff] %v8908_v54  ;;  %v8920_v0 = vld [vmem:[%s11048_s1 + $0x120] sm:$0xff] }
 0x3aa   : > { %2893 = vmatpush.msra.mxu0 %v8726_v53  ;;  %2913 = vmatpush.msra.mxu1 %v8732_v51  ;;  %11180 = vst [vmem:[#allocation12_spill] sm:$0xff] %v8914_v28 }
 0x3ab   : > { %5995 = vset.pattern.permute.xlu0 %v11168_v15  ;;  %11181 = vst [vmem:[#allocation13_spill] sm:$0xff] %v8920_v0 }
 0x3ac   : > { %2894 = vmatpush.msra.mxu0 %v8749_v45  ;;  %2914 = vmatpush.msra.mxu1 %v8755_v1  ;;  %11183 = vst [vmem:[#allocation48_spill] sm:$0xff] %v8933_v23 }
 0x3ad   : > { %5992 = vset.pattern.permute.xlu1 %v11171_v30  ;;  %3158 = vperm.xlu0 %5995, %v8689_v33   ;;  %11184 = vst [vmem:[#allocation49_spill] sm:$0xff] %v8940_v61 }
 0x3ae   : > { %2895 = vmatpush.msra.mxu0 %v8761_v12  ;;  %2915 = vmatpush.msra.mxu1 %v8767_v22 }
 0x3af   : > { %3092 = vperm.xlu1 %5992, %v8773_v32   ;;  %3088 = vperm.xlu2 %5989, %v8689_v33  }
 0x3b0   : > { %2896 = vmatpush.msra.mxu0 %v8778_v25  ;;  %2916 = vmatpush.msra.mxu1 %v8784_v4 }
 0x3b2   : > { %2897 = vmatpush.msra.mxu0 %v8790_v35  ;;  %2917 = vmatpush.msra.mxu1 %v8796_v39 }
 0x3b4   : > { %2898 = vmatpush.msra.mxu0 %v8804_v42  ;;  %2918 = vmatpush.msra.mxu1 %v8810_v40 }
 0x3b5   : > { %3154 = vperm.xlu0 %5995, %v8684_v17  }
 0x3b6   : > { %2899 = vmatpush.msra.mxu0 %v8820_v56  ;;  %2919 = vmatpush.msra.mxu1 %v8826_v19 }
 0x3b7   : > { %3080 = vperm.xlu1 %5992, %v8740_v8   ;;  %5993 = vset.pattern.permute.xlu2 %v11167_v48 }
 0x3b8   : > { %2900 = vmatpush.msra.mxu0 %v8832_v59  ;;  %2920 = vmatpush.msra.mxu1 %v8838_v58 }
 0x3b9   : > { %5649 = vmatmul.msk.bf16.gmra.mxu0 %vm2667_vm6, %v5878_v26  ;;  %5652 = vmatmul.msk.bf16.gmra.mxu1 %vm2667_vm6, %v5878_v26  ;;  %v8927_v26 = vld [vmem:[%s11048_s1 + $0x10] sm:$0xff] }
 0x3ba   : > { %2901 = vmatpush.msra.mxu0 %v8846_v52  ;;  %2921 = vmatpush.msra.mxu1 %v8852_v43  ;;  %11182 = vst [vmem:[#allocation47_spill] sm:$0xff] %v8927_v26 }
 0x3bb   : > { %3118 = vperm.xlu2 %5993, %v8689_v33   ;;  %v2767_v33 = vpop.f32.mrf.mxu2 }
 0x3bc   : > { %2902 = vmatpush.msra.mxu0 %v8859_v14  ;;  %2922 = vmatpush.msra.mxu1 %v8865_v16 }
 0x3bd   : > { %6001 = vset.pattern.permute.xlu0 %v11186_v37 }
 0x3be   : > { %2903 = vmatpush.msra.mxu0 %v8875_v9  ;;  %2923 = vmatpush.msra.mxu1 %v8881_v6 }
 0x3bf   : > { %5996 = vset.pattern.permute.xlu1 %v11168_v15 }
 0x3c0   : > { %2904 = vmatpush.msra.mxu0 %v8889_v44  ;;  %2924 = vmatpush.msra.mxu1 %v8895_v2 }
 0x3c1   : > { %3162 = vperm.xlu1 %5996, %v8773_v32   ;;  %v2790_v32 = vpop.f32.mrf.mxu3 }
 0x3c2   : > { %2905 = vmatpush.msra.mxu0 %v8902_v55  ;;  %2925 = vmatpush.msra.mxu1 %v8908_v54 }
 0x3c3   : > { %5994 = vset.pattern.permute.xlu2 %v11171_v30 }
 0x3c4   : > { %2906 = vmatpush.msra.mxu0 %v8914_v28  ;;  %2926 = vmatpush.msra.mxu1 %v8920_v0 }
 0x3c5   : > { %3084 = vperm.xlu2 %5994, %v8684_v17  }
 0x3c6   : > { %2907 = vmatpush.msra.mxu0 %v8927_v26  ;;  %2927 = vmatpush.msra.mxu1 %v8933_v23 }
 0x3c8   : > { %2908 = vmatpush.msra.mxu0 %v8940_v61  ;;  %2928 = vmatpush.msra.mxu1 %v8946_v47 }
 0x3c9   : > { %5650 = vmatmul.msk.bf16.gmra.mxu0 %vm2667_vm6, %v2666_v41  ;;  %5653 = vmatmul.msk.bf16.gmra.mxu1 %vm2667_vm6, %v2666_v41  ;;  %v2769_v41 = vpop.f32.mrf.mxu2  ;;  %v2792_v29 = vpop.f32.mrf.mxu3 }
 0x3ca   : > { %5998 = vset.pattern.permute.xlu1 %v11167_v48 }
 0x3cb   : > { %3114 = vperm.xlu1 %5998, %v8684_v17  }
 0x3cd   : > { %5997 = vset.pattern.permute.xlu2 %v11167_v48 }
 0x3ce   : > { %3110 = vperm.xlu2 %5997, %v8740_v8  }
 0x3d1   : > { %v2795_v13 = vpop.f32.mrf.mxu3  ;;  %v2772_v36 = vpop.f32.mrf.mxu2 }
 0x3d3   : > { %6002 = vset.pattern.permute.xlu1 %v11171_v30 }
 0x3d6   : > { %5999 = vset.pattern.permute.xlu2 %v11168_v15 }
 0x3d7   : > { %3150 = vperm.xlu2 %5999, %v8740_v8  }
 0x3d9   : > { %v2797_v24 = vpop.f32.mrf.mxu3  ;;  %v2774_v17 = vpop.f32.mrf.mxu2 }
 0x3df   : > { %6000 = vset.pattern.permute.xlu2 %v11186_v37 }
 0x3e5   : > { %v2817_v61 = vpop.permute.xlu1 %2816 }
 0x3eb   : > { %v2812_v18 = vpop.permute.xlu0 %2811 }
 0x3ef   : > { %v2807_v21 = vpop.permute.xlu2 %2806 }
 0x40b   : > { %v2800_v50 = vpop.f32.mrf.mxu3  ;;  %v2777_v63 = vpop.f32.mrf.mxu2 }
 0x413   : > { %v2802_v57 = vpop.f32.mrf.mxu3  ;;  %v2779_v7 = vpop.f32.mrf.mxu2 }
 0x426   : > { %v2693_v11 = vpop.f32.mrf.mxu0  ;;  %v2716_v46 = vpop.f32.mrf.mxu1 }
 0x427   : > { %v2768_v31 = vadd.f32 %v2767_v33, %v2693_v11  ;;  %v2791_v20 = vadd.f32 %v2790_v32, %v2716_v46  ;;  %v2822_v46 = vpop.permute.xlu2 %2821 }
 0x429   : > { %v8971_v54 = vadd.f32 %v2807_v21, %v2768_v31  ;;  %v8973_v55 = vadd.f32 %v2807_v21, %v2791_v20 }
 0x42b   : > { %v2860_v20 = vmul.f32 %v8973_v55, %v8973_v55 }
 0x42e   : > { %v2695_v38 = vpop.f32.mrf.mxu0  ;;  %v2718_v27 = vpop.f32.mrf.mxu1 }
 0x42f   : > { %v2770_v49 = vadd.f32 %v2769_v41, %v2695_v38  ;;  %v2793_v62 = vadd.f32 %v2792_v29, %v2718_v27 }
 0x431   : > { %v8967_v23 = vadd.f32 %v2812_v18, %v2770_v49  ;;  %v8969_v26 = vadd.f32 %v2812_v18, %v2793_v62 }
 0x436   : > { %v2698_v5 = vpop.f32.mrf.mxu0  ;;  %v2721_v8 = vpop.f32.mrf.mxu1 }
 0x437   : > { %v2773_v3 = vadd.f32 %v2772_v36, %v2698_v5  ;;  %v2796_v47 = vadd.f32 %v2795_v13, %v2721_v8  ;;  %v2861_v13 = vmul.f32 %v8967_v23, %v8967_v23  ;;  %v2862_v36 = vmul.f32 %v8969_v26, %v8969_v26 }
 0x438   : > { %v2839_v5 = vadd.f32 %v8967_v23, %v8971_v54 }
 0x439   : > { %v8975_v38 = vadd.f32 %v2817_v61, %v2773_v3  ;;  %v8977_v29 = vadd.f32 %v2817_v61, %v2796_v47  ;;  %v2849_v3 = vadd.f32 %v8969_v26, %v8973_v55  ;;  %v2879_v62 = vadd.f32 %v2862_v36, %v2860_v20 }
 0x43b   : > { %v2863_v47 = vmul.f32 %v8975_v38, %v8975_v38  ;;  %v2864_v31 = vmul.f32 %v8977_v29, %v8977_v29  ;;  %v2840_v61 = vadd.f32 %v2839_v5, %v8975_v38  ;;  %v2850_v33 = vadd.f32 %v2849_v3, %v8977_v29 }
 0x43d   : > { %v2880_v8 = vadd.f32 %v2879_v62, %v2864_v31 }
 0x43e   : > { %v2700_v0 = vpop.f32.mrf.mxu0  ;;  %v2723_v57 = vpop.f32.mrf.mxu1 }
 0x43f   : > { %v2775_v7 = vadd.f32 %v2774_v17, %v2700_v0  ;;  %v2798_v28 = vadd.f32 %v2797_v24, %v2723_v57  ;;  %v2859_v24 = vmul.f32 %v8971_v54, %v8971_v54  ;;  %v2827_v57 = vpop.permute.xlu1 %2826 }
 0x441   : > { %v8983_v49 = vadd.f32 %v2822_v46, %v2775_v7  ;;  %v8985_v11 = vadd.f32 %v2822_v46, %v2798_v28  ;;  %v2869_v27 = vadd.f32 %v2861_v13, %v2859_v24 }
 0x443   : > { %v2865_v21 = vmul.f32 %v8983_v49, %v8983_v49  ;;  %v2866_v18 = vmul.f32 %v8985_v11, %v8985_v11  ;;  %v2870_v17 = vadd.f32 %v2869_v27, %v2863_v47  ;;  %v2841_v7 = vadd.f32 %v2840_v61, %v8983_v49 }
 0x444   : > { %v2851_v46 = vadd.f32 %v2850_v33, %v8985_v11 }
 0x445   : > { %v2871_v24 = vadd.f32 %v2870_v17, %v2865_v21  ;;  %v2881_v20 = vadd.f32 %v2880_v8, %v2866_v18 }
 0x446   : > { %v2703_v28 = vpop.f32.mrf.mxu0  ;;  %v2726_v0 = vpop.f32.mrf.mxu1 }
 0x447   : > { %v2778_v32 = vadd.f32 %v2777_v63, %v2703_v28  ;;  %v2801_v41 = vadd.f32 %v2800_v50, %v2726_v0 }
 0x449   : > { %v9007_v13 = vadd.f32 %v2827_v57, %v2778_v32  ;;  %v9009_v36 = vadd.f32 %v2827_v57, %v2801_v41 }
 0x44b   : > { %v2842_v2 = vadd.f32 %v2841_v7, %v9007_v13  ;;  %v2867_v5 = vmul.f32 %v9007_v13, %v9007_v13  ;;  %v2852_v63 = vadd.f32 %v2851_v46, %v9009_v36  ;;  %v2868_v50 = vmul.f32 %v9009_v36, %v9009_v36 }
 0x44d   : > { %v2843_v47 = vrot.slane %v2842_v2, 4  ;;  %v2872_v31 = vadd.f32 %v2871_v24, %v2867_v5  ;;  %v2853_v3 = vrot.slane %v2852_v63, 4  ;;  %v2882_v27 = vadd.f32 %v2881_v20, %v2868_v50 }
 0x44e   : > { %v2705_v62 = vpop.f32.mrf.mxu0  ;;  %v2728_v28 = vpop.f32.mrf.mxu1 }
 0x44f   : > { %v2844_v0 = vadd.f32 %v2843_v47, %v2842_v2  ;;  %v2873_v61 = vrot.slane %v2872_v31, 4  ;;  %v2854_v21 = vadd.f32 %v2853_v3, %v2852_v63  ;;  %v2883_v18 = vrot.slane %v2882_v27, 4  ;;  %v9026_v3 = vld [vmem:[%s11010_s5] sm:$0xf] }
 0x450   : > { %11187 = vst [vmem:[#allocation51_spill] sm:$0xff] %v9026_v3 }
 0x451   : > { %v2845_v33 = vrot.slane %v2844_v0, 2  ;;  %v2874_v32 = vadd.f32 %v2873_v61, %v2872_v31  ;;  %v2855_v41 = vrot.slane %v2854_v21, 2  ;;  %v2884_v17 = vadd.f32 %v2883_v18, %v2882_v27 }
 0x453   : > { %v2846_v8 = vadd.f32 %v2845_v33, %v2844_v0  ;;  %v2875_v57 = vrot.slane %v2874_v32, 2  ;;  %v2856_v7 = vadd.f32 %v2855_v41, %v2854_v21  ;;  %v2885_v46 = vrot.slane %v2884_v17, 2 }
 0x455   : > { %v2847_v44 = vrot.slane %v2846_v8, 1  ;;  %v2876_v6 = vadd.f32 %v2875_v57, %v2874_v32  ;;  %v2857_v9 = vrot.slane %v2856_v7, 1  ;;  %v2886_v24 = vadd.f32 %v2885_v46, %v2884_v17  ;;  %v9029_v46 = vpop.permute.xlu2 %3096 }
 0x457   : > { %v2877_v5 = vrot.slane %v2876_v6, 1  ;;  %v2887_v20 = vrot.slane %v2886_v24, 1  ;;  %v2848_v50 = vadd.f32 %v2847_v44, %v2846_v8  ;;  %v2858_v2 = vadd.f32 %v2857_v9, %v2856_v7 }
 0x458   : > { %v2973_v9 = vmul.f32 40.0, %v9026_v3 }
 0x459   : > { %v2878_v62 = vadd.f32 %v2877_v5, %v2876_v6  ;;  %v2888_v47 = vadd.f32 %v2887_v20, %v2886_v24 }
 0x45a   : > { %v2975_v6 = vperm.slane %v2973_v9, 0  ;;  %v2976_v44 = vperm.slane %v2973_v9, 2 }
 0x45b   : > { %v2889_v63 = vsel %vm860_vm0, %v2848_v50, %v2878_v62  ;;  %v2890_v31 = vsel %vm860_vm0, %v2858_v2, %v2888_v47 }
 0x45c   : > { %5668 = vmatmul.msk.f32.vlgmr.msra.gmra.mxu0 %vm2008_vm7, %v2889_v63  ;;  %5669 = vmatmul.msk.f32.vlgmr.msra.gmra.mxu1 %vm2008_vm7, %v2890_v31  ;;  %6132 = vrcp.f32 %v2975_v6  ;;  %vm2984_vm8 = vweird.f32 %v2975_v6  ;;  %v2990_v33 = vand.u32 2147483648, %v2975_v6  ;;  %v2988_v17 = vand.u32 2147483647, %v2975_v6 }
 0x45d   : > { %5670 = vmatmul.msk.f32.vlgmr.msra.gmra.mxu2 %vm2008_vm7, %v2889_v63  ;;  %5671 = vmatmul.msk.f32.vlgmr.msra.gmra.mxu3 %vm2008_vm7, %v2890_v31  ;;  %6134 = vrcp.f32 %v2976_v44  ;;  %vm2999_vm13 = vweird.f32 %v2976_v44  ;;  %v3005_v24 = vand.u32 2147483648, %v2976_v44  ;;  %v3003_v2 = vand.u32 2147483647, %v2976_v44 }
 0x45e   : > { %v2991_v8 = vor.u32 1.1754944e-38, %v2990_v33  ;;  %vm2989_vm12 = vcmp.eq.f32.partialorder %v2988_v17, 8.507059e+37  ;;  %v9039_v17 = vpop.permute.xlu2 %3088 }
 0x45f   : > { %v3006_v31 = vor.u32 1.1754944e-38, %v3005_v24  ;;  %vm3004_vm3 = vcmp.eq.f32.partialorder %v3003_v2, 8.507059e+37 }
 0x462   : > { %v6133_v27 = vpop.eup %6132 }
 0x463   : > { %v2980_v28 = vmul.f32 %v6133_v27, %v2975_v6  ;;  %v6135_v0 = vpop.eup %6134  ;;  %vm2985_vm10 = vweird.f32 %v6133_v27 }
 0x464   : > { %v2995_v21 = vmul.f32 %v6135_v0, %v2976_v44  ;;  %vm2986_vm11 = vmor %vm2984_vm8, %vm2985_vm10  ;;  %vm3000_vm14 = vweird.f32 %v6135_v0 }
 0x465   : > { %v2981_v61 = vsub.f32 1.0, %v2980_v28  ;;  %vm3001_vm15 = vmor %vm2999_vm13, %vm3000_vm14 }
 0x466   : > { %v2996_v32 = vsub.f32 1.0, %v2995_v21 }
 0x467   : > { %v2982_v18 = vmul.f32 %v6133_v27, %v2981_v61 }
 0x468   : > { %v2997_v57 = vmul.f32 %v6135_v0, %v2996_v32 }
 0x469   : > { %v2983_v41 = vadd.f32 %v6133_v27, %v2982_v18 }
 0x46a   : > { %v2998_v62 = vadd.f32 %v6135_v0, %v2997_v57 }
 0x46b   : > { %v2987_v7 = vsel %vm2986_vm11, %v6133_v27, %v2983_v41  ;;  %v9034_v27 = vpop.permute.xlu1 %3166 }
 0x46c   : > { %v9031_v50 = vsel %vm2989_vm12, %v2991_v8, %v2987_v7  ;;  %v3002_v9 = vsel %vm3001_vm15, %v6135_v0, %v2998_v62 }
 0x46d   : > { %11188 = vst [vmem:[#allocation52_spill] sm:$0xff] %v9031_v50  ;;  %v9036_v18 = vsel %vm3004_vm3, %v3006_v31, %v3002_v9 }
 0x46e   : > { %11189 = vst [vmem:[#allocation53_spill] sm:$0xff] %v9036_v18 }
 0x4d9   : > { %v2910_v5 = vpop.f32.mrf.mxu0  ;;  %v2930_v20 = vpop.f32.mrf.mxu1 }
 0x4da   : > { %v2931_v47 = vadd.f32 %v2930_v20, %v2910_v5  ;;  %v9042_v20 = vpop.permute.xlu1 %3092 }
 0x4dc   : > { %v2993_v63 = vmul.f32 %v9031_v50, %v2931_v47 }
 0x4de   : > { %v3009_v6 = vmul.f32 2.0, %v2993_v63  ;;  %v3023_v41 = vmul.f32 %v2993_v63, %v2993_v63 }
 0x4e0   : > { %v3011_v28 = vmul.f32 %v3009_v6, %v2931_v47  ;;  %v2950_v61 = vpop.f32.mrf.mxu2  ;;  %v2970_v21 = vpop.f32.mrf.mxu3  ;;  %v3027_v7 = vrot.slane %v3023_v41, 7 }
 0x4e1   : > { %v2971_v33 = vadd.f32 %v2970_v21, %v2950_v61  ;;  %v9044_v6 = vpop.permute.xlu0 %3126  ;;  %v9047_v21 = vpop.permute.xlu2 %3118 }
 0x4e2   : > { %v3015_v32 = vrot.slane %v3011_v28, 7  ;;  %v9049_v41 = vpop.permute.xlu1 %3080 }
 0x4e3   : > { %v3008_v44 = vmul.f32 %v9036_v18, %v2971_v33 }
 0x4e4   : > { %v3019_v8 = vsub.f32 %v2931_v47, %v3015_v32 }
 0x4e5   : > { %v3010_v57 = vmul.f32 2.0, %v3008_v44  ;;  %v3024_v2 = vmul.f32 %v3008_v44, %v3008_v44 }
 0x4e6   : > { %v3021_v0 = vmul.f32 %v3019_v8, %v9031_v50 }
 0x4e7   : > { %v3012_v24 = vmul.f32 %v3010_v57, %v2971_v33  ;;  %v3028_v61 = vrot.slane %v3024_v2, 7 }
 0x4e8   : > { %v3031_v5 = vadd.f32 %v3027_v7, %v3021_v0 }
 0x4e9   : > { %v3016_v62 = vrot.slane %v3012_v24, 7  ;;  %v9051_v7 = vpop.permute.xlu0 %3122 }
 0x4ea   : > { %v3033_v31 = vadd.f32 1e-05, %v3031_v5 }
 0x4eb   : > { %v3020_v9 = vsub.f32 %v2971_v33, %v3016_v62  ;;  %v9053_v33 = vpop.permute.xlu2 %3084 }
 0x4ec   : > { %6136 = vrsqrt.f32 %v3033_v31  ;;  %vm3041_vm1 = vweird.f32 %v3033_v31 }
 0x4ed   : > { %v3022_v28 = vmul.f32 %v3020_v9, %v9036_v18  ;;  %v3055_v9 = vperm.slane %v2993_v63, 0 }
 0x4ef   : > { %v3032_v47 = vadd.f32 %v3028_v61, %v3022_v28  ;;  %v9055_v61 = vpop.permute.xlu1 %3162  ;;  %v3065_v50 = vsub.f32 %v9007_v13, %v3055_v9  ;;  %v3063_v16 = vsub.f32 %v8983_v49, %v3055_v9  ;;  %v3057_v63 = vsub.f32 %v8971_v54, %v3055_v9 }
 0x4f1   : > { %v3034_v32 = vadd.f32 1e-05, %v3032_v47  ;;  %v3159_v52 = vpop.permute.xlu0 %3158 }
 0x4f2   : > { %v6137_v8 = vpop.eup %6136 }
 0x4f3   : > { %v3036_v57 = vmul.f32 %v6137_v8, %v3033_v31  ;;  %6138 = vrsqrt.f32 %v3034_v32  ;;  %vm3042_vm4 = vweird.f32 %v6137_v8  ;;  %vm3051_vm8 = vweird.f32 %v3034_v32 }
 0x4f4   : > { %vm3043_vm5 = vmor %vm3041_vm1, %vm3042_vm4 }
 0x4f5   : > { %v3037_v0 = vmul.f32 %v6137_v8, %v3036_v57 }
 0x4f7   : > { %v3038_v24 = vmul.f32 0.5, %v3037_v0  ;;  %v3061_v0 = vsub.f32 %v8975_v38, %v3055_v9 }
 0x4f9   : > { %v6139_v5 = vpop.eup %6138  ;;  %v3039_v62 = vsub.f32 1.5, %v3038_v24  ;;  %v3056_v24 = vperm.slane %v3008_v44, 0 }
 0x4fa   : > { %v3046_v2 = vmul.f32 %v6139_v5, %v3034_v32  ;;  %vm3052_vm6 = vweird.f32 %v6139_v5 }
 0x4fb   : > { %v3040_v18 = vmul.f32 %v6137_v8, %v3039_v62  ;;  %v3059_v62 = vsub.f32 %v8967_v23, %v3055_v9  ;;  %vm3053_vm10 = vmor %vm3051_vm8, %vm3052_vm6  ;;  %v3062_v54 = vsub.f32 %v8977_v29, %v3056_v24  ;;  %v3064_v23 = vsub.f32 %v8985_v11, %v3056_v24 }
 0x4fc   : > { %v3047_v28 = vmul.f32 %v6139_v5, %v3046_v2  ;;  %vm3252_vm8 = vcmask 326656  }
 0x4fd   : > { %v3044_v47 = vsel %vm3043_vm5, %v6137_v8, %v3040_v18  ;;  %v3111_v8 = vpop.permute.xlu2 %3110 }
 0x4fe   : > { %v3067_v57 = vperm.slane %v3044_v47, 1  ;;  %v3048_v3 = vmul.f32 0.5, %v3047_v28  ;;  %v3060_v47 = vsub.f32 %v8969_v26, %v3056_v24 }
 0x500   : > { %v3077_v31 = vmul.f32 %v3067_v57, %v3065_v50  ;;  %v3049_v14 = vsub.f32 1.5, %v3048_v3  ;;  %v3073_v2 = vmul.f32 %v3067_v57, %v3061_v0  ;;  %v3075_v43 = vmul.f32 %v3067_v57, %v3063_v16  ;;  %v3115_v0 = vpop.permute.xlu1 %3114 }
 0x501   : > { %v3069_v18 = vmul.f32 %v3067_v57, %v3057_v63  ;;  %v3071_v13 = vmul.f32 %v3067_v57, %v3059_v62  ;;  %v3066_v16 = vsub.f32 %v9009_v36, %v3056_v24 }
 0x502   : > { %v3107_v28 = vmul.f32 %v9029_v46, %v3077_v31  ;;  %v3050_v38 = vmul.f32 %v6139_v5, %v3049_v14  ;;  %v3103_v49 = vmul.f32 %v9039_v17, %v3073_v2  ;;  %v3105_v44 = vmul.f32 %v9042_v20, %v3075_v43 }
 0x503   : > { %v3058_v14 = vsub.f32 %v8973_v55, %v3056_v24  ;;  %v3101_v43 = vmul.f32 %v9053_v33, %v3071_v13  ;;  %v3099_v57 = vmul.f32 %v9049_v41, %v3069_v18 }
 0x504   : > { %v3054_v3 = vsel %vm3053_vm10, %v6139_v5, %v3050_v38  ;;  %v3137_v50 = vadd.f32 %v9044_v6, %v3107_v28  ;;  %v3133_v32 = vadd.f32 %v9047_v21, %v3103_v49  ;;  %v3135_v29 = vadd.f32 %v9051_v7, %v3105_v44  ;;  %v3155_v38 = vpop.permute.xlu0 %3154 }
 0x505   : > { %v3068_v9 = vperm.slane %v3054_v3, 1  ;;  %v3131_v13 = vadd.f32 %v3115_v0, %v3101_v43  ;;  %v3129_v28 = vadd.f32 %v3111_v8, %v3099_v57 }
 0x506   : > { %vm3147_vm11 = vcmp.ge.f32.partialorder %v3137_v50, 0.0  ;;  %v3177_v11 = vmul.f32 %v9034_v27, %v3137_v50  ;;  %v3173_v2 = vmul.f32 %v3159_v52, %v3133_v32  ;;  %v3175_v18 = vmul.f32 %v9055_v61, %v3135_v29 }
 0x507   : > { %v3074_v36 = vmul.f32 %v3068_v9, %v3062_v54  ;;  %v3076_v5 = vmul.f32 %v3068_v9, %v3064_v23  ;;  %v3078_v63 = vmul.f32 %v3068_v9, %v3066_v16  ;;  %v3070_v62 = vmul.f32 %v3068_v9, %v3058_v14 }
 0x508   : > { %v3072_v31 = vmul.f32 %v3068_v9, %v3060_v47  ;;  %v3187_v49 = vsel %vm3147_vm11, %v3137_v50, %v3177_v11  ;;  %vm3143_vm12 = vcmp.ge.f32.partialorder %v3133_v32, 0.0  ;;  %vm3145_vm13 = vcmp.ge.f32.partialorder %v3135_v29, 0.0 }
 0x509   : > { %v3104_v55 = vmul.f32 %v9039_v17, %v3074_v36  ;;  %v3106_v26 = vmul.f32 %v9042_v20, %v3076_v5  ;;  %v3108_v24 = vmul.f32 %v9029_v46, %v3078_v63  ;;  %v3100_v23 = vmul.f32 %v9049_v41, %v3070_v62  ;;  %v3151_v17 = vpop.permute.xlu2 %3150  ;;  %3205 = vrot.lane.b32.xlu1 %v3187_v49, %s11128_s0 }
 0x50a   : > { %v3102_v3 = vmul.f32 %v9053_v33, %v3072_v31  ;;  %v3195_v20 = vpack.c.bf16 %v3187_v49, %v3187_v49  ;;  %v3183_v16 = vsel %vm3143_vm12, %v3133_v32, %v3173_v2  ;;  %v3171_v9 = vmul.f32 %v3155_v38, %v3131_v13  ;;  %v9112_v31 = vld [vmem:[%s11048_s1 + $0xf8] sm:$0xff]  ;;  %v9120_v2 = vld [vmem:[%s11048_s1 + $0xe8] sm:$0xff] }
 0x50b   : > { %v3138_v44 = vadd.f32 %v9044_v6, %v3108_v24  ;;  %v3134_v54 = vadd.f32 %v9047_v21, %v3104_v55  ;;  %v3136_v46 = vadd.f32 %v9051_v7, %v3106_v26  ;;  %3201 = vrot.lane.b32.xlu0 %v3183_v16, %s11128_s0  ;;  %v3169_v50 = vmul.f32 %v3151_v17, %v3129_v28  ;;  %v9129_v26 = vld [vmem:[%s11048_s1 + $0xd8] sm:$0xff]  ;;  %v9169_v49 = vld [vmem:[%s11048_s1 + $0xa8] sm:$0xff] }
 0x50c   : > { %v3185_v14 = vsel %vm3145_vm13, %v3135_v29, %v3175_v18  ;;  %v9089_v6 = vsel %vm2677_vm9, %v3195_v20, 0  ;;  %v3130_v21 = vadd.f32 %v3111_v8, %v3100_v23  ;;  %vm3139_vm15 = vcmp.ge.f32.partialorder %v3129_v28, 0.0  ;;  %v9137_v24 = vld [vmem:[%s11048_s1 + $0x1f8] sm:$0xff]  ;;  %v9149_v18 = vld [vmem:[%s11048_s1 + $0x1e8] sm:$0xff] }
 0x50d   : > { %11190 = vst [vmem:[#allocation54_spill] sm:$0xff] %v9089_v6  ;;  %vm3148_vm14 = vcmp.ge.f32.partialorder %v3138_v44, 0.0  ;;  %vm3141_vm3 = vcmp.ge.f32.partialorder %v3131_v13, 0.0  ;;  %3309 = vmatpush.bf16.msrb.mxu2 %v9089_v6  ;;  %v3178_v41 = vmul.f32 %v9034_v27, %v3138_v44  ;;  %v3176_v7 = vmul.f32 %v9055_v61, %v3136_v46  ;;  %v9187_v23 = vld [vmem:[%s11048_s1 + $0x1b8] sm:$0xff] }
 0x50e   : > { %v3174_v33 = vmul.f32 %v3159_v52, %v3134_v54  ;;  %v3132_v32 = vadd.f32 %v3115_v0, %v3102_v3  ;;  %v9094_v47 = vpack.c.bf16 %v3185_v14, %v3183_v16  ;;  %vm3144_vm4 = vcmp.ge.f32.partialorder %v3134_v54, 0.0  ;;  %v9193_v3 = vld [vmem:[%s11048_s1 + $0x88] sm:$0xff]  ;;  %v9211_v20 = vld [vmem:[%s11048_s1 + $0x198] sm:$0xff] }
 0x50f   : > { %v3188_v43 = vsel %vm3148_vm14, %v3138_v44, %v3178_v41  ;;  %vm3146_vm1 = vcmp.ge.f32.partialorder %v3136_v46, 0.0  ;;  %v3179_v29 = vsel %vm3139_vm15, %v3129_v28, %v3169_v50  ;;  %v3181_v8 = vsel %vm3141_vm3, %v3131_v13, %v3171_v9  ;;  %v9143_v13 = vld [vmem:[%s11048_s1 + $0xc8] sm:$0xff]  ;;  %v9155_v28 = vld [vmem:[%s11048_s1 + $0xb8] sm:$0xff] }
 0x510   : > { %11191 = vst [vmem:[#allocation55_spill] sm:$0xff] %v9094_v47  ;;  %3215 = vrot.lane.b32.xlu2 %v3188_v43, %s11128_s0  ;;  %v3196_v57 = vpack.c.bf16 %v3188_v43, %v3188_v43  ;;  %v3170_v11 = vmul.f32 %v3151_v17, %v3130_v21  ;;  %v3172_v27 = vmul.f32 %v3155_v38, %v3132_v32  ;;  %vm3140_vm5 = vcmp.ge.f32.partialorder %v3130_v21, 0.0  ;;  %v9162_v38 = vld [vmem:[%s11048_s1 + $0x1d8] sm:$0xff]  ;;  %v9175_v44 = vld [vmem:[%s11048_s1 + $0x1c8] sm:$0xff] }
 0x511   : > { %3310 = vmatpush.bf16.msrb.mxu2 %v9094_v47  ;;  %3203 = vrot.lane.b32.xlu1 %v3185_v14, %s11128_s0  ;;  %v3184_v36 = vsel %vm3144_vm4, %v3134_v54, %v3174_v33  ;;  %v3186_v61 = vsel %vm3146_vm1, %v3136_v46, %v3176_v7  ;;  %v9104_v0 = vpack.c.bf16 %v3181_v8, %v3179_v29  ;;  %vm3142_vm6 = vcmp.ge.f32.partialorder %v3132_v32, 0.0  ;;  %v9181_v54 = vld [vmem:[%s11048_s1 + $0x98] sm:$0xff]  ;;  %v9199_v17 = vld [vmem:[%s11048_s1 + $0x1a8] sm:$0xff]  ;;  %v3189_v47 = vld [vmem:[%s10843_s13] sm:$0xff] }
 0x512   : > { %v9100_v52 = vsel %vm2677_vm9, %v3196_v57, 0  ;;  %v9106_v5 = vpack.c.bf16 %v3186_v61, %v3184_v36  ;;  %v3180_v63 = vsel %vm3140_vm5, %v3130_v21, %v3170_v11  ;;  %v3182_v62 = vsel %vm3142_vm6, %v3132_v32, %v3172_v27  ;;  %v9205_v46 = vld [vmem:[%s11048_s1 + $0x78] sm:$0xff]  ;;  %v9217_v16 = vld [vmem:[%s11048_s1 + $0x68] sm:$0xff] }
 0x513   : > { %11192 = vst [vmem:[#allocation56_spill] sm:$0xff] %v9100_v52  ;;  %3213 = vrot.lane.b32.xlu0 %v3186_v61, %s11128_s0  ;;  %3323 = vmatpush.bf16.msrb.mxu3 %v9100_v52  ;;  %v9123_v55 = vpack.c.bf16 %v3182_v62, %v3180_v63  ;;  %v9223_v9 = vld [vmem:[%s11048_s1 + $0x188] sm:$0xff]  ;;  %v9229_v50 = vld [vmem:[%s11048_s1 + $0x58] sm:$0xff]  ;;  %v5879_v61 = vld [vmem:[%s10841_s11] sm:$0xff] }
 0x514   : > { %11193 = vst [vmem:[#allocation57_spill] sm:$0xff] %v9104_v0  ;;  %v9235_v14 = vld [vmem:[%s11048_s1 + $0x178] sm:$0xff]  ;;  %v9241_v21 = vld [vmem:[%s11048_s1 + $0x48] sm:$0xff] }
 0x515   : > { %11194 = vst [vmem:[#allocation58_spill] sm:$0xff] %v9106_v5  ;;  %3311 = vmatpush.bf16.msrb.mxu2 %v9104_v0  ;;  %v9247_v41 = vld [vmem:[%s11048_s1 + $0x168] sm:$0xff]  ;;  %v9253_v7 = vld [vmem:[%s11048_s1 + $0x38] sm:$0xff] }
 0x516   : > { %11195 = vst [vmem:[#allocation59_spill] sm:$0xff] %v9123_v55  ;;  %v9259_v33 = vld [vmem:[%s11048_s1 + $0x158] sm:$0xff]  ;;  %v9265_v32 = vld [vmem:[%s11048_s1 + $0x28] sm:$0xff] }
 0x517   : > { %3324 = vmatpush.bf16.msrb.mxu3 %v9106_v5  ;;  %v9271_v43 = vld [vmem:[%s11048_s1 + $0x148] sm:$0xff]  ;;  %v9277_v57 = vld [vmem:[%s11048_s1 + $0x18] sm:$0xff] }
 0x518   : > { %3211 = vrot.lane.b32.xlu2 %v3184_v36, %s11128_s0  ;;  %v9295_v11 = vld [vmem:[%s11048_s1 + $0x128] sm:$0xff]  ;;  %v9301_v27 = vld [vmem:[%s11048_s1 + $0x118] sm:$0xff]  ;;  %5682 = vmatmul.msk.bf16.vlgmr.msrb.gmra.mxu2 %vm3252_vm8, %v5879_v61 }
 0x519   : > { %3422 = vmatpush.msra.mxu2 %v9112_v31  ;;  %3197 = vrot.lane.b32.xlu1 %v3179_v29, %s11128_s0  ;;  %v9283_v29 = vld [vmem:[%s11048_s1 + $0x138] sm:$0xff]  ;;  %11197 = vst [vmem:[#allocation61_spill] sm:$0xff] %v9295_v11  ;;  %v9307_v36 = vld [vmem:[%s11048_s1 + $0x108] sm:$0xff] }
 0x51a   : > { %11196 = vst [vmem:[#allocation60_spill] sm:$0xff] %v9283_v29  ;;  %v3190_v5 = vld [vmem:[%s10843_s13 + $0x8] sm:$0xff] }
 0x51b   : > { %3423 = vmatpush.msra.mxu2 %v9120_v2  ;;  %3207 = vrot.lane.b32.xlu0 %v3180_v63, %s11128_s0  ;;  %11198 = vst [vmem:[#allocation62_spill] sm:$0xff] %v9301_v27 }
 0x51c   : > { %3325 = vmatpush.bf16.msrb.mxu3 %v9123_v55  ;;  %11199 = vst [vmem:[#allocation63_spill] sm:$0xff] %v9307_v36 }
 0x51d   : > { %3424 = vmatpush.msra.mxu2 %v9129_v26 }
 0x51f   : > { %3425 = vmatpush.msra.mxu2 %v9143_v13  ;;  %5683 = vmatmul.msk.bf16.vlgmr.msrb.gmra.mxu3 %vm3252_vm8, %v5879_v61 }
 0x520   : > { %3442 = vmatpush.msra.mxu3 %v9137_v24  ;;  %3199 = vrot.lane.b32.xlu2 %v3181_v8, %s11128_s0  ;;  %v9289_v8 = vld [vmem:[%s11048_s1 + $0x8] sm:$0xff] }
 0x521   : > { %3426 = vmatpush.msra.mxu2 %v9155_v28  ;;  %3209 = vrot.lane.b32.xlu1 %v3182_v62, %s11128_s0 }
 0x522   : > { %3443 = vmatpush.msra.mxu3 %v9149_v18 }
 0x523   : > { %3427 = vmatpush.msra.mxu2 %v9169_v49  ;;  %3339 = vperm.xlu0 %6001, %v3190_v5  }
 0x524   : > { %3444 = vmatpush.msra.mxu3 %v9162_v38 }
 0x525   : > { %3428 = vmatpush.msra.mxu2 %v9181_v54 }
 0x526   : > { %3445 = vmatpush.msra.mxu3 %v9175_v44 }
 0x527   : > { %3429 = vmatpush.msra.mxu2 %v9193_v3 }
 0x528   : > { %3446 = vmatpush.msra.mxu3 %v9187_v23  ;;  %3334 = vperm.xlu2 %6000, %v3189_v47  }
 0x529   : > { %3430 = vmatpush.msra.mxu2 %v9205_v46  ;;  %3557 = vperm.xlu1 %6002, %v3189_v47  }
 0x52a   : > { %3447 = vmatpush.msra.mxu3 %v9199_v17 }
 0x52b   : > { %3431 = vmatpush.msra.mxu2 %v9217_v16  ;;  %6006 = vset.pattern.permute.xlu0 %v11168_v15 }
 0x52c   : > { %3448 = vmatpush.msra.mxu3 %v9211_v20  ;;  %3585 = vperm.xlu0 %6006, %v3189_v47  }
 0x52d   : > { %3432 = vmatpush.msra.mxu2 %v9229_v50 }
 0x52e   : > { %3449 = vmatpush.msra.mxu3 %v9223_v9 }
 0x52f   : > { %3433 = vmatpush.msra.mxu2 %v9241_v21 }
 0x530   : > { %3450 = vmatpush.msra.mxu3 %v9235_v14  ;;  %6003 = vset.pattern.permute.xlu2 %v11171_v30 }
 0x531   : > { %3434 = vmatpush.msra.mxu2 %v9253_v7  ;;  %6004 = vset.pattern.permute.xlu1 %v11167_v48 }
 0x532   : > { %3451 = vmatpush.msra.mxu3 %v9247_v41  ;;  %3569 = vperm.xlu1 %6004, %v3189_v47  }
 0x533   : > { %3435 = vmatpush.msra.mxu2 %v9265_v32  ;;  %3561 = vperm.xlu2 %6003, %v3190_v5  }
 0x534   : > { %3452 = vmatpush.msra.mxu3 %v9259_v33  ;;  %6010 = vset.pattern.permute.xlu0 %v11186_v37 }
 0x535   : > { %3436 = vmatpush.msra.mxu2 %v9277_v57 }
 0x536   : > { %3453 = vmatpush.msra.mxu3 %v9271_v43 }
 0x537   : > { %3437 = vmatpush.msra.mxu2 %v9289_v8 }
 0x538   : > { %3454 = vmatpush.msra.mxu3 %v9283_v29 }
 0x53a   : > { %3455 = vmatpush.msra.mxu3 %v9295_v11  ;;  %6007 = vset.pattern.permute.xlu1 %v11168_v15 }
 0x53b   : > { %6005 = vset.pattern.permute.xlu2 %v11167_v48  ;;  %3589 = vperm.xlu1 %6007, %v3190_v5  }
 0x53c   : > { %3456 = vmatpush.msra.mxu3 %v9301_v27  ;;  %3573 = vperm.xlu2 %6005, %v3190_v5  }
 0x53e   : > { %3457 = vmatpush.msra.mxu3 %v9307_v36 }
 0x543   : > { %6008 = vset.pattern.permute.xlu1 %v11186_v37 }
 0x544   : > { %6009 = vset.pattern.permute.xlu2 %v11186_v37 }
 0x56a   : > { %v3216_v63 = vpop.permute.xlu2 %3215 }
 0x572   : > { %v3212_v11 = vpop.permute.xlu2 %3211 }
 0x57b   : > { %v3206_v62 = vpop.permute.xlu1 %3205 }
 0x57c   : > { %v3221_v55 = vsel %vm747_vm2, %v3206_v62, %v3216_v63  ;;  %v3226_v0 = vsel %vm747_vm2, %v3216_v63, %v3206_v62 }
 0x57d   : > { %v3235_v52 = vmul.f32 %v3226_v0, %v11164_v60  ;;  %v3236_v61 = vmul.f32 %v3221_v55, %v11165_v10  ;;  %v3202_v6 = vpop.permute.xlu0 %3201 }
 0x57e   : > { %v3224_v0 = vsel %vm747_vm2, %v3212_v11, %v3202_v6  ;;  %v3219_v29 = vsel %vm747_vm2, %v3202_v6, %v3212_v11 }
 0x57f   : > { %v3241_v36 = vpack.c.bf16 %v3235_v52, %v3235_v52  ;;  %v3242_v27 = vpack.c.bf16 %v3236_v61, %v3236_v61 }
 0x581   : > { %v9328_v63 = vsel %vm2677_vm9, %v3241_v36, 0  ;;  %v9331_v62 = vsel %vm2677_vm9, %v3242_v27, 0  ;;  %v3231_v27 = vmul.f32 %v3224_v0, %v11164_v60 }
 0x582   : > { %11200 = vst [vmem:[#allocation64_spill] sm:$0xff] %v9328_v63  ;;  %3267 = vmatpush.bf16.msrb.mxu0 %v9328_v63  ;;  %3281 = vmatpush.bf16.msrb.mxu1 %v9331_v62 }
 0x583   : > { %11201 = vst [vmem:[#allocation65_spill] sm:$0xff] %v9331_v62  ;;  %v3204_v55 = vpop.permute.xlu1 %3203  ;;  %v3232_v62 = vmul.f32 %v3219_v29, %v11165_v10 }
 0x585   : > { %v3214_v52 = vpop.permute.xlu0 %3213 }
 0x586   : > { %v3220_v36 = vsel %vm747_vm2, %v3204_v55, %v3214_v52  ;;  %v3225_v61 = vsel %vm747_vm2, %v3214_v52, %v3204_v55 }
 0x587   : > { %v3233_v6 = vmul.f32 %v3225_v61, %v11164_v60  ;;  %v3234_v11 = vmul.f32 %v3220_v36, %v11165_v10 }
 0x589   : > { %v9350_v63 = vpack.c.bf16 %v3233_v6, %v3231_v27  ;;  %v9352_v0 = vpack.c.bf16 %v3234_v11, %v3232_v62  ;;  %v3200_v62 = vpop.permute.xlu2 %3199 }
 0x58b   : > { %11202 = vst [vmem:[#allocation66_spill] sm:$0xff] %v9350_v63  ;;  %3268 = vmatpush.bf16.msrb.mxu0 %v9350_v63  ;;  %3282 = vmatpush.bf16.msrb.mxu1 %v9352_v0  ;;  %v3198_v55 = vpop.permute.xlu1 %3197 }
 0x58c   : > { %11203 = vst [vmem:[#allocation67_spill] sm:$0xff] %v9352_v0 }
 0x58d   : > { %v3208_v52 = vpop.permute.xlu0 %3207 }
 0x58e   : > { %v3217_v47 = vsel %vm747_vm2, %v3198_v55, %v3208_v52  ;;  %v3222_v29 = vsel %vm747_vm2, %v3208_v52, %v3198_v55  ;;  %v5880_v55 = vld [vmem:[%s10842_s12] sm:$0xff] }
 0x58f   : > { %v3227_v6 = vmul.f32 %v3222_v29, %v11164_v60  ;;  %v3228_v11 = vmul.f32 %v3217_v47, %v11165_v10 }
 0x593   : > { %v3210_v27 = vpop.permute.xlu1 %3209 }
 0x594   : > { %v3218_v36 = vsel %vm747_vm2, %v3200_v62, %v3210_v27  ;;  %v3223_v61 = vsel %vm747_vm2, %v3210_v27, %v3200_v62 }
 0x595   : > { %v3229_v5 = vmul.f32 %v3223_v61, %v11164_v60  ;;  %v3230_v0 = vmul.f32 %v3218_v36, %v11165_v10  ;;  %v3335_v36 = vpop.permute.xlu2 %3334 }
 0x597   : > { %v9371_v63 = vpack.c.bf16 %v3229_v5, %v3227_v6  ;;  %v9373_v48 = vpack.c.bf16 %v3230_v0, %v3228_v11  ;;  %v3340_v11 = vpop.permute.xlu0 %3339 }
 0x599   : > { %11204 = vst [vmem:[#allocation68_spill] sm:$0xff] %v9371_v63  ;;  %3269 = vmatpush.bf16.msrb.mxu0 %v9371_v63  ;;  %3283 = vmatpush.bf16.msrb.mxu1 %v9373_v48 }
 0x59a   : > { %11205 = vst [vmem:[#allocation69_spill] sm:$0xff] %v9373_v48 }
 0x59b   : > { %v3313_v0 = vpop.f32.mrf.mxu2 }
 0x59c   : > { %5676 = vmatmul.msk.bf16.vlgmr.msrb.gmra.mxu0 %vm3252_vm8, %v5880_v55  ;;  %5677 = vmatmul.msk.bf16.vlgmr.msrb.gmra.mxu1 %vm3252_vm8, %v5880_v55 }
 0x59d   : > { %3382 = vmatpush.msra.mxu0 %v8726_v53  ;;  %3402 = vmatpush.msra.mxu1 %v8732_v51  ;;  %v11206_v53 = vld [vmem:[#allocation18_spill] sm:$0xff]  ;;  %v11207_v51 = vld [vmem:[#allocation17_spill] sm:$0xff] }
 0x59f   : > { %3383 = vmatpush.msra.mxu0 %v8749_v45  ;;  %3403 = vmatpush.msra.mxu1 %v8755_v1  ;;  %v11208_v45 = vld [vmem:[#allocation20_spill] sm:$0xff] }
 0x5a0   : > { %v11209_v1 = vld [vmem:[#allocation16_spill] sm:$0xff] }
 0x5a1   : > { %3384 = vmatpush.msra.mxu0 %v8761_v12  ;;  %3404 = vmatpush.msra.mxu1 %v8767_v22  ;;  %v11210_v12 = vld [vmem:[#allocation23_spill] sm:$0xff] }
 0x5a2   : > { %v11211_v22 = vld [vmem:[#allocation19_spill] sm:$0xff]  ;;  %v3327_v52 = vpop.f32.mrf.mxu3 }
 0x5a3   : > { %3385 = vmatpush.msra.mxu0 %v8778_v25  ;;  %3405 = vmatpush.msra.mxu1 %v8784_v4  ;;  %v11212_v25 = vld [vmem:[#allocation25_spill] sm:$0xff]  ;;  %v11213_v4 = vld [vmem:[#allocation24_spill] sm:$0xff]  ;;  %v3315_v61 = vpop.f32.mrf.mxu2 }
 0x5a5   : > { %3386 = vmatpush.msra.mxu0 %v8790_v35  ;;  %3406 = vmatpush.msra.mxu1 %v8796_v39  ;;  %v11214_v35 = vld [vmem:[#allocation26_spill] sm:$0xff]  ;;  %v11215_v39 = vld [vmem:[#allocation11_spill] sm:$0xff] }
 0x5a7   : > { %3387 = vmatpush.msra.mxu0 %v8804_v42  ;;  %3407 = vmatpush.msra.mxu1 %v8810_v40  ;;  %v11216_v42 = vld [vmem:[#allocation12_spill] sm:$0xff]  ;;  %v11217_v40 = vld [vmem:[#allocation13_spill] sm:$0xff] }
 0x5a9   : > { %3388 = vmatpush.msra.mxu0 %v8820_v56  ;;  %3408 = vmatpush.msra.mxu1 %v8826_v19  ;;  %v11218_v56 = vld [vmem:[#allocation47_spill] sm:$0xff]  ;;  %v11219_v19 = vld [vmem:[#allocation48_spill] sm:$0xff] }
 0x5aa   : > { %v3329_v6 = vpop.f32.mrf.mxu3 }
 0x5ab   : > { %3389 = vmatpush.msra.mxu0 %v8832_v59  ;;  %3409 = vmatpush.msra.mxu1 %v8838_v58  ;;  %v11220_v59 = vld [vmem:[#allocation49_spill] sm:$0xff]  ;;  %v11221_v58 = vld [vmem:[#allocation50_spill] sm:$0xff] }
 0x5ad   : > { %3390 = vmatpush.msra.mxu0 %v11206_v53  ;;  %3410 = vmatpush.msra.mxu1 %v11207_v51 }
 0x5af   : > { %3391 = vmatpush.msra.mxu0 %v11208_v45  ;;  %3411 = vmatpush.msra.mxu1 %v11209_v1 }
 0x5b1   : > { %3392 = vmatpush.msra.mxu0 %v11210_v12  ;;  %3412 = vmatpush.msra.mxu1 %v11211_v22 }
 0x5b3   : > { %3393 = vmatpush.msra.mxu0 %v11212_v25  ;;  %3413 = vmatpush.msra.mxu1 %v11213_v4 }
 0x5b5   : > { %3394 = vmatpush.msra.mxu0 %v11214_v35  ;;  %3414 = vmatpush.msra.mxu1 %v11215_v39 }
 0x5b7   : > { %3395 = vmatpush.msra.mxu0 %v11216_v42  ;;  %3415 = vmatpush.msra.mxu1 %v11217_v40 }
 0x5b9   : > { %3396 = vmatpush.msra.mxu0 %v11218_v56  ;;  %3416 = vmatpush.msra.mxu1 %v11219_v19 }
 0x5bb   : > { %3397 = vmatpush.msra.mxu0 %v11220_v59  ;;  %3417 = vmatpush.msra.mxu1 %v11221_v58 }
 0x619   : > { %v3271_v47 = vpop.f32.mrf.mxu0  ;;  %v3285_v29 = vpop.f32.mrf.mxu1 }
 0x61a   : > { %v3314_v62 = vadd.f32 %v3313_v0, %v3271_v47  ;;  %v3328_v27 = vadd.f32 %v3327_v52, %v3285_v29 }
 0x61c   : > { %v9416_v5 = vadd.f32 %v3335_v36, %v3314_v62  ;;  %v9418_v55 = vadd.f32 %v3335_v36, %v3328_v27 }
 0x61e   : > { %v3360_v25 = vmul.f32 %v9416_v5, %v9416_v5  ;;  %v3361_v4 = vmul.f32 %v9418_v55, %v9418_v55 }
 0x621   : > { %v3273_v53 = vpop.f32.mrf.mxu0  ;;  %v3287_v51 = vpop.f32.mrf.mxu1 }
 0x622   : > { %v3316_v45 = vadd.f32 %v3315_v61, %v3273_v53  ;;  %v3330_v1 = vadd.f32 %v3329_v6, %v3287_v51 }
 0x624   : > { %v9420_v12 = vadd.f32 %v3340_v11, %v3316_v45  ;;  %v9422_v22 = vadd.f32 %v3340_v11, %v3330_v1 }
 0x626   : > { %v3346_v35 = vadd.f32 %v9420_v12, %v9416_v5  ;;  %v3353_v39 = vadd.f32 %v9422_v22, %v9418_v55  ;;  %v3362_v42 = vmul.f32 %v9420_v12, %v9420_v12  ;;  %v3363_v40 = vmul.f32 %v9422_v22, %v9422_v22 }
 0x628   : > { %v3347_v56 = vrot.slane %v3346_v35, 4  ;;  %v3354_v19 = vrot.slane %v3353_v39, 4  ;;  %v3364_v59 = vadd.f32 %v3362_v42, %v3360_v25  ;;  %v3371_v58 = vadd.f32 %v3363_v40, %v3361_v4 }
 0x62a   : > { %v3348_v0 = vadd.f32 %v3347_v56, %v3346_v35  ;;  %v3355_v52 = vadd.f32 %v3354_v19, %v3353_v39  ;;  %v3365_v47 = vrot.slane %v3364_v59, 4  ;;  %v3372_v29 = vrot.slane %v3371_v58, 4  ;;  %v11222_v56 = vld [vmem:[#allocation51_spill] sm:$0xff] }
 0x62b   : > { %v3462_v19 = vmul.f32 16.0, %v11222_v56 }
 0x62c   : > { %v3349_v62 = vrot.slane %v3348_v0, 2  ;;  %v3356_v27 = vrot.slane %v3355_v52, 2  ;;  %v3366_v36 = vadd.f32 %v3365_v47, %v3364_v59  ;;  %v3373_v61 = vadd.f32 %v3372_v29, %v3371_v58 }
 0x62d   : > { %v3464_v59 = vperm.slane %v3462_v19, 0  ;;  %v3465_v58 = vperm.slane %v3462_v19, 2 }
 0x62e   : > { %v3350_v6 = vadd.f32 %v3349_v62, %v3348_v0  ;;  %v3357_v11 = vadd.f32 %v3356_v27, %v3355_v52  ;;  %v3367_v53 = vrot.slane %v3366_v36, 2  ;;  %v3374_v51 = vrot.slane %v3373_v61, 2 }
 0x62f   : > { %6140 = vrcp.f32 %v3464_v59  ;;  %vm3473_vm10 = vweird.f32 %v3464_v59  ;;  %v3479_v47 = vand.u32 2147483648, %v3464_v59  ;;  %v3477_v27 = vand.u32 2147483647, %v3464_v59 }
 0x630   : > { %v3351_v45 = vrot.slane %v3350_v6, 1  ;;  %v3358_v1 = vrot.slane %v3357_v11, 1  ;;  %v3368_v48 = vadd.f32 %v3367_v53, %v3366_v36  ;;  %v3375_v63 = vadd.f32 %v3374_v51, %v3373_v61 }
 0x631   : > { %6142 = vrcp.f32 %v3465_v58  ;;  %v3480_v36 = vor.u32 1.1754944e-38, %v3479_v47  ;;  %vm3478_vm13 = vcmp.eq.f32.partialorder %v3477_v27, 8.507059e+37  ;;  %vm3488_vm14 = vweird.f32 %v3465_v58 }
 0x632   : > { %v3369_v37 = vrot.slane %v3368_v48, 1  ;;  %v3376_v30 = vrot.slane %v3375_v63, 1  ;;  %v3352_v25 = vadd.f32 %v3351_v45, %v3350_v6  ;;  %v3359_v4 = vadd.f32 %v3358_v1, %v3357_v11 }
 0x633   : > { %v3494_v11 = vand.u32 2147483648, %v3465_v58 }
 0x634   : > { %v3370_v35 = vadd.f32 %v3369_v37, %v3368_v48  ;;  %v3377_v39 = vadd.f32 %v3376_v30, %v3375_v63 }
 0x635   : > { %v6141_v0 = vpop.eup %6140 }
 0x636   : > { %v3378_v42 = vsel %vm860_vm0, %v3352_v25, %v3370_v35  ;;  %v3379_v40 = vsel %vm860_vm0, %v3359_v4, %v3377_v39  ;;  %v3469_v37 = vmul.f32 %v6141_v0, %v3464_v59  ;;  %vm3474_vm11 = vweird.f32 %v6141_v0 }
 0x637   : > { %5684 = vmatmul.msk.f32.vlgmr.msra.gmra.mxu0 %vm2008_vm7, %v3378_v42  ;;  %5685 = vmatmul.msk.f32.vlgmr.msra.gmra.mxu1 %vm2008_vm7, %v3379_v40  ;;  %v6143_v48 = vpop.eup %6142  ;;  %vm3475_vm12 = vmor %vm3473_vm10, %vm3474_vm11  ;;  %v3492_v25 = vand.u32 2147483647, %v3465_v58  ;;  %v3495_v39 = vor.u32 1.1754944e-38, %v3494_v11 }
 0x638   : > { %5686 = vmatmul.msk.f32.vlgmr.msra.gmra.mxu2 %vm2008_vm7, %v3378_v42  ;;  %5687 = vmatmul.msk.f32.vlgmr.msra.gmra.mxu3 %vm2008_vm7, %v3379_v40  ;;  %v3470_v30 = vsub.f32 1.0, %v3469_v37  ;;  %v3484_v63 = vmul.f32 %v6143_v48, %v3465_v58  ;;  %vm3489_vm15 = vweird.f32 %v6143_v48 }
 0x639   : > { %vm3490_vm3 = vmor %vm3488_vm14, %vm3489_vm15  ;;  %vm3493_vm4 = vcmp.eq.f32.partialorder %v3492_v25, 8.507059e+37  ;;  %v3558_v25 = vpop.permute.xlu1 %3557 }
 0x63a   : > { %v3471_v52 = vmul.f32 %v6141_v0, %v3470_v30  ;;  %v3485_v29 = vsub.f32 1.0, %v3484_v63 }
 0x63c   : > { %v3472_v62 = vadd.f32 %v6141_v0, %v3471_v52  ;;  %v3486_v61 = vmul.f32 %v6143_v48, %v3485_v29 }
 0x63e   : > { %v3476_v6 = vsel %vm3475_vm12, %v6141_v0, %v3472_v62  ;;  %v3487_v1 = vadd.f32 %v6143_v48, %v3486_v61 }
 0x63f   : > { %v3481_v45 = vsel %vm3478_vm13, %v3480_v36, %v3476_v6 }
 0x640   : > { %v3491_v42 = vsel %vm3490_vm3, %v6143_v48, %v3487_v1 }
 0x641   : > { %v3496_v0 = vsel %vm3493_vm4, %v3495_v39, %v3491_v42  ;;  %vm3648_vm4 = vcmask 130048  }
 0x6b4   : > { %v3399_v53 = vpop.f32.mrf.mxu0  ;;  %v3419_v51 = vpop.f32.mrf.mxu1 }
 0x6b5   : > { %v3420_v4 = vadd.f32 %v3419_v51, %v3399_v53 }
 0x6b7   : > { %v3482_v35 = vmul.f32 %v3481_v45, %v3420_v4 }
 0x6b9   : > { %v3498_v40 = vmul.f32 2.0, %v3482_v35  ;;  %v3512_v63 = vmul.f32 %v3482_v35, %v3482_v35 }
 0x6bb   : > { %v3500_v56 = vmul.f32 %v3498_v40, %v3420_v4  ;;  %v3439_v19 = vpop.f32.mrf.mxu2  ;;  %v3459_v59 = vpop.f32.mrf.mxu3  ;;  %v3516_v27 = vrot.slane %v3512_v63, 7 }
 0x6bc   : > { %v3460_v37 = vadd.f32 %v3459_v59, %v3439_v19  ;;  %v3562_v19 = vpop.permute.xlu2 %3561 }
 0x6bd   : > { %v3504_v30 = vrot.slane %v3500_v56, 7 }
 0x6be   : > { %v3497_v52 = vmul.f32 %v3496_v0, %v3460_v37 }
 0x6bf   : > { %v3508_v47 = vsub.f32 %v3420_v4, %v3504_v30  ;;  %v3570_v30 = vpop.permute.xlu1 %3569 }
 0x6c0   : > { %v3499_v29 = vmul.f32 2.0, %v3497_v52  ;;  %v3513_v6 = vmul.f32 %v3497_v52, %v3497_v52 }
 0x6c1   : > { %v3510_v62 = vmul.f32 %v3508_v47, %v3481_v45  ;;  %v3544_v47 = vperm.slane %v3482_v35, 0 }
 0x6c2   : > { %v3501_v58 = vmul.f32 %v3499_v29, %v3460_v37  ;;  %v3517_v51 = vrot.slane %v3513_v6, 7 }
 0x6c3   : > { %v3520_v36 = vadd.f32 %v3516_v27, %v3510_v62  ;;  %v3546_v27 = vsub.f32 %v9416_v5, %v3544_v47 }
 0x6c4   : > { %v3505_v61 = vrot.slane %v3501_v58, 7 }
 0x6c5   : > { %v3522_v11 = vadd.f32 1e-05, %v3520_v36  ;;  %v3548_v36 = vsub.f32 %v9420_v12, %v3544_v47 }
 0x6c6   : > { %v3509_v48 = vsub.f32 %v3460_v37, %v3505_v61 }
 0x6c7   : > { %6144 = vrsqrt.f32 %v3522_v11  ;;  %vm3530_vm5 = vweird.f32 %v3522_v11 }
 0x6c8   : > { %v3511_v53 = vmul.f32 %v3509_v48, %v3496_v0 }
 0x6ca   : > { %v3521_v1 = vadd.f32 %v3517_v51, %v3511_v53  ;;  %v3545_v53 = vperm.slane %v3497_v52, 0  ;;  %v3574_v51 = vpop.permute.xlu2 %3573 }
 0x6cc   : > { %v3523_v39 = vadd.f32 1e-05, %v3521_v1  ;;  %v3547_v5 = vsub.f32 %v9418_v55, %v3545_v53  ;;  %v3549_v12 = vsub.f32 %v9422_v22, %v3545_v53  ;;  %v9558_v53 = vld [vmem:[%s11048_s1 + $0xe0] sm:$0xff] }
 0x6cd   : > { %v6145_v42 = vpop.eup %6144 }
 0x6ce   : > { %v3525_v40 = vmul.f32 %v6145_v42, %v3522_v11  ;;  %6146 = vrsqrt.f32 %v3523_v39  ;;  %vm3531_vm1 = vweird.f32 %v6145_v42  ;;  %vm3540_vm11 = vweird.f32 %v3523_v39  ;;  %v3586_v11 = vpop.permute.xlu0 %3585 }
 0x6cf   : > { %vm3532_vm6 = vmor %vm3530_vm5, %vm3531_vm1 }
 0x6d0   : > { %v3526_v56 = vmul.f32 %v6145_v42, %v3525_v40 }
 0x6d2   : > { %v3527_v4 = vmul.f32 0.5, %v3526_v56  ;;  %v3590_v56 = vpop.permute.xlu1 %3589 }
 0x6d4   : > { %v6147_v45 = vpop.eup %6146  ;;  %v3528_v59 = vsub.f32 1.5, %v3527_v4 }
 0x6d5   : > { %v3535_v63 = vmul.f32 %v6147_v45, %v3523_v39  ;;  %vm3541_vm10 = vweird.f32 %v6147_v45 }
 0x6d6   : > { %v3529_v29 = vmul.f32 %v6145_v42, %v3528_v59  ;;  %vm3542_vm12 = vmor %vm3540_vm11, %vm3541_vm10 }
 0x6d7   : > { %v3536_v0 = vmul.f32 %v6147_v45, %v3535_v63 }
 0x6d8   : > { %v3533_v37 = vsel %vm3532_vm6, %v6145_v42, %v3529_v29 }
 0x6d9   : > { %v3537_v62 = vmul.f32 0.5, %v3536_v0  ;;  %v3550_v58 = vperm.slane %v3533_v37, 1 }
 0x6db   : > { %v3538_v61 = vsub.f32 1.5, %v3537_v62  ;;  %v3552_v6 = vmul.f32 %v3550_v58, %v3546_v27  ;;  %v3554_v48 = vmul.f32 %v3550_v58, %v3548_v36 }
 0x6dd   : > { %v3539_v1 = vmul.f32 %v6147_v45, %v3538_v61  ;;  %v3564_v35 = vmul.f32 %v3558_v25, %v3552_v6  ;;  %v3566_v40 = vmul.f32 %v3562_v19, %v3554_v48  ;;  %v3604_v48 = vld [vmem:[%s10846_s16 + $0x20] sm:$0xff] }
 0x6df   : > { %v3543_v42 = vsel %vm3542_vm12, %v6147_v45, %v3539_v1  ;;  %v3576_v4 = vadd.f32 %v3570_v30, %v3564_v35  ;;  %v3578_v59 = vadd.f32 %v3574_v51, %v3566_v40  ;;  %v9570_v1 = vld [vmem:[%s11048_s1 + $0xd0] sm:$0xff]  ;;  %v9582_v40 = vld [vmem:[%s11048_s1 + $0xc0] sm:$0xff] }
 0x6e0   : > { %v3551_v63 = vperm.slane %v3543_v42, 1  ;;  %v9576_v35 = vld [vmem:[%s11048_s1 + $0x1d0] sm:$0xff] }
 0x6e1   : > { %v3592_v47 = vmul.f32 %v3586_v11, %v3576_v4  ;;  %v3594_v29 = vmul.f32 %v3590_v56, %v3578_v59  ;;  %vm3582_vm13 = vcmp.ge.f32.partialorder %v3578_v59, 0.0  ;;  %vm3580_vm14 = vcmp.ge.f32.partialorder %v3576_v4, 0.0  ;;  %v9600_v42 = vld [vmem:[%s11048_s1 + $0x1b0] sm:$0xff] }
 0x6e2   : > { %v3553_v52 = vmul.f32 %v3551_v63, %v3547_v5  ;;  %v3555_v0 = vmul.f32 %v3551_v63, %v3549_v12  ;;  %v9613_v5 = vld [vmem:[%s11048_s1 + $0x1a0] sm:$0xff]  ;;  %v5884_v63 = vld [vmem:[%s10845_s15 + $0x8] sm:$0xff]  ;;  %v9623_v12 = vld [vmem:[%s11048_s1 + $0x90] sm:$0xff] }
 0x6e3   : > { %v3598_v39 = vsel %vm3582_vm13, %v3578_v59, %v3594_v29  ;;  %v3596_v37 = vsel %vm3580_vm14, %v3576_v4, %v3592_v47  ;;  %v11227_v4 = vmov 1   ;;  %v9607_v59 = vld [vmem:[%s11048_s1 + $0xa0] sm:$0xff]  ;;  %v9629_v47 = vld [vmem:[%s11048_s1 + $0x190] sm:$0xff] }
 0x6e4   : > { %v3565_v62 = vmul.f32 %v3558_v25, %v3553_v52  ;;  %v3567_v27 = vmul.f32 %v3562_v19, %v3555_v0  ;;  %3609 = vrot.lane.b32.xlu1 %v3598_v39, %s11128_s0  ;;  %3607 = vrot.lane.b32.xlu2 %v3596_v37, %s11128_s0  ;;  %v3605_v45 = vpack.c.bf16 %v3598_v39, %v3596_v37  ;;  %v9543_v19 = vld [vmem:[%s10846_s16 + $0x18] sm:$0xff]  ;;  %v9636_v29 = vld [vmem:[%s11048_s1 + $0x80] sm:$0xff]  ;;  %v11228_v37 = vmov 2  }
 0x6e5   : > { %v9642_v52 = vld [vmem:[%s11048_s1 + $0x180] sm:$0xff]  ;;  %v9650_v0 = vld [vmem:[%s11048_s1 + $0x70] sm:$0xff] }
 0x6e6   : > { %v3577_v58 = vadd.f32 %v3570_v30, %v3565_v62  ;;  %v3579_v55 = vadd.f32 %v3574_v51, %v3567_v27  ;;  %3733 = vmatpush.bf16.msrb.mxu2 %v3605_v45  ;;  %v9548_v30 = vld [vmem:[%s10846_s16 + $0x8] sm:$0xff]  ;;  %v9564_v51 = vld [vmem:[%s11048_s1 + $0x1e0] sm:$0xff]  ;;  %v9656_v39 = vld [vmem:[%s11048_s1 + $0x170] sm:$0xff] }
 0x6e7   : > { %v9663_v62 = vld [vmem:[%s11048_s1 + $0x60] sm:$0xff]  ;;  %v3634_v45 = vld [vmem:[%s10845_s15 + $0x10] sm:$0xf] }
 0x6e8   : > { %v3593_v22 = vmul.f32 %v3586_v11, %v3577_v58  ;;  %v3595_v36 = vmul.f32 %v3590_v56, %v3579_v55  ;;  %vm3583_vm15 = vcmp.ge.f32.partialorder %v3579_v55, 0.0  ;;  %vm3581_vm3 = vcmp.ge.f32.partialorder %v3577_v58, 0.0  ;;  %v9588_v11 = vld [vmem:[%s11048_s1 + $0x1c0] sm:$0xff]  ;;  %v9594_v56 = vld [vmem:[%s11048_s1 + $0xb0] sm:$0xff] }
 0x6e9   : > { %v9669_v27 = vld [vmem:[%s11048_s1 + $0x160] sm:$0xff] }
 0x6ea   : > { %3901 = vmatpush.msra.mxu2 %v9112_v31  ;;  %v3599_v61 = vsel %vm3583_vm15, %v3579_v55, %v3595_v36  ;;  %v3597_v6 = vsel %vm3581_vm3, %v3577_v58, %v3593_v22  ;;  %v11223_v31 = vld [vmem:[#allocation60_spill] sm:$0xff]  ;;  %v9679_v58 = vld [vmem:[%s11048_s1 + $0x50] sm:$0xff]  ;;  %v9692_v22 = vld [vmem:[%s11048_s1 + $0x40] sm:$0xff] }
 0x6eb   : > { %3613 = vrot.lane.b32.xlu0 %v3599_v61, %s11128_s0  ;;  %v3606_v25 = vpack.c.bf16 %v3599_v61, %v3597_v6  ;;  %11229 = vst [vmem:[#allocation18_spill] sm:$0xff] %v9679_v58  ;;  %v9685_v55 = vld [vmem:[%s11048_s1 + $0x150] sm:$0xff]  ;;  %v9698_v36 = vld [vmem:[%s11048_s1 + $0x140] sm:$0xff]  ;;  %v3644_v61 = vunpack.c.l.b16 %v3634_v45 }
 0x6ec   : > { %3902 = vmatpush.msra.mxu2 %v9120_v2  ;;  %3611 = vrot.lane.b32.xlu2 %v3597_v6, %s11128_s0  ;;  %v11224_v2 = vld [vmem:[#allocation61_spill] sm:$0xff]  ;;  %11230 = vst [vmem:[#allocation17_spill] sm:$0xff] %v9685_v55 }
 0x6ed   : > { %3756 = vmatpush.bf16.msrb.mxu3 %v3606_v25  ;;  %11231 = vst [vmem:[#allocation20_spill] sm:$0xff] %v9692_v22  ;;  %v9705_v6 = vld [vmem:[%s11048_s1 + $0x30] sm:$0xff] }
 0x6ee   : > { %3903 = vmatpush.msra.mxu2 %v9129_v26  ;;  %v11225_v26 = vld [vmem:[#allocation62_spill] sm:$0xff]  ;;  %11232 = vst [vmem:[#allocation16_spill] sm:$0xff] %v9698_v36  ;;  %v9711_v25 = vld [vmem:[%s11048_s1 + $0x130] sm:$0xff] }
 0x6ef   : > { %11233 = vst [vmem:[#allocation23_spill] sm:$0xff] %v9705_v6 }
 0x6f0   : > { %3904 = vmatpush.msra.mxu2 %v9143_v13  ;;  %v5881_v13 = vld [vmem:[%s10844_s14] sm:$0xff]  ;;  %11234 = vst [vmem:[#allocation19_spill] sm:$0xff] %v9711_v25 }
 0x6f1   : > { %3921 = vmatpush.msra.mxu3 %v9137_v24  ;;  %v11226_v24 = vld [vmem:[#allocation63_spill] sm:$0xff]  ;;  %5710 = vmatmul.msk.bf16.vlgmr.msrb.gmra.mxu2 %vm3648_vm4, %v5881_v13 }
 0x6f2   : > { %3905 = vmatpush.msra.mxu2 %v9155_v28  ;;  %5713 = vmatmul.msk.bf16.vlgmr.msrb.gmra.mxu3 %vm3648_vm4, %v5881_v13  ;;  %v9737_v13 = vld [vmem:[%s11048_s1 + $0x110] sm:$0xff] }
 0x6f3   : > { %3922 = vmatpush.msra.mxu3 %v9149_v18  ;;  %v5882_v18 = vld [vmem:[%s10844_s14 + $0x8] sm:$0xff]  ;;  %11238 = vst [vmem:[#allocation11_spill] sm:$0xff] %v9737_v13 }
 0x6f4   : > { %3906 = vmatpush.msra.mxu2 %v9169_v49  ;;  %v3629_v49 = vld [vmem:[%s10844_s14 + $0x10] sm:$0xf]  ;;  %3779 = vperm.xlu2 %6009, %v9548_v30  }
 0x6f5   : > { %3923 = vmatpush.msra.mxu3 %v9162_v38  ;;  %v9496_v38 = vld [vmem:[%s10846_s16] sm:$0xff] }
 0x6f6   : > { %3907 = vmatpush.msra.mxu2 %v9181_v54  ;;  %3774 = vperm.xlu1 %6008, %v9496_v38  }
 0x6f7   : > { %3924 = vmatpush.msra.mxu3 %v9175_v44  ;;  %v9504_v44 = vld [vmem:[%s10846_s16 + $0x10] sm:$0xff] }
 0x6f8   : > { %3908 = vmatpush.msra.mxu2 %v9193_v3  ;;  %3784 = vperm.xlu0 %6010, %v9504_v44  }
 0x6f9   : > { %3925 = vmatpush.msra.mxu3 %v9187_v23  ;;  %v3713_v23 = vunpack.c.l.b16 %v3629_v49  ;;  %v11241_v49 = vmov 0  }
 0x6fa   : > { %3909 = vmatpush.msra.mxu2 %v9205_v46 }
 0x6fb   : > { %3926 = vmatpush.msra.mxu3 %v9199_v17 }
 0x6fc   : > { %3910 = vmatpush.msra.mxu2 %v9217_v16  ;;  %v3716_v16 = vpack.c.b16 %v3713_v23, %v3713_v23  ;;  %3794 = vperm.xlu2 %6009, %v3604_v48  }
 0x6fd   : > { %3927 = vmatpush.msra.mxu3 %v9211_v20 }
 0x6fe   : > { %3911 = vmatpush.msra.mxu2 %v9229_v50  ;;  %3789 = vperm.xlu1 %6008, %v9543_v19  }
 0x6ff   : > { %3928 = vmatpush.msra.mxu3 %v9223_v9 }
 0x700   : > { %3912 = vmatpush.msra.mxu2 %v9241_v21  ;;  %6013 = vset.pattern.permute.xlu0 %v11168_v15 }
 0x701   : > { %3929 = vmatpush.msra.mxu3 %v9235_v14  ;;  %5711 = vmatmul.msk.bf16.gmra.mxu2 %vm3648_vm4, %v5882_v18 }
 0x702   : > { %3913 = vmatpush.msra.mxu2 %v9253_v7  ;;  %5714 = vmatmul.msk.bf16.gmra.mxu3 %vm3648_vm4, %v5882_v18  ;;  %v9745_v18 = vld [vmem:[%s11048_s1] sm:$0xff] }
 0x703   : > { %3930 = vmatpush.msra.mxu3 %v9247_v41  ;;  %4100 = vperm.xlu0 %6013, %v3604_v48   ;;  %11239 = vst [vmem:[#allocation12_spill] sm:$0xff] %v9745_v18 }
 0x704   : > { %3914 = vmatpush.msra.mxu2 %v9265_v32  ;;  %6012 = vset.pattern.permute.xlu2 %v11228_v37 }
 0x705   : > { %3931 = vmatpush.msra.mxu3 %v9259_v33  ;;  %4060 = vperm.xlu2 %6012, %v3604_v48  }
 0x706   : > { %3915 = vmatpush.msra.mxu2 %v9277_v57  ;;  %v9529_v57 = vld [vmem:[%s11048_s1 + $0xf0] sm:$0xff]  ;;  %6011 = vset.pattern.permute.xlu1 %v11227_v4 }
 0x707   : > { %3932 = vmatpush.msra.mxu3 %v9271_v43  ;;  %v5883_v43 = vld [vmem:[%s10845_s15] sm:$0xff]  ;;  %4030 = vperm.xlu1 %6011, %v3604_v48  }
 0x708   : > { %3916 = vmatpush.msra.mxu2 %v9289_v8  ;;  %v9535_v8 = vld [vmem:[%s11048_s1 + $0x1f0] sm:$0xff] }
 0x709   : > { %3933 = vmatpush.msra.mxu3 %v11223_v31  ;;  %v9717_v31 = vld [vmem:[%s11048_s1 + $0x20] sm:$0xff] }
 0x70a   : > { %11235 = vst [vmem:[#allocation25_spill] sm:$0xff] %v9717_v31 }
 0x70b   : > { %3934 = vmatpush.msra.mxu3 %v11224_v2  ;;  %6017 = vset.pattern.permute.xlu0 %v11227_v4  ;;  %v9723_v2 = vld [vmem:[%s11048_s1 + $0x120] sm:$0xff] }
 0x70c   : > { %4014 = vperm.xlu0 %6017, %v9496_v38   ;;  %11236 = vst [vmem:[#allocation24_spill] sm:$0xff] %v9723_v2 }
 0x70d   : > { %3935 = vmatpush.msra.mxu3 %v11225_v26  ;;  %v3647_v26 = vpack.c.b16 %v3644_v61, %v3644_v61  ;;  %6014 = vset.pattern.permute.xlu2 %v11227_v4 }
 0x70e   : > { %4026 = vperm.xlu2 %6014, %v9543_v19  }
 0x70f   : > { %3936 = vmatpush.msra.mxu3 %v11226_v24  ;;  %4022 = vperm.xlu1 %6011, %v9504_v44   ;;  %v9731_v24 = vld [vmem:[%s11048_s1 + $0x10] sm:$0xff] }
 0x710   : > { %11237 = vst [vmem:[#allocation26_spill] sm:$0xff] %v9731_v24 }
 0x711   : > { %5712 = vmatmul.msk.bf16.gmra.mxu2 %vm3648_vm4, %v3716_v16 }
 0x712   : > { %5715 = vmatmul.msk.bf16.gmra.mxu3 %vm3648_vm4, %v3716_v16 }
 0x714   : > { %6022 = vset.pattern.permute.xlu0 %v11228_v37 }
 0x715   : > { %4048 = vperm.xlu0 %6022, %v9548_v30  }
 0x716   : > { %6016 = vset.pattern.permute.xlu2 %v11228_v37 }
 0x717   : > { %6015 = vset.pattern.permute.xlu1 %v11228_v37  ;;  %4056 = vperm.xlu2 %6016, %v9543_v19  }
 0x718   : > { %4052 = vperm.xlu1 %6015, %v9504_v44  }
 0x71d   : > { %6025 = vset.pattern.permute.xlu0 %v11241_v49 }
 0x71f   : > { %6019 = vset.pattern.permute.xlu2 %v11168_v15 }
 0x720   : > { %6018 = vset.pattern.permute.xlu1 %v11227_v4  ;;  %4092 = vperm.xlu2 %6019, %v9504_v44  }
 0x721   : > { %4018 = vperm.xlu1 %6018, %v9548_v30  }
 0x728   : > { %6021 = vset.pattern.permute.xlu2 %v11228_v37 }
 0x729   : > { %6020 = vset.pattern.permute.xlu1 %v11168_v15  ;;  %4044 = vperm.xlu2 %6021, %v9496_v38  }
 0x72a   : > { %4096 = vperm.xlu1 %6020, %v9543_v19  }
 0x731   : > { %6023 = vset.pattern.permute.xlu2 %v11168_v15 }
 0x732   : > { %4084 = vperm.xlu1 %6020, %v9496_v38   ;;  %4088 = vperm.xlu2 %6023, %v9548_v30  }
 0x73a   : > { %6026 = vset.pattern.permute.xlu1 %v11241_v49  ;;  %6024 = vset.pattern.permute.xlu2 %v11241_v49 }
 0x73e   : > { %v3608_v28 = vpop.permute.xlu2 %3607 }
 0x746   : > { %v3612_v54 = vpop.permute.xlu2 %3611 }
 0x747   : > { %v3615_v3 = vsel %vm747_vm2, %v3608_v28, %v3612_v54  ;;  %v3617_v17 = vsel %vm747_vm2, %v3612_v54, %v3608_v28  ;;  %v9751_v28 = vld [vmem:[%s11048_s1 + $0x100] sm:$0xff] }
 0x748   : > { %v3619_v14 = vmul.f32 %v3617_v17, %v11164_v60  ;;  %v3620_v21 = vmul.f32 %v3615_v3, %v11165_v10  ;;  %11240 = vst [vmem:[#allocation13_spill] sm:$0xff] %v9751_v28 }
 0x756   : > { %v3610_v46 = vpop.permute.xlu1 %3609 }
 0x75d   : > { %v3614_v20 = vpop.permute.xlu0 %3613 }
 0x75e   : > { %v3616_v9 = vsel %vm747_vm2, %v3610_v46, %v3614_v20  ;;  %v3618_v50 = vsel %vm747_vm2, %v3614_v20, %v3610_v46 }
 0x75f   : > { %v3621_v41 = vmul.f32 %v3618_v50, %v11164_v60  ;;  %v3622_v7 = vmul.f32 %v3616_v9, %v11165_v10 }
 0x761   : > { %v3623_v33 = vpack.c.bf16 %v3621_v41, %v3619_v14  ;;  %v3624_v32 = vpack.c.bf16 %v3622_v7, %v3620_v21 }
 0x763   : > { %3665 = vmatpush.bf16.msrb.mxu0 %v3623_v33  ;;  %3688 = vmatpush.bf16.msrb.mxu1 %v3624_v32 }
 0x766   : > { %5696 = vmatmul.msk.bf16.vlgmr.msrb.gmra.mxu0 %vm3648_vm4, %v5883_v43  ;;  %5699 = vmatmul.msk.bf16.vlgmr.msrb.gmra.mxu1 %vm3648_vm4, %v5883_v43 }
 0x767   : > { %3861 = vmatpush.msra.mxu0 %v9529_v57  ;;  %3881 = vmatpush.msra.mxu1 %v9535_v8 }
 0x768   : > { %v3775_v19 = vpop.permute.xlu1 %3774 }
 0x769   : > { %3862 = vmatpush.msra.mxu0 %v9558_v53  ;;  %3882 = vmatpush.msra.mxu1 %v9564_v51 }
 0x76a   : > { %v3785_v15 = vpop.permute.xlu0 %3784 }
 0x76b   : > { %3863 = vmatpush.msra.mxu0 %v9570_v1  ;;  %3883 = vmatpush.msra.mxu1 %v9576_v35 }
 0x76d   : > { %3864 = vmatpush.msra.mxu0 %v9582_v40  ;;  %3884 = vmatpush.msra.mxu1 %v9588_v11 }
 0x76f   : > { %3865 = vmatpush.msra.mxu0 %v9594_v56  ;;  %3885 = vmatpush.msra.mxu1 %v9600_v42 }
 0x771   : > { %3866 = vmatpush.msra.mxu0 %v9607_v59  ;;  %3886 = vmatpush.msra.mxu1 %v9613_v5 }
 0x773   : > { %3867 = vmatpush.msra.mxu0 %v9623_v12  ;;  %3887 = vmatpush.msra.mxu1 %v9629_v47 }
 0x774   : > { %v3735_v54 = vpop.f32.mrf.mxu2 }
 0x775   : > { %3868 = vmatpush.msra.mxu0 %v9636_v29  ;;  %3888 = vmatpush.msra.mxu1 %v9642_v52  ;;  %v3758_v23 = vpop.f32.mrf.mxu3 }
 0x776   : > { %5697 = vmatmul.msk.bf16.gmra.mxu0 %vm3648_vm4, %v5884_v63  ;;  %5700 = vmatmul.msk.bf16.gmra.mxu1 %vm3648_vm4, %v5884_v63  ;;  %v3780_v63 = vpop.permute.xlu2 %3779 }
 0x777   : > { %3869 = vmatpush.msra.mxu0 %v9650_v0  ;;  %3889 = vmatpush.msra.mxu1 %v9656_v39 }
 0x779   : > { %3870 = vmatpush.msra.mxu0 %v9663_v62  ;;  %3890 = vmatpush.msra.mxu1 %v9669_v27 }
 0x77b   : > { %3871 = vmatpush.msra.mxu0 %v9679_v58  ;;  %3891 = vmatpush.msra.mxu1 %v9685_v55 }
 0x77c   : > { %v3737_v3 = vpop.f32.mrf.mxu2 }
 0x77d   : > { %3872 = vmatpush.msra.mxu0 %v9692_v22  ;;  %3892 = vmatpush.msra.mxu1 %v9698_v36  ;;  %v3760_v17 = vpop.f32.mrf.mxu3  ;;  %v9844_v36 = vpop.permute.xlu0 %4100 }
 0x77f   : > { %3873 = vmatpush.msra.mxu0 %v9705_v6  ;;  %3893 = vmatpush.msra.mxu1 %v9711_v25 }
 0x781   : > { %3874 = vmatpush.msra.mxu0 %v9717_v31  ;;  %3894 = vmatpush.msra.mxu1 %v9723_v2 }
 0x783   : > { %3875 = vmatpush.msra.mxu0 %v9731_v24  ;;  %3895 = vmatpush.msra.mxu1 %v9737_v13 }
 0x784   : > { %v3740_v46 = vpop.f32.mrf.mxu2 }
 0x785   : > { %3876 = vmatpush.msra.mxu0 %v9745_v18  ;;  %3896 = vmatpush.msra.mxu1 %v9751_v28  ;;  %v3763_v44 = vpop.f32.mrf.mxu3 }
 0x786   : > { %5698 = vmatmul.msk.bf16.gmra.mxu0 %vm3648_vm4, %v3647_v26  ;;  %5701 = vmatmul.msk.bf16.gmra.mxu1 %vm3648_vm4, %v3647_v26 }
 0x78c   : > { %v3742_v20 = vpop.f32.mrf.mxu2 }
 0x78d   : > { %v3765_v16 = vpop.f32.mrf.mxu3 }
 0x794   : > { %v3745_v14 = vpop.f32.mrf.mxu2 }
 0x795   : > { %v3768_v38 = vpop.f32.mrf.mxu3 }
 0x79c   : > { %v3747_v7 = vpop.f32.mrf.mxu2 }
 0x79d   : > { %v3770_v33 = vpop.f32.mrf.mxu3 }
 0x7e3   : > { %v3667_v9 = vpop.f32.mrf.mxu0  ;;  %v3690_v50 = vpop.f32.mrf.mxu1 }
 0x7e4   : > { %v3736_v45 = vadd.f32 %v3735_v54, %v3667_v9  ;;  %v3759_v61 = vadd.f32 %v3758_v23, %v3690_v50  ;;  %v3790_v54 = vpop.permute.xlu1 %3789 }
 0x7e6   : > { %v9776_v33 = vadd.f32 %v3775_v19, %v3736_v45  ;;  %v9778_v24 = vadd.f32 %v3775_v19, %v3759_v61 }
 0x7eb   : > { %v3669_v21 = vpop.f32.mrf.mxu0  ;;  %v3692_v41 = vpop.f32.mrf.mxu1 }
 0x7ec   : > { %v3738_v30 = vadd.f32 %v3737_v3, %v3669_v21  ;;  %v3761_v48 = vadd.f32 %v3760_v17, %v3692_v41 }
 0x7ee   : > { %v9772_v37 = vadd.f32 %v3780_v63, %v3738_v30  ;;  %v9774_v4 = vadd.f32 %v3780_v63, %v3761_v48 }
 0x7f0   : > { %v3829_v23 = vmul.f32 %v9772_v37, %v9772_v37 }
 0x7f3   : > { %v3672_v32 = vpop.f32.mrf.mxu0  ;;  %v3695_v43 = vpop.f32.mrf.mxu1 }
 0x7f4   : > { %v3741_v26 = vadd.f32 %v3740_v46, %v3672_v32  ;;  %v3764_v49 = vadd.f32 %v3763_v44, %v3695_v43  ;;  %v3830_v46 = vmul.f32 %v9774_v4, %v9774_v4 }
 0x7f6   : > { %v9780_v3 = vadd.f32 %v3785_v15, %v3741_v26  ;;  %v9782_v17 = vadd.f32 %v3785_v15, %v3764_v49  ;;  %v3795_v49 = vpop.permute.xlu2 %3794 }
 0x7f8   : > { %v3831_v15 = vmul.f32 %v9780_v3, %v9780_v3 }
 0x7fb   : > { %v3674_v28 = vpop.f32.mrf.mxu0  ;;  %v3697_v18 = vpop.f32.mrf.mxu1 }
 0x7fc   : > { %v3743_v13 = vadd.f32 %v3742_v20, %v3674_v28  ;;  %v3766_v7 = vadd.f32 %v3765_v16, %v3697_v18  ;;  %v3827_v18 = vmul.f32 %v9776_v33, %v9776_v33  ;;  %v3828_v28 = vmul.f32 %v9778_v24, %v9778_v24 }
 0x7fd   : > { %v3832_v20 = vmul.f32 %v9782_v17, %v9782_v17  ;;  %v3807_v16 = vadd.f32 %v9772_v37, %v9776_v33 }
 0x7fe   : > { %v9788_v44 = vadd.f32 %v3790_v54, %v3743_v13  ;;  %v9790_v9 = vadd.f32 %v3790_v54, %v3766_v7  ;;  %v3817_v13 = vadd.f32 %v9774_v4, %v9778_v24  ;;  %v3837_v50 = vadd.f32 %v3829_v23, %v3827_v18 }
 0x7ff   : > { %v3847_v21 = vadd.f32 %v3830_v46, %v3828_v28  ;;  %v3808_v30 = vadd.f32 %v3807_v16, %v9780_v3 }
 0x800   : > { %v3833_v41 = vmul.f32 %v9788_v44, %v9788_v44  ;;  %v3834_v32 = vmul.f32 %v9790_v9, %v9790_v9  ;;  %v3818_v48 = vadd.f32 %v3817_v13, %v9782_v17  ;;  %v3838_v61 = vadd.f32 %v3837_v50, %v3831_v15 }
 0x801   : > { %v3848_v26 = vadd.f32 %v3847_v21, %v3832_v20  ;;  %v3809_v7 = vadd.f32 %v3808_v30, %v9788_v44 }
 0x802   : > { %v3819_v54 = vadd.f32 %v3818_v48, %v9790_v9  ;;  %v3839_v18 = vadd.f32 %v3838_v61, %v3833_v41 }
 0x803   : > { %v3677_v43 = vpop.f32.mrf.mxu0  ;;  %v3700_v19 = vpop.f32.mrf.mxu1  ;;  %v3849_v28 = vadd.f32 %v3848_v26, %v3834_v32 }
 0x804   : > { %v3746_v63 = vadd.f32 %v3745_v14, %v3677_v43  ;;  %v3769_v45 = vadd.f32 %v3768_v38, %v3700_v19 }
 0x806   : > { %v9812_v23 = vadd.f32 %v3795_v49, %v3746_v63  ;;  %v9814_v46 = vadd.f32 %v3795_v49, %v3769_v45 }
 0x808   : > { %v3810_v2 = vadd.f32 %v3809_v7, %v9812_v23  ;;  %v3835_v16 = vmul.f32 %v9812_v23, %v9812_v23  ;;  %v3820_v14 = vadd.f32 %v3819_v54, %v9814_v46  ;;  %v3836_v38 = vmul.f32 %v9814_v46, %v9814_v46 }
 0x80a   : > { %v3811_v15 = vrot.slane %v3810_v2, 4  ;;  %v3840_v20 = vadd.f32 %v3839_v18, %v3835_v16  ;;  %v3821_v13 = vrot.slane %v3820_v14, 4  ;;  %v3850_v50 = vadd.f32 %v3849_v28, %v3836_v38 }
 0x80b   : > { %v3679_v21 = vpop.f32.mrf.mxu0  ;;  %v3702_v43 = vpop.f32.mrf.mxu1 }
 0x80c   : > { %v3812_v19 = vadd.f32 %v3811_v15, %v3810_v2  ;;  %v3841_v30 = vrot.slane %v3840_v20, 4  ;;  %v3822_v41 = vadd.f32 %v3821_v13, %v3820_v14  ;;  %v3851_v32 = vrot.slane %v3850_v50, 4  ;;  %v9828_v13 = vpop.permute.xlu1 %4030  ;;  %v11242_v43 = vld [vmem:[#allocation52_spill] sm:$0xff] }
 0x80e   : > { %v3813_v48 = vrot.slane %v3812_v19, 2  ;;  %v3842_v63 = vadd.f32 %v3841_v30, %v3840_v20  ;;  %v3823_v45 = vrot.slane %v3822_v41, 2  ;;  %v3852_v61 = vadd.f32 %v3851_v32, %v3850_v50  ;;  %v9830_v50 = vpop.permute.xlu2 %4060 }
 0x810   : > { %v3814_v26 = vadd.f32 %v3813_v48, %v3812_v19  ;;  %v3843_v49 = vrot.slane %v3842_v63, 2  ;;  %v3824_v7 = vadd.f32 %v3823_v45, %v3822_v41  ;;  %v3853_v54 = vrot.slane %v3852_v61, 2 }
 0x812   : > { %v3815_v31 = vrot.slane %v3814_v26, 1  ;;  %v3844_v25 = vadd.f32 %v3843_v49, %v3842_v63  ;;  %v3825_v6 = vrot.slane %v3824_v7, 1  ;;  %v3854_v18 = vadd.f32 %v3853_v54, %v3852_v61 }
 0x814   : > { %v3845_v16 = vrot.slane %v3844_v25, 1  ;;  %v3855_v28 = vrot.slane %v3854_v18, 1  ;;  %v3816_v38 = vadd.f32 %v3815_v31, %v3814_v26  ;;  %v3826_v2 = vadd.f32 %v3825_v6, %v3824_v7  ;;  %v9833_v26 = vpop.permute.xlu1 %4022  ;;  %v11243_v7 = vld [vmem:[#allocation53_spill] sm:$0xff] }
 0x816   : > { %v3846_v21 = vadd.f32 %v3845_v16, %v3844_v25  ;;  %v3856_v15 = vadd.f32 %v3855_v28, %v3854_v18  ;;  %v9835_v49 = vpop.permute.xlu2 %4026 }
 0x818   : > { %v3857_v14 = vsel %vm860_vm0, %v3816_v38, %v3846_v21  ;;  %v3858_v20 = vsel %vm860_vm0, %v3826_v2, %v3856_v15 }
 0x819   : > { %5716 = vmatmul.msk.f32.vlgmr.msra.gmra.mxu0 %vm2008_vm7, %v3857_v14  ;;  %5717 = vmatmul.msk.f32.vlgmr.msra.gmra.mxu1 %vm2008_vm7, %v3858_v20 }
 0x81a   : > { %5718 = vmatmul.msk.f32.vlgmr.msra.gmra.mxu2 %vm2008_vm7, %v3857_v14  ;;  %5719 = vmatmul.msk.f32.vlgmr.msra.gmra.mxu3 %vm2008_vm7, %v3858_v20 }
 0x896   : > { %v3878_v31 = vpop.f32.mrf.mxu0  ;;  %v3898_v25 = vpop.f32.mrf.mxu1 }
 0x897   : > { %v3899_v6 = vadd.f32 %v3898_v25, %v3878_v31  ;;  %v9839_v25 = vpop.permute.xlu1 %4052 }
 0x899   : > { %v3941_v19 = vmul.f32 %v3899_v6, %v11242_v43 }
 0x89b   : > { %v3943_v30 = vmul.f32 2.0, %v3941_v19  ;;  %v3957_v61 = vmul.f32 %v3941_v19, %v3941_v19 }
 0x89d   : > { %v3945_v41 = vmul.f32 %v3943_v30, %v3899_v6  ;;  %v3918_v32 = vpop.f32.mrf.mxu2  ;;  %v3938_v48 = vpop.f32.mrf.mxu3  ;;  %v3961_v38 = vrot.slane %v3957_v61, 7 }
 0x89e   : > { %v3939_v63 = vadd.f32 %v3938_v48, %v3918_v32  ;;  %v9841_v30 = vpop.permute.xlu2 %4056 }
 0x89f   : > { %v3949_v45 = vrot.slane %v3945_v41, 7 }
 0x8a0   : > { %v3942_v54 = vmul.f32 %v3939_v63, %v11243_v7 }
 0x8a1   : > { %v3953_v18 = vsub.f32 %v3899_v6, %v3949_v45 }
 0x8a2   : > { %v3944_v16 = vmul.f32 2.0, %v3942_v54  ;;  %v3958_v14 = vmul.f32 %v3942_v54, %v3942_v54 }
 0x8a3   : > { %v3955_v28 = vmul.f32 %v3953_v18, %v11242_v43  ;;  %v9846_v18 = vpop.permute.xlu1 %4018 }
 0x8a4   : > { %v3946_v21 = vmul.f32 %v3944_v16, %v3939_v63  ;;  %v3962_v32 = vrot.slane %v3958_v14, 7  ;;  %v4015_v14 = vpop.permute.xlu0 %4014 }
 0x8a5   : > { %v3965_v2 = vadd.f32 %v3961_v38, %v3955_v28 }
 0x8a6   : > { %v3950_v15 = vrot.slane %v3946_v21, 7  ;;  %v9848_v16 = vpop.permute.xlu2 %4092  ;;  %v3989_v21 = vperm.slane %v3941_v19, 0 }
 0x8a7   : > { %v3967_v20 = vadd.f32 1e-05, %v3965_v2 }
 0x8a8   : > { %v3954_v31 = vsub.f32 %v3939_v63, %v3950_v15  ;;  %v3997_v22 = vsub.f32 %v9788_v44, %v3989_v21  ;;  %v3991_v19 = vsub.f32 %v9776_v33, %v3989_v21 }
 0x8a9   : > { %6148 = vrsqrt.f32 %v3967_v20  ;;  %vm3975_vm5 = vweird.f32 %v3967_v20 }
 0x8aa   : > { %v3956_v41 = vmul.f32 %v3954_v31, %v11243_v7 }
 0x8ab   : > { %v4097_v58 = vpop.permute.xlu1 %4096 }
 0x8ac   : > { %v3966_v48 = vadd.f32 %v3962_v32, %v3956_v41  ;;  %v3999_v41 = vsub.f32 %v9812_v23, %v3989_v21 }
 0x8ae   : > { %v3968_v6 = vadd.f32 1e-05, %v3966_v48 }
 0x8af   : > { %v6149_v45 = vpop.eup %6148 }
 0x8b0   : > { %v3970_v43 = vmul.f32 %v6149_v45, %v3967_v20  ;;  %6150 = vrsqrt.f32 %v3968_v6  ;;  %vm3976_vm1 = vweird.f32 %v6149_v45  ;;  %vm3985_vm11 = vweird.f32 %v3968_v6 }
 0x8b1   : > { %vm3977_vm6 = vmor %vm3975_vm5, %vm3976_vm1 }
 0x8b2   : > { %v3971_v61 = vmul.f32 %v6149_v45, %v3970_v43  ;;  %v3995_v43 = vsub.f32 %v9780_v3, %v3989_v21 }
 0x8b4   : > { %v3972_v63 = vmul.f32 0.5, %v3971_v61  ;;  %v3990_v61 = vperm.slane %v3942_v54, 0 }
 0x8b6   : > { %v6151_v28 = vpop.eup %6150  ;;  %v3973_v38 = vsub.f32 1.5, %v3972_v63  ;;  %v3993_v63 = vsub.f32 %v9772_v37, %v3989_v21  ;;  %v3996_v37 = vsub.f32 %v9782_v17, %v3990_v61  ;;  %v3998_v33 = vsub.f32 %v9790_v9, %v3990_v61  ;;  %v4049_v9 = vpop.permute.xlu0 %4048 }
 0x8b7   : > { %v3980_v2 = vmul.f32 %v6151_v28, %v3968_v6  ;;  %vm3986_vm10 = vweird.f32 %v6151_v28  ;;  %v3992_v17 = vsub.f32 %v9778_v24, %v3990_v61 }
 0x8b8   : > { %v3974_v7 = vmul.f32 %v6149_v45, %v3973_v38  ;;  %vm3987_vm12 = vmor %vm3985_vm11, %vm3986_vm10 }
 0x8b9   : > { %v3981_v15 = vmul.f32 %v6151_v28, %v3980_v2 }
 0x8ba   : > { %v3978_v31 = vsel %vm3977_vm6, %v6149_v45, %v3974_v7  ;;  %v4045_v45 = vpop.permute.xlu2 %4044 }
 0x8bb   : > { %v4001_v32 = vperm.slane %v3978_v31, 1  ;;  %v3982_v48 = vmul.f32 0.5, %v3981_v15 }
 0x8bd   : > { %v4011_v38 = vmul.f32 %v4001_v32, %v3999_v41  ;;  %v3983_v20 = vsub.f32 1.5, %v3982_v48  ;;  %v4007_v55 = vmul.f32 %v4001_v32, %v3995_v43  ;;  %v4009_v2 = vmul.f32 %v4001_v32, %v3997_v22 }
 0x8be   : > { %v4005_v23 = vmul.f32 %v4001_v32, %v3993_v63  ;;  %v4003_v7 = vmul.f32 %v4001_v32, %v3991_v19  ;;  %v4000_v32 = vsub.f32 %v9814_v46, %v3990_v61  ;;  %v3994_v48 = vsub.f32 %v9774_v4, %v3990_v61  ;;  %v4085_v61 = vpop.permute.xlu1 %4084 }
 0x8bf   : > { %v4041_v15 = vmul.f32 %v9828_v13, %v4011_v38  ;;  %v3984_v3 = vmul.f32 %v6151_v28, %v3983_v20  ;;  %v4037_v44 = vmul.f32 %v9833_v26, %v4007_v55  ;;  %v4039_v54 = vmul.f32 %v9835_v49, %v4009_v2 }
 0x8c0   : > { %v4033_v31 = vmul.f32 %v4015_v14, %v4003_v7  ;;  %v4035_v55 = vmul.f32 %v9846_v18, %v4005_v23 }
 0x8c1   : > { %v4071_v22 = vadd.f32 %v9830_v50, %v4041_v15  ;;  %v3988_v21 = vsel %vm3987_vm12, %v6151_v28, %v3984_v3  ;;  %v4067_v6 = vadd.f32 %v9839_v25, %v4037_v44  ;;  %v4069_v43 = vadd.f32 %v9841_v30, %v4039_v54 }
 0x8c2   : > { %v4002_v41 = vperm.slane %v3988_v21, 1  ;;  %v4063_v46 = vadd.f32 %v4045_v45, %v4033_v31  ;;  %v4065_v3 = vadd.f32 %v4049_v9, %v4035_v55  ;;  %v4089_v54 = vpop.permute.xlu2 %4088 }
 0x8c3   : > { %v4111_v63 = vmul.f32 %v9844_v36, %v4071_v22  ;;  %vm4081_vm13 = vcmp.ge.f32.partialorder %v4071_v22, 0.0  ;;  %v4107_v2 = vmul.f32 %v9848_v16, %v4067_v6  ;;  %v4109_v24 = vmul.f32 %v4097_v58, %v4069_v43 }
 0x8c4   : > { %v4008_v19 = vmul.f32 %v4002_v41, %v3996_v37  ;;  %v4010_v28 = vmul.f32 %v4002_v41, %v3998_v33  ;;  %v4012_v38 = vmul.f32 %v4002_v41, %v4000_v32  ;;  %v4006_v20 = vmul.f32 %v4002_v41, %v3994_v48 }
 0x8c5   : > { %v4004_v7 = vmul.f32 %v4002_v41, %v3992_v17  ;;  %v4121_v37 = vsel %vm4081_vm13, %v4071_v22, %v4111_v63  ;;  %vm4077_vm14 = vcmp.ge.f32.partialorder %v4067_v6, 0.0  ;;  %vm4073_vm15 = vcmp.ge.f32.partialorder %v4063_v46, 0.0 }
 0x8c6   : > { %v4038_v4 = vmul.f32 %v9833_v26, %v4008_v19  ;;  %v4040_v23 = vmul.f32 %v9835_v49, %v4010_v28  ;;  %v4042_v15 = vmul.f32 %v9828_v13, %v4012_v38  ;;  %v4036_v44 = vmul.f32 %v9846_v18, %v4006_v20  ;;  %4148 = vrot.lane.b32.xlu1 %v4121_v37, %s11128_s0 }
 0x8c7   : > { %v4034_v26 = vmul.f32 %v4015_v14, %v4004_v7  ;;  %v4138_v13 = vpack.c.bf16 %v4121_v37, %v4121_v37  ;;  %vm4079_vm3 = vcmp.ge.f32.partialorder %v4069_v43, 0.0  ;;  %v4117_v49 = vsel %vm4077_vm14, %v4067_v6, %v4107_v2  ;;  %v11244_v2 = vld [vmem:[#allocation64_spill] sm:$0xff] }
 0x8c8   : > { %v4068_v33 = vadd.f32 %v9839_v25, %v4038_v4  ;;  %v4070_v21 = vadd.f32 %v9841_v30, %v4040_v23  ;;  %v4072_v31 = vadd.f32 %v9830_v50, %v4042_v15  ;;  %vm4075_vm4 = vcmp.ge.f32.partialorder %v4065_v3, 0.0  ;;  %4144 = vrot.lane.b32.xlu0 %v4117_v49, %s11128_s0  ;;  %v11246_v4 = vld [vmem:[#allocation65_spill] sm:$0xff]  ;;  %v11247_v23 = vld [vmem:[#allocation68_spill] sm:$0xff]  ;;  %v11248_v15 = vld [vmem:[#allocation67_spill] sm:$0xff] }
 0x8c9   : > { %v4103_v41 = vmul.f32 %v4085_v61, %v4063_v46  ;;  %v4105_v32 = vmul.f32 %v4089_v54, %v4065_v3  ;;  %v4066_v22 = vadd.f32 %v4049_v9, %v4036_v44  ;;  %v4119_v25 = vsel %vm4079_vm3, %v4069_v43, %v4109_v24  ;;  %v5885_v44 = vld [vmem:[%s10847_s17] sm:$0xff]  ;;  %v6290_v37 = vld [vmem:[%s11048_s1 + $0xe8] sm:$0xff] }
 0x8ca   : > { %v4112_v18 = vmul.f32 %v9844_v36, %v4072_v31  ;;  %v4383_v30 = vsel %vm2677_vm9, %v4138_v13, 0  ;;  %vm4082_vm1 = vcmp.ge.f32.partialorder %v4072_v31, 0.0  ;;  %v4108_v50 = vmul.f32 %v9848_v16, %v4068_v33  ;;  %v6292_v13 = vld [vmem:[%s11048_s1 + $0xd8] sm:$0xff] }
 0x8cb   : > { %v4110_v14 = vmul.f32 %v4097_v58, %v4070_v21  ;;  %v4064_v48 = vadd.f32 %v4045_v45, %v4034_v26  ;;  %4393 = vmatpush.bf16.msrb.mxu2 %v4383_v30  ;;  %vm4078_vm5 = vcmp.ge.f32.partialorder %v4068_v33, 0.0  ;;  %vm4080_vm6 = vcmp.ge.f32.partialorder %v4070_v21, 0.0 }
 0x8cc   : > { %v4122_v55 = vsel %vm4082_vm1, %v4072_v31, %v4112_v18  ;;  %v4136_v36 = vpack.c.bf16 %v4119_v25, %v4117_v49  ;;  %v4106_v63 = vmul.f32 %v4089_v54, %v4066_v22  ;;  %v4113_v43 = vsel %vm4073_vm15, %v4063_v46, %v4103_v41  ;;  %v11245_v46 = vld [vmem:[#allocation66_spill] sm:$0xff] }
 0x8cd   : > { %4158 = vrot.lane.b32.xlu2 %v4122_v55, %s11128_s0  ;;  %v4139_v6 = vpack.c.bf16 %v4122_v55, %v4122_v55  ;;  %v4115_v9 = vsel %vm4075_vm4, %v4065_v3, %v4105_v32  ;;  %v4104_v19 = vmul.f32 %v4085_v61, %v4064_v48  ;;  %v4118_v58 = vsel %vm4078_vm5, %v4068_v33, %v4108_v50  ;;  %v11249_v3 = vld [vmem:[#allocation69_spill] sm:$0xff]  ;;  %v6288_v61 = vld [vmem:[%s11048_s1 + $0xf8] sm:$0xff]  ;;  %v6291_v33 = vld [vmem:[%s11048_s1 + $0x1e8] sm:$0xff] }
 0x8ce   : > { %4146 = vrot.lane.b32.xlu1 %v4119_v25, %s11128_s0  ;;  %v4120_v16 = vsel %vm4080_vm6, %v4070_v21, %v4110_v14  ;;  %vm4074_vm10 = vcmp.ge.f32.partialorder %v4064_v48, 0.0  ;;  %vm4076_vm11 = vcmp.ge.f32.partialorder %v4066_v22, 0.0  ;;  %v4134_v45 = vpack.c.bf16 %v4115_v9, %v4113_v43  ;;  %v6289_v54 = vld [vmem:[%s11048_s1 + $0x1f8] sm:$0xff]  ;;  %v6295_v25 = vld [vmem:[%s11048_s1 + $0x1c8] sm:$0xff] }
 0x8cf   : > { %v4386_v17 = vsel %vm2677_vm9, %v4139_v6, 0  ;;  %4394 = vmatpush.bf16.msrb.mxu2 %v4136_v36  ;;  %v4137_v28 = vpack.c.bf16 %v4120_v16, %v4118_v58  ;;  %v4114_v38 = vsel %vm4074_vm10, %v4064_v48, %v4104_v19  ;;  %v4116_v20 = vsel %vm4076_vm11, %v4066_v22, %v4106_v63  ;;  %v6293_v49 = vld [vmem:[%s11048_s1 + $0x1d8] sm:$0xff]  ;;  %v6294_v22 = vld [vmem:[%s11048_s1 + $0xc8] sm:$0xff] }
 0x8d0   : > { %4431 = vmatpush.bf16.msrb.mxu3 %v4386_v17  ;;  %4156 = vrot.lane.b32.xlu0 %v4120_v16, %s11128_s0  ;;  %v4135_v7 = vpack.c.bf16 %v4116_v20, %v4114_v38  ;;  %v6296_v14 = vld [vmem:[%s11048_s1 + $0xb8] sm:$0xff]  ;;  %v6299_v19 = vld [vmem:[%s11048_s1 + $0x1a8] sm:$0xff] }
 0x8d1   : > { %v6297_v48 = vld [vmem:[%s11048_s1 + $0x1b8] sm:$0xff] }
 0x8d3   : > { %4395 = vmatpush.bf16.msrb.mxu2 %v4134_v45  ;;  %v6300_v45 = vld [vmem:[%s11048_s1 + $0x98] sm:$0xff] }
 0x8d4   : > { %4432 = vmatpush.bf16.msrb.mxu3 %v4137_v28  ;;  %v6301_v28 = vld [vmem:[%s11048_s1 + $0x198] sm:$0xff] }
 0x8d5   : > { %4154 = vrot.lane.b32.xlu2 %v4118_v58, %s11128_s0 }
 0x8d6   : > { %4140 = vrot.lane.b32.xlu1 %v4113_v43, %s11128_s0  ;;  %5772 = vmatmul.msk.bf16.vlgmr.msrb.gmra.mxu2 %vm3252_vm8, %v5885_v44  ;;  %v5886_v43 = vld [vmem:[%s10847_s17 + $0x8] sm:$0xff] }
 0x8d7   : > { %4681 = vmatpush.bf16.msra.mxu2 %v11244_v2 }
 0x8d8   : > { %4433 = vmatpush.bf16.msrb.mxu3 %v4135_v7  ;;  %4150 = vrot.lane.b32.xlu0 %v4114_v38, %s11128_s0 }
 0x8db   : > { %4682 = vmatpush.bf16.msra.mxu2 %v11245_v46  ;;  %5778 = vmatmul.msk.bf16.vlgmr.msrb.gmra.mxu3 %vm3252_vm8, %v5885_v44 }
 0x8dc   : > { %4719 = vmatpush.bf16.msra.mxu3 %v11246_v4 }
 0x8dd   : > { %4142 = vrot.lane.b32.xlu2 %v4115_v9, %s11128_s0  ;;  %v6298_v9 = vld [vmem:[%s11048_s1 + $0xa8] sm:$0xff] }
 0x8de   : > { %4152 = vrot.lane.b32.xlu1 %v4116_v20, %s11128_s0 }
 0x8df   : > { %4683 = vmatpush.bf16.msra.mxu2 %v11247_v23  ;;  %v6302_v23 = vld [vmem:[%s11048_s1 + $0x188] sm:$0xff] }
 0x8e0   : > { %4720 = vmatpush.bf16.msra.mxu3 %v11248_v15  ;;  %v6303_v15 = vld [vmem:[%s11048_s1 + $0x88] sm:$0xff] }
 0x8e3   : > { %4981 = vmatpush.msrb.mxu2 %v6288_v61  ;;  %v6305_v61 = vld [vmem:[%s11048_s1 + $0x78] sm:$0xff] }
 0x8e4   : > { %4721 = vmatpush.bf16.msra.mxu3 %v11249_v3 }
 0x8e5   : > { %4982 = vmatpush.msrb.mxu2 %v6290_v37  ;;  %v6306_v37 = vld [vmem:[%s11048_s1 + $0x68] sm:$0xff] }
 0x8e6   : > { %5773 = vmatmul.msk.bf16.gmra.mxu2 %vm3252_vm8, %v5886_v43 }
 0x8e7   : > { %4983 = vmatpush.msrb.mxu2 %v6292_v13  ;;  %v6310_v13 = vld [vmem:[%s11048_s1 + $0x148] sm:$0xff] }
 0x8e8   : > { %5001 = vmatpush.msrb.mxu3 %v6289_v54 }
 0x8e9   : > { %4984 = vmatpush.msrb.mxu2 %v6294_v22  ;;  %v6313_v22 = vld [vmem:[%s11048_s1 + $0x138] sm:$0xff] }
 0x8ea   : > { %5002 = vmatpush.msrb.mxu3 %v6291_v33  ;;  %v6307_v33 = vld [vmem:[%s11048_s1 + $0x168] sm:$0xff] }
 0x8eb   : > { %4985 = vmatpush.msrb.mxu2 %v6296_v14  ;;  %5779 = vmatmul.msk.bf16.gmra.mxu3 %vm3252_vm8, %v5886_v43 }
 0x8ec   : > { %5003 = vmatpush.msrb.mxu3 %v6293_v49  ;;  %v6311_v49 = vld [vmem:[%s11048_s1 + $0x48] sm:$0xff] }
 0x8ed   : > { %4986 = vmatpush.msrb.mxu2 %v6298_v9  ;;  %v6317_v9 = vld [vmem:[%s11048_s1 + $0x18] sm:$0xff] }
 0x8ee   : > { %5004 = vmatpush.msrb.mxu3 %v6295_v25 }
 0x8ef   : > { %4987 = vmatpush.msrb.mxu2 %v6300_v45  ;;  %v11250_v45 = vld [vmem:[#allocation54_spill] sm:$0xff] }
 0x8f0   : > { %5005 = vmatpush.msrb.mxu3 %v6297_v48 }
 0x8f1   : > { %4988 = vmatpush.msrb.mxu2 %v6303_v15  ;;  %v5901_v15 = vld [vmem:[%s10850_s20 + $0x8] sm:$0xff] }
 0x8f2   : > { %5006 = vmatpush.msrb.mxu3 %v6299_v19 }
 0x8f3   : > { %4989 = vmatpush.msrb.mxu2 %v6305_v61  ;;  %v5902_v61 = vld [vmem:[%s10850_s20 + $0x10] sm:$0xff] }
 0x8f4   : > { %5007 = vmatpush.msrb.mxu3 %v6301_v28  ;;  %v11251_v28 = vld [vmem:[#allocation56_spill] sm:$0xff] }
 0x8f5   : > { %4990 = vmatpush.msrb.mxu2 %v6306_v37 }
 0x8f6   : > { %5008 = vmatpush.msrb.mxu3 %v6302_v23  ;;  %v4207_v23 = vld [vmem:[%s10848_s18 + $0x28] sm:$0xf] }
 0x927   : > { %v4159_v24 = vpop.permute.xlu2 %4158 }
 0x92f   : > { %v4155_v36 = vpop.permute.xlu2 %4154 }
 0x937   : > { %v4143_v25 = vpop.permute.xlu2 %4142 }
 0x938   : > { %v4149_v21 = vpop.permute.xlu1 %4148 }
 0x939   : > { %v4164_v31 = vsel %vm747_vm2, %v4149_v21, %v4159_v24  ;;  %v4169_v26 = vsel %vm747_vm2, %v4159_v24, %v4149_v21  ;;  %v6304_v24 = vld [vmem:[%s11048_s1 + $0x178] sm:$0xff] }
 0x93a   : > { %v4178_v18 = vmul.f32 %v4169_v26, %v11164_v60  ;;  %v4179_v41 = vmul.f32 %v4164_v31, %v11165_v10  ;;  %v4145_v32 = vpop.permute.xlu0 %4144  ;;  %5009 = vmatpush.msrb.mxu3 %v6304_v24  ;;  %v6308_v21 = vld [vmem:[%s11048_s1 + $0x58] sm:$0xff]  ;;  %v10139_v24 = vld [vmem:[%s10851_s21 + $0x8] sm:$0xff] }
 0x93b   : > { %v4167_v63 = vsel %vm747_vm2, %v4155_v36, %v4145_v32  ;;  %v4162_v58 = vsel %vm747_vm2, %v4145_v32, %v4155_v36  ;;  %4991 = vmatpush.msrb.mxu2 %v6308_v21  ;;  %v6309_v31 = vld [vmem:[%s11048_s1 + $0x158] sm:$0xff]  ;;  %4781 = vperm.xlu0 %6025, %v10139_v24   ;;  %v10157_v21 = vld [vmem:[%s10851_s21 + $0x10] sm:$0xff] }
 0x93c   : > { %v4184_v30 = vpack.c.bf16 %v4178_v18, %v4178_v18  ;;  %v4185_v50 = vpack.c.bf16 %v4179_v41, %v4179_v41  ;;  %v4174_v38 = vmul.f32 %v4167_v63, %v11164_v60  ;;  %v4175_v7 = vmul.f32 %v4162_v58, %v11165_v10  ;;  %5010 = vmatpush.msrb.mxu3 %v6307_v33  ;;  %v6312_v32 = vld [vmem:[%s11048_s1 + $0x38] sm:$0xff] }
 0x93d   : > { %4992 = vmatpush.msrb.mxu2 %v6311_v49  ;;  %4786 = vperm.xlu1 %6026, %v10157_v21   ;;  %v5903_v49 = vld [vmem:[%s10850_s20 + $0x18] sm:$0xff] }
 0x93e   : > { %v4255_v55 = vsel %vm2677_vm9, %v4184_v30, 0  ;;  %v4258_v6 = vsel %vm2677_vm9, %v4185_v50, 0  ;;  %5011 = vmatpush.msrb.mxu3 %v6309_v31  ;;  %v5887_v50 = vld [vmem:[%s10847_s17 + $0x10] sm:$0xff] }
 0x93f   : > { %4265 = vmatpush.bf16.msrb.mxu0 %v4255_v55  ;;  %4303 = vmatpush.bf16.msrb.mxu1 %v4258_v6  ;;  %v6314_v55 = vld [vmem:[%s11048_s1 + $0x28] sm:$0xff] }
 0x940   : > { %v4147_v17 = vpop.permute.xlu1 %4146  ;;  %5012 = vmatpush.msrb.mxu3 %v6310_v13  ;;  %4993 = vmatpush.msrb.mxu2 %v6312_v32  ;;  %v6315_v6 = vld [vmem:[%s11048_s1 + $0x128] sm:$0xff]  ;;  %v10165_v13 = vld [vmem:[%s10851_s21] sm:$0xff] }
 0x941   : > { %5774 = vmatmul.msk.bf16.gmra.mxu2 %vm3252_vm8, %v5887_v50  ;;  %5780 = vmatmul.msk.bf16.gmra.mxu3 %vm3252_vm8, %v5887_v50  ;;  %v5904_v50 = vld [vmem:[%s10850_s20 + $0x20] sm:$0xff] }
 0x942   : > { %v4157_v16 = vpop.permute.xlu0 %4156  ;;  %5013 = vmatpush.msrb.mxu3 %v6313_v22  ;;  %4994 = vmatpush.msrb.mxu2 %v6314_v55  ;;  %v10179_v22 = vld [vmem:[%s10851_s21 + $0x20] sm:$0xff] }
 0x943   : > { %v4163_v20 = vsel %vm747_vm2, %v4147_v17, %v4157_v16  ;;  %v4168_v2 = vsel %vm747_vm2, %v4157_v16, %v4147_v17  ;;  %v6319_v16 = vld [vmem:[%s11048_s1 + $0x108] sm:$0xff]  ;;  %4776 = vperm.xlu2 %6024, %v10165_v13  }
 0x944   : > { %v4176_v46 = vmul.f32 %v4168_v2, %v11164_v60  ;;  %v4177_v4 = vmul.f32 %v4163_v20, %v11165_v10  ;;  %5014 = vmatpush.msrb.mxu3 %v6315_v6  ;;  %4995 = vmatpush.msrb.mxu2 %v6317_v9  ;;  %v11253_v20 = vld [vmem:[#allocation58_spill] sm:$0xff]  ;;  %v11254_v2 = vld [vmem:[#allocation57_spill] sm:$0xff] }
 0x945   : > { %4796 = vperm.xlu1 %6026, %v10179_v22  }
 0x946   : > { %v4182_v3 = vpack.c.bf16 %v4176_v46, %v4174_v38  ;;  %v4183_v44 = vpack.c.bf16 %v4177_v4, %v4175_v7  ;;  %5015 = vmatpush.msrb.mxu3 %v6316_v34  ;;  %v11252_v38 = vld [vmem:[#allocation55_spill] sm:$0xff]  ;;  %v5888_v46 = vld [vmem:[%s10847_s17 + $0x18] sm:$0xff]  ;;  %v5891_v4 = vld [vmem:[%s10848_s18 + $0x8] sm:$0xff] }
 0x947   : > { %v11255_v7 = vld [vmem:[#allocation59_spill] sm:$0xff] }
 0x948   : > { %4266 = vmatpush.bf16.msrb.mxu0 %v4182_v3  ;;  %4304 = vmatpush.bf16.msrb.mxu1 %v4183_v44  ;;  %v4141_v54 = vpop.permute.xlu1 %4140  ;;  %v4229_v3 = vunpack.c.l.b16 %v4207_v23 }
 0x949   : > { %5016 = vmatpush.msrb.mxu3 %v6319_v16  ;;  %v4629_v16 = vld [vmem:[%s10850_s20 + $0x28] sm:$0xf] }
 0x94a   : > { %v4151_v26 = vpop.permute.xlu0 %4150  ;;  %v4235_v44 = vpack.c.b16 %v4229_v3, %v4229_v3 }
 0x94b   : > { %v4160_v18 = vsel %vm747_vm2, %v4141_v54, %v4151_v26  ;;  %v4165_v41 = vsel %vm747_vm2, %v4151_v26, %v4141_v54  ;;  %v5895_v54 = vld [vmem:[%s10849_s19] sm:$0xff] }
 0x94c   : > { %v4170_v36 = vmul.f32 %v4165_v41, %v11164_v60  ;;  %v4171_v63 = vmul.f32 %v4160_v18, %v11165_v10  ;;  %v5896_v18 = vld [vmem:[%s10849_s19 + $0x8] sm:$0xff] }
 0x950   : > { %v4153_v30 = vpop.permute.xlu1 %4152 }
 0x951   : > { %v4161_v14 = vsel %vm747_vm2, %v4143_v25, %v4153_v30  ;;  %v4166_v48 = vsel %vm747_vm2, %v4153_v30, %v4143_v25  ;;  %5775 = vmatmul.msk.bf16.gmra.mxu2 %vm3252_vm8, %v5888_v46  ;;  %5781 = vmatmul.msk.bf16.gmra.mxu3 %vm3252_vm8, %v5888_v46 }
 0x952   : > { %v4172_v17 = vmul.f32 %v4166_v48, %v11164_v60  ;;  %v4173_v43 = vmul.f32 %v4161_v14, %v11165_v10  ;;  %v5890_v60 = vld [vmem:[%s10848_s18] sm:$0xff]  ;;  %v6318_v10 = vld [vmem:[%s11048_s1 + $0x8] sm:$0xff]  ;;  %v5897_v14 = vld [vmem:[%s10849_s19 + $0x10] sm:$0xff] }
 0x953   : > { %4996 = vmatpush.msrb.mxu2 %v6318_v10 }
 0x954   : > { %v4180_v19 = vpack.c.bf16 %v4172_v17, %v4170_v36  ;;  %v4181_v58 = vpack.c.bf16 %v4173_v43, %v4171_v63  ;;  %v10199_v63 = vld [vmem:[%s10851_s21 + $0x30] sm:$0xff]  ;;  %v10204_v17 = vld [vmem:[%s10851_s21 + $0x18] sm:$0xff] }
 0x955   : > { %4806 = vperm.xlu0 %6025, %v10199_v63   ;;  %4791 = vperm.xlu2 %6024, %v10204_v17   ;;  %v10213_v43 = vld [vmem:[%s10851_s21 + $0x38] sm:$0xff] }
 0x956   : > { %4267 = vmatpush.bf16.msrb.mxu0 %v4180_v19  ;;  %4305 = vmatpush.bf16.msrb.mxu1 %v4181_v58 }
 0x957   : > { %4811 = vperm.xlu1 %6026, %v10213_v43  }
 0x959   : > { %5740 = vmatmul.msk.bf16.vlgmr.msrb.gmra.mxu0 %vm3252_vm8, %v5890_v60  ;;  %5746 = vmatmul.msk.bf16.vlgmr.msrb.gmra.mxu1 %vm3252_vm8, %v5890_v60  ;;  %v10150_v37 = vpop.f32.mrf.mxu2 }
 0x95a   : > { %4526 = vmatpush.bf16.msra.mxu0 %v11250_v45  ;;  %4564 = vmatpush.bf16.msra.mxu1 %v11251_v28  ;;  %v10226_v45 = vld [vmem:[%s10851_s21 + $0x50] sm:$0xff]  ;;  %v4651_v28 = vunpack.c.l.b16 %v4629_v16 }
 0x95e   : > { %4527 = vmatpush.bf16.msra.mxu0 %v11252_v38  ;;  %4565 = vmatpush.bf16.msra.mxu1 %v11253_v20  ;;  %v10152_v33 = vpop.f32.mrf.mxu3  ;;  %v4657_v38 = vpack.c.b16 %v4651_v28, %v4651_v28  ;;  %v5898_v20 = vld [vmem:[%s10849_s19 + $0x18] sm:$0xff] }
 0x95f   : > { %4826 = vperm.xlu1 %6026, %v10226_v45  }
 0x961   : > { %v4399_v31 = vpop.f32.mrf.mxu2 }
 0x962   : > { %4528 = vmatpush.bf16.msra.mxu0 %v11254_v2  ;;  %4566 = vmatpush.bf16.msra.mxu1 %v11255_v7 }
 0x966   : > { %4941 = vmatpush.msrb.mxu0 %v9529_v57  ;;  %4961 = vmatpush.msrb.mxu1 %v9535_v8  ;;  %v5889_v57 = vld [vmem:[%s10847_s17 + $0x20] sm:$0xff]  ;;  %v5892_v8 = vld [vmem:[%s10848_s18 + $0x10] sm:$0xff]  ;;  %v4437_v26 = vpop.f32.mrf.mxu3 }
 0x967   : > { %5776 = vmatmul.msk.bf16.gmra.mxu2 %vm3252_vm8, %v5889_v57  ;;  %5782 = vmatmul.msk.bf16.gmra.mxu3 %vm3252_vm8, %v5889_v57 }
 0x968   : > { %4942 = vmatpush.msrb.mxu0 %v9558_v53  ;;  %4962 = vmatpush.msrb.mxu1 %v9564_v51  ;;  %v11256_v53 = vld [vmem:[#allocation18_spill] sm:$0xff]  ;;  %v11257_v51 = vld [vmem:[#allocation17_spill] sm:$0xff] }
 0x969   : > { %5741 = vmatmul.msk.bf16.gmra.mxu0 %vm3252_vm8, %v5891_v4  ;;  %5747 = vmatmul.msk.bf16.gmra.mxu1 %vm3252_vm8, %v5891_v4  ;;  %v4402_v41 = vpop.f32.mrf.mxu2 }
 0x96a   : > { %4943 = vmatpush.msrb.mxu0 %v9570_v1  ;;  %4963 = vmatpush.msrb.mxu1 %v9576_v35  ;;  %v4196_v1 = vld [vmem:[%s10847_s17 + $0x28] sm:$0xf] }
 0x96b   : > { %v11258_v35 = vld [vmem:[#allocation20_spill] sm:$0xff] }
 0x96c   : > { %4944 = vmatpush.msrb.mxu0 %v9582_v40  ;;  %4964 = vmatpush.msrb.mxu1 %v9588_v11  ;;  %v11259_v40 = vld [vmem:[#allocation16_spill] sm:$0xff]  ;;  %v4357_v11 = vunpack.c.l.b16 %v4196_v1  ;;  %v11268_v1 = vmov 1  }
 0x96d   : > { %6029 = vset.pattern.permute.xlu1 %v11268_v1 }
 0x96e   : > { %4945 = vmatpush.msrb.mxu0 %v9594_v56  ;;  %4965 = vmatpush.msrb.mxu1 %v9600_v42  ;;  %v11260_v56 = vld [vmem:[#allocation23_spill] sm:$0xff]  ;;  %v4440_v32 = vpop.f32.mrf.mxu3 }
 0x96f   : > { %v11261_v42 = vld [vmem:[#allocation19_spill] sm:$0xff]  ;;  %5126 = vperm.xlu1 %6029, %v10157_v21  }
 0x970   : > { %4946 = vmatpush.msrb.mxu0 %v9607_v59  ;;  %4966 = vmatpush.msrb.mxu1 %v9613_v5  ;;  %v11262_v59 = vld [vmem:[#allocation25_spill] sm:$0xff]  ;;  %v11263_v5 = vld [vmem:[#allocation24_spill] sm:$0xff] }
 0x971   : > { %v4404_v25 = vpop.f32.mrf.mxu2 }
 0x972   : > { %4947 = vmatpush.msrb.mxu0 %v9623_v12  ;;  %4967 = vmatpush.msrb.mxu1 %v9629_v47  ;;  %v4363_v12 = vpack.c.b16 %v4357_v11, %v4357_v11  ;;  %v11264_v47 = vld [vmem:[#allocation26_spill] sm:$0xff] }
 0x974   : > { %4948 = vmatpush.msrb.mxu0 %v9636_v29  ;;  %4968 = vmatpush.msrb.mxu1 %v9642_v52  ;;  %v11265_v29 = vld [vmem:[#allocation11_spill] sm:$0xff]  ;;  %v11266_v52 = vld [vmem:[#allocation12_spill] sm:$0xff] }
 0x976   : > { %4949 = vmatpush.msrb.mxu0 %v9650_v0  ;;  %4969 = vmatpush.msrb.mxu1 %v9656_v39  ;;  %v11267_v0 = vld [vmem:[#allocation13_spill] sm:$0xff]  ;;  %v5893_v39 = vld [vmem:[%s10848_s18 + $0x18] sm:$0xff]  ;;  %v4442_v30 = vpop.f32.mrf.mxu3 }
 0x977   : > { %5777 = vmatmul.msk.bf16.gmra.mxu2 %vm3252_vm8, %v4363_v12  ;;  %5783 = vmatmul.msk.bf16.gmra.mxu3 %vm3252_vm8, %v4363_v12 }
 0x978   : > { %4950 = vmatpush.msrb.mxu0 %v9663_v62  ;;  %4970 = vmatpush.msrb.mxu1 %v9669_v27  ;;  %v5900_v62 = vld [vmem:[%s10850_s20] sm:$0xff] }
 0x979   : > { %5742 = vmatmul.msk.bf16.gmra.mxu0 %vm3252_vm8, %v5892_v8  ;;  %5748 = vmatmul.msk.bf16.gmra.mxu1 %vm3252_vm8, %v5892_v8  ;;  %v5894_v27 = vld [vmem:[%s10848_s18 + $0x20] sm:$0xff] }
 0x97a   : > { %4951 = vmatpush.msrb.mxu0 %v11256_v53  ;;  %4971 = vmatpush.msrb.mxu1 %v11257_v51  ;;  %v10241_v53 = vld [vmem:[%s10851_s21 + $0x28] sm:$0xff] }
 0x97b   : > { %4801 = vperm.xlu2 %6024, %v10241_v53   ;;  %v10249_v51 = vld [vmem:[%s10851_s21 + $0x48] sm:$0xff]  ;;  %5134 = vperm.xlu1 %6029, %v10179_v22  }
 0x97c   : > { %4952 = vmatpush.msrb.mxu0 %v11258_v35  ;;  %4972 = vmatpush.msrb.mxu1 %v11259_v40 }
 0x97d   : > { %4821 = vperm.xlu0 %6025, %v10249_v51  }
 0x97e   : > { %4953 = vmatpush.msrb.mxu0 %v11260_v56  ;;  %4973 = vmatpush.msrb.mxu1 %v11261_v42 }
 0x980   : > { %4954 = vmatpush.msrb.mxu0 %v11262_v59  ;;  %4974 = vmatpush.msrb.mxu1 %v11263_v5  ;;  %v5899_v5 = vld [vmem:[%s10849_s19 + $0x20] sm:$0xff] }
 0x982   : > { %4955 = vmatpush.msrb.mxu0 %v11264_v47  ;;  %4975 = vmatpush.msrb.mxu1 %v11265_v29 }
 0x983   : > { %5146 = vperm.xlu1 %6029, %v10213_v43  }
 0x984   : > { %4956 = vmatpush.msrb.mxu0 %v11266_v52  ;;  %4976 = vmatpush.msrb.mxu1 %v11267_v0 }
 0x985   : > { %6028 = vset.pattern.permute.xlu0 %v11268_v1 }
 0x986   : > { %5122 = vperm.xlu0 %6028, %v10139_v24  }
 0x987   : > { %5836 = vmatmul.msk.bf16.vlgmr.msra.gmra.mxu2 %vm3252_vm8, %v5900_v62  ;;  %5842 = vmatmul.msk.bf16.vlgmr.msra.gmra.mxu3 %vm3252_vm8, %v5900_v62  ;;  %v10271_v62 = vld [vmem:[%s10851_s21 + $0x40] sm:$0xff] }
 0x988   : > { %4816 = vperm.xlu2 %6024, %v10271_v62  }
 0x989   : > { %5743 = vmatmul.msk.bf16.gmra.mxu0 %vm3252_vm8, %v5893_v39  ;;  %5749 = vmatmul.msk.bf16.gmra.mxu1 %vm3252_vm8, %v5893_v39 }
 0x98b   : > { %5158 = vperm.xlu1 %6029, %v10226_v45  }
 0x98e   : > { %5142 = vperm.xlu0 %6028, %v10199_v63  }
 0x990   : > { %6027 = vset.pattern.permute.xlu2 %v11268_v1 }
 0x991   : > { %5118 = vperm.xlu2 %6027, %v10165_v13  }
 0x996   : > { %5154 = vperm.xlu0 %6028, %v10249_v51  }
 0x997   : > { %5837 = vmatmul.msk.bf16.gmra.mxu2 %vm3252_vm8, %v5901_v15  ;;  %5843 = vmatmul.msk.bf16.gmra.mxu3 %vm3252_vm8, %v5901_v15  ;;  %v4474_v15 = vld [vmem:[%s10849_s19 + $0x28] sm:$0xf] }
 0x999   : > { %5744 = vmatmul.msk.bf16.gmra.mxu0 %vm3252_vm8, %v5894_v27  ;;  %5750 = vmatmul.msk.bf16.gmra.mxu1 %vm3252_vm8, %v5894_v27 }
 0x99a   : > { %5130 = vperm.xlu2 %6027, %v10204_v17  }
 0x9a2   : > { %5138 = vperm.xlu2 %6027, %v10241_v53  }
 0x9a7   : > { %5838 = vmatmul.msk.bf16.gmra.mxu2 %vm3252_vm8, %v5902_v61  ;;  %5844 = vmatmul.msk.bf16.gmra.mxu3 %vm3252_vm8, %v5902_v61 }
 0x9a9   : > { %5745 = vmatmul.msk.bf16.gmra.mxu0 %vm3252_vm8, %v4235_v44  ;;  %5751 = vmatmul.msk.bf16.gmra.mxu1 %vm3252_vm8, %v4235_v44 }
 0x9aa   : > { %5150 = vperm.xlu2 %6027, %v10271_v62  }
 0x9b7   : > { %5839 = vmatmul.msk.bf16.gmra.mxu2 %vm3252_vm8, %v5903_v49  ;;  %5845 = vmatmul.msk.bf16.gmra.mxu3 %vm3252_vm8, %v5903_v49 }
 0x9b9   : > { %5804 = vmatmul.msk.bf16.vlgmr.msra.gmra.mxu0 %vm3252_vm8, %v5895_v54  ;;  %5810 = vmatmul.msk.bf16.vlgmr.msra.gmra.mxu1 %vm3252_vm8, %v5895_v54 }
 0x9c4   : > { %v4407_v6 = vpop.f32.mrf.mxu2  ;;  %v4445_v36 = vpop.f32.mrf.mxu3 }
 0x9c7   : > { %5840 = vmatmul.msk.bf16.gmra.mxu2 %vm3252_vm8, %v5904_v50  ;;  %5846 = vmatmul.msk.bf16.gmra.mxu3 %vm3252_vm8, %v5904_v50  ;;  %v11269_v50 = vmov 2  }
 0x9c8   : > { %6032 = vset.pattern.permute.xlu1 %v11269_v50  ;;  %6031 = vset.pattern.permute.xlu0 %v11269_v50 }
 0x9c9   : > { %5805 = vmatmul.msk.bf16.gmra.mxu0 %vm3252_vm8, %v5896_v18  ;;  %5811 = vmatmul.msk.bf16.gmra.mxu1 %vm3252_vm8, %v5896_v18 }
 0x9ca   : > { %5192 = vperm.xlu1 %6032, %v10157_v21   ;;  %5188 = vperm.xlu0 %6031, %v10139_v24  }
 0x9cb   : > { %6030 = vset.pattern.permute.xlu2 %v11269_v50 }
 0x9cc   : > { %v4447_v60 = vpop.f32.mrf.mxu3  ;;  %v4409_v10 = vpop.f32.mrf.mxu2  ;;  %5184 = vperm.xlu2 %6030, %v10165_v13  }
 0x9d2   : > { %5200 = vperm.xlu1 %6032, %v10179_v22   ;;  %5208 = vperm.xlu0 %6031, %v10199_v63  }
 0x9d4   : > { %v4450_v57 = vpop.f32.mrf.mxu3  ;;  %v4412_v8 = vpop.f32.mrf.mxu2  ;;  %5196 = vperm.xlu2 %6030, %v10204_v17  }
 0x9d6   : > { %v10192_v48 = vpop.f32.mrf.mxu0  ;;  %v10194_v55 = vpop.f32.mrf.mxu1 }
 0x9d7   : > { %5841 = vmatmul.msk.bf16.gmra.mxu2 %vm3252_vm8, %v4657_v38  ;;  %5847 = vmatmul.msk.bf16.gmra.mxu3 %vm3252_vm8, %v4657_v38 }
 0x9d9   : > { %5806 = vmatmul.msk.bf16.gmra.mxu0 %vm3252_vm8, %v5897_v14  ;;  %5812 = vmatmul.msk.bf16.gmra.mxu1 %vm3252_vm8, %v5897_v14 }
 0x9da   : > { %5212 = vperm.xlu1 %6032, %v10213_v43   ;;  %5220 = vperm.xlu0 %6031, %v10249_v51  }
 0x9dc   : > { %v4414_v42 = vpop.f32.mrf.mxu2  ;;  %v4452_v59 = vpop.f32.mrf.mxu3  ;;  %5204 = vperm.xlu2 %6030, %v10241_v53  }
 0x9de   : > { %v4271_v34 = vpop.f32.mrf.mxu0  ;;  %v4309_v9 = vpop.f32.mrf.mxu1 }
 0x9df   : > { %v10216_v19 = vadd.f32 %v4399_v31, %v4271_v34  ;;  %v10218_v58 = vadd.f32 %v4437_v26, %v4309_v9  ;;  %v4496_v31 = vunpack.c.l.b16 %v4474_v15 }
 0x9e1   : > { %v4502_v26 = vpack.c.b16 %v4496_v31, %v4496_v31 }
 0x9e2   : > { %5224 = vperm.xlu1 %6032, %v10226_v45  }
 0x9e4   : > { %5216 = vperm.xlu2 %6030, %v10271_v62  }
 0x9e6   : > { %v4274_v2 = vpop.f32.mrf.mxu0  ;;  %v4312_v7 = vpop.f32.mrf.mxu1 }
 0x9e7   : > { %v10234_v46 = vadd.f32 %v4402_v41, %v4274_v2  ;;  %v10236_v4 = vadd.f32 %v4440_v32, %v4312_v7 }
 0x9e9   : > { %5807 = vmatmul.msk.bf16.gmra.mxu0 %vm3252_vm8, %v5898_v20  ;;  %5813 = vmatmul.msk.bf16.gmra.mxu1 %vm3252_vm8, %v5898_v20 }
 0x9ea   : > { %v4417_v0 = vpop.f32.mrf.mxu2  ;;  %v4455_v39 = vpop.f32.mrf.mxu3 }
 0x9ee   : > { %v4276_v35 = vpop.f32.mrf.mxu0  ;;  %v4314_v40 = vpop.f32.mrf.mxu1 }
 0x9ef   : > { %v10254_v11 = vadd.f32 %v4404_v25, %v4276_v35  ;;  %v10256_v56 = vadd.f32 %v4442_v30, %v4314_v40 }
 0x9f2   : > { %v4419_v61 = vpop.f32.mrf.mxu2  ;;  %v4457_v54 = vpop.f32.mrf.mxu3 }
 0x9f6   : > { %v4279_v12 = vpop.f32.mrf.mxu0  ;;  %v4317_v47 = vpop.f32.mrf.mxu1 }
 0x9f7   : > { %v10264_v29 = vadd.f32 %v4407_v6, %v4279_v12  ;;  %v10266_v52 = vadd.f32 %v4445_v36, %v4317_v47 }
 0x9f9   : > { %5808 = vmatmul.msk.bf16.gmra.mxu0 %vm3252_vm8, %v5899_v5  ;;  %5814 = vmatmul.msk.bf16.gmra.mxu1 %vm3252_vm8, %v5899_v5 }
 0x9fa   : > { %v4422_v25 = vpop.f32.mrf.mxu2  ;;  %v4460_v30 = vpop.f32.mrf.mxu3 }
 0x9fe   : > { %v4281_v27 = vpop.f32.mrf.mxu0  ;;  %v4319_v23 = vpop.f32.mrf.mxu1 }
 0x9ff   : > { %v10281_v3 = vadd.f32 %v4409_v10, %v4281_v27  ;;  %v10283_v44 = vadd.f32 %v4447_v60, %v4319_v23 }
 0xa02   : > { %v4424_v9 = vpop.f32.mrf.mxu2  ;;  %v4462_v60 = vpop.f32.mrf.mxu3 }
 0xa06   : > { %v4284_v49 = vpop.f32.mrf.mxu0  ;;  %v4322_v18 = vpop.f32.mrf.mxu1 }
 0xa07   : > { %v10289_v41 = vadd.f32 %v4412_v8, %v4284_v49  ;;  %v10291_v32 = vadd.f32 %v4450_v57, %v4322_v18 }
 0xa09   : > { %5809 = vmatmul.msk.bf16.gmra.mxu0 %vm3252_vm8, %v4502_v26  ;;  %5815 = vmatmul.msk.bf16.gmra.mxu1 %vm3252_vm8, %v4502_v26 }
 0xa0a   : > { %v10311_v20 = vpop.f32.mrf.mxu2  ;;  %v10313_v2 = vpop.f32.mrf.mxu3 }
 0xa0e   : > { %v4286_v14 = vpop.f32.mrf.mxu0  ;;  %v4324_v6 = vpop.f32.mrf.mxu1 }
 0xa0f   : > { %v10300_v36 = vadd.f32 %v4414_v42, %v4286_v14  ;;  %v10302_v34 = vadd.f32 %v4452_v59, %v4324_v6  ;;  %v11270_v42 = vmov 3  }
 0xa10   : > { %6034 = vset.pattern.permute.xlu0 %v11270_v42  ;;  %6035 = vset.pattern.permute.xlu1 %v11270_v42 }
 0xa11   : > { %5276 = vperm.xlu0 %6034, %v10139_v24   ;;  %5280 = vperm.xlu1 %6035, %v10157_v21  }
 0xa12   : > { %v4687_v35 = vpop.f32.mrf.mxu2  ;;  %v4725_v40 = vpop.f32.mrf.mxu3  ;;  %6033 = vset.pattern.permute.xlu2 %v11270_v42 }
 0xa13   : > { %5272 = vperm.xlu2 %6033, %v10165_v13  }
 0xa16   : > { %v4289_v10 = vpop.f32.mrf.mxu0  ;;  %v4327_v16 = vpop.f32.mrf.mxu1 }
 0xa17   : > { %v10307_v28 = vadd.f32 %v4417_v0, %v4289_v10  ;;  %v10309_v38 = vadd.f32 %v4455_v39, %v4327_v16 }
 0xa19   : > { %5296 = vperm.xlu0 %6034, %v10199_v63   ;;  %5288 = vperm.xlu1 %6035, %v10179_v22  }
 0xa1a   : > { %v4690_v0 = vpop.f32.mrf.mxu2  ;;  %v4728_v39 = vpop.f32.mrf.mxu3 }
 0xa1b   : > { %5284 = vperm.xlu2 %6033, %v10204_v17  }
 0xa1e   : > { %v4291_v7 = vpop.f32.mrf.mxu0  ;;  %v4329_v57 = vpop.f32.mrf.mxu1 }
 0xa1f   : > { %v10318_v8 = vadd.f32 %v4419_v61, %v4291_v7  ;;  %v10320_v1 = vadd.f32 %v4457_v54, %v4329_v57 }
 0xa21   : > { %5308 = vperm.xlu0 %6034, %v10249_v51   ;;  %5300 = vperm.xlu1 %6035, %v10213_v43  }
 0xa22   : > { %v4692_v15 = vpop.f32.mrf.mxu2  ;;  %v4730_v24 = vpop.f32.mrf.mxu3 }
 0xa23   : > { %5292 = vperm.xlu2 %6033, %v10241_v53   ;;  %v4398_v53 = vadd.f32 %v10150_v37, %v10192_v48 }
 0xa26   : > { %v4294_v59 = vpop.f32.mrf.mxu0  ;;  %v4332_v5 = vpop.f32.mrf.mxu1 }
 0xa27   : > { %v10327_v12 = vadd.f32 %v4422_v25, %v4294_v59  ;;  %v10329_v47 = vadd.f32 %v4460_v30, %v4332_v5 }
 0xa29   : > { %5312 = vperm.xlu1 %6035, %v10226_v45  }
 0xa2a   : > { %v4695_v31 = vpop.f32.mrf.mxu2  ;;  %v4733_v26 = vpop.f32.mrf.mxu3 }
 0xa2b   : > { %5304 = vperm.xlu2 %6033, %v10271_v62  }
 0xa2e   : > { %v4296_v27 = vpop.f32.mrf.mxu0  ;;  %v4334_v23 = vpop.f32.mrf.mxu1 }
 0xa32   : > { %v10342_v25 = vpop.f32.mrf.mxu2  ;;  %v10344_v30 = vpop.f32.mrf.mxu3 }
 0xa36   : > { %v4530_v61 = vpop.f32.mrf.mxu0  ;;  %v4568_v54 = vpop.f32.mrf.mxu1 }
 0xa3a   : > { %v10351_v6 = vpop.f32.mrf.mxu2 }
 0xa3e   : > { %v4532_v21 = vpop.f32.mrf.mxu0  ;;  %v4570_v63 = vpop.f32.mrf.mxu1 }
 0xa3f   : > { %v4599_v49 = vadd.f32 %v4532_v21, %v10216_v19  ;;  %v4600_v18 = vadd.f32 %v4570_v63, %v10218_v58  ;;  %v10353_v58 = vpop.f32.mrf.mxu3  ;;  %v4777_v21 = vpop.permute.xlu2 %4776 }
 0xa40   : > { %v4782_v63 = vpop.permute.xlu0 %4781 }
 0xa41   : > { %v4754_v22 = vadd.f32 %v4687_v35, %v4599_v49  ;;  %v4755_v51 = vadd.f32 %v4725_v40, %v4600_v18 }
 0xa42   : > { %v10360_v57 = vpop.f32.mrf.mxu2 }
 0xa43   : > { %v10386_v37 = vadd.f32 %v4782_v63, %v4755_v51 }
 0xa46   : > { %v4535_v50 = vpop.f32.mrf.mxu0  ;;  %v4573_v43 = vpop.f32.mrf.mxu1 }
 0xa47   : > { %v4601_v14 = vadd.f32 %v4535_v50, %v10234_v46  ;;  %v4602_v19 = vadd.f32 %v4573_v43, %v10236_v4  ;;  %v10358_v7 = vpop.f32.mrf.mxu3  ;;  %v4787_v50 = vpop.permute.xlu1 %4786  ;;  %v10384_v43 = vadd.f32 %v4782_v63, %v4754_v22 }
 0xa49   : > { %v4756_v9 = vadd.f32 %v4690_v0, %v4601_v14  ;;  %v4757_v60 = vadd.f32 %v4728_v39, %v4602_v19 }
 0xa4a   : > { %v10365_v59 = vpop.f32.mrf.mxu2 }
 0xa4b   : > { %v10398_v22 = vadd.f32 %v4787_v50, %v4757_v60 }
 0xa4e   : > { %v4537_v10 = vpop.f32.mrf.mxu0  ;;  %v4575_v16 = vpop.f32.mrf.mxu1 }
 0xa4f   : > { %v4603_v13 = vadd.f32 %v4537_v10, %v10254_v11  ;;  %v4604_v45 = vadd.f32 %v4575_v16, %v10256_v56  ;;  %v10367_v5 = vpop.f32.mrf.mxu3  ;;  %v4885_v10 = vmul.f32 %v10384_v43, %v10384_v43 }
 0xa51   : > { %v4758_v46 = vadd.f32 %v4692_v15, %v4603_v13  ;;  %v4759_v4 = vadd.f32 %v4730_v24, %v4604_v45 }
 0xa52   : > { %v10372_v23 = vpop.f32.mrf.mxu2 }
 0xa56   : > { %v4540_v35 = vpop.f32.mrf.mxu0  ;;  %v4578_v40 = vpop.f32.mrf.mxu1 }
 0xa57   : > { %v4605_v42 = vadd.f32 %v4540_v35, %v10264_v29  ;;  %v4606_v17 = vadd.f32 %v4578_v40, %v10266_v52  ;;  %v10370_v27 = vpop.f32.mrf.mxu3  ;;  %v4436_v29 = vadd.f32 %v10152_v33, %v10194_v55 }
 0xa59   : > { %v4760_v11 = vadd.f32 %v4695_v31, %v4605_v42  ;;  %v4761_v56 = vadd.f32 %v4733_v26, %v4606_v17  ;;  %v4597_v31 = vadd.f32 %v4530_v61, %v4398_v53  ;;  %v4598_v26 = vadd.f32 %v4568_v54, %v4436_v29  ;;  %v4792_v54 = vpop.permute.xlu2 %4791  ;;  %v4797_v42 = vpop.permute.xlu1 %4796 }
 0xa5a   : > { %v10380_v62 = vpop.f32.mrf.mxu2  ;;  %v10412_v60 = vadd.f32 %v4792_v54, %v4759_v4 }
 0xa5b   : > { %v4752_v49 = vadd.f32 %v10311_v20, %v4597_v31  ;;  %v4753_v18 = vadd.f32 %v10313_v2, %v4598_v26  ;;  %v4886_v20 = vmul.f32 %v10386_v37, %v10386_v37  ;;  %v10396_v2 = vadd.f32 %v4787_v50, %v4756_v9 }
 0xa5c   : > { %v10410_v9 = vadd.f32 %v4792_v54, %v4758_v46  ;;  %v4888_v31 = vmul.f32 %v10398_v22, %v10398_v22  ;;  %v4807_v54 = vpop.permute.xlu0 %4806 }
 0xa5d   : > { %v10388_v14 = vadd.f32 %v4777_v21, %v4752_v49  ;;  %v10390_v61 = vadd.f32 %v4777_v21, %v4753_v18  ;;  %v4887_v29 = vmul.f32 %v10396_v2, %v10396_v2  ;;  %v10430_v49 = vadd.f32 %v4797_v42, %v4760_v11 }
 0xa5e   : > { %v4542_v0 = vpop.f32.mrf.mxu0  ;;  %v4580_v39 = vpop.f32.mrf.mxu1 }
 0xa5f   : > { %v10378_v24 = vpop.f32.mrf.mxu3  ;;  %v4607_v51 = vadd.f32 %v4542_v0, %v10281_v3  ;;  %v4608_v16 = vadd.f32 %v4580_v39, %v10283_v44  ;;  %v4883_v13 = vmul.f32 %v10388_v14, %v10388_v14  ;;  %v4884_v45 = vmul.f32 %v10390_v61, %v10390_v61 }
 0xa60   : > { %v4851_v35 = vadd.f32 %v10384_v43, %v10388_v14  ;;  %v4867_v40 = vadd.f32 %v10386_v37, %v10390_v61 }
 0xa61   : > { %v4905_v3 = vadd.f32 %v4885_v10, %v4883_v13  ;;  %v4921_v17 = vadd.f32 %v4886_v20, %v4884_v45  ;;  %v4762_v46 = vadd.f32 %v10342_v25, %v4607_v51  ;;  %v4763_v4 = vadd.f32 %v10344_v30, %v4608_v16  ;;  %v4802_v63 = vpop.permute.xlu2 %4801 }
 0xa62   : > { %v4712_v19 = vpop.f32.mrf.mxu2  ;;  %v4852_v26 = vadd.f32 %v4851_v35, %v10396_v2  ;;  %v4868_v21 = vadd.f32 %v4867_v40, %v10398_v22  ;;  %v10432_v25 = vadd.f32 %v4797_v42, %v4761_v56  ;;  %v4812_v40 = vpop.permute.xlu1 %4811 }
 0xa64   : > { %v4853_v11 = vadd.f32 %v4852_v26, %v10410_v9  ;;  %v4869_v56 = vadd.f32 %v4868_v21, %v10412_v60 }
 0xa66   : > { %v4545_v52 = vpop.f32.mrf.mxu0  ;;  %v4583_v15 = vpop.f32.mrf.mxu1 }
 0xa67   : > { %v4750_v55 = vpop.f32.mrf.mxu3  ;;  %v4609_v44 = vadd.f32 %v4545_v52, %v10289_v41  ;;  %v4610_v0 = vadd.f32 %v4583_v15, %v10291_v32  ;;  %v4889_v52 = vmul.f32 %v10410_v9, %v10410_v9  ;;  %v4890_v15 = vmul.f32 %v10412_v60, %v10412_v60 }
 0xa68   : > { %v10440_v55 = vadd.f32 %v4802_v63, %v4763_v4 }
 0xa69   : > { %v4764_v30 = vadd.f32 %v10351_v6, %v4609_v44  ;;  %v4765_v18 = vadd.f32 %v10353_v58, %v4610_v0  ;;  %v4870_v44 = vadd.f32 %v4869_v56, %v10432_v25 }
 0xa6a   : > { %v4894_v35 = vmul.f32 %v10440_v55, %v10440_v55 }
 0xa6b   : > { %v10450_v20 = vadd.f32 %v4807_v54, %v4764_v30  ;;  %v10452_v51 = vadd.f32 %v4807_v54, %v4765_v18  ;;  %v4871_v21 = vadd.f32 %v4870_v44, %v10440_v55 }
 0xa6d   : > { %v4872_v18 = vadd.f32 %v4871_v21, %v10452_v51 }
 0xa6e   : > { %v4547_v33 = vpop.f32.mrf.mxu0  ;;  %v4585_v48 = vpop.f32.mrf.mxu1 }
 0xa6f   : > { %v4611_v41 = vadd.f32 %v4547_v33, %v10300_v36  ;;  %v4612_v32 = vadd.f32 %v4585_v48, %v10302_v34  ;;  %v4906_v33 = vadd.f32 %v4905_v3, %v4887_v29  ;;  %v4922_v34 = vadd.f32 %v4921_v17, %v4888_v31 }
 0xa70   : > { %v10438_v48 = vadd.f32 %v4802_v63, %v4762_v46  ;;  %v4854_v17 = vadd.f32 %v4853_v11, %v10430_v49 }
 0xa71   : > { %v4766_v19 = vadd.f32 %v10360_v57, %v4611_v41  ;;  %v4767_v6 = vadd.f32 %v10358_v7, %v4612_v32  ;;  %v4907_v58 = vadd.f32 %v4906_v33, %v4889_v52  ;;  %v4923_v10 = vadd.f32 %v4922_v34, %v4890_v15  ;;  %v4822_v32 = vpop.permute.xlu0 %4821 }
 0xa72   : > { %v4893_v7 = vmul.f32 %v10438_v48, %v10438_v48  ;;  %v4855_v26 = vadd.f32 %v4854_v17, %v10438_v48 }
 0xa74   : > { %v4856_v30 = vadd.f32 %v4855_v26, %v10450_v20 }
 0xa76   : > { %v4550_v39 = vpop.f32.mrf.mxu0  ;;  %v4588_v53 = vpop.f32.mrf.mxu1 }
 0xa77   : > { %v4613_v50 = vadd.f32 %v4550_v39, %v10307_v28  ;;  %v4614_v36 = vadd.f32 %v4588_v53, %v10309_v38  ;;  %v4891_v28 = vmul.f32 %v10430_v49, %v10430_v49  ;;  %v4892_v38 = vmul.f32 %v10432_v25, %v10432_v25  ;;  %v4817_v53 = vpop.permute.xlu2 %4816 }
 0xa79   : > { %v4768_v16 = vadd.f32 %v10365_v59, %v4613_v50  ;;  %v4769_v13 = vadd.f32 %v10367_v5, %v4614_v36  ;;  %v10464_v59 = vadd.f32 %v4812_v40, %v4766_v19  ;;  %v10466_v5 = vadd.f32 %v4812_v40, %v4767_v6  ;;  %v4827_v40 = vpop.permute.xlu1 %4826 }
 0xa7a   : > { %v4908_v0 = vadd.f32 %v4907_v58, %v4891_v28  ;;  %v4924_v39 = vadd.f32 %v4923_v10, %v4892_v38 }
 0xa7b   : > { %v10474_v46 = vadd.f32 %v4817_v53, %v4768_v16  ;;  %v10476_v4 = vadd.f32 %v4817_v53, %v4769_v13  ;;  %v4857_v56 = vadd.f32 %v4856_v30, %v10464_v59  ;;  %v4873_v19 = vadd.f32 %v4872_v18, %v10466_v5 }
 0xa7c   : > { %v4909_v63 = vadd.f32 %v4908_v0, %v4893_v7  ;;  %v4925_v41 = vadd.f32 %v4924_v39, %v4894_v35 }
 0xa7d   : > { %v4899_v33 = vmul.f32 %v10474_v46, %v10474_v46  ;;  %v4900_v34 = vmul.f32 %v10476_v4, %v10476_v4  ;;  %v4858_v13 = vadd.f32 %v4857_v56, %v10474_v46 }
 0xa7e   : > { %v4552_v45 = vpop.f32.mrf.mxu0  ;;  %v4590_v57 = vpop.f32.mrf.mxu1 }
 0xa7f   : > { %v4615_v42 = vadd.f32 %v4552_v45, %v10318_v8  ;;  %v4616_v3 = vadd.f32 %v4590_v57, %v10320_v1  ;;  %v4895_v8 = vmul.f32 %v10450_v20, %v10450_v20  ;;  %v4896_v1 = vmul.f32 %v10452_v51, %v10452_v51 }
 0xa80   : > { %v4874_v45 = vadd.f32 %v4873_v19, %v10476_v4 }
 0xa81   : > { %v4770_v29 = vadd.f32 %v10372_v23, %v4615_v42  ;;  %v4771_v31 = vadd.f32 %v10370_v27, %v4616_v3  ;;  %v4897_v27 = vmul.f32 %v10464_v59, %v10464_v59  ;;  %v4898_v23 = vmul.f32 %v10466_v5, %v10466_v5 }
 0xa82   : > { %v4910_v50 = vadd.f32 %v4909_v63, %v4895_v8  ;;  %v4926_v36 = vadd.f32 %v4925_v41, %v4896_v1 }
 0xa83   : > { %v10484_v52 = vadd.f32 %v4822_v32, %v4770_v29  ;;  %v10486_v15 = vadd.f32 %v4822_v32, %v4771_v31 }
 0xa84   : > { %v4911_v10 = vadd.f32 %v4910_v50, %v4897_v27  ;;  %v4927_v28 = vadd.f32 %v4926_v36, %v4898_v23 }
 0xa85   : > { %v4901_v38 = vmul.f32 %v10484_v52, %v10484_v52  ;;  %v4902_v16 = vmul.f32 %v10486_v15, %v10486_v15  ;;  %v4875_v42 = vadd.f32 %v4874_v45, %v10486_v15 }
 0xa86   : > { %v4555_v54 = vpop.f32.mrf.mxu0  ;;  %v4593_v11 = vpop.f32.mrf.mxu1  ;;  %v4912_v35 = vadd.f32 %v4911_v10, %v4899_v33 }
 0xa87   : > { %v4617_v6 = vadd.f32 %v4555_v54, %v10327_v12  ;;  %v4618_v58 = vadd.f32 %v4593_v11, %v10329_v47  ;;  %v4928_v12 = vadd.f32 %v4927_v28, %v4900_v34  ;;  %v4859_v47 = vadd.f32 %v4858_v13, %v10484_v52 }
 0xa88   : > { %v4913_v44 = vadd.f32 %v4912_v35, %v4901_v38  ;;  %v10526_v35 = vpop.permute.xlu1 %5126 }
 0xa89   : > { %v4772_v57 = vadd.f32 %v10380_v62, %v4617_v6  ;;  %v4773_v7 = vadd.f32 %v10378_v24, %v4618_v58  ;;  %v4929_v0 = vadd.f32 %v4928_v12, %v4902_v16 }
 0xa8b   : > { %v10508_v3 = vadd.f32 %v4827_v40, %v4772_v57  ;;  %v10510_v17 = vadd.f32 %v4827_v40, %v4773_v7  ;;  %v10524_v7 = vpop.permute.xlu2 %5118 }
 0xa8d   : > { %v4860_v39 = vadd.f32 %v4859_v47, %v10508_v3  ;;  %v4903_v62 = vmul.f32 %v10508_v3, %v10508_v3  ;;  %v4876_v24 = vadd.f32 %v4875_v42, %v10510_v17  ;;  %v4904_v53 = vmul.f32 %v10510_v17, %v10510_v17 }
 0xa8e   : > { %v4557_v29 = vpop.f32.mrf.mxu0  ;;  %v4595_v31 = vpop.f32.mrf.mxu1 }
 0xa8f   : > { %v4861_v8 = vrot.slane %v4860_v39, 4  ;;  %v4914_v1 = vadd.f32 %v4913_v44, %v4903_v62  ;;  %v4877_v26 = vrot.slane %v4876_v24, 4  ;;  %v4930_v21 = vadd.f32 %v4929_v0, %v4904_v53 }
 0xa90   : > { %v10530_v40 = vpop.permute.xlu1 %5134 }
 0xa91   : > { %v4862_v63 = vadd.f32 %v4861_v8, %v4860_v39  ;;  %v4915_v41 = vrot.slane %v4914_v1, 4  ;;  %v4878_v32 = vadd.f32 %v4877_v26, %v4876_v24  ;;  %v4931_v27 = vrot.slane %v4930_v21, 4  ;;  %v10540_v39 = vpop.permute.xlu0 %5122 }
 0xa93   : > { %v4863_v23 = vrot.slane %v4862_v63, 2  ;;  %v4916_v30 = vadd.f32 %v4915_v41, %v4914_v1  ;;  %v4879_v18 = vrot.slane %v4878_v32, 2  ;;  %v4932_v50 = vadd.f32 %v4931_v27, %v4930_v21  ;;  %v10528_v12 = vpop.permute.xlu2 %5130  ;;  %v11271_v1 = vld [vmem:[#allocation27_spill] sm:$0xff] }
 0xa95   : > { %v4864_v36 = vadd.f32 %v4863_v23, %v4862_v63  ;;  %v4917_v33 = vrot.slane %v4916_v30, 2  ;;  %v4880_v34 = vadd.f32 %v4879_v18, %v4878_v32  ;;  %v4933_v54 = vrot.slane %v4932_v50, 2 }
 0xa97   : > { %v4865_v11 = vrot.slane %v4864_v36, 1  ;;  %v4918_v56 = vadd.f32 %v4917_v33, %v4916_v30  ;;  %v4881_v19 = vrot.slane %v4880_v34, 1  ;;  %v4934_v6 = vadd.f32 %v4933_v54, %v4932_v50  ;;  %v11272_v33 = vld [vmem:[#allocation28_spill] sm:$0xff] }
 0xa98   : > { %v10534_v42 = vpop.permute.xlu1 %5146 }
 0xa99   : > { %v4919_v58 = vrot.slane %v4918_v56, 1  ;;  %v4935_v10 = vrot.slane %v4934_v6, 1  ;;  %v4866_v28 = vadd.f32 %v4865_v11, %v4864_v36  ;;  %v4882_v16 = vadd.f32 %v4881_v19, %v4880_v34  ;;  %v10546_v53 = vpop.permute.xlu0 %5142 }
 0xa9b   : > { %v4920_v38 = vadd.f32 %v4919_v58, %v4918_v56  ;;  %v4936_v13 = vadd.f32 %v4935_v10, %v4934_v6  ;;  %v10532_v47 = vpop.permute.xlu2 %5138 }
 0xa9d   : > { %v4937_v45 = vsel %vm860_vm0, %v4866_v28, %v4920_v38  ;;  %v4938_v57 = vsel %vm860_vm0, %v4882_v16, %v4936_v13 }
 0xa9e   : > { %5848 = vmatmul.msk.f32.vlgmr.msrb.gmra.mxu0 %vm2008_vm7, %v4937_v45  ;;  %5849 = vmatmul.msk.f32.vlgmr.msrb.gmra.mxu1 %vm2008_vm7, %v4938_v57 }
 0xa9f   : > { %5850 = vmatmul.msk.f32.vlgmr.msrb.gmra.mxu2 %vm2008_vm7, %v4937_v45  ;;  %5851 = vmatmul.msk.f32.vlgmr.msrb.gmra.mxu3 %vm2008_vm7, %v4938_v57 }
 0xaa0   : > { %v10538_v0 = vpop.permute.xlu1 %5158 }
 0xaa1   : > { %v10553_v36 = vpop.permute.xlu0 %5154 }
 0xaa3   : > { %v10536_v44 = vpop.permute.xlu2 %5150 }
 0xaa8   : > { %v10544_v24 = vpop.permute.xlu1 %5192 }
 0xaa9   : > { %v10561_v57 = vpop.permute.xlu0 %5188 }
 0xaab   : > { %v10542_v62 = vpop.permute.xlu2 %5184 }
 0xab0   : > { %v10551_v50 = vpop.permute.xlu1 %5200 }
 0xab3   : > { %v10549_v27 = vpop.permute.xlu2 %5196 }
 0xab8   : > { %v10559_v45 = vpop.permute.xlu1 %5212 }
 0xabb   : > { %v10557_v16 = vpop.permute.xlu2 %5204 }
 0xb1b   : > { %v4958_v29 = vpop.f32.mrf.mxu0  ;;  %v4978_v31 = vpop.f32.mrf.mxu1 }
 0xb1c   : > { %v4979_v8 = vadd.f32 %v4978_v31, %v4958_v29 }
 0xb1e   : > { %v5021_v26 = vmul.f32 %v4979_v8, %v11271_v1 }
 0xb20   : > { %v5023_v21 = vmul.f32 2.0, %v5021_v26  ;;  %v5037_v18 = vmul.f32 %v5021_v26, %v5021_v26 }
 0xb22   : > { %v5025_v63 = vmul.f32 %v5023_v21, %v4979_v8  ;;  %v4998_v41 = vpop.f32.mrf.mxu2  ;;  %v5018_v32 = vpop.f32.mrf.mxu3  ;;  %v5041_v19 = vrot.slane %v5037_v18, 7 }
 0xb23   : > { %v5019_v23 = vadd.f32 %v5018_v32, %v4998_v41  ;;  %v10564_v41 = vperm.slane %v5021_v26, 0  ;;  %v10566_v32 = vpop.permute.xlu2 %5216  ;;  %v10568_v18 = vpop.permute.xlu1 %5224 }
 0xb24   : > { %v5029_v30 = vrot.slane %v5025_v63, 7  ;;  %11273 = vst [vmem:[#allocation47_spill] sm:$0xff] %v10568_v18 }
 0xb25   : > { %v5022_v34 = vmul.f32 %v5019_v23, %v11272_v33  ;;  %v5075_v26 = vsub.f32 %v10396_v2, %v10564_v41 }
 0xb26   : > { %v5033_v54 = vsub.f32 %v4979_v8, %v5029_v30 }
 0xb27   : > { %v5024_v11 = vmul.f32 2.0, %v5022_v34  ;;  %v5038_v28 = vmul.f32 %v5022_v34, %v5022_v34 }
 0xb28   : > { %v5035_v56 = vmul.f32 %v5033_v54, %v11271_v1  ;;  %v10570_v54 = vpop.permute.xlu0 %5208 }
 0xb29   : > { %v5026_v6 = vmul.f32 %v5024_v11, %v5019_v23  ;;  %v5042_v31 = vrot.slane %v5038_v28, 7  ;;  %v5083_v11 = vsub.f32 %v10450_v20, %v10564_v41  ;;  %v5077_v28 = vsub.f32 %v10410_v9, %v10564_v41 }
 0xb2a   : > { %v5045_v58 = vadd.f32 %v5041_v19, %v5035_v56  ;;  %v5071_v56 = vsub.f32 %v10388_v14, %v10564_v41  ;;  %v5079_v20 = vsub.f32 %v10430_v49, %v10564_v41 }
 0xb2b   : > { %v5030_v10 = vrot.slane %v5026_v6, 7 }
 0xb2c   : > { %v5047_v38 = vadd.f32 1e-05, %v5045_v58  ;;  %v5089_v58 = vsub.f32 %v10484_v52, %v10564_v41 }
 0xb2d   : > { %v5034_v13 = vsub.f32 %v5019_v23, %v5030_v10 }
 0xb2e   : > { %6152 = vrsqrt.f32 %v5047_v38  ;;  %vm5055_vm2 = vweird.f32 %v5047_v38 }
 0xb2f   : > { %v5036_v29 = vmul.f32 %v5034_v13, %v11272_v33  ;;  %v10574_v33 = vperm.slane %v5022_v34, 0  ;;  %v5073_v34 = vsub.f32 %v10384_v43, %v10564_v41 }
 0xb31   : > { %v5046_v8 = vadd.f32 %v5042_v31, %v5036_v29  ;;  %v5072_v29 = vsub.f32 %v10390_v61, %v10574_v33  ;;  %v5090_v31 = vsub.f32 %v10486_v15, %v10574_v33 }
 0xb33   : > { %v5048_v21 = vadd.f32 1e-05, %v5046_v8  ;;  %v5078_v8 = vsub.f32 %v10412_v60, %v10574_v33 }
 0xb34   : > { %v6153_v1 = vpop.eup %6152 }
 0xb35   : > { %v5050_v63 = vmul.f32 %v6153_v1, %v5047_v38  ;;  %6154 = vrsqrt.f32 %v5048_v21  ;;  %vm5056_vm0 = vweird.f32 %v6153_v1  ;;  %v5076_v38 = vsub.f32 %v10398_v22, %v10574_v33 }
 0xb36   : > { %vm5057_vm7 = vmor %vm5055_vm2, %vm5056_vm0  ;;  %vm5065_vm9 = vweird.f32 %v5048_v21 }
 0xb37   : > { %v5051_v30 = vmul.f32 %v6153_v1, %v5050_v63 }
 0xb39   : > { %v5052_v23 = vmul.f32 0.5, %v5051_v30 }
 0xb3b   : > { %v6155_v19 = vpop.eup %6154  ;;  %v5053_v6 = vsub.f32 1.5, %v5052_v23 }
 0xb3c   : > { %v5060_v10 = vmul.f32 %v6155_v19, %v5048_v21  ;;  %vm5066_vm8 = vweird.f32 %v6155_v19 }
 0xb3d   : > { %v5054_v14 = vmul.f32 %v6153_v1, %v5053_v6  ;;  %vm5067_vm12 = vmor %vm5065_vm9, %vm5066_vm8 }
 0xb3e   : > { %v5061_v52 = vmul.f32 %v6155_v19, %v5060_v10 }
 0xb3f   : > { %v5058_v43 = vsel %vm5057_vm7, %v6153_v1, %v5054_v14  ;;  %v10610_v1 = vpop.permute.xlu2 %5272 }
 0xb40   : > { %v10604_v63 = vperm.slane %v5058_v43, 1  ;;  %v5062_v61 = vmul.f32 0.5, %v5061_v52  ;;  %v5281_v52 = vpop.permute.xlu1 %5280  ;;  %v5221_v43 = vpop.permute.xlu0 %5220 }
 0xb42   : > { %v5107_v60 = vmul.f32 %v10604_v63, %v5083_v11  ;;  %v5063_v6 = vsub.f32 1.5, %v5062_v61  ;;  %v5095_v10 = vmul.f32 %v10604_v63, %v5071_v56  ;;  %v5099_v14 = vmul.f32 %v10604_v63, %v5075_v26 }
 0xb43   : > { %v5113_v49 = vmul.f32 %v10604_v63, %v5089_v58  ;;  %v5101_v9 = vmul.f32 %v10604_v63, %v5077_v28  ;;  %v5103_v2 = vmul.f32 %v10604_v63, %v5079_v20  ;;  %v5097_v22 = vmul.f32 %v10604_v63, %v5073_v34 }
 0xb44   : > { %v5173_v15 = vmul.f32 %v10546_v53, %v5107_v60  ;;  %v5064_v11 = vmul.f32 %v6155_v19, %v5063_v6  ;;  %v5161_v61 = vmul.f32 %v10524_v7, %v5095_v10  ;;  %v5165_v56 = vmul.f32 %v10526_v35, %v5099_v14 }
 0xb45   : > { %v5167_v26 = vmul.f32 %v10528_v12, %v5101_v9  ;;  %v5169_v21 = vmul.f32 %v10530_v40, %v5103_v2  ;;  %v5179_v9 = vmul.f32 %v10553_v36, %v5113_v49  ;;  %v5163_v28 = vmul.f32 %v10540_v39, %v5097_v22 }
 0xb46   : > { %v5068_v34 = vsel %vm5067_vm12, %v6155_v19, %v5064_v11  ;;  %v5227_v60 = vadd.f32 %v10542_v62, %v5161_v61  ;;  %v5231_v6 = vadd.f32 %v10544_v24, %v5165_v56  ;;  %v10647_v58 = vadd.f32 %v10570_v54, %v5173_v15 }
 0xb47   : > { %v10641_v10 = vperm.slane %v5068_v34, 1  ;;  %v5233_v14 = vadd.f32 %v10549_v27, %v5167_v26  ;;  %v5235_v22 = vadd.f32 %v10551_v50, %v5169_v21  ;;  %v11274_v26 = vld [vmem:[#allocation41_spill] sm:$0xff]  ;;  %v5285_v30 = vpop.permute.xlu2 %5284  ;;  %v10666_v21 = vadd.f32 %v5221_v43, %v5179_v9  ;;  %v11277_v9 = vld [vmem:[#allocation38_spill] sm:$0xff] }
 0xb48   : > { %vm5249_vm13 = vcmp.ge.f32.partialorder %v5227_v60, 0.0  ;;  %v5315_v19 = vmul.f32 %v10610_v1, %v5227_v60  ;;  %vm5253_vm14 = vcmp.ge.f32.partialorder %v5231_v6, 0.0  ;;  %v5319_v2 = vmul.f32 %v5281_v52, %v5231_v6 }
 0xb49   : > { %v5096_v11 = vmul.f32 %v10641_v10, %v5072_v29  ;;  %v5100_v61 = vmul.f32 %v10641_v10, %v5076_v38  ;;  %v5114_v56 = vmul.f32 %v10641_v10, %v5090_v31  ;;  %v5102_v49 = vmul.f32 %v10641_v10, %v5078_v8  ;;  %v11275_v29 = vld [vmem:[#allocation37_spill] sm:$0xff] }
 0xb4a   : > { %v5337_v34 = vsel %vm5249_vm13, %v5227_v60, %v5315_v19  ;;  %vm5255_vm15 = vcmp.ge.f32.partialorder %v5233_v14, 0.0  ;;  %v5341_v23 = vsel %vm5253_vm14, %v5231_v6, %v5319_v2  ;;  %v5321_v60 = vmul.f32 %v5285_v30, %v5233_v14  ;;  %v5277_v6 = vpop.permute.xlu0 %5276  ;;  %v11278_v2 = vld [vmem:[#allocation45_spill] sm:$0xff] }
 0xb4b   : > { %v5162_v15 = vmul.f32 %v10524_v7, %v5096_v11  ;;  %v5359_v20 = vadd.f32 %v5337_v34, %v11274_v26  ;;  %v5166_v13 = vmul.f32 %v10526_v35, %v5100_v61  ;;  %v5363_v18 = vadd.f32 %v5341_v23, %v11275_v29  ;;  %v5289_v35 = vpop.permute.xlu1 %5288  ;;  %v11279_v34 = vld [vmem:[#allocation43_spill] sm:$0xff] }
 0xb4c   : > { %v5180_v38 = vmul.f32 %v10553_v36, %v5114_v56  ;;  %v5168_v31 = vmul.f32 %v10528_v12, %v5102_v49  ;;  %v11276_v23 = vsub.f32 %v10432_v25, %v10574_v33  ;;  %vm5257_vm3 = vcmp.ge.f32.partialorder %v5235_v22, 0.0 }
 0xb4d   : > { %v5228_v8 = vadd.f32 %v10542_v62, %v5162_v15  ;;  %5381 = vst [vmem:[%s10662_s30] sm:$0xff] %v5359_v20  ;;  %v5232_v7 = vadd.f32 %v10544_v24, %v5166_v13  ;;  %v5343_v62 = vsel %vm5255_vm15, %v5233_v14, %v5321_v60  ;;  %v5323_v19 = vmul.f32 %v5289_v35, %v5235_v22  ;;  %v11281_v15 = vld [vmem:[#allocation44_spill] sm:$0xff] }
 0xb4e   : > { %v5104_v36 = vmul.f32 %v10641_v10, %v11276_v23  ;;  %5385 = vst [vmem:[%s10662_s30 + $0x20] sm:$0xff] %v5363_v18  ;;  %v5234_v12 = vadd.f32 %v10549_v27, %v5168_v31  ;;  %v10676_v20 = vadd.f32 %v5221_v43, %v5180_v38  ;;  %v5365_v11 = vadd.f32 %v5343_v62, %v11277_v9 }
 0xb4f   : > { %vm5250_vm4 = vcmp.ge.f32.partialorder %v5228_v8, 0.0  ;;  %v5316_v24 = vmul.f32 %v10610_v1, %v5228_v8  ;;  %vm5254_vm1 = vcmp.ge.f32.partialorder %v5232_v7, 0.0  ;;  %v5320_v13 = vmul.f32 %v5281_v52, %v5232_v7  ;;  %v11280_v52 = vld [vmem:[#allocation36_spill] sm:$0xff] }
 0xb50   : > { %vm5256_vm5 = vcmp.ge.f32.partialorder %v5234_v12, 0.0  ;;  %v5322_v25 = vmul.f32 %v5285_v30, %v5234_v12  ;;  %v5170_v27 = vmul.f32 %v10530_v40, %v5104_v36  ;;  %v5345_v14 = vsel %vm5257_vm3, %v5235_v22, %v5323_v19  ;;  %5387 = vst [vmem:[%s10662_s30 + $0x30] sm:$0xff] %v5365_v11 }
 0xb51   : > { %v5338_v18 = vsel %vm5250_vm4, %v5228_v8, %v5316_v24  ;;  %v5342_v61 = vsel %vm5254_vm1, %v5232_v7, %v5320_v13  ;;  %v5367_v43 = vadd.f32 %v5345_v14, %v11280_v52  ;;  %v11282_v29 = vsub.f32 %v10386_v37, %v10574_v33  ;;  %v11288_v13 = vld [vmem:[#allocation39_spill] sm:$0xff] }
 0xb52   : > { %v5360_v56 = vadd.f32 %v5338_v18, %v11278_v2  ;;  %v5364_v49 = vadd.f32 %v5342_v61, %v11279_v34  ;;  %v5344_v1 = vsel %vm5256_vm5, %v5234_v12, %v5322_v25  ;;  %v5236_v30 = vadd.f32 %v10551_v50, %v5170_v27  ;;  %v5297_v24 = vpop.permute.xlu0 %5296  ;;  %v5293_v61 = vpop.permute.xlu2 %5292 }
 0xb53   : > { %v5366_v26 = vadd.f32 %v5344_v1, %v11281_v15  ;;  %v5098_v40 = vmul.f32 %v10641_v10, %v11282_v29  ;;  %v5229_v22 = vadd.f32 %v10561_v57, %v5163_v28  ;;  %v11283_v38 = vsub.f32 %v10438_v48, %v10564_v41  ;;  %5389 = vst [vmem:[%s10662_s30 + $0x40] sm:$0xff] %v5367_v43  ;;  %v5301_v2 = vpop.permute.xlu1 %5300  ;;  %v11291_v15 = vld [vmem:[#allocation31_spill] sm:$0xff] }
 0xb54   : > { %5382 = vst [vmem:[%s10662_s30 + $0x8] sm:$0xff] %v5360_v56  ;;  %v11284_v60 = vsub.f32 %v10440_v55, %v10574_v33  ;;  %v11285_v50 = vsub.f32 %v10464_v59, %v10564_v41  ;;  %v11286_v28 = vsub.f32 %v10466_v5, %v10574_v33  ;;  %vm5261_vm6 = vcmp.ge.f32.partialorder %v10647_v58, 0.0 }
 0xb55   : > { %v5105_v31 = vmul.f32 %v10604_v63, %v11283_v38  ;;  %5386 = vst [vmem:[%s10662_s30 + $0x28] sm:$0xff] %v5364_v49  ;;  %vm5258_vm10 = vcmp.ge.f32.partialorder %v5236_v30, 0.0  ;;  %v5324_v48 = vmul.f32 %v5289_v35, %v5236_v30  ;;  %v5164_v55 = vmul.f32 %v10540_v39, %v5098_v40 }
 0xb56   : > { %v5106_v8 = vmul.f32 %v10641_v10, %v11284_v60  ;;  %v5109_v37 = vmul.f32 %v10604_v63, %v11285_v50  ;;  %v5110_v7 = vmul.f32 %v10641_v10, %v11286_v28  ;;  %vm5251_vm11 = vcmp.ge.f32.partialorder %v5229_v22, 0.0  ;;  %5388 = vst [vmem:[%s10662_s30 + $0x38] sm:$0xff] %v5366_v26 }
 0xb57   : > { %v5317_v23 = vmul.f32 %v5277_v6, %v5229_v22  ;;  %v5171_v36 = vmul.f32 %v10532_v47, %v5105_v31  ;;  %v5346_v62 = vsel %vm5258_vm10, %v5236_v30, %v5324_v48  ;;  %v5230_v5 = vadd.f32 %v10561_v57, %v5164_v55  ;;  %v11289_v57 = vld [vmem:[#allocation42_spill] sm:$0xff]  ;;  %v11292_v30 = vld [vmem:[#allocation40_spill] sm:$0xff] }
 0xb58   : > { %v5172_v59 = vmul.f32 %v10532_v47, %v5106_v8  ;;  %v5175_v12 = vmul.f32 %v10534_v42, %v5109_v37  ;;  %v5176_v19 = vmul.f32 %v10534_v42, %v5110_v7  ;;  %v11287_v39 = vsub.f32 %v10452_v51, %v10574_v33  ;;  %v11294_v8 = vld [vmem:[#allocation32_spill] sm:$0xff] }
 0xb59   : > { %v5368_v25 = vadd.f32 %v5346_v62, %v11288_v13  ;;  %v5339_v9 = vsel %vm5251_vm11, %v5229_v22, %v5317_v23  ;;  %v5237_v47 = vadd.f32 %v10557_v16, %v5171_v36  ;;  %vm5267_vm0 = vcmp.ge.f32.partialorder %v10666_v21, 0.0  ;;  %v11298_v36 = vld [vmem:[#allocation34_spill] sm:$0xff] }
 0xb5a   : > { %v5108_v35 = vmul.f32 %v10641_v10, %v11287_v39  ;;  %v5238_v11 = vadd.f32 %v10557_v16, %v5172_v59  ;;  %vm5268_vm2 = vcmp.ge.f32.partialorder %v10676_v20, 0.0  ;;  %vm5252_vm7 = vcmp.ge.f32.partialorder %v5230_v5, 0.0 }
 0xb5b   : > { %v5318_v42 = vmul.f32 %v5277_v6, %v5230_v5  ;;  %v5361_v18 = vadd.f32 %v5339_v9, %v11289_v57  ;;  %v5241_v51 = vadd.f32 %v10559_v45, %v5175_v12  ;;  %5390 = vst [vmem:[%s10662_s30 + $0x48] sm:$0xff] %v5368_v25  ;;  %vm5259_vm9 = vcmp.ge.f32.partialorder %v5237_v47, 0.0  ;;  %v11290_v6 = vld [vmem:[#allocation46_spill] sm:$0xff] }
 0xb5c   : > { %vm5260_vm8 = vcmp.ge.f32.partialorder %v5238_v11, 0.0  ;;  %v5325_v27 = vmul.f32 %v5293_v61, %v5237_v47  ;;  %v5326_v14 = vmul.f32 %v5293_v61, %v5238_v11  ;;  %v5242_v16 = vadd.f32 %v10559_v45, %v5176_v19  ;;  %v11303_v61 = vld [vmem:[#allocation33_spill] sm:$0xff] }
 0xb5d   : > { %v5340_v56 = vsel %vm5252_vm7, %v5230_v5, %v5318_v42  ;;  %5383 = vst [vmem:[%s10662_s30 + $0x10] sm:$0xff] %v5361_v18  ;;  %vm5263_vm12 = vcmp.ge.f32.partialorder %v5241_v51, 0.0  ;;  %v5329_v34 = vmul.f32 %v5301_v2, %v5241_v51  ;;  %v5174_v43 = vmul.f32 %v10546_v53, %v5108_v35  ;;  %v11301_v35 = vld [vmem:[#allocation47_spill] sm:$0xff]  ;;  %v11302_v42 = vld [vmem:[#allocation22_spill] sm:$0xff] }
 0xb5e   : > { %v5362_v49 = vadd.f32 %v5340_v56, %v11290_v6  ;;  %v5347_v1 = vsel %vm5259_vm9, %v5237_v47, %v5325_v27  ;;  %v5348_v52 = vsel %vm5260_vm8, %v5238_v11, %v5326_v14  ;;  %vm5264_vm13 = vcmp.ge.f32.partialorder %v5242_v16, 0.0  ;;  %v5313_v11 = vpop.permute.xlu1 %5312  ;;  %v11304_v27 = vld [vmem:[#allocation15_spill] sm:$0xff] }
 0xb5f   : > { %v5369_v26 = vadd.f32 %v5347_v1, %v11291_v15  ;;  %v5370_v29 = vadd.f32 %v5348_v52, %v11292_v30  ;;  %v5330_v40 = vmul.f32 %v5301_v2, %v5242_v16  ;;  %v5351_v22 = vsel %vm5263_vm12, %v5241_v51, %v5329_v34  ;;  %v11305_v2 = vld [vmem:[#allocation35_spill] sm:$0xff]  ;;  %v11307_v52 = vld [vmem:[#allocation14_spill] sm:$0xff] }
 0xb60   : > { %5384 = vst [vmem:[%s10662_s30 + $0x18] sm:$0xff] %v5362_v49  ;;  %v5240_v45 = vadd.f32 %v10570_v54, %v5174_v43  ;;  %v5327_v38 = vmul.f32 %v5297_v24, %v10647_v58  ;;  %v11293_v31 = vsub.f32 %v10474_v46, %v10564_v41  ;;  %v5373_v50 = vadd.f32 %v5351_v22, %v11294_v8  ;;  %v11297_v46 = vld [vmem:[#allocation29_spill] sm:$0xff] }
 0xb61   : > { %5391 = vst [vmem:[%s10662_s30 + $0x50] sm:$0xff] %v5369_v26  ;;  %v5352_v53 = vsel %vm5264_vm13, %v5242_v16, %v5330_v40  ;;  %v11295_v37 = vsub.f32 %v10476_v4, %v10574_v33  ;;  %v11296_v54 = vsub.f32 %v10508_v3, %v10564_v41  ;;  %v11299_v3 = vsub.f32 %v10510_v17, %v10574_v33  ;;  %v11306_v49 = vld [vmem:[#allocation21_spill] sm:$0xff] }
 0xb62   : > { %v5111_v60 = vmul.f32 %v10604_v63, %v11293_v31  ;;  %5392 = vst [vmem:[%s10662_s30 + $0x58] sm:$0xff] %v5370_v29  ;;  %v5374_v48 = vadd.f32 %v5352_v53, %v11297_v46  ;;  %vm5262_vm14 = vcmp.ge.f32.partialorder %v5240_v45, 0.0  ;;  %v5328_v55 = vmul.f32 %v5297_v24, %v5240_v45  ;;  %v11300_v24 = vld [vmem:[#allocation30_spill] sm:$0xff] }
 0xb63   : > { %v5112_v28 = vmul.f32 %v10641_v10, %v11295_v37  ;;  %v5115_v7 = vmul.f32 %v10604_v63, %v11296_v54  ;;  %v5349_v23 = vsel %vm5261_vm6, %v10647_v58, %v5327_v38  ;;  %5395 = vst [vmem:[%s10662_s30 + $0x70] sm:$0xff] %v5373_v50  ;;  %v5116_v41 = vmul.f32 %v10641_v10, %v11299_v3  ;;  %v5309_v63 = vpop.permute.xlu0 %5308  ;;  %v5305_v10 = vpop.permute.xlu2 %5304 }
 0xb64   : > { %v5371_v4 = vadd.f32 %v5349_v23, %v11298_v36  ;;  %v5177_v59 = vmul.f32 %v10536_v44, %v5111_v60  ;;  %5396 = vst [vmem:[%s10662_s30 + $0x78] sm:$0xff] %v5374_v48  ;;  %v5350_v62 = vsel %vm5262_vm14, %v5240_v45, %v5328_v55  ;;  %v5333_v58 = vmul.f32 %v5309_v63, %v10666_v21 }
 0xb65   : > { %v5178_v12 = vmul.f32 %v10536_v44, %v5112_v28  ;;  %v5181_v5 = vmul.f32 %v10538_v0, %v5115_v7  ;;  %v5334_v19 = vmul.f32 %v5309_v63, %v10676_v20  ;;  %v5372_v39 = vadd.f32 %v5350_v62, %v11300_v24 }
 0xb66   : > { %5393 = vst [vmem:[%s10662_s30 + $0x60] sm:$0xff] %v5371_v4  ;;  %v5243_v44 = vadd.f32 %v10566_v32, %v5177_v59  ;;  %v5182_v33 = vmul.f32 %v10538_v0, %v5116_v41  ;;  %v5355_v25 = vsel %vm5267_vm0, %v10666_v21, %v5333_v58 }
 0xb67   : > { %v5244_v17 = vadd.f32 %v10566_v32, %v5178_v12  ;;  %v5247_v13 = vadd.f32 %v11301_v35, %v5181_v5  ;;  %v5356_v9 = vsel %vm5268_vm2, %v10676_v20, %v5334_v19  ;;  %5394 = vst [vmem:[%s10662_s30 + $0x68] sm:$0xff] %v5372_v39  ;;  %v5377_v57 = vadd.f32 %v5355_v25, %v11302_v42 }
 0xb68   : > { %vm5265_vm15 = vcmp.ge.f32.partialorder %v5243_v44, 0.0  ;;  %v5331_v47 = vmul.f32 %v5305_v10, %v5243_v44  ;;  %v5248_v0 = vadd.f32 %v11301_v35, %v5182_v33  ;;  %v5378_v51 = vadd.f32 %v5356_v9, %v11303_v61 }
 0xb69   : > { %vm5266_vm3 = vcmp.ge.f32.partialorder %v5244_v17, 0.0  ;;  %v5332_v32 = vmul.f32 %v5305_v10, %v5244_v17  ;;  %vm5269_vm4 = vcmp.ge.f32.partialorder %v5247_v13, 0.0  ;;  %v5335_v21 = vmul.f32 %v5313_v11, %v5247_v13  ;;  %5399 = vst [vmem:[%s10662_s30 + $0x90] sm:$0xff] %v5377_v57 }
 0xb6a   : > { %v5353_v20 = vsel %vm5265_vm15, %v5243_v44, %v5331_v47  ;;  %vm5270_vm1 = vcmp.ge.f32.partialorder %v5248_v0, 0.0  ;;  %v5336_v16 = vmul.f32 %v5313_v11, %v5248_v0  ;;  %5400 = vst [vmem:[%s10662_s30 + $0x98] sm:$0xff] %v5378_v51 }
 0xb6b   : > { %v5354_v18 = vsel %vm5266_vm3, %v5244_v17, %v5332_v32  ;;  %v5375_v14 = vadd.f32 %v5353_v20, %v11304_v27  ;;  %v5357_v34 = vsel %vm5269_vm4, %v5247_v13, %v5335_v21 }
 0xb6c   : > { %v5376_v56 = vadd.f32 %v5354_v18, %v11305_v2  ;;  %v5358_v6 = vsel %vm5270_vm1, %v5248_v0, %v5336_v16  ;;  %v5379_v1 = vadd.f32 %v5357_v34, %v11306_v49 }
 0xb6d   : > { %5397 = vst [vmem:[%s10662_s30 + $0x80] sm:$0xff] %v5375_v14  ;;  %v5380_v43 = vadd.f32 %v5358_v6, %v11307_v52 }
 0xb6e   : > { %5398 = vst [vmem:[%s10662_s30 + $0x88] sm:$0xff] %v5376_v56 }
 0xb6f   : > { %5401 = vst [vmem:[%s10662_s30 + $0xa0] sm:$0xff] %v5379_v1 }
 0xb70   : > { %5402 = vst [vmem:[%s10662_s30 + $0xa8] sm:$0xff] %v5380_v43 }
 0xb71   : > { %6347 = shalt.err (!%p6344_p3)
}
 0xb72   : > { %s6390_s23 = smov 256   ;;  %s6391_s30 = smov 16  }
 0xb73   : > { %5908 = dma.vmem_to_hbm [thread:$0]  (%p6545_p5), %s5417_s25, 2816, %s5419_s26, %s5404_s2, %s6390_s23, %s6390_s23, %s6391_s30  }
 0xb74 PF: > { %s11308_s1 = sld [smem:[#allocation7_spill]] }
 0xb75   : > { %s11309_s5 = sld [smem:[#allocation5_spill]] }
 0xb7a   : > { %p5914_p4 = scmp.ge.s32.totalorder %s11308_s1, 2 }
 0xb7b   : > { %s5433_s3 = sand.u32 1, %s11309_s5  }
 0xb7c   : > { %p5911_p7 = pnand %p5914_p4, %p6549_p6  ;;  %s5434_s24 = scalar_lea.sflag [#allocation3], %s5433_s3 }
 0xb7e   : > { %p5912_p8 = pneg %p5911_p7 }
 0xb80   : > { %6365 = dma.done.wait (%p5912_p8), %s5434_s24, 2816  }
 0xb81   : > { %6367 = vsyncadd (%p5912_p8), %s5434_s24, 4294964480  ;;  %s11311_s30 = sld [smem:[#allocation8_spill]]  ;;  %s11314_s3 = smov %s6374_s28 }
 0xb82   : > { %s11312_s7 = sld [smem:[#allocation6_spill]] }
 0xb83   : > { %s11313_s29 = sld [smem:[#allocation9_spill]] }
 0xb87   : > { %p32_p9 = scmp.ge.s32.totalorder %s11311_s30, 4  }
 0xb88   : > { %s11315_s28 = smov %s11312_s7 }
 0xb89   :  { %34 = sbr.rel (!%p32_p9) target bundleno = 13 (0xd), region = 143 }
 0xb8e   :  { %5440 = vsyncpa [#allocation3], 1 }
 0xb8f   :  { %5442 = vsyncpa [#allocation3 + $0x1], 1 }

</bundles_post_ra>
